<compile_context>
chip_gen: v5e
topology: v5e:2x2
jax: 0.10.0
libtpu: 0.0.40
codegen_flags: <defaults>
</compile_context>

<pallas_src>
import functools
import math

import jax
import jax.numpy as jnp
from jax import lax
from jax.experimental import pallas as pl
from jax.experimental.pallas import tpu as pltpu

# Keep the XLA reference and the in-kernel MXU matmuls at full f32 precision
# so the correctness check below is meaningful.
jax.config.update("jax_default_matmul_precision", "highest")


def transformer_encoder_kernel(
    x_ref, we_ref, be_ref, pos_ref,
    wqkv_ref, bqkv_ref, wo_ref, bo_ref,
    ln1g_ref, ln1b_ref,
    w1_ref, b1_ref, w2_ref, b2_ref,
    ln2g_ref, ln2b_ref,
    o_ref,
    x_vmem,
    *, batch, seq, num_heads, eps):
  """One layer grid step; batch folded into the matmul M dimension."""
  B, S = batch, seq
  Din = x_ref.shape[-1]
  H = wo_ref.shape[-1]
  M = B * S
  hd = H // num_heads
  scale = 1.0 / math.sqrt(hd)
  l = pl.program_id(0)

  def layer_norm(y, g, b):
    mu = jnp.mean(y, axis=-1, keepdims=True)
    yc = y - mu
    var = jnp.mean(yc * yc, axis=-1, keepdims=True)
    return yc * lax.rsqrt(var + eps) * g + b

  # ---- layer 0: input embedding + positional encoding into the scratch ----
  @pl.when(l == 0)
  def _():
    xin = x_ref[...].reshape(M, Din)                           # (B*S, Din)
    emb = (jnp.dot(xin, we_ref[...], preferred_element_type=jnp.float32)
           + be_ref[...])                                      # (B*S, H)
    emb = emb.reshape(B, S, H) + pos_ref[...][None]            # add pos enc
    x_vmem[...] = emb.reshape(M, H)

  x = x_vmem[...]                                              # (B*S, H)

  # ---- self-attention block (post-LN) ----
  qkv = (jnp.dot(x, wqkv_ref[...], preferred_element_type=jnp.float32)
         + bqkv_ref[...])                                      # (B*S, 3H)
  q = (qkv[:, 0 * H:1 * H] * scale).reshape(B, S, H)           # scale once
  k = qkv[:, 1 * H:2 * H].reshape(B, S, H)
  v = qkv[:, 2 * H:3 * H].reshape(B, S, H)

  # Per-head attention with direct accumulation into the out-projection
  # (no concatenate, no explicit k transpose).
  acc = jnp.zeros((M, H), jnp.float32)
  for h in range(num_heads):                                   # small static unroll
    sl = slice(h * hd, (h + 1) * hd)
    s = jnp.einsum("bqd,bkd->bqk", q[:, :, sl], k[:, :, sl],
                   preferred_element_type=jnp.float32)         # (B, S, S)
    s = s - jnp.max(s, axis=-1, keepdims=True)
    p = jnp.exp(s)
    p = p / jnp.sum(p, axis=-1, keepdims=True)                 # exact softmax
    o_h = jnp.einsum("bqk,bkd->bqd", p, v[:, :, sl],
                     preferred_element_type=jnp.float32)       # (B, S, hd)
    acc = acc + jnp.dot(o_h.reshape(M, hd), wo_ref[sl, :],
                        preferred_element_type=jnp.float32)    # fused out-proj

  attn = acc + bo_ref[...]
  x = layer_norm(x + attn, ln1g_ref[...], ln1b_ref[...])

  # ---- feed-forward block ----
  h1 = (jnp.dot(x, w1_ref[...], preferred_element_type=jnp.float32)
        + b1_ref[...])
  h1 = jnp.maximum(h1, 0.0)
  h2 = (jnp.dot(h1, w2_ref[...], preferred_element_type=jnp.float32)
        + b2_ref[...])
  x = layer_norm(x + h2, ln2g_ref[...], ln2b_ref[...])

  x_vmem[...] = x

  # ---- last layer: final module-level ReLU and store ----
  @pl.when(l == pl.num_programs(0) - 1)
  def _():
    o_ref[...] = jnp.maximum(x, 0.0).reshape(B, S, H)


def init_params(key, input_dim, len_seq, hidden_dim, num_layers, num_heads,
                ffn_dim):
  ks = iter(jax.random.split(key, 32))

  def n(shape, std=0.02):
    return std * jax.random.normal(next(ks), shape, jnp.float32)

  # Per-layer vector params are kept as (L, 1, dim) so their blocked windows
  # have full (1, dim) trailing dims (clean TPU block layout).
  return dict(
      we=n((input_dim, hidden_dim)),                    # Linear weight, (in,out)
      be=n((1, hidden_dim)),
      pos=n((len_seq, hidden_dim)),                     # Embedding weight, std=0.02
      wqkv=n((num_layers, hidden_dim, 3 * hidden_dim)),
      bqkv=n((num_layers, 1, 3 * hidden_dim)),
      wo=n((num_layers, hidden_dim, hidden_dim)),
      bo=n((num_layers, 1, hidden_dim)),
      ln1g=jnp.ones((num_layers, 1, hidden_dim), jnp.float32),
      ln1b=jnp.zeros((num_layers, 1, hidden_dim), jnp.float32),
      w1=n((num_layers, hidden_dim, ffn_dim)),
      b1=n((num_layers, 1, ffn_dim)),
      w2=n((num_layers, ffn_dim, hidden_dim)),
      b2=n((num_layers, 1, hidden_dim)),
      ln2g=jnp.ones((num_layers, 1, hidden_dim), jnp.float32),
      ln2b=jnp.zeros((num_layers, 1, hidden_dim), jnp.float32),
  )


def transformer_encoder(x, params, *, num_layers, num_heads, eps=1e-5):
  B, S, Din = x.shape
  H = params["we"].shape[1]
  FFN = params["w1"].shape[-1]
  assert H % num_heads == 0, "hidden_dim must be divisible by num_heads"

  const2 = lambda l: (0, 0)
  const3 = lambda l: (0, 0, 0)
  layer3 = lambda l: (l, 0, 0)

  in_specs = [
      pl.BlockSpec((B, S, Din), const3),        # x     (whole batch resident)
      pl.BlockSpec((Din, H), const2),           # we    (resident)
      pl.BlockSpec((1, H), const2),             # be
      pl.BlockSpec((S, H), const2),             # pos
      # Per-layer weights: streamed once, double-buffered across the layer axis
      # so layer l+1 weight DMA overlaps layer l compute.
      pl.BlockSpec((None, H, 3 * H), layer3),   # wqkv
      pl.BlockSpec((None, 1, 3 * H), layer3),   # bqkv
      pl.BlockSpec((None, H, H), layer3),       # wo
      pl.BlockSpec((None, 1, H), layer3),       # bo
      pl.BlockSpec((None, 1, H), layer3),       # ln1g
      pl.BlockSpec((None, 1, H), layer3),       # ln1b
      pl.BlockSpec((None, H, FFN), layer3),     # w1
      pl.BlockSpec((None, 1, FFN), layer3),     # b1
      pl.BlockSpec((None, FFN, H), layer3),     # w2
      pl.BlockSpec((None, 1, H), layer3),       # b2
      pl.BlockSpec((None, 1, H), layer3),       # ln2g
      pl.BlockSpec((None, 1, H), layer3),       # ln2b
  ]

  # Explicit VMEM budget: 2x (double-buffered) per-layer weights + resident
  # embedding/pos/x/out blocks + activation scratch + generous margin for
  # intermediates and vregs.  (Default scoped limits: 16 MiB v5e / 32 MiB v6e.)
  f32 = 4
  per_layer_w = f32 * (H * 3 * H + 3 * H          # wqkv + bqkv
                       + H * H + H                # wo + bo
                       + 2 * H                    # ln1
                       + H * FFN + FFN            # w1 + b1
                       + FFN * H + H              # w2 + b2
                       + 2 * H)                   # ln2
  resident = f32 * (Din * H + H + S * H + B * S * Din + B * S * H)
  scratch = f32 * B * S * H
  vmem_limit = min(2 * per_layer_w + 2 * resident + scratch + (16 << 20),
                   128 << 20)

  kernel = functools.partial(transformer_encoder_kernel,
                             batch=B, seq=S, num_heads=num_heads, eps=eps)
  grid_spec = pltpu.PrefetchScalarGridSpec(
      num_scalar_prefetch=0,
      grid=(num_layers,),                        # layer stream only
      in_specs=in_specs,
      out_specs=pl.BlockSpec((B, S, H), const3),
      scratch_shapes=[pltpu.VMEM((B * S, H), jnp.float32)],  # running activation
  )
  return pl.pallas_call(
      kernel,
      out_shape=jax.ShapeDtypeStruct((B, S, H), jnp.float32),
      grid_spec=grid_spec,
      compiler_params=pltpu.CompilerParams(
          dimension_semantics=("arbitrary",),
          vmem_limit_bytes=int(vmem_limit)),
  )(x, params["we"], params["be"], params["pos"],
    params["wqkv"], params["bqkv"], params["wo"], params["bo"],
    params["ln1g"], params["ln1b"],
    params["w1"], params["b1"], params["w2"], params["b2"],
    params["ln2g"], params["ln2b"])


def reference(x, params, *, num_layers, num_heads, eps=1e-5):
  """Pure-JAX reference mirroring PyTorch TransformerEncoder semantics."""
  B, S, _ = x.shape
  H = params["we"].shape[1]
  hd = H // num_heads
  x = x @ params["we"] + params["be"]
  x = x + params["pos"][None]

  def ln(y, g, b):
    mu = y.mean(-1, keepdims=True)
    var = ((y - mu) ** 2).mean(-1, keepdims=True)
    return (y - mu) / jnp.sqrt(var + eps) * g + b

  for l in range(num_layers):
    qkv = x @ params["wqkv"][l] + params["bqkv"][l]
    q, k, v = jnp.split(qkv, 3, axis=-1)
    q = q.reshape(B, S, num_heads, hd).transpose(0, 2, 1, 3)
    k = k.reshape(B, S, num_heads, hd).transpose(0, 2, 1, 3)
    v = v.reshape(B, S, num_heads, hd).transpose(0, 2, 1, 3)
    s = jnp.einsum("bhqd,bhkd->bhqk", q, k) / math.sqrt(hd)
    p = jax.nn.softmax(s, axis=-1)
    a = jnp.einsum("bhqk,bhkd->bhqd", p, v).transpose(0, 2, 1, 3).reshape(B, S, H)
    a = a @ params["wo"][l] + params["bo"][l]
    x = ln(x + a, params["ln1g"][l], params["ln1b"][l])
    h = jax.nn.relu(x @ params["w1"][l] + params["b1"][l])
    h = h @ params["w2"][l] + params["b2"][l]
    x = ln(x + h, params["ln2g"][l], params["ln2b"][l])
  return jax.nn.relu(x)


if __name__ == "__main__":
  # Small shapes consistent with the module's forward:
  B, S, DIN, H, L, NH = 2, 8, 16, 32, 2, 4
  FFN = 2048  # nn.TransformerEncoderLayer default dim_feedforward

  key = jax.random.PRNGKey(0)
  kx, kp = jax.random.split(key)
  x = jax.random.normal(kx, (B, S, DIN), jnp.float32)
  params = init_params(kp, DIN, S, H, L, NH, FFN)

  out = transformer_encoder(x, params, num_layers=L, num_heads=NH)
  out = jax.block_until_ready(out)

  ref = reference(x, params, num_layers=L, num_heads=NH)
  assert out.shape == (B, S, H)
  assert bool(jnp.all(jnp.isfinite(out)))
  assert bool(jnp.allclose(out, ref, atol=1e-2, rtol=1e-2)), (
      float(jnp.max(jnp.abs(out - ref))))
  print("KERNEL_OK")
</pallas_src>

<mosaic_0001>
module attributes {stable_mosaic.version = 11 : i64} {
  func.func @transformer_encoder_kernel(%arg0: i32, %arg1: memref<2x8x16xf32, #tpu.memory_space<vmem>>, %arg2: memref<16x32xf32, #tpu.memory_space<vmem>>, %arg3: memref<1x32xf32, #tpu.memory_space<vmem>>, %arg4: memref<8x32xf32, #tpu.memory_space<vmem>>, %arg5: memref<1x32x96xf32, #tpu.memory_space<vmem>>, %arg6: memref<1x1x96xf32, #tpu.memory_space<vmem>>, %arg7: memref<1x32x32xf32, #tpu.memory_space<vmem>>, %arg8: memref<1x1x32xf32, #tpu.memory_space<vmem>>, %arg9: memref<1x1x32xf32, #tpu.memory_space<vmem>>, %arg10: memref<1x1x32xf32, #tpu.memory_space<vmem>>, %arg11: memref<1x32x2048xf32, #tpu.memory_space<vmem>>, %arg12: memref<1x1x2048xf32, #tpu.memory_space<vmem>>, %arg13: memref<1x2048x32xf32, #tpu.memory_space<vmem>>, %arg14: memref<1x1x32xf32, #tpu.memory_space<vmem>>, %arg15: memref<1x1x32xf32, #tpu.memory_space<vmem>>, %arg16: memref<1x1x32xf32, #tpu.memory_space<vmem>>, %arg17: memref<2x8x32xf32, #tpu.memory_space<vmem>>, %arg18: memref<16x32xf32, #tpu.memory_space<vmem>>) attributes {dimension_semantics = [#tpu.dimension_semantics<arbitrary>], iteration_bounds = array<i64: 2>, scalar_prefetch = 0 : i64, scratch_operands = 1 : i64, tpu.core_type = #tpu.core_type<tc>, window_params = [{pipeline_mode = #tpu.pipeline_mode<synchronous>, transform_indices = @transform_0, window_bounds = array<i64: 2, 8, 16>}, {pipeline_mode = #tpu.pipeline_mode<synchronous>, transform_indices = @transform_1, window_bounds = array<i64: 16, 32>}, {pipeline_mode = #tpu.pipeline_mode<synchronous>, transform_indices = @transform_2, window_bounds = array<i64: 1, 32>}, {pipeline_mode = #tpu.pipeline_mode<synchronous>, transform_indices = @transform_3, window_bounds = array<i64: 8, 32>}, {transform_indices = @transform_4, window_bounds = array<i64: 1, 32, 96>}, {transform_indices = @transform_5, window_bounds = array<i64: 1, 1, 96>}, {transform_indices = @transform_6, window_bounds = array<i64: 1, 32, 32>}, {transform_indices = @transform_7, window_bounds = array<i64: 1, 1, 32>}, {transform_indices = @transform_8, window_bounds = array<i64: 1, 1, 32>}, {transform_indices = @transform_9, window_bounds = array<i64: 1, 1, 32>}, {transform_indices = @transform_10, window_bounds = array<i64: 1, 32, 2048>}, {transform_indices = @transform_11, window_bounds = array<i64: 1, 1, 2048>}, {transform_indices = @transform_12, window_bounds = array<i64: 1, 2048, 32>}, {transform_indices = @transform_13, window_bounds = array<i64: 1, 1, 32>}, {transform_indices = @transform_14, window_bounds = array<i64: 1, 1, 32>}, {transform_indices = @transform_15, window_bounds = array<i64: 1, 1, 32>}, {pipeline_mode = #tpu.pipeline_mode<synchronous>, transform_indices = @transform_16, window_bounds = array<i64: 2, 8, 32>}]} {
    %c0_i32 = arith.constant 0 : i32
    %0 = arith.cmpi eq, %arg0, %c0_i32 : i32
    %1 = arith.extui %0 : i1 to i32
    %c0_i32_0 = arith.constant 0 : i32
    %2 = arith.cmpi ne, %1, %c0_i32_0 : i32
    scf.if %2 {
      %c0_82 = arith.constant 0 : index
      %c0_83 = arith.constant 0 : index
      %c0_84 = arith.constant 0 : index
      %170 = vector.load %arg1[%c0_82, %c0_83, %c0_84] : memref<2x8x16xf32, #tpu.memory_space<vmem>>, vector<2x8x16xf32>
      %171 = vector.shape_cast %170 : vector<2x8x16xf32> to vector<16x16xf32>
      %c0_85 = arith.constant 0 : index
      %c0_86 = arith.constant 0 : index
      %172 = vector.load %arg2[%c0_85, %c0_86] : memref<16x32xf32, #tpu.memory_space<vmem>>, vector<16x32xf32>
      %cst_87 = arith.constant dense<0.000000e+00> : vector<16x32xf32>
      %173 = tpu.matmul %171, %172, %cst_87 {dimension_numbers = #tpu.dot_dimension_numbers<[1], [0], [0], [1], [0, 0, 1, 1], [], []>, precision = #tpu.contract_precision<fp32>} : vector<16x16xf32>, vector<16x32xf32>, vector<16x32xf32> -> vector<16x32xf32>
      %c0_88 = arith.constant 0 : index
      %c0_89 = arith.constant 0 : index
      %174 = vector.load %arg3[%c0_88, %c0_89] : memref<1x32xf32, #tpu.memory_space<vmem>>, vector<1x32xf32>
      %175 = vector.broadcast %174 : vector<1x32xf32> to vector<16x32xf32>
      %176 = arith.addf %173, %175 : vector<16x32xf32>
      %177 = vector.shape_cast %176 : vector<16x32xf32> to vector<2x8x32xf32>
      %c0_90 = arith.constant 0 : index
      %c0_91 = arith.constant 0 : index
      %178 = vector.load %arg4[%c0_90, %c0_91] : memref<8x32xf32, #tpu.memory_space<vmem>>, vector<8x32xf32>
      %179 = vector.shape_cast %178 : vector<8x32xf32> to vector<1x8x32xf32>
      %180 = vector.broadcast %179 : vector<1x8x32xf32> to vector<2x8x32xf32>
      %181 = arith.addf %177, %180 : vector<2x8x32xf32>
      %182 = vector.shape_cast %181 : vector<2x8x32xf32> to vector<16x32xf32>
      %c0_92 = arith.constant 0 : index
      %c0_93 = arith.constant 0 : index
      %183 = vector.load %arg18[%c0_92, %c0_93] : memref<16x32xf32, #tpu.memory_space<vmem>>, vector<16x32xf32>
      tpu.vector_store %arg18[%c0_92, %c0_93], %182 {strides = array<i32>} : memref<16x32xf32, #tpu.memory_space<vmem>>, vector<16x32xf32>,
    } else {
    }
    %c0 = arith.constant 0 : index
    %c0_1 = arith.constant 0 : index
    %3 = vector.load %arg18[%c0, %c0_1] : memref<16x32xf32, #tpu.memory_space<vmem>>, vector<16x32xf32>
    %c0_2 = arith.constant 0 : index
    %c0_3 = arith.constant 0 : index
    %c0_4 = arith.constant 0 : index
    %4 = vector.load %arg5[%c0_2, %c0_3, %c0_4] : memref<1x32x96xf32, #tpu.memory_space<vmem>>, vector<1x32x96xf32>
    %5 = vector.shape_cast %4 : vector<1x32x96xf32> to vector<32x96xf32>
    %cst = arith.constant dense<0.000000e+00> : vector<16x96xf32>
    %6 = tpu.matmul %3, %5, %cst {dimension_numbers = #tpu.dot_dimension_numbers<[1], [0], [0], [1], [0, 0, 1, 1], [], []>, precision = #tpu.contract_precision<fp32>} : vector<16x32xf32>, vector<32x96xf32>, vector<16x96xf32> -> vector<16x96xf32>
    %c0_5 = arith.constant 0 : index
    %c0_6 = arith.constant 0 : index
    %c0_7 = arith.constant 0 : index
    %7 = vector.load %arg6[%c0_5, %c0_6, %c0_7] : memref<1x1x96xf32, #tpu.memory_space<vmem>>, vector<1x1x96xf32>
    %8 = vector.shape_cast %7 : vector<1x1x96xf32> to vector<1x96xf32>
    %9 = vector.broadcast %8 : vector<1x96xf32> to vector<16x96xf32>
    %10 = arith.addf %6, %9 : vector<16x96xf32>
    %11 = vector.extract_strided_slice %10 {offsets = [0, 0], sizes = [16, 32], strides = [1, 1]} : vector<16x96xf32> to vector<16x32xf32>
    %cst_8 = arith.constant 0.353553385 : f32
    %12 = vector.broadcast %cst_8 : f32 to vector<16x32xf32>
    %13 = arith.mulf %11, %12 : vector<16x32xf32>
    %14 = vector.shape_cast %13 : vector<16x32xf32> to vector<2x8x32xf32>
    %15 = vector.extract_strided_slice %10 {offsets = [0, 32], sizes = [16, 32], strides = [1, 1]} : vector<16x96xf32> to vector<16x32xf32>
    %16 = vector.shape_cast %15 : vector<16x32xf32> to vector<2x8x32xf32>
    %17 = vector.extract_strided_slice %10 {offsets = [0, 64], sizes = [16, 32], strides = [1, 1]} : vector<16x96xf32> to vector<16x32xf32>
    %18 = vector.shape_cast %17 : vector<16x32xf32> to vector<2x8x32xf32>
    %cst_9 = arith.constant 0.000000e+00 : f32
    %19 = vector.broadcast %cst_9 : f32 to vector<16x32xf32>
    %20 = vector.extract_strided_slice %14 {offsets = [0, 0, 0], sizes = [2, 8, 8], strides = [1, 1, 1]} : vector<2x8x32xf32> to vector<2x8x8xf32>
    %21 = vector.extract_strided_slice %16 {offsets = [0, 0, 0], sizes = [2, 8, 8], strides = [1, 1, 1]} : vector<2x8x32xf32> to vector<2x8x8xf32>
    "tpu.trace_start"() <{level = 10 : i32, message = "bqd,bkd->bqk"}> : () -> ()
    %cst_10 = arith.constant dense<0.000000e+00> : vector<2x8x8xf32>
    %22 = tpu.matmul %20, %21, %cst_10 {dimension_numbers = #tpu.dot_dimension_numbers<[2], [2], [1], [1], [0, 0, 0, 1, 1, 1], [0], [0]>, precision = #tpu.contract_precision<fp32>} : vector<2x8x8xf32>, vector<2x8x8xf32>, vector<2x8x8xf32> -> vector<2x8x8xf32>
    "tpu.trace_stop"() : () -> ()
    %cst_11 = arith.constant dense<0xFF800000> : vector<2x8xf32>
    %23 = vector.multi_reduction <maximumf>, %22, %cst_11 [2] : vector<2x8x8xf32> to vector<2x8xf32>
    %24 = vector.shape_cast %23 : vector<2x8xf32> to vector<2x8x1xf32>
    %25 = vector.broadcast %24 : vector<2x8x1xf32> to vector<2x8x8xf32>
    %26 = arith.subf %22, %25 : vector<2x8x8xf32>
    %27 = math.exp %26 : vector<2x8x8xf32>
    %cst_12 = arith.constant dense<0.000000e+00> : vector<2x8xf32>
    %28 = vector.multi_reduction <add>, %27, %cst_12 [2] : vector<2x8x8xf32> to vector<2x8xf32>
    %29 = vector.shape_cast %28 : vector<2x8xf32> to vector<2x8x1xf32>
    %30 = vector.broadcast %29 : vector<2x8x1xf32> to vector<2x8x8xf32>
    %31 = arith.divf %27, %30 : vector<2x8x8xf32>
    %32 = vector.extract_strided_slice %18 {offsets = [0, 0, 0], sizes = [2, 8, 8], strides = [1, 1, 1]} : vector<2x8x32xf32> to vector<2x8x8xf32>
    "tpu.trace_start"() <{level = 10 : i32, message = "bqk,bkd->bqd"}> : () -> ()
    %cst_13 = arith.constant dense<0.000000e+00> : vector<2x8x8xf32>
    %33 = tpu.matmul %31, %32, %cst_13 {dimension_numbers = #tpu.dot_dimension_numbers<[2], [1], [1], [2], [0, 0, 0, 1, 1, 2], [0], [0]>, precision = #tpu.contract_precision<fp32>} : vector<2x8x8xf32>, vector<2x8x8xf32>, vector<2x8x8xf32> -> vector<2x8x8xf32>
    "tpu.trace_stop"() : () -> ()
    %34 = vector.shape_cast %33 : vector<2x8x8xf32> to vector<16x8xf32>
    %c0_14 = arith.constant 0 : index
    %c0_15 = arith.constant 0 : index
    %c0_16 = arith.constant 0 : index
    %35 = vector.load %arg7[%c0_14, %c0_15, %c0_16] : memref<1x32x32xf32, #tpu.memory_space<vmem>>, vector<1x8x32xf32>
    %36 = vector.shape_cast %35 : vector<1x8x32xf32> to vector<8x32xf32>
    %cst_17 = arith.constant dense<0.000000e+00> : vector<16x32xf32>
    %37 = tpu.matmul %34, %36, %cst_17 {dimension_numbers = #tpu.dot_dimension_numbers<[1], [0], [0], [1], [0, 0, 1, 1], [], []>, precision = #tpu.contract_precision<fp32>} : vector<16x8xf32>, vector<8x32xf32>, vector<16x32xf32> -> vector<16x32xf32>
    %38 = arith.addf %19, %37 : vector<16x32xf32>
    %39 = vector.extract_strided_slice %14 {offsets = [0, 0, 8], sizes = [2, 8, 8], strides = [1, 1, 1]} : vector<2x8x32xf32> to vector<2x8x8xf32>
    %40 = vector.extract_strided_slice %16 {offsets = [0, 0, 8], sizes = [2, 8, 8], strides = [1, 1, 1]} : vector<2x8x32xf32> to vector<2x8x8xf32>
    "tpu.trace_start"() <{level = 10 : i32, message = "bqd,bkd->bqk"}> : () -> ()
    %cst_18 = arith.constant dense<0.000000e+00> : vector<2x8x8xf32>
    %41 = tpu.matmul %39, %40, %cst_18 {dimension_numbers = #tpu.dot_dimension_numbers<[2], [2], [1], [1], [0, 0, 0, 1, 1, 1], [0], [0]>, precision = #tpu.contract_precision<fp32>} : vector<2x8x8xf32>, vector<2x8x8xf32>, vector<2x8x8xf32> -> vector<2x8x8xf32>
    "tpu.trace_stop"() : () -> ()
    %cst_19 = arith.constant dense<0xFF800000> : vector<2x8xf32>
    %42 = vector.multi_reduction <maximumf>, %41, %cst_19 [2] : vector<2x8x8xf32> to vector<2x8xf32>
    %43 = vector.shape_cast %42 : vector<2x8xf32> to vector<2x8x1xf32>
    %44 = vector.broadcast %43 : vector<2x8x1xf32> to vector<2x8x8xf32>
    %45 = arith.subf %41, %44 : vector<2x8x8xf32>
    %46 = math.exp %45 : vector<2x8x8xf32>
    %cst_20 = arith.constant dense<0.000000e+00> : vector<2x8xf32>
    %47 = vector.multi_reduction <add>, %46, %cst_20 [2] : vector<2x8x8xf32> to vector<2x8xf32>
    %48 = vector.shape_cast %47 : vector<2x8xf32> to vector<2x8x1xf32>
    %49 = vector.broadcast %48 : vector<2x8x1xf32> to vector<2x8x8xf32>
    %50 = arith.divf %46, %49 : vector<2x8x8xf32>
    %51 = vector.extract_strided_slice %18 {offsets = [0, 0, 8], sizes = [2, 8, 8], strides = [1, 1, 1]} : vector<2x8x32xf32> to vector<2x8x8xf32>
    "tpu.trace_start"() <{level = 10 : i32, message = "bqk,bkd->bqd"}> : () -> ()
    %cst_21 = arith.constant dense<0.000000e+00> : vector<2x8x8xf32>
    %52 = tpu.matmul %50, %51, %cst_21 {dimension_numbers = #tpu.dot_dimension_numbers<[2], [1], [1], [2], [0, 0, 0, 1, 1, 2], [0], [0]>, precision = #tpu.contract_precision<fp32>} : vector<2x8x8xf32>, vector<2x8x8xf32>, vector<2x8x8xf32> -> vector<2x8x8xf32>
    "tpu.trace_stop"() : () -> ()
    %53 = vector.shape_cast %52 : vector<2x8x8xf32> to vector<16x8xf32>
    %c0_22 = arith.constant 0 : index
    %c8 = arith.constant 8 : index
    %c0_23 = arith.constant 0 : index
    %54 = vector.load %arg7[%c0_22, %c8, %c0_23] : memref<1x32x32xf32, #tpu.memory_space<vmem>>, vector<1x8x32xf32>
    %55 = vector.shape_cast %54 : vector<1x8x32xf32> to vector<8x32xf32>
    %cst_24 = arith.constant dense<0.000000e+00> : vector<16x32xf32>
    %56 = tpu.matmul %53, %55, %cst_24 {dimension_numbers = #tpu.dot_dimension_numbers<[1], [0], [0], [1], [0, 0, 1, 1], [], []>, precision = #tpu.contract_precision<fp32>} : vector<16x8xf32>, vector<8x32xf32>, vector<16x32xf32> -> vector<16x32xf32>
    %57 = arith.addf %38, %56 : vector<16x32xf32>
    %58 = vector.extract_strided_slice %14 {offsets = [0, 0, 16], sizes = [2, 8, 8], strides = [1, 1, 1]} : vector<2x8x32xf32> to vector<2x8x8xf32>
    %59 = vector.extract_strided_slice %16 {offsets = [0, 0, 16], sizes = [2, 8, 8], strides = [1, 1, 1]} : vector<2x8x32xf32> to vector<2x8x8xf32>
    "tpu.trace_start"() <{level = 10 : i32, message = "bqd,bkd->bqk"}> : () -> ()
    %cst_25 = arith.constant dense<0.000000e+00> : vector<2x8x8xf32>
    %60 = tpu.matmul %58, %59, %cst_25 {dimension_numbers = #tpu.dot_dimension_numbers<[2], [2], [1], [1], [0, 0, 0, 1, 1, 1], [0], [0]>, precision = #tpu.contract_precision<fp32>} : vector<2x8x8xf32>, vector<2x8x8xf32>, vector<2x8x8xf32> -> vector<2x8x8xf32>
    "tpu.trace_stop"() : () -> ()
    %cst_26 = arith.constant dense<0xFF800000> : vector<2x8xf32>
    %61 = vector.multi_reduction <maximumf>, %60, %cst_26 [2] : vector<2x8x8xf32> to vector<2x8xf32>
    %62 = vector.shape_cast %61 : vector<2x8xf32> to vector<2x8x1xf32>
    %63 = vector.broadcast %62 : vector<2x8x1xf32> to vector<2x8x8xf32>
    %64 = arith.subf %60, %63 : vector<2x8x8xf32>
    %65 = math.exp %64 : vector<2x8x8xf32>
    %cst_27 = arith.constant dense<0.000000e+00> : vector<2x8xf32>
    %66 = vector.multi_reduction <add>, %65, %cst_27 [2] : vector<2x8x8xf32> to vector<2x8xf32>
    %67 = vector.shape_cast %66 : vector<2x8xf32> to vector<2x8x1xf32>
    %68 = vector.broadcast %67 : vector<2x8x1xf32> to vector<2x8x8xf32>
    %69 = arith.divf %65, %68 : vector<2x8x8xf32>
    %70 = vector.extract_strided_slice %18 {offsets = [0, 0, 16], sizes = [2, 8, 8], strides = [1, 1, 1]} : vector<2x8x32xf32> to vector<2x8x8xf32>
    "tpu.trace_start"() <{level = 10 : i32, message = "bqk,bkd->bqd"}> : () -> ()
    %cst_28 = arith.constant dense<0.000000e+00> : vector<2x8x8xf32>
    %71 = tpu.matmul %69, %70, %cst_28 {dimension_numbers = #tpu.dot_dimension_numbers<[2], [1], [1], [2], [0, 0, 0, 1, 1, 2], [0], [0]>, precision = #tpu.contract_precision<fp32>} : vector<2x8x8xf32>, vector<2x8x8xf32>, vector<2x8x8xf32> -> vector<2x8x8xf32>
    "tpu.trace_stop"() : () -> ()
    %72 = vector.shape_cast %71 : vector<2x8x8xf32> to vector<16x8xf32>
    %c0_29 = arith.constant 0 : index
    %c16 = arith.constant 16 : index
    %c0_30 = arith.constant 0 : index
    %73 = vector.load %arg7[%c0_29, %c16, %c0_30] : memref<1x32x32xf32, #tpu.memory_space<vmem>>, vector<1x8x32xf32>
    %74 = vector.shape_cast %73 : vector<1x8x32xf32> to vector<8x32xf32>
    %cst_31 = arith.constant dense<0.000000e+00> : vector<16x32xf32>
    %75 = tpu.matmul %72, %74, %cst_31 {dimension_numbers = #tpu.dot_dimension_numbers<[1], [0], [0], [1], [0, 0, 1, 1], [], []>, precision = #tpu.contract_precision<fp32>} : vector<16x8xf32>, vector<8x32xf32>, vector<16x32xf32> -> vector<16x32xf32>
    %76 = arith.addf %57, %75 : vector<16x32xf32>
    %77 = vector.extract_strided_slice %14 {offsets = [0, 0, 24], sizes = [2, 8, 8], strides = [1, 1, 1]} : vector<2x8x32xf32> to vector<2x8x8xf32>
    %78 = vector.extract_strided_slice %16 {offsets = [0, 0, 24], sizes = [2, 8, 8], strides = [1, 1, 1]} : vector<2x8x32xf32> to vector<2x8x8xf32>
    "tpu.trace_start"() <{level = 10 : i32, message = "bqd,bkd->bqk"}> : () -> ()
    %cst_32 = arith.constant dense<0.000000e+00> : vector<2x8x8xf32>
    %79 = tpu.matmul %77, %78, %cst_32 {dimension_numbers = #tpu.dot_dimension_numbers<[2], [2], [1], [1], [0, 0, 0, 1, 1, 1], [0], [0]>, precision = #tpu.contract_precision<fp32>} : vector<2x8x8xf32>, vector<2x8x8xf32>, vector<2x8x8xf32> -> vector<2x8x8xf32>
    "tpu.trace_stop"() : () -> ()
    %cst_33 = arith.constant dense<0xFF800000> : vector<2x8xf32>
    %80 = vector.multi_reduction <maximumf>, %79, %cst_33 [2] : vector<2x8x8xf32> to vector<2x8xf32>
    %81 = vector.shape_cast %80 : vector<2x8xf32> to vector<2x8x1xf32>
    %82 = vector.broadcast %81 : vector<2x8x1xf32> to vector<2x8x8xf32>
    %83 = arith.subf %79, %82 : vector<2x8x8xf32>
    %84 = math.exp %83 : vector<2x8x8xf32>
    %cst_34 = arith.constant dense<0.000000e+00> : vector<2x8xf32>
    %85 = vector.multi_reduction <add>, %84, %cst_34 [2] : vector<2x8x8xf32> to vector<2x8xf32>
    %86 = vector.shape_cast %85 : vector<2x8xf32> to vector<2x8x1xf32>
    %87 = vector.broadcast %86 : vector<2x8x1xf32> to vector<2x8x8xf32>
    %88 = arith.divf %84, %87 : vector<2x8x8xf32>
    %89 = vector.extract_strided_slice %18 {offsets = [0, 0, 24], sizes = [2, 8, 8], strides = [1, 1, 1]} : vector<2x8x32xf32> to vector<2x8x8xf32>
    "tpu.trace_start"() <{level = 10 : i32, message = "bqk,bkd->bqd"}> : () -> ()
    %cst_35 = arith.constant dense<0.000000e+00> : vector<2x8x8xf32>
    %90 = tpu.matmul %88, %89, %cst_35 {dimension_numbers = #tpu.dot_dimension_numbers<[2], [1], [1], [2], [0, 0, 0, 1, 1, 2], [0], [0]>, precision = #tpu.contract_precision<fp32>} : vector<2x8x8xf32>, vector<2x8x8xf32>, vector<2x8x8xf32> -> vector<2x8x8xf32>
    "tpu.trace_stop"() : () -> ()
    %91 = vector.shape_cast %90 : vector<2x8x8xf32> to vector<16x8xf32>
    %c0_36 = arith.constant 0 : index
    %c24 = arith.constant 24 : index
    %c0_37 = arith.constant 0 : index
    %92 = vector.load %arg7[%c0_36, %c24, %c0_37] : memref<1x32x32xf32, #tpu.memory_space<vmem>>, vector<1x8x32xf32>
    %93 = vector.shape_cast %92 : vector<1x8x32xf32> to vector<8x32xf32>
    %cst_38 = arith.constant dense<0.000000e+00> : vector<16x32xf32>
    %94 = tpu.matmul %91, %93, %cst_38 {dimension_numbers = #tpu.dot_dimension_numbers<[1], [0], [0], [1], [0, 0, 1, 1], [], []>, precision = #tpu.contract_precision<fp32>} : vector<16x8xf32>, vector<8x32xf32>, vector<16x32xf32> -> vector<16x32xf32>
    %95 = arith.addf %76, %94 : vector<16x32xf32>
    %c0_39 = arith.constant 0 : index
    %c0_40 = arith.constant 0 : index
    %c0_41 = arith.constant 0 : index
    %96 = vector.load %arg8[%c0_39, %c0_40, %c0_41] : memref<1x1x32xf32, #tpu.memory_space<vmem>>, vector<1x1x32xf32>
    %97 = vector.shape_cast %96 : vector<1x1x32xf32> to vector<1x32xf32>
    %98 = vector.broadcast %97 : vector<1x32xf32> to vector<16x32xf32>
    %99 = arith.addf %95, %98 : vector<16x32xf32>
    %100 = arith.addf %3, %99 : vector<16x32xf32>
    %c0_42 = arith.constant 0 : index
    %c0_43 = arith.constant 0 : index
    %c0_44 = arith.constant 0 : index
    %101 = vector.load %arg9[%c0_42, %c0_43, %c0_44] : memref<1x1x32xf32, #tpu.memory_space<vmem>>, vector<1x1x32xf32>
    %102 = vector.shape_cast %101 : vector<1x1x32xf32> to vector<1x32xf32>
    %c0_45 = arith.constant 0 : index
    %c0_46 = arith.constant 0 : index
    %c0_47 = arith.constant 0 : index
    %103 = vector.load %arg10[%c0_45, %c0_46, %c0_47] : memref<1x1x32xf32, #tpu.memory_space<vmem>>, vector<1x1x32xf32>
    %104 = vector.shape_cast %103 : vector<1x1x32xf32> to vector<1x32xf32>
    %cst_48 = arith.constant dense<0.000000e+00> : vector<16xf32>
    %105 = vector.multi_reduction <add>, %100, %cst_48 [1] : vector<16x32xf32> to vector<16xf32>
    %106 = vector.shape_cast %105 : vector<16xf32> to vector<16x1xf32>
    %cst_49 = arith.constant 3.200000e+01 : f32
    %107 = vector.broadcast %cst_49 : f32 to vector<16x1xf32>
    %108 = arith.divf %106, %107 : vector<16x1xf32>
    %109 = vector.broadcast %108 : vector<16x1xf32> to vector<16x32xf32>
    %110 = arith.subf %100, %109 : vector<16x32xf32>
    %111 = arith.mulf %110, %110 : vector<16x32xf32>
    %cst_50 = arith.constant dense<0.000000e+00> : vector<16xf32>
    %112 = vector.multi_reduction <add>, %111, %cst_50 [1] : vector<16x32xf32> to vector<16xf32>
    %113 = vector.shape_cast %112 : vector<16xf32> to vector<16x1xf32>
    %cst_51 = arith.constant 3.200000e+01 : f32
    %114 = vector.broadcast %cst_51 : f32 to vector<16x1xf32>
    %115 = arith.divf %113, %114 : vector<16x1xf32>
    %cst_52 = arith.constant 9.99999974E-6 : f32
    %116 = vector.broadcast %cst_52 : f32 to vector<16x1xf32>
    %117 = arith.addf %115, %116 : vector<16x1xf32>
    %118 = math.rsqrt %117 : vector<16x1xf32>
    %119 = vector.broadcast %118 : vector<16x1xf32> to vector<16x32xf32>
    %120 = arith.mulf %110, %119 : vector<16x32xf32>
    %121 = vector.broadcast %102 : vector<1x32xf32> to vector<16x32xf32>
    %122 = arith.mulf %120, %121 : vector<16x32xf32>
    %123 = vector.broadcast %104 : vector<1x32xf32> to vector<16x32xf32>
    %124 = arith.addf %122, %123 : vector<16x32xf32>
    %c0_53 = arith.constant 0 : index
    %c0_54 = arith.constant 0 : index
    %c0_55 = arith.constant 0 : index
    %125 = vector.load %arg11[%c0_53, %c0_54, %c0_55] : memref<1x32x2048xf32, #tpu.memory_space<vmem>>, vector<1x32x2048xf32>
    %126 = vector.shape_cast %125 : vector<1x32x2048xf32> to vector<32x2048xf32>
    %cst_56 = arith.constant dense<0.000000e+00> : vector<16x2048xf32>
    %127 = tpu.matmul %124, %126, %cst_56 {dimension_numbers = #tpu.dot_dimension_numbers<[1], [0], [0], [1], [0, 0, 1, 1], [], []>, precision = #tpu.contract_precision<fp32>} : vector<16x32xf32>, vector<32x2048xf32>, vector<16x2048xf32> -> vector<16x2048xf32>
    %c0_57 = arith.constant 0 : index
    %c0_58 = arith.constant 0 : index
    %c0_59 = arith.constant 0 : index
    %128 = vector.load %arg12[%c0_57, %c0_58, %c0_59] : memref<1x1x2048xf32, #tpu.memory_space<vmem>>, vector<1x1x2048xf32>
    %129 = vector.shape_cast %128 : vector<1x1x2048xf32> to vector<1x2048xf32>
    %130 = vector.broadcast %129 : vector<1x2048xf32> to vector<16x2048xf32>
    %131 = arith.addf %127, %130 : vector<16x2048xf32>
    %cst_60 = arith.constant 0.000000e+00 : f32
    %132 = vector.broadcast %cst_60 : f32 to vector<16x2048xf32>
    %133 = arith.maximumf %131, %132 : vector<16x2048xf32>
    %c0_61 = arith.constant 0 : index
    %c0_62 = arith.constant 0 : index
    %c0_63 = arith.constant 0 : index
    %134 = vector.load %arg13[%c0_61, %c0_62, %c0_63] : memref<1x2048x32xf32, #tpu.memory_space<vmem>>, vector<1x2048x32xf32>
    %135 = vector.shape_cast %134 : vector<1x2048x32xf32> to vector<2048x32xf32>
    %cst_64 = arith.constant dense<0.000000e+00> : vector<16x32xf32>
    %136 = tpu.matmul %133, %135, %cst_64 {dimension_numbers = #tpu.dot_dimension_numbers<[1], [0], [0], [1], [0, 0, 1, 1], [], []>, precision = #tpu.contract_precision<fp32>} : vector<16x2048xf32>, vector<2048x32xf32>, vector<16x32xf32> -> vector<16x32xf32>
    %c0_65 = arith.constant 0 : index
    %c0_66 = arith.constant 0 : index
    %c0_67 = arith.constant 0 : index
    %137 = vector.load %arg14[%c0_65, %c0_66, %c0_67] : memref<1x1x32xf32, #tpu.memory_space<vmem>>, vector<1x1x32xf32>
    %138 = vector.shape_cast %137 : vector<1x1x32xf32> to vector<1x32xf32>
    %139 = vector.broadcast %138 : vector<1x32xf32> to vector<16x32xf32>
    %140 = arith.addf %136, %139 : vector<16x32xf32>
    %141 = arith.addf %124, %140 : vector<16x32xf32>
    %c0_68 = arith.constant 0 : index
    %c0_69 = arith.constant 0 : index
    %c0_70 = arith.constant 0 : index
    %142 = vector.load %arg15[%c0_68, %c0_69, %c0_70] : memref<1x1x32xf32, #tpu.memory_space<vmem>>, vector<1x1x32xf32>
    %143 = vector.shape_cast %142 : vector<1x1x32xf32> to vector<1x32xf32>
    %c0_71 = arith.constant 0 : index
    %c0_72 = arith.constant 0 : index
    %c0_73 = arith.constant 0 : index
    %144 = vector.load %arg16[%c0_71, %c0_72, %c0_73] : memref<1x1x32xf32, #tpu.memory_space<vmem>>, vector<1x1x32xf32>
    %145 = vector.shape_cast %144 : vector<1x1x32xf32> to vector<1x32xf32>
    %cst_74 = arith.constant dense<0.000000e+00> : vector<16xf32>
    %146 = vector.multi_reduction <add>, %141, %cst_74 [1] : vector<16x32xf32> to vector<16xf32>
    %147 = vector.shape_cast %146 : vector<16xf32> to vector<16x1xf32>
    %cst_75 = arith.constant 3.200000e+01 : f32
    %148 = vector.broadcast %cst_75 : f32 to vector<16x1xf32>
    %149 = arith.divf %147, %148 : vector<16x1xf32>
    %150 = vector.broadcast %149 : vector<16x1xf32> to vector<16x32xf32>
    %151 = arith.subf %141, %150 : vector<16x32xf32>
    %152 = arith.mulf %151, %151 : vector<16x32xf32>
    %cst_76 = arith.constant dense<0.000000e+00> : vector<16xf32>
    %153 = vector.multi_reduction <add>, %152, %cst_76 [1] : vector<16x32xf32> to vector<16xf32>
    %154 = vector.shape_cast %153 : vector<16xf32> to vector<16x1xf32>
    %cst_77 = arith.constant 3.200000e+01 : f32
    %155 = vector.broadcast %cst_77 : f32 to vector<16x1xf32>
    %156 = arith.divf %154, %155 : vector<16x1xf32>
    %cst_78 = arith.constant 9.99999974E-6 : f32
    %157 = vector.broadcast %cst_78 : f32 to vector<16x1xf32>
    %158 = arith.addf %156, %157 : vector<16x1xf32>
    %159 = math.rsqrt %158 : vector<16x1xf32>
    %160 = vector.broadcast %159 : vector<16x1xf32> to vector<16x32xf32>
    %161 = arith.mulf %151, %160 : vector<16x32xf32>
    %162 = vector.broadcast %143 : vector<1x32xf32> to vector<16x32xf32>
    %163 = arith.mulf %161, %162 : vector<16x32xf32>
    %164 = vector.broadcast %145 : vector<1x32xf32> to vector<16x32xf32>
    %165 = arith.addf %163, %164 : vector<16x32xf32>
    %c0_79 = arith.constant 0 : index
    %c0_80 = arith.constant 0 : index
    %166 = vector.load %arg18[%c0_79, %c0_80] : memref<16x32xf32, #tpu.memory_space<vmem>>, vector<16x32xf32>
    tpu.vector_store %arg18[%c0_79, %c0_80], %165 {strides = array<i32>} : memref<16x32xf32, #tpu.memory_space<vmem>>, vector<16x32xf32>,
    %c1_i32 = arith.constant 1 : i32
    %167 = arith.cmpi eq, %arg0, %c1_i32 : i32
    %168 = arith.extui %167 : i1 to i32
    %c0_i32_81 = arith.constant 0 : i32
    %169 = arith.cmpi ne, %168, %c0_i32_81 : i32
    scf.if %169 {
      %cst_82 = arith.constant 0.000000e+00 : f32
      %170 = vector.broadcast %cst_82 : f32 to vector<16x32xf32>
      %171 = arith.maximumf %165, %170 : vector<16x32xf32>
      %172 = vector.shape_cast %171 : vector<16x32xf32> to vector<2x8x32xf32>
      %c0_83 = arith.constant 0 : index
      %c0_84 = arith.constant 0 : index
      %c0_85 = arith.constant 0 : index
      %173 = vector.load %arg17[%c0_83, %c0_84, %c0_85] : memref<2x8x32xf32, #tpu.memory_space<vmem>>, vector<2x8x32xf32>
      tpu.vector_store %arg17[%c0_83, %c0_84, %c0_85], %172 {strides = array<i32>} : memref<2x8x32xf32, #tpu.memory_space<vmem>>, vector<2x8x32xf32>,
    } else {
    }
    return
  }
  func.func @transform_0(%arg0: i32) -> (i32, i32, i32) {
    %c0_i32 = arith.constant 0 : i32
    %c0_i32_0 = arith.constant 0 : i32
    %c0_i32_1 = arith.constant 0 : i32
    %c0_i32_2 = arith.constant 0 : i32
    return %c0_i32, %c0_i32_0, %c0_i32_1 : i32, i32, i32
  }
  func.func @transform_1(%arg0: i32) -> (i32, i32) {
    %c0_i32 = arith.constant 0 : i32
    %c0_i32_0 = arith.constant 0 : i32
    %c0_i32_1 = arith.constant 0 : i32
    return %c0_i32, %c0_i32_0 : i32, i32
  }
  func.func @transform_2(%arg0: i32) -> (i32, i32) {
    %c0_i32 = arith.constant 0 : i32
    %c0_i32_0 = arith.constant 0 : i32
    %c0_i32_1 = arith.constant 0 : i32
    return %c0_i32, %c0_i32_0 : i32, i32
  }
  func.func @transform_3(%arg0: i32) -> (i32, i32) {
    %c0_i32 = arith.constant 0 : i32
    %c0_i32_0 = arith.constant 0 : i32
    %c0_i32_1 = arith.constant 0 : i32
    return %c0_i32, %c0_i32_0 : i32, i32
  }
  func.func @transform_4(%arg0: i32) -> (i32, i32, i32) {
    %c0_i32 = arith.constant 0 : i32
    %c0_i32_0 = arith.constant 0 : i32
    %c0_i32_1 = arith.constant 0 : i32
    return %arg0, %c0_i32, %c0_i32_0 : i32, i32, i32
  }
  func.func @transform_5(%arg0: i32) -> (i32, i32, i32) {
    %c0_i32 = arith.constant 0 : i32
    %c0_i32_0 = arith.constant 0 : i32
    %c0_i32_1 = arith.constant 0 : i32
    return %arg0, %c0_i32, %c0_i32_0 : i32, i32, i32
  }
  func.func @transform_6(%arg0: i32) -> (i32, i32, i32) {
    %c0_i32 = arith.constant 0 : i32
    %c0_i32_0 = arith.constant 0 : i32
    %c0_i32_1 = arith.constant 0 : i32
    return %arg0, %c0_i32, %c0_i32_0 : i32, i32, i32
  }
  func.func @transform_7(%arg0: i32) -> (i32, i32, i32) {
    %c0_i32 = arith.constant 0 : i32
    %c0_i32_0 = arith.constant 0 : i32
    %c0_i32_1 = arith.constant 0 : i32
    return %arg0, %c0_i32, %c0_i32_0 : i32, i32, i32
  }
  func.func @transform_8(%arg0: i32) -> (i32, i32, i32) {
    %c0_i32 = arith.constant 0 : i32
    %c0_i32_0 = arith.constant 0 : i32
    %c0_i32_1 = arith.constant 0 : i32
    return %arg0, %c0_i32, %c0_i32_0 : i32, i32, i32
  }
  func.func @transform_9(%arg0: i32) -> (i32, i32, i32) {
    %c0_i32 = arith.constant 0 : i32
    %c0_i32_0 = arith.constant 0 : i32
    %c0_i32_1 = arith.constant 0 : i32
    return %arg0, %c0_i32, %c0_i32_0 : i32, i32, i32
  }
  func.func @transform_10(%arg0: i32) -> (i32, i32, i32) {
    %c0_i32 = arith.constant 0 : i32
    %c0_i32_0 = arith.constant 0 : i32
    %c0_i32_1 = arith.constant 0 : i32
    return %arg0, %c0_i32, %c0_i32_0 : i32, i32, i32
  }
  func.func @transform_11(%arg0: i32) -> (i32, i32, i32) {
    %c0_i32 = arith.constant 0 : i32
    %c0_i32_0 = arith.constant 0 : i32
    %c0_i32_1 = arith.constant 0 : i32
    return %arg0, %c0_i32, %c0_i32_0 : i32, i32, i32
  }
  func.func @transform_12(%arg0: i32) -> (i32, i32, i32) {
    %c0_i32 = arith.constant 0 : i32
    %c0_i32_0 = arith.constant 0 : i32
    %c0_i32_1 = arith.constant 0 : i32
    return %arg0, %c0_i32, %c0_i32_0 : i32, i32, i32
  }
  func.func @transform_13(%arg0: i32) -> (i32, i32, i32) {
    %c0_i32 = arith.constant 0 : i32
    %c0_i32_0 = arith.constant 0 : i32
    %c0_i32_1 = arith.constant 0 : i32
    return %arg0, %c0_i32, %c0_i32_0 : i32, i32, i32
  }
  func.func @transform_14(%arg0: i32) -> (i32, i32, i32) {
    %c0_i32 = arith.constant 0 : i32
    %c0_i32_0 = arith.constant 0 : i32
    %c0_i32_1 = arith.constant 0 : i32
    return %arg0, %c0_i32, %c0_i32_0 : i32, i32, i32
  }
  func.func @transform_15(%arg0: i32) -> (i32, i32, i32) {
    %c0_i32 = arith.constant 0 : i32
    %c0_i32_0 = arith.constant 0 : i32
    %c0_i32_1 = arith.constant 0 : i32
    return %arg0, %c0_i32, %c0_i32_0 : i32, i32, i32
  }
  func.func @transform_16(%arg0: i32) -> (i32, i32, i32) {
    %c0_i32 = arith.constant 0 : i32
    %c0_i32_0 = arith.constant 0 : i32
    %c0_i32_1 = arith.constant 0 : i32
    %c0_i32_2 = arith.constant 0 : i32
    return %c0_i32, %c0_i32_0, %c0_i32_1 : i32, i32, i32
  }
}

</mosaic_0001>

<bundles_post_ra>
// kernel: tpu_custom_call.1
= control target key start
LH: loop header
LB: loop body
LE: loop exit
PB: predicated region body
PF: predicated region fallthrough
CT: control target
= control target key end

     0   :  { %s21734_s0 = inlined_call_operand.vmem [shape: f32[2,8,16], index: 0, kind: input, shape index: {}]   ;;  %s21735_s1 = inlined_call_operand.vmem [shape: f32[16,32], index: 1, kind: input, shape index: {}]   ;;  %s21736_s2 = inlined_call_operand.vmem [shape: f32[1,32], index: 2, kind: input, shape index: {}]   ;;  %s21737_s3 = inlined_call_operand.vmem [shape: f32[8,32], index: 3, kind: input, shape index: {}]   ;;  %s21738_s4 = inlined_call_operand.vmem [shape: f32[2,32,96], index: 4, kind: input, shape index: {}]   ;;  %s21739_s5 = inlined_call_operand.vmem [shape: f32[2,1,96], index: 5, kind: input, shape index: {}]   ;;  %s21740_s6 = inlined_call_operand.vmem [shape: f32[2,32,32], index: 6, kind: input, shape index: {}]   ;;  %s21741_s7 = inlined_call_operand.vmem [shape: f32[2,1,32], index: 7, kind: input, shape index: {}]   ;;  %s21742_s8 = inlined_call_operand.vmem [shape: f32[2,1,32], index: 8, kind: input, shape index: {}]   ;;  %s21743_s9 = inlined_call_operand.vmem [shape: f32[2,1,32], index: 9, kind: input, shape index: {}]   ;;  %s21744_s10 = inlined_call_operand.vmem [shape: f32[2,32,2048], index: 10, kind: input, shape index: {}]   ;;  %s21745_s11 = inlined_call_operand.vmem [shape: f32[2,1,2048], index: 11, kind: input, shape index: {}]   ;;  %s21746_s12 = inlined_call_operand.vmem [shape: f32[2,2048,32], index: 12, kind: input, shape index: {}]   ;;  %s21747_s13 = inlined_call_operand.vmem [shape: f32[2,1,32], index: 13, kind: input, shape index: {}]   ;;  %s21748_s14 = inlined_call_operand.vmem [shape: f32[2,1,32], index: 14, kind: input, shape index: {}]   ;;  %s21749_s15 = inlined_call_operand.vmem [shape: f32[2,1,32], index: 15, kind: input, shape index: {}]   ;;  %s21750_s16 = inlined_call_operand.hbm [shape: f32[2,8,32], index: 16, kind: output, shape index: {}]  }
   0x1   :  { %21996 = sst [smem:[#allocation120_spill]] %s21734_s0 }
   0x2   :  { %21997 = sst [smem:[#allocation121_spill]] %s21736_s2 }
   0x3   :  { %21998 = sst [smem:[#allocation122_spill]] %s21737_s3 }
   0x4   :  { %21999 = sst [smem:[#allocation123_spill]] %s21738_s4 }
   0x5   :  { %22000 = sst [smem:[#allocation124_spill]] %s21739_s5 }
   0x6   :  { %22001 = sst [smem:[#allocation125_spill]] %s21740_s6 }
   0x7   :  { %22002 = sst [smem:[#allocation126_spill]] %s21750_s16 }
   0x8   :  { %21 = vsyncpa [#allocation4], 0  ;;  %s14880_s21 = smov 0  }
   0x9 LB: > { %22003 = sst [smem:[#allocation6_spill]] %s14778_s21  ;;  %s14886_s22 = sadd.s32 4294967295, %s14778_s21   ;;  %s14778_s21 = sphi %s14880_s21, %s27_s21  }
   0xa   : > { %p14623_p0 = scmp.ge.s32.totalorder %s14778_s21, 1  ;;  %p553_p1 = scmp.lt.s32.totalorder %s14778_s21, 3 }
   0xc   : > { %p554_p2 = pnand %p14623_p0, %p553_p1 }
   0xe   : > { %557 = sbr.rel (%p554_p2) target bundleno = 4823 (0x12d7), region = 84 }
  0x13   : > { %p638_p3 = scmp.lt.s32.totalorder %s14886_s22, 1  ;;  %s22005_s4 = sld [smem:[#allocation123_spill]] }
  0x14   : > { %s22006_s6 = sld [smem:[#allocation125_spill]]  ;;  %p14633_p4 = scmp.ne.s32.totalorder %s14886_s22, 0 }
  0x15   : > { %s14892_s23 = scalar_select %p638_p3, %s14886_s22, 1 }
  0x16   : > { %s22007_s26 = sld [smem:[#allocation120_spill]] (!%p14633_p4) }
  0x17   : > { %s14639_s24 = sshll.u32 %s14892_s23, 5  ;;  %s14641_s28 = sshll.u32 %s14892_s23, 9 }
  0x18   : > { %s14925_s5 = scalar_lea.vmem %s21744_s10, %s14641_s28  ;;  %s14642_s20 = sshll.u32 %s14892_s23, 11 }
  0x19   : > { %s14902_s30 = scalar_lea.vmem %s22005_s4, %s14639_s24  ;;  %s14937_s16 = scalar_lea.vmem %s21746_s12, %s14642_s20 }
  0x1a   : > { %s14907_s18 = scalar_lea.vmem %s22006_s6, %s14639_s24  ;;  %s14630_s24 = sshll.u32 %s14892_s23, 4 }
  0x1b   : > { %s14931_s19 = scalar_lea.vmem %s21745_s11, %s14630_s24  ;;  %s676_s27 = scalar_lea.vmem %s21747_s13, %s14892_s23 }
  0x1c   : > { %s679_s28 = scalar_lea.vmem %s21748_s14, %s14892_s23  ;;  %s682_s0 = scalar_lea.vmem %s21749_s15, %s14892_s23 }
  0x1d   : > { %686 = sbr.rel (%p14633_p4) target bundleno = 206 (0xce), region = 88  ;;  %s22008_s24 = sld [smem:[#allocation121_spill]] (!%p14633_p4) }
  0x1e   : > { %s22009_s20 = sld [smem:[#allocation122_spill]] (!%p14633_p4) }
  0x22   : > { %v690_v0 = vld [vmem:[%s21735_s1 + $0x8] sm:$0xff]  ;;  %v689_v1 = vld [vmem:[%s21735_s1] sm:$0xff]  ;;  %vm695_vm0 = vcmask 130048   ;;  %vm895_vm1 = vcmask 261120  }
  0x23   : > { %v688_v2 = vld [vmem:[%s22007_s26 + $0x8] sm:$0xff]  ;;  %v716_v3 = vand.u32 4294901760, %v690_v0  ;;  %v718_v4 = vand.u32 4294901760, %v689_v1  ;;  %v687_v6 = vld [vmem:[%s22007_s26] sm:$0xff] }
  0x24   : > { %v700_v5 = vsel %vm695_vm0, %v688_v2, 0  ;;  %v697_v8 = vsel %vm695_vm0, %v687_v6, 0  ;;  %v14684_v27 = vld [vmem:[%s22008_s24] ss:$0 sm:$0xff] }
  0x25   : > { %v728_v7 = vand.u32 4294901760, %v700_v5  ;;  %14643 = vmatpush.msra.mxu2 %v716_v3  ;;  %v752_v9 = vsub.f32 %v690_v0, %v716_v3  ;;  %v758_v10 = vsub.f32 %v689_v1, %v718_v4  ;;  %717 = vmatpush.msra.mxu0 %v716_v3  ;;  %v720_v11 = vand.u32 4294901760, %v697_v8  ;;  %v892_v41 = vld [vmem:[%s22009_s20] sm:$0xff] }
  0x27   : > { %v729_v12 = vsub.f32 %v700_v5, %v728_v7  ;;  %14644 = vmatpush.msra.mxu2 %v718_v4  ;;  %v753_v13 = vand.u32 4294901760, %v752_v9  ;;  %v759_v14 = vand.u32 4294901760, %v758_v10  ;;  %v721_v15 = vsub.f32 %v697_v8, %v720_v11  ;;  %719 = vmatpush.msra.mxu0 %v718_v4 }
  0x29   : > { %v730_v16 = vand.u32 4294901760, %v729_v12  ;;  %788 = vmatpush.msrb.mxu2 %v752_v9  ;;  %v754_v17 = vsub.f32 %v752_v9, %v753_v13  ;;  %v760_v18 = vsub.f32 %v758_v10, %v759_v14  ;;  %v722_v19 = vand.u32 4294901760, %v721_v15  ;;  %851 = vmatpush.msrb.mxu0 %v753_v13 }
  0x2b   : > { %v731_v20 = vsub.f32 %v729_v12, %v730_v16  ;;  %791 = vmatpush.msrb.mxu2 %v758_v10  ;;  %v755_v21 = vand.u32 4294901760, %v754_v17  ;;  %v761_v22 = vand.u32 4294901760, %v760_v18  ;;  %v723_v23 = vsub.f32 %v721_v15, %v722_v19  ;;  %855 = vmatpush.msrb.mxu0 %v759_v14 }
  0x2d   : > { %v732_v24 = vand.u32 4294901760, %v731_v20  ;;  %14645 = vmatpush.msra.mxu3 %v755_v21  ;;  %756 = vmatpush.msra.mxu1 %v755_v21  ;;  %v724_v25 = vand.u32 4294901760, %v723_v23 }
  0x2f   : > { %733 = vmatmul.f32.vlgmr.msra.gmra.mxu2 %v732_v24  ;;  %14646 = vmatpush.msra.mxu3 %v761_v22 }
  0x30   : > { %725 = vmatmul.f32.vlgmr.msra.gmra.mxu0 %v724_v25  ;;  %768 = vmatmul.f32.vlgmr.msra.gmra.mxu3 %v728_v7 }
  0x31   : > { %762 = vmatpush.msra.mxu1 %v761_v22  ;;  %818 = vmatpush.msrb.mxu3 %v716_v3 }
  0x32   : > { %764 = vmatmul.f32.vlgmr.msra.gmra.mxu1 %v720_v11 }
  0x33   : > { %880 = vmatpush.msrb.mxu1 %v716_v3  ;;  %820 = vmatpush.msrb.mxu3 %v718_v4 }
  0x35   : > { %882 = vmatpush.msrb.mxu1 %v718_v4 }
  0x37   : > { %794 = vmatmul.f32.vlgmr.msrb.gmra.mxu2 %v721_v15 }
  0x38   : > { %857 = vmatmul.f32.vlgmr.msrb.gmra.mxu0 %v720_v11  ;;  %824 = vmatmul.f32.vlgmr.msrb.gmra.mxu3 %v722_v19 }
  0x3a   : > { %884 = vmatmul.f32.vlgmr.msrb.gmra.mxu1 %v720_v11 }
  0x3f   : > { %799 = vmatmul.f32.gmra.mxu2 %v729_v12 }
  0x40   : > { %861 = vmatmul.f32.gmra.mxu0 %v728_v7  ;;  %830 = vmatmul.f32.gmra.mxu3 %v730_v16 }
  0x42   : > { %888 = vmatmul.f32.gmra.mxu1 %v728_v7 }
  0xad   : > { %v726_v26 = vpop.f32.mrf.mxu0 }
  0xae   : > { %v727_v30 = vadd.f32 %v14684_v27, %v726_v26 }
  0xaf   : > { %v765_v29 = vpop.f32.mrf.mxu1 }
  0xb0   : > { %v766_v32 = vadd.f32 %v765_v29, %v727_v30 }
  0xb2   : > { %v734_v28 = vpop.f32.mrf.mxu2 }
  0xb3   : > { %v769_v31 = vpop.f32.mrf.mxu3  ;;  %v735_v38 = vadd.f32 %v14684_v27, %v734_v28 }
  0xb5   : > { %v858_v34 = vpop.f32.mrf.mxu0  ;;  %v770_v42 = vadd.f32 %v769_v31, %v735_v38 }
  0xb7   : > { %v885_v37 = vpop.f32.mrf.mxu1 }
  0xba   : > { %v795_v33 = vpop.f32.mrf.mxu2 }
  0xbb   : > { %v796_v35 = vadd.f32 %v795_v33, %v766_v32  ;;  %v825_v36 = vpop.f32.mrf.mxu3 }
  0xbd   : > { %v826_v39 = vadd.f32 %v825_v36, %v796_v35  ;;  %v862_v48 = vpop.f32.mrf.mxu0 }
  0xbf   : > { %v859_v40 = vadd.f32 %v858_v34, %v826_v39  ;;  %v889_v50 = vpop.f32.mrf.mxu1 }
  0xc1   : > { %v886_v43 = vadd.f32 %v885_v37, %v859_v40 }
  0xc2   : > { %v800_v44 = vpop.f32.mrf.mxu2 }
  0xc3   : > { %v893_v45 = vadd.f32 %v892_v41, %v886_v43  ;;  %v801_v46 = vadd.f32 %v800_v44, %v770_v42  ;;  %v831_v47 = vpop.f32.mrf.mxu3 }
  0xc5   : > { %896 = vst.msk [vmem:[#allocation2] sm:$0xff] %vm895_vm1, %v893_v45  ;;  %v832_v49 = vadd.f32 %v831_v47, %v801_v46 }
  0xc7   : > { %v863_v51 = vadd.f32 %v862_v48, %v832_v49 }
  0xc9   : > { %v890_v52 = vadd.f32 %v889_v50, %v863_v51 }
  0xcb   : > { %v894_v53 = vadd.f32 %v892_v41, %v890_v52 }
  0xcd   : > { %897 = vst.msk [vmem:[#allocation2 + $0x8] sm:$0xff] %vm895_vm1, %v894_v53 }
  0xce PF: > { %v903_v54 = vld [vmem:[%s14902_s30 + $0x18] sm:$0xff]  ;;  %v902_v55 = vld [vmem:[%s14902_s30 + $0x10] sm:$0xff]  ;;  %v901_v56 = vld [vmem:[%s14902_s30 + $0x8] sm:$0xff]  ;;  %vm908_vm2 = vcmask 261120   ;;  %s22010_s25 = sld [smem:[#allocation124_spill]]  ;;  %s14780_s6 = smov 96  }
  0xcf   : > { %v927_v57 = vand.u32 4294901760, %v903_v54  ;;  %v14973_v58 = vand.u32 4294901760, %v902_v55  ;;  %v14975_v59 = vand.u32 4294901760, %v901_v56  ;;  %v900_v60 = vld [vmem:[%s14902_s30] sm:$0xff]  ;;  %s14781_s4 = smov 64   ;;  %s14782_s29 = smov 120  }
  0xd0   : > { %v898_v62 = vld [vmem:[#allocation2] sm:$0xff]  ;;  %v14978_v63 = vand.u32 4294901760, %v900_v60  ;;  %s14783_s24 = smov 88   ;;  %vm1136_vm3 = vcmask 64512   ;;  %s14784_s17 = smov 56  }
  0xd1   : > { %v910_v1 = vsel %vm908_vm2, %v898_v62, 0  ;;  %14647 = vmatpush.msra.mxu2 %v927_v57  ;;  %v965_v2 = vsub.f32 %v903_v54, %v927_v57  ;;  %v971_v4 = vsub.f32 %v902_v55, %v14973_v58  ;;  %v977_v5 = vsub.f32 %v901_v56, %v14975_v59  ;;  %928 = vmatpush.msra.mxu0 %v927_v57  ;;  %s14785_s21 = smov 112   ;;  %s14786_s20 = smov 80  }
  0xd2   : > { %v983_v6 = vsub.f32 %v900_v60, %v14978_v63  ;;  %v935_v7 = vand.u32 4294901760, %v910_v1  ;;  %s14787_s30 = smov 48   ;;  %s14788_s3 = smov 104  }
  0xd3   : > { %14648 = vmatpush.msra.mxu2 %v14973_v58  ;;  %v966_v8 = vand.u32 4294901760, %v965_v2  ;;  %v972_v10 = vand.u32 4294901760, %v971_v4  ;;  %v978_v11 = vand.u32 4294901760, %v977_v5  ;;  %930 = vmatpush.msra.mxu0 %v14973_v58  ;;  %p14634_p5 = scmp.ne.s32.totalorder %s14886_s22, 1 }
  0xd4   : > { %v899_v61 = vld [vmem:[#allocation2 + $0x8] sm:$0xff]  ;;  %v984_v12 = vand.u32 4294901760, %v983_v6  ;;  %v936_v13 = vsub.f32 %v910_v1, %v935_v7  ;;  %s22011_s2 = scalar_lea.vmem %s22010_s25, %s14892_s23  ;;  %s14789_s25 = smov 72  }
  0xd5   : > { %v913_v0 = vsel %vm908_vm2, %v899_v61, 0  ;;  %14649 = vmatpush.msra.mxu2 %v14975_v59  ;;  %v967_v14 = vsub.f32 %v965_v2, %v966_v8  ;;  %v973_v16 = vsub.f32 %v971_v4, %v972_v10  ;;  %v979_v17 = vsub.f32 %v977_v5, %v978_v11  ;;  %932 = vmatpush.msra.mxu0 %v14975_v59  ;;  %v14685_v29 = vld [vmem:[%s22011_s2] ss:$0 sm:$0xff]  ;;  %s14790_s2 = smov 40  }
  0xd6   : > { %v14982_v3 = vand.u32 4294901760, %v913_v0  ;;  %v937_v18 = vand.u32 4294901760, %v936_v13  ;;  %v985_v22 = vsub.f32 %v983_v6, %v984_v12 }
  0xd7   : > { %14650 = vmatpush.msra.mxu2 %v14978_v63  ;;  %v968_v19 = vand.u32 4294901760, %v967_v14  ;;  %v974_v21 = vand.u32 4294901760, %v973_v16  ;;  %934 = vmatpush.msra.mxu0 %v14978_v63  ;;  %v980_v25 = vand.u32 4294901760, %v979_v17 }
  0xd8   : > { %v944_v9 = vsub.f32 %v913_v0, %v14982_v3  ;;  %v938_v23 = vsub.f32 %v936_v13, %v937_v18  ;;  %v986_v27 = vand.u32 4294901760, %v985_v22 }
  0xd9   : > { %1011 = vmatpush.msrb.mxu2 %v965_v2  ;;  %1080 = vmatpush.msrb.mxu0 %v966_v8 }
  0xda   : > { %v945_v15 = vand.u32 4294901760, %v944_v9  ;;  %14651 = vmatpush.msra.mxu3 %v968_v19  ;;  %969 = vmatpush.msra.mxu1 %v968_v19  ;;  %v939_v26 = vand.u32 4294901760, %v938_v23 }
  0xdb   : > { %1014 = vmatpush.msrb.mxu2 %v971_v4  ;;  %1084 = vmatpush.msrb.mxu0 %v972_v10 }
  0xdc   : > { %v946_v20 = vsub.f32 %v944_v9, %v945_v15  ;;  %14652 = vmatpush.msra.mxu3 %v974_v21  ;;  %975 = vmatpush.msra.mxu1 %v974_v21 }
  0xdd   : > { %1017 = vmatpush.msrb.mxu2 %v977_v5  ;;  %940 = vmatmul.f32.vlgmr.msra.gmra.mxu0 %v939_v26 }
  0xde   : > { %v947_v24 = vand.u32 4294901760, %v946_v20  ;;  %14653 = vmatpush.msra.mxu3 %v980_v25  ;;  %981 = vmatpush.msra.mxu1 %v980_v25 }
  0xdf   : > { %1020 = vmatpush.msrb.mxu2 %v983_v6  ;;  %1088 = vmatpush.msrb.mxu0 %v978_v11 }
  0xe0   : > { %948 = vmatmul.f32.vlgmr.msra.gmra.mxu2 %v947_v24  ;;  %14654 = vmatpush.msra.mxu3 %v986_v27 }
  0xe1   : > { %993 = vmatmul.f32.vlgmr.msra.gmra.mxu3 %v14982_v3  ;;  %987 = vmatpush.msra.mxu1 %v986_v27 }
  0xe2   : > { %1045 = vmatpush.msrb.mxu3 %v927_v57  ;;  %989 = vmatmul.f32.vlgmr.msra.gmra.mxu1 %v935_v7 }
  0xe3   : > { %1115 = vmatpush.msrb.mxu1 %v927_v57  ;;  %1092 = vmatpush.msrb.mxu0 %v984_v12 }
  0xe4   : > { %1047 = vmatpush.msrb.mxu3 %v14973_v58 }
  0xe5   : > { %1117 = vmatpush.msrb.mxu1 %v14973_v58  ;;  %1094 = vmatmul.f32.vlgmr.msrb.gmra.mxu0 %v935_v7 }
  0xe6   : > { %1049 = vmatpush.msrb.mxu3 %v14975_v59 }
  0xe7   : > { %1119 = vmatpush.msrb.mxu1 %v14975_v59 }
  0xe8   : > { %1023 = vmatmul.f32.vlgmr.msrb.gmra.mxu2 %v936_v13  ;;  %1051 = vmatpush.msrb.mxu3 %v14978_v63 }
  0xe9   : > { %1055 = vmatmul.f32.vlgmr.msrb.gmra.mxu3 %v937_v18  ;;  %1121 = vmatpush.msrb.mxu1 %v14978_v63 }
  0xea   : > { %1123 = vmatmul.f32.vlgmr.msrb.gmra.mxu1 %v935_v7 }
  0xed   : > { %1098 = vmatmul.f32.gmra.mxu0 %v14982_v3 }
  0xf0   : > { %1028 = vmatmul.f32.gmra.mxu2 %v944_v9 }
  0xf1   : > { %1061 = vmatmul.f32.gmra.mxu3 %v945_v15 }
  0xf2   : > { %1127 = vmatmul.f32.gmra.mxu1 %v14982_v3 }
 0x15a   : > { %v941_v28 = vpop.f32.mrf.mxu0 }
 0x15b   : > { %v942_v31 = vadd.f32 %v14685_v29, %v941_v28 }
 0x15f   : > { %v990_v32 = vpop.f32.mrf.mxu1 }
 0x160   : > { %v991_v34 = vadd.f32 %v990_v32, %v942_v31 }
 0x162   : > { %v1095_v37 = vpop.f32.mrf.mxu0 }
 0x163   : > { %v949_v30 = vpop.f32.mrf.mxu2 }
 0x164   : > { %v994_v33 = vpop.f32.mrf.mxu3  ;;  %v950_v40 = vadd.f32 %v14685_v29, %v949_v30 }
 0x166   : > { %v995_v44 = vadd.f32 %v994_v33, %v950_v40 }
 0x167   : > { %v1124_v39 = vpop.f32.mrf.mxu1 }
 0x16a   : > { %v1099_v48 = vpop.f32.mrf.mxu0 }
 0x16b   : > { %v1024_v35 = vpop.f32.mrf.mxu2 }
 0x16c   : > { %v1025_v36 = vadd.f32 %v1024_v35, %v991_v34  ;;  %v1056_v38 = vpop.f32.mrf.mxu3 }
 0x16e   : > { %v1057_v41 = vadd.f32 %v1056_v38, %v1025_v36 }
 0x16f   : > { %v1128_v50 = vpop.f32.mrf.mxu1 }
 0x170   : > { %v1096_v42 = vadd.f32 %v1095_v37, %v1057_v41 }
 0x172   : > { %v15008_v45 = vadd.f32 %v1124_v39, %v1096_v42 }
 0x173   : > { %v1029_v43 = vpop.f32.mrf.mxu2 }
 0x174   : > { %v1030_v46 = vadd.f32 %v1029_v43, %v995_v44  ;;  %1134 = vrot.lane.b32.xlu0 %v15008_v45, %s14780_s6  ;;  %v1062_v47 = vpop.f32.mrf.mxu3  ;;  %v15017_v53 = vmul.f32 0.35355338, %v15008_v45 }
 0x176   : > { %v1063_v49 = vadd.f32 %v1062_v47, %v1030_v46  ;;  %v1138_v55 = vsel %vm1136_vm3, %v15017_v53, 0 }
 0x177   : > { %v1159_v56 = vand.u32 4294901760, %v1138_v55 }
 0x178   : > { %v1100_v51 = vadd.f32 %v1099_v48, %v1063_v49 }
 0x179   : > { %v1160_v57 = vsub.f32 %v1138_v55, %v1159_v56 }
 0x17a   : > { %v15011_v52 = vadd.f32 %v1128_v50, %v1100_v51 }
 0x17b   : > { %v1161_v58 = vand.u32 4294901760, %v1160_v57 }
 0x17c   : > { %1289 = vrot.lane.b32.xlu0 %v15011_v52, %s14780_s6  ;;  %v15023_v54 = vmul.f32 0.35355338, %v15011_v52 }
 0x17d   : > { %v1162_v61 = vsub.f32 %v1160_v57, %v1161_v58 }
 0x17e   : > { %v1292_v63 = vsel %vm1136_vm3, %v15023_v54, 0 }
 0x17f   : > { %v1163_v1 = vand.u32 4294901760, %v1162_v61  ;;  %v1313_v2 = vand.u32 4294901760, %v1292_v63 }
 0x181   : > { %v1314_v7 = vsub.f32 %v1292_v63, %v1313_v2 }
 0x183   : > { %v1315_v11 = vand.u32 4294901760, %v1314_v7 }
 0x184   : > { %1490 = vrot.lane.b32.xlu0 %v15008_v45, %s14781_s4 }
 0x185   : > { %v1316_v16 = vsub.f32 %v1314_v7, %v1315_v11 }
 0x187   : > { %v1317_v20 = vand.u32 4294901760, %v1316_v16 }
 0x18c   : > { %1795 = vrot.lane.b32.xlu0 %v15017_v53, %s14782_s29 }
 0x194   : > { %1951 = vrot.lane.b32.xlu0 %v15011_v52, %s14783_s24 }
 0x19c   : > { %1949 = vrot.lane.b32.xlu0 %v15023_v54, %s14782_s29 }
 0x1e6   : > { %v1135_v59 = vpop.permute.xlu0 %1134 }
 0x1e7   : > { %v1140_v60 = vsel %vm1136_vm3, %v1135_v59, 0 }
 0x1e8   : > { %v1157_v62 = vand.u32 4294901760, %v1140_v60 }
 0x1ea   : > { %v1184_v0 = vsub.f32 %v1140_v60, %v1157_v62  ;;  %1158 = vmatpush.xpose.msra.mxu2 %v1157_v62  ;;  %1282 = vmatpush.xpose.msra.mxu1 %v1157_v62 }
 0x1ec   : > { %v1185_v3 = vand.u32 4294901760, %v1184_v0 }
 0x1ed   : > { %1164 = vmatmul.f32.vlgmr.msra.gmra.mxu2 %v1163_v1  ;;  %1284 = vmatmul.f32.vlgmr.msra.gmra.mxu1 %v1159_v56 }
 0x1ee   : > { %1211 = vmatpush.xpose.msrb.mxu2 %v1184_v0  ;;  %v1186_v4 = vsub.f32 %v1184_v0, %v1185_v3  ;;  %1260 = vmatpush.xpose.msra.mxu0 %v1185_v3  ;;  %v1290_v5 = vpop.permute.xlu0 %1289 }
 0x1ef   : > { %v1294_v6 = vsel %vm1136_vm3, %v1290_v5, 0 }
 0x1f0   : > { %v1187_v8 = vand.u32 4294901760, %v1186_v4  ;;  %v1311_v9 = vand.u32 4294901760, %v1294_v6 }
 0x1f1   : > { %1262 = vmatmul.f32.vlgmr.msra.gmra.mxu0 %v1159_v56 }
 0x1f2   : > { %v1338_v10 = vsub.f32 %v1294_v6, %v1311_v9  ;;  %1188 = vmatpush.xpose.msra.mxu3 %v1187_v8  ;;  %1312 = vmatpush.xpose.msra.mxu2 %v1311_v9 }
 0x1f3   : > { %1388 = vmatpush.xpose.msrb.mxu1 %v1311_v9 }
 0x1f4   : > { %v1339_v12 = vand.u32 4294901760, %v1338_v10  ;;  %1365 = vmatpush.xpose.msrb.mxu0 %v1338_v10 }
 0x1f5   : > { %1190 = vmatmul.f32.vlgmr.msra.gmra.mxu3 %v1159_v56  ;;  %1214 = vmatmul.f32.vlgmr.msrb.gmra.mxu2 %v1160_v57 }
 0x1f6   : > { %1234 = vmatpush.xpose.msrb.mxu3 %v1157_v62  ;;  %v1340_v13 = vsub.f32 %v1338_v10, %v1339_v12  ;;  %1392 = vmatmul.f32.vlgmr.msrb.gmra.mxu1 %v1315_v11  ;;  %v1491_v14 = vpop.permute.xlu0 %1490 }
 0x1f7   : > { %1414 = vmatpush.xpose.msrb.mxu2 %v1339_v12  ;;  %v1511_v15 = vand.u32 4294901760, %v1491_v14 }
 0x1f8   : > { %v1341_v17 = vand.u32 4294901760, %v1340_v13 }
 0x1f9   : > { %v1538_v18 = vsub.f32 %v1491_v14, %v1511_v15  ;;  %1368 = vmatmul.f32.vlgmr.msrb.gmra.mxu0 %v1314_v7 }
 0x1fa   : > { %1512 = vmatpush.msra.mxu0 %v1511_v15  ;;  %1342 = vmatpush.xpose.msra.mxu3 %v1341_v17 }
 0x1fb   : > { %v1539_v19 = vand.u32 4294901760, %v1538_v18 }
 0x1fd   : > { %v1540_v21 = vsub.f32 %v1538_v18, %v1539_v19  ;;  %1238 = vmatmul.f32.vlgmr.msrb.gmra.mxu3 %v1161_v58  ;;  %1318 = vmatmul.f32.vlgmr.msra.gmra.mxu2 %v1317_v20 }
 0x1fe   : > { %1436 = vmatpush.xpose.msrb.mxu3 %v1311_v9  ;;  %1565 = vmatpush.msra.mxu2 %v1538_v18  ;;  %v1796_v6 = vpop.permute.xlu0 %1795 }
 0x1ff   : > { %v1541_v22 = vand.u32 4294901760, %v1540_v21  ;;  %1614 = vmatpush.msrb.mxu0 %v1539_v19 }
 0x201   : > { %1542 = vmatpush.msra.mxu1 %v1541_v22 }
 0x203   : > { %1636 = vmatpush.msrb.mxu1 %v1511_v15 }
 0x205   : > { %1344 = vmatmul.f32.vlgmr.msra.gmra.mxu3 %v1313_v2  ;;  %1416 = vmatmul.f32.vlgmr.msrb.gmra.mxu2 %v1313_v2 }
 0x206   : > { %1588 = vmatpush.msra.mxu3 %v1511_v15  ;;  %v1952_v18 = vpop.permute.xlu0 %1951 }
 0x20d   : > { %1438 = vmatmul.f32.vlgmr.msrb.gmra.mxu3 %v1313_v2 }
 0x26a   : > { %v1285_v31 = vpop.f32.mrf.mxu1 }
 0x26e   : > { %v1263_v28 = vpop.f32.mrf.mxu0 }
 0x270   : > { %v1165_v23 = vpop.f32.mrf.mxu2 }
 0x273   : > { %v1393_v40 = vpop.f32.mrf.mxu1 }
 0x276   : > { %v1369_v38 = vpop.f32.mrf.mxu0 }
 0x278   : > { %v1191_v24 = vpop.f32.mrf.mxu3  ;;  %v1215_v25 = vpop.f32.mrf.mxu2 }
 0x279   : > { %v1192_v26 = vadd.f32 %v1191_v24, %v1165_v23 }
 0x27b   : > { %v1216_v27 = vadd.f32 %v1215_v25, %v1192_v26  ;;  %v1955_v26 = vsel %vm1136_vm3, %v1952_v18, 0 }
 0x280   : > { %v1239_v29 = vpop.f32.mrf.mxu3  ;;  %v1319_v33 = vpop.f32.mrf.mxu2 }
 0x281   : > { %v1240_v30 = vadd.f32 %v1239_v29, %v1216_v27 }
 0x283   : > { %v1264_v32 = vadd.f32 %v1263_v28, %v1240_v30 }
 0x285   : > { %v1286_v34 = vadd.f32 %v1285_v31, %v1264_v32 }
 0x287   : > { %v1442_v35 = vsel %vm1136_vm3, %v1286_v34, -inf }
 0x288   : > { %v1345_v36 = vpop.f32.mrf.mxu3  ;;  %1443 = vmax.xlane.f32.xlu1 %v1442_v35  ;;  %v1417_v42 = vpop.f32.mrf.mxu2 }
 0x289   : > { %v1346_v37 = vadd.f32 %v1345_v36, %v1319_v33  ;;  %v1972_v33 = vand.u32 4294901760, %v1955_v26 }
 0x28b   : > { %v1370_v39 = vadd.f32 %v1369_v38, %v1346_v37 }
 0x28d   : > { %v1394_v41 = vadd.f32 %v1393_v40, %v1370_v39 }
 0x28f   : > { %v1418_v43 = vadd.f32 %v1417_v42, %v1394_v41  ;;  %v1999_v42 = vsub.f32 %v1955_v26, %v1972_v33 }
 0x290   : > { %v1439_v44 = vpop.f32.mrf.mxu3 }
 0x291   : > { %v1440_v46 = vadd.f32 %v1439_v44, %v1418_v43 }
 0x293   : > { %v1445_v47 = vsel %vm1136_vm3, %v1440_v46, -inf }
 0x294   : > { %1446 = vmax.xlane.f32.xlu1 %v1445_v47 }
 0x2ad   : > { %1642 = vrot.lane.b32.xlu1 %v15011_v52, %s14781_s4  ;;  %s22012_s4 = scalar_lea.vmem %s21741_s7, %s14892_s23 }
 0x2fb   : > { %v1444_v48 = vpop.xlane.xlu1 %1443 }
 0x2fc   : > { %v1448_v49 = vsub.f32 %v1286_v34, %v1444_v48  ;;  %v1799_v48 = vsel %vm1136_vm3, %v1796_v6, 0 }
 0x2fe   : > { %v1450_v50 = vmul.f32 1.442695, %v1448_v49  ;;  %v2000_v49 = vand.u32 4294901760, %v1999_v42 }
 0x300   : > { %14692 = vpow2.f32 %v1450_v50 }
 0x306   : > { %v14693_v51 = vpop.eup %14692 }
 0x307   : > { %v1447_v55 = vpop.xlane.xlu1 %1446  ;;  %v1454_v56 = vsel %vm1136_vm3, %v14693_v51, 0.0 }
 0x308   : > { %v1449_v57 = vsub.f32 %v1440_v46, %v1447_v55  ;;  %1455 = vadd.xlane.f32.xlu2 %v1454_v56  ;;  %v2001_v56 = vsub.f32 %v1999_v42, %v2000_v49 }
 0x30a   : > { %v1452_v58 = vmul.f32 1.442695, %v1449_v57 }
 0x30c   : > { %14694 = vpow2.f32 %v1452_v58 }
 0x312   : > { %v15037_v59 = vpop.eup %14694 }
 0x313   : > { %v1457_v60 = vsel %vm1136_vm3, %v15037_v59, 0.0 }
 0x314   : > { %1458 = vadd.xlane.f32.xlu2 %v1457_v60  ;;  %v2002_v60 = vand.u32 4294901760, %v2001_v56 }
 0x31f   : > { %v1643_v61 = vpop.permute.xlu1 %1642 }
 0x320   : > { %v1663_v62 = vand.u32 4294901760, %v1643_v61 }
 0x322   : > { %v15041_v63 = vsub.f32 %v1643_v61, %v1663_v62  ;;  %1664 = vmatpush.msrb.mxu2 %v1663_v62  ;;  %v1950_v61 = vpop.permute.xlu0 %1949 }
 0x324   : > { %v1691_v0 = vand.u32 4294901760, %v15041_v63 }
 0x326   : > { %v1692_v1 = vsub.f32 %v15041_v63, %v1691_v0 }
 0x328   : > { %v1693_v2 = vand.u32 4294901760, %v1692_v1 }
 0x32a   : > { %1694 = vmatpush.msrb.mxu3 %v1693_v2 }
 0x32c   : > { %1797 = vrot.lane.b32.xlu2 %v15008_v45, %s14783_s24 }
 0x37b   : > { %v1456_v3 = vpop.xlane.xlu2 %1455 }
 0x37c   : > { %14696 = vrcp.f32 %v1456_v3  ;;  %v1471_v8 = vand.u32 2147483648, %v1456_v3  ;;  %v1469_v10 = vand.u32 2147483647, %v1456_v3  ;;  %vm1465_vm5 = vweird.f32 %v1456_v3 }
 0x37e   : > { %v1472_v13 = vor.u32 1.1754944e-38, %v1471_v8  ;;  %vm1470_vm7 = vcmp.eq.f32.partialorder %v1469_v10, 8.507059e+37 }
 0x382   : > { %v14697_v4 = vpop.eup %14696 }
 0x383   : > { %v1461_v5 = vmul.f32 %v14697_v4, %v1456_v3  ;;  %vm1466_vm4 = vweird.f32 %v14697_v4 }
 0x384   : > { %vm1467_vm6 = vmor %vm1465_vm5, %vm1466_vm4 }
 0x385   : > { %v1462_v7 = vsub.f32 1.0, %v1461_v5 }
 0x387   : > { %v1463_v9 = vmul.f32 %v14697_v4, %v1462_v7  ;;  %v1459_v11 = vpop.xlane.xlu2 %1458 }
 0x388   : > { %14698 = vrcp.f32 %v1459_v11  ;;  %v1486_v27 = vand.u32 2147483648, %v1459_v11  ;;  %v1484_v30 = vand.u32 2147483647, %v1459_v11  ;;  %vm1480_vm9 = vweird.f32 %v1459_v11 }
 0x389   : > { %v1464_v12 = vadd.f32 %v14697_v4, %v1463_v9 }
 0x38a   : > { %v1487_v36 = vor.u32 1.1754944e-38, %v1486_v27  ;;  %vm1485_vm11 = vcmp.eq.f32.partialorder %v1484_v30, 8.507059e+37 }
 0x38b   : > { %v1468_v14 = vsel %vm1467_vm6, %v14697_v4, %v1464_v12 }
 0x38c   : > { %v1473_v15 = vsel %vm1470_vm7, %v1472_v13, %v1468_v14 }
 0x38d   : > { %v1474_v16 = vmul.f32 %v14693_v51, %v1473_v15  ;;  %v1820_v51 = vand.u32 4294901760, %v1799_v48 }
 0x38e   : > { %v14699_v17 = vpop.eup %14698 }
 0x38f   : > { %v1476_v19 = vmul.f32 %v14699_v17, %v1459_v11  ;;  %v1798_v20 = vpop.permute.xlu2 %1797  ;;  %v1494_v21 = vsel %vm1136_vm3, %v1474_v16, 0  ;;  %vm1481_vm8 = vweird.f32 %v14699_v17  ;;  %v1821_v58 = vsub.f32 %v1799_v48, %v1820_v51 }
 0x390   : > { %v1801_v22 = vsel %vm1136_vm3, %v1798_v20, 0  ;;  %v1513_v23 = vand.u32 4294901760, %v1494_v21  ;;  %vm1482_vm10 = vmor %vm1480_vm9, %vm1481_vm8 }
 0x391   : > { %v1477_v24 = vsub.f32 1.0, %v1476_v19  ;;  %v1818_v25 = vand.u32 4294901760, %v1801_v22 }
 0x392   : > { %1544 = vmatmul.f32.vlgmr.msra.gmra.mxu1 %v1513_v23  ;;  %v1514_v28 = vsub.f32 %v1494_v21, %v1513_v23 }
 0x393   : > { %v1478_v29 = vmul.f32 %v14699_v17, %v1477_v24  ;;  %v1845_v31 = vsub.f32 %v1801_v22, %v1818_v25  ;;  %1740 = vmatpush.msra.mxu1 %v1663_v62 }
 0x394   : > { %1568 = vmatmul.f32.vlgmr.msra.gmra.mxu2 %v1514_v28  ;;  %v1515_v32 = vand.u32 4294901760, %v1514_v28 }
 0x395   : > { %v1479_v34 = vadd.f32 %v14699_v17, %v1478_v29  ;;  %v1846_v35 = vand.u32 4294901760, %v1845_v31  ;;  %1766 = vmatpush.msra.mxu2 %v1691_v0 }
 0x396   : > { %1592 = vmatmul.f32.vlgmr.msra.gmra.mxu3 %v1515_v32  ;;  %v1516_v37 = vsub.f32 %v1514_v28, %v1515_v32 }
 0x397   : > { %v1483_v38 = vsel %vm1482_vm10, %v14699_v17, %v1479_v34  ;;  %v1847_v39 = vsub.f32 %v1845_v31, %v1846_v35  ;;  %1788 = vmatpush.msra.mxu3 %v1663_v62  ;;  %v1822_v62 = vand.u32 4294901760, %v1821_v58 }
 0x398   : > { %v1488_v40 = vsel %vm1485_vm11, %v1487_v36, %v1483_v38  ;;  %v1517_v41 = vand.u32 4294901760, %v1516_v37 }
 0x399   : > { %v1848_v43 = vand.u32 4294901760, %v1847_v39  ;;  %v1489_v44 = vmul.f32 %v15037_v59, %v1488_v40  ;;  %v1823_v0 = vsub.f32 %v1821_v58, %v1822_v62 }
 0x39a   : > { %1518 = vmatmul.f32.vlgmr.msra.gmra.mxu0 %v1517_v41  ;;  %1638 = vmatmul.f32.vlgmr.msrb.gmra.mxu1 %v1513_v23 }
 0x39b   : > { %1717 = vmatpush.msra.mxu0 %v15041_v63  ;;  %1849 = vmatpush.xpose.msrb.mxu1 %v1848_v43  ;;  %v1646_v46 = vsel %vm1136_vm3, %v1489_v44, 0  ;;  %v1953_v63 = vsel %vm1136_vm3, %v1950_v61, 0  ;;  %v1824_v2 = vand.u32 4294901760, %v1823_v0 }
 0x39c   : > { %v1665_v47 = vand.u32 4294901760, %v1646_v46  ;;  %v1974_v1 = vand.u32 4294901760, %v1953_v63 }
 0x39e   : > { %v1666_v50 = vsub.f32 %v1646_v46, %v1665_v47  ;;  %1696 = vmatmul.f32.vlgmr.msrb.gmra.mxu3 %v1665_v47  ;;  %v1975_v3 = vsub.f32 %v1953_v63, %v1974_v1 }
 0x39f   : > { %1895 = vmatpush.xpose.msrb.mxu3 %v1818_v25 }
 0x3a0   : > { %v1667_v55 = vand.u32 4294901760, %v1666_v50  ;;  %v1976_v4 = vand.u32 4294901760, %v1975_v3 }
 0x3a2   : > { %1616 = vmatmul.f32.vlgmr.msrb.gmra.mxu0 %v1513_v23  ;;  %1744 = vmatmul.f32.vlgmr.msra.gmra.mxu1 %v1667_v55  ;;  %v1668_v57 = vsub.f32 %v1666_v50, %v1667_v55  ;;  %v1977_v5 = vsub.f32 %v1975_v3, %v1976_v4 }
 0x3a3   : > { %1819 = vmatpush.xpose.msrb.mxu0 %v1818_v25  ;;  %1943 = vmatpush.xpose.msra.mxu1 %v1818_v25 }
 0x3a4   : > { %v1669_v59 = vand.u32 4294901760, %v1668_v57  ;;  %v1978_v6 = vand.u32 4294901760, %v1977_v5 }
 0x3a6   : > { %1670 = vmatmul.f32.vlgmr.msrb.gmra.mxu2 %v1669_v59  ;;  %1790 = vmatmul.f32.vlgmr.msra.gmra.mxu3 %v1665_v47 }
 0x3a7   : > { %1872 = vmatpush.xpose.msrb.mxu2 %v1845_v31  ;;  %2003 = vmatpush.xpose.msra.mxu3 %v2002_v60 }
 0x3aa   : > { %1720 = vmatmul.f32.vlgmr.msra.gmra.mxu0 %v1666_v50  ;;  %1851 = vmatmul.f32.vlgmr.msrb.gmra.mxu1 %v1820_v51 }
 0x3ab   : > { %1921 = vmatpush.xpose.msra.mxu0 %v1846_v35  ;;  %2049 = vmatpush.xpose.msrb.mxu1 %v1972_v33 }
 0x3ae   : > { %1768 = vmatmul.f32.vlgmr.msra.gmra.mxu2 %v1665_v47  ;;  %1899 = vmatmul.f32.vlgmr.msrb.gmra.mxu3 %v1822_v62 }
 0x3af   : > { %1973 = vmatpush.xpose.msra.mxu2 %v1972_v33  ;;  %2097 = vmatpush.xpose.msrb.mxu3 %v1972_v33 }
 0x3b2   : > { %1825 = vmatmul.f32.vlgmr.msrb.gmra.mxu0 %v1824_v2  ;;  %1945 = vmatmul.f32.vlgmr.msra.gmra.mxu1 %v1820_v51 }
 0x3b3   : > { %2026 = vmatpush.xpose.msrb.mxu0 %v1999_v42 }
 0x3b6   : > { %1875 = vmatmul.f32.vlgmr.msrb.gmra.mxu2 %v1821_v58  ;;  %2005 = vmatmul.f32.vlgmr.msra.gmra.mxu3 %v1974_v1 }
 0x3b7   : > { %2075 = vmatpush.xpose.msrb.mxu2 %v2000_v49 }
 0x3ba   : > { %1923 = vmatmul.f32.vlgmr.msra.gmra.mxu0 %v1820_v51  ;;  %2053 = vmatmul.f32.vlgmr.msrb.gmra.mxu1 %v1976_v4 }
 0x3be   : > { %1979 = vmatmul.f32.vlgmr.msra.gmra.mxu2 %v1978_v6  ;;  %2099 = vmatmul.f32.vlgmr.msrb.gmra.mxu3 %v1974_v1 }
 0x3c2   : > { %2029 = vmatmul.f32.vlgmr.msrb.gmra.mxu0 %v1975_v3 }
 0x3c6   : > { %2077 = vmatmul.f32.vlgmr.msrb.gmra.mxu2 %v1974_v1 }
 0x40f   : > { %v15055_v7 = vpop.f32.mrf.mxu1 }
 0x417   : > { %v15057_v8 = vpop.f32.mrf.mxu0  ;;  %v15061_v10 = vpop.f32.mrf.mxu1 }
 0x418   : > { %v15065_v12 = vpop.f32.mrf.mxu2 }
 0x419   : > { %v15059_v9 = vpop.f32.mrf.mxu3 }
 0x41f   : > { %v15063_v11 = vpop.f32.mrf.mxu0  ;;  %v15071_v15 = vpop.f32.mrf.mxu1 }
 0x421   : > { %v15067_v13 = vpop.f32.mrf.mxu3 }
 0x427   : > { %v15069_v14 = vpop.f32.mrf.mxu0  ;;  %v1852_v20 = vpop.f32.mrf.mxu1 }
 0x429   : > { %v15073_v16 = vpop.f32.mrf.mxu2  ;;  %v15075_v17 = vpop.f32.mrf.mxu3 }
 0x42f   : > { %v1826_v18 = vpop.f32.mrf.mxu0  ;;  %v1946_v27 = vpop.f32.mrf.mxu1 }
 0x430   : > { %v1853_v22 = vadd.f32 %v1852_v20, %v1826_v18 }
 0x431   : > { %v15077_v19 = vpop.f32.mrf.mxu2  ;;  %v1900_v21 = vpop.f32.mrf.mxu3 }
 0x437   : > { %v1924_v23 = vpop.f32.mrf.mxu0  ;;  %v2054_v36 = vpop.f32.mrf.mxu1 }
 0x439   : > { %v1876_v24 = vpop.f32.mrf.mxu2  ;;  %v2006_v30 = vpop.f32.mrf.mxu3 }
 0x43a   : > { %v1877_v25 = vadd.f32 %v1876_v24, %v1853_v22 }
 0x43c   : > { %v1901_v26 = vadd.f32 %v1900_v21, %v1877_v25 }
 0x43e   : > { %v1925_v28 = vadd.f32 %v1924_v23, %v1901_v26 }
 0x43f   : > { %v2030_v34 = vpop.f32.mrf.mxu0 }
 0x440   : > { %v1947_v29 = vadd.f32 %v1946_v27, %v1925_v28 }
 0x441   : > { %v1980_v31 = vpop.f32.mrf.mxu2  ;;  %v2100_v40 = vpop.f32.mrf.mxu3 }
 0x442   : > { %v2007_v32 = vadd.f32 %v2006_v30, %v1980_v31  ;;  %v2103_v33 = vsel %vm1136_vm3, %v1947_v29, -inf }
 0x443   : > { %2104 = vmax.xlane.f32.xlu2 %v2103_v33 }
 0x444   : > { %v2031_v35 = vadd.f32 %v2030_v34, %v2007_v32 }
 0x446   : > { %v2055_v37 = vadd.f32 %v2054_v36, %v2031_v35 }
 0x449   : > { %v2078_v38 = vpop.f32.mrf.mxu2 }
 0x44a   : > { %v2079_v39 = vadd.f32 %v2078_v38, %v2055_v37 }
 0x44c   : > { %v2101_v41 = vadd.f32 %v2100_v40, %v2079_v39 }
 0x44e   : > { %v2106_v42 = vsel %vm1136_vm3, %v2101_v41, -inf }
 0x44f   : > { %2107 = vmax.xlane.f32.xlu1 %v2106_v42 }
 0x468   : > { %2151 = vrot.lane.b32.xlu1 %v15008_v45, %s14784_s17 }
 0x470   : > { %2822 = vrot.lane.b32.xlu1 %v15017_v53, %s14785_s21 }
 0x4b6   : > { %v2105_v43 = vpop.xlane.xlu2 %2104 }
 0x4b7   : > { %v2109_v44 = vsub.f32 %v1947_v29, %v2105_v43 }
 0x4b9   : > { %v2111_v46 = vmul.f32 1.442695, %v2109_v44 }
 0x4bb   : > { %14700 = vpow2.f32 %v2111_v46 }
 0x4c1   : > { %v14701_v47 = vpop.eup %14700 }
 0x4c2   : > { %v2108_v48 = vpop.xlane.xlu1 %2107  ;;  %v2115_v49 = vsel %vm1136_vm3, %v14701_v47, 0.0 }
 0x4c3   : > { %v2110_v50 = vsub.f32 %v2101_v41, %v2108_v48  ;;  %2116 = vadd.xlane.f32.xlu0 %v2115_v49 }
 0x4c5   : > { %v2113_v51 = vmul.f32 1.442695, %v2110_v50 }
 0x4c7   : > { %14702 = vpow2.f32 %v2113_v51 }
 0x4cd   : > { %v15086_v55 = vpop.eup %14702 }
 0x4ce   : > { %v2118_v56 = vsel %vm1136_vm3, %v15086_v55, 0.0 }
 0x4cf   : > { %2119 = vadd.xlane.f32.xlu2 %v2118_v56 }
 0x4d7   : > { %2824 = vrot.lane.b32.xlu0 %v15008_v45, %s14786_s20 }
 0x4da   : > { %v2152_v57 = vpop.permute.xlu1 %2151 }
 0x4db   : > { %v2172_v58 = vand.u32 4294901760, %v2152_v57 }
 0x4dd   : > { %v2199_v59 = vsub.f32 %v2152_v57, %v2172_v58  ;;  %2173 = vmatpush.msra.mxu0 %v2172_v58  ;;  %2249 = vmatpush.msra.mxu3 %v2172_v58 }
 0x4df   : > { %v2200_v60 = vand.u32 4294901760, %v2199_v59  ;;  %2226 = vmatpush.msra.mxu2 %v2199_v59  ;;  %2978 = vrot.lane.b32.xlu0 %v15011_v52, %s14786_s20 }
 0x4e1   : > { %v2201_v61 = vsub.f32 %v2199_v59, %v2200_v60  ;;  %2275 = vmatpush.msrb.mxu0 %v2200_v60 }
 0x4e3   : > { %v2202_v62 = vand.u32 4294901760, %v2201_v61 }
 0x4e5   : > { %2203 = vmatpush.msra.mxu1 %v2202_v62 }
 0x4e7   : > { %2297 = vmatpush.msrb.mxu1 %v2172_v58  ;;  %2303 = vrot.lane.b32.xlu2 %v15011_v52, %s14784_s17  ;;  %s22014_s17 = scalar_lea.vmem %s21742_s8, %s14892_s23 }
 0x4ef   : > { %2976 = vrot.lane.b32.xlu2 %v15023_v54, %s14785_s21 }
 0x536   : > { %v2117_v63 = vpop.xlane.xlu0 %2116 }
 0x537   : > { %14704 = vrcp.f32 %v2117_v63  ;;  %v2132_v3 = vand.u32 2147483648, %v2117_v63  ;;  %v2130_v5 = vand.u32 2147483647, %v2117_v63  ;;  %vm2126_vm13 = vweird.f32 %v2117_v63 }
 0x539   : > { %v2133_v20 = vor.u32 1.1754944e-38, %v2132_v3  ;;  %vm2131_vm15 = vcmp.eq.f32.partialorder %v2130_v5, 8.507059e+37  ;;  %v1794_v3 = vld [vmem:[%s14907_s18] sm:$0xff] }
 0x53a   : > { %v2660_v5 = vand.u32 4294901760, %v1794_v3 }
 0x53d   : > { %v14705_v0 = vpop.eup %14704 }
 0x53e   : > { %v2122_v1 = vmul.f32 %v14705_v0, %v2117_v63  ;;  %vm2127_vm12 = vweird.f32 %v14705_v0 }
 0x53f   : > { %vm2128_vm14 = vmor %vm2126_vm13, %vm2127_vm12 }
 0x540   : > { %v2123_v2 = vsub.f32 1.0, %v2122_v1 }
 0x542   : > { %v2124_v4 = vmul.f32 %v14705_v0, %v2123_v2  ;;  %v2120_v6 = vpop.xlane.xlu2 %2119 }
 0x543   : > { %14706 = vrcp.f32 %v2120_v6  ;;  %v2147_v31 = vand.u32 2147483648, %v2120_v6  ;;  %v2145_v35 = vand.u32 2147483647, %v2120_v6  ;;  %vm2141_vm1 = vweird.f32 %v2120_v6 }
 0x544   : > { %v2125_v18 = vadd.f32 %v14705_v0, %v2124_v4 }
 0x545   : > { %v2148_v39 = vor.u32 1.1754944e-38, %v2147_v31  ;;  %vm2146_vm5 = vcmp.eq.f32.partialorder %v2145_v35, 8.507059e+37  ;;  %v1698_v31 = vadd.f32 %v15067_v13, %v15073_v16 }
 0x546   : > { %v2129_v21 = vsel %vm2128_vm14, %v14705_v0, %v2125_v18  ;;  %v2695_v18 = vsub.f32 %v1794_v3, %v2660_v5 }
 0x547   : > { %v2134_v22 = vsel %vm2131_vm15, %v2133_v20, %v2129_v21 }
 0x548   : > { %v2135_v23 = vmul.f32 %v14701_v47, %v2134_v22  ;;  %v2696_v22 = vand.u32 4294901760, %v2695_v18 }
 0x549   : > { %v14707_v24 = vpop.eup %14706 }
 0x54a   : > { %v2137_v25 = vmul.f32 %v14707_v24, %v2120_v6  ;;  %v2304_v26 = vpop.permute.xlu2 %2303  ;;  %v2155_v27 = vsel %vm1136_vm3, %v2135_v23, 0  ;;  %vm2142_vm0 = vweird.f32 %v14707_v24  ;;  %v1546_v6 = vadd.f32 %v15055_v7, %v15057_v8 }
 0x54b   : > { %v2324_v28 = vand.u32 4294901760, %v2304_v26  ;;  %v2174_v29 = vand.u32 4294901760, %v2155_v27  ;;  %vm2143_vm4 = vmor %vm2141_vm1, %vm2142_vm0 }
 0x54c   : > { %v2138_v30 = vsub.f32 1.0, %v2137_v25  ;;  %v1570_v23 = vadd.f32 %v15065_v12, %v1546_v6  ;;  %v1722_v12 = vadd.f32 %v15069_v14, %v1698_v31 }
 0x54d   : > { %v2351_v32 = vsub.f32 %v2304_v26, %v2324_v28  ;;  %2205 = vmatmul.f32.vlgmr.msra.gmra.mxu1 %v2174_v29  ;;  %2325 = vmatpush.msrb.mxu2 %v2324_v28  ;;  %v2175_v33 = vsub.f32 %v2155_v27, %v2174_v29  ;;  %v2697_v26 = vsub.f32 %v2695_v18, %v2696_v22 }
 0x54e   : > { %v2139_v34 = vmul.f32 %v14707_v24, %v2138_v30  ;;  %2401 = vmatpush.msra.mxu1 %v2324_v28  ;;  %v1594_v30 = vadd.f32 %v15059_v9, %v1570_v23 }
 0x54f   : > { %v2352_v36 = vand.u32 4294901760, %v2351_v32  ;;  %2229 = vmatmul.f32.vlgmr.msra.gmra.mxu2 %v2175_v33  ;;  %v2176_v37 = vand.u32 4294901760, %v2175_v33 }
 0x550   : > { %v2140_v38 = vadd.f32 %v14707_v24, %v2139_v34  ;;  %v1618_v8 = vadd.f32 %v15063_v11, %v1594_v30  ;;  %v1746_v11 = vadd.f32 %v15071_v15, %v1722_v12 }
 0x551   : > { %v2353_v40 = vsub.f32 %v2351_v32, %v2352_v36  ;;  %2253 = vmatmul.f32.vlgmr.msra.gmra.mxu3 %v2176_v37  ;;  %2427 = vmatpush.msra.mxu2 %v2352_v36  ;;  %v2177_v41 = vsub.f32 %v2175_v33, %v2176_v37  ;;  %v2825_v36 = vpop.permute.xlu0 %2824 }
 0x552   : > { %v2144_v42 = vsel %vm2143_vm4, %v14707_v24, %v2140_v38  ;;  %v1640_v9 = vadd.f32 %v15061_v10, %v1618_v8 }
 0x553   : > { %v2149_v43 = vsel %vm2146_vm5, %v2148_v39, %v2144_v42  ;;  %v2354_v44 = vand.u32 4294901760, %v2353_v40  ;;  %v2178_v46 = vand.u32 4294901760, %v2177_v41  ;;  %v2828_v39 = vsel %vm1136_vm3, %v2825_v36, 0 }
 0x554   : > { %v2150_v47 = vmul.f32 %v15086_v55, %v2149_v43  ;;  %v2455_v55 = vld [vmem:[%s14907_s18 + $0x8] sm:$0xff]  ;;  %v2640_v40 = vsel %vm1136_vm3, %v1640_v9, 0  ;;  %v1770_v41 = vadd.f32 %v15077_v19, %v1746_v11  ;;  %v2845_v43 = vand.u32 4294901760, %v2828_v39 }
 0x555   : > { %2299 = vmatmul.f32.vlgmr.msrb.gmra.mxu1 %v2174_v29  ;;  %2355 = vmatpush.msrb.mxu3 %v2354_v44  ;;  %v2477_v58 = vand.u32 4294901760, %v2455_v55 }
 0x556   : > { %2179 = vmatmul.f32.vlgmr.msra.gmra.mxu0 %v2178_v46  ;;  %v2307_v48 = vsel %vm1136_vm3, %v2150_v47, 0  ;;  %v2662_v46 = vand.u32 4294901760, %v2640_v40  ;;  %v1792_v15 = vadd.f32 %v15075_v17, %v1770_v41 }
 0x557   : > { %2449 = vmatpush.msra.mxu3 %v2324_v28  ;;  %2378 = vmatpush.msra.mxu0 %v2351_v32  ;;  %v2326_v49 = vand.u32 4294901760, %v2307_v48  ;;  %v2512_v59 = vsub.f32 %v2455_v55, %v2477_v58 }
 0x559   : > { %v2327_v50 = vsub.f32 %v2307_v48, %v2326_v49  ;;  %2357 = vmatmul.f32.vlgmr.msrb.gmra.mxu3 %v2326_v49  ;;  %v2513_v60 = vand.u32 4294901760, %v2512_v59 }
 0x55a   : > { %2571 = vmatpush.msrb.mxu3 %v2477_v58 }
 0x55b   : > { %v2328_v51 = vand.u32 4294901760, %v2327_v50  ;;  %v2514_v61 = vsub.f32 %v2512_v59, %v2513_v60 }
 0x55d   : > { %2405 = vmatmul.f32.vlgmr.msra.gmra.mxu1 %v2328_v51  ;;  %v2329_v56 = vsub.f32 %v2327_v50, %v2328_v51  ;;  %v2515_v62 = vand.u32 4294901760, %v2514_v61 }
 0x55e   : > { %2277 = vmatmul.f32.vlgmr.msrb.gmra.mxu0 %v2174_v29  ;;  %v2698_v29 = vand.u32 4294901760, %v2697_v26  ;;  %v2823_v26 = vpop.permute.xlu1 %2822 }
 0x55f   : > { %v2330_v57 = vand.u32 4294901760, %v2329_v56  ;;  %2478 = vmatpush.msrb.mxu0 %v2477_v58  ;;  %2516 = vmatpush.msrb.mxu1 %v2515_v62  ;;  %v2663_v56 = vsub.f32 %v2640_v40, %v2662_v46 }
 0x561   : > { %2331 = vmatmul.f32.vlgmr.msrb.gmra.mxu2 %v2330_v57  ;;  %2451 = vmatmul.f32.vlgmr.msra.gmra.mxu3 %v2326_v49  ;;  %v2643_v57 = vsel %vm1136_vm3, %v1792_v15, 0  ;;  %v2664_v61 = vand.u32 4294901760, %v2663_v56 }
 0x562   : > { %2543 = vmatpush.msrb.mxu2 %v2512_v59  ;;  %2629 = vmatpush.msra.mxu1 %v2477_v58  ;;  %v2670_v59 = vand.u32 4294901760, %v2643_v57 }
 0x563   : > { %2699 = vmatpush.msra.mxu3 %v2698_v29 }
 0x566   : > { %2381 = vmatmul.f32.vlgmr.msra.gmra.mxu0 %v2327_v50  ;;  %v2872_v50 = vsub.f32 %v2828_v39, %v2845_v43 }
 0x567   : > { %2603 = vmatpush.msra.mxu0 %v2513_v60 }
 0x568   : > { %v2873_v58 = vand.u32 4294901760, %v2872_v50 }
 0x569   : > { %2429 = vmatmul.f32.vlgmr.msra.gmra.mxu2 %v2326_v49 }
 0x56a   : > { %2661 = vmatpush.msra.mxu2 %v2660_v5 }
 0x5ca   : > { %v2206_v63 = vpop.f32.mrf.mxu1 }
 0x5d2   : > { %v2230_v2 = vpop.f32.mrf.mxu2  ;;  %v2300_v27 = vpop.f32.mrf.mxu1 }
 0x5d3   : > { %v2180_v0 = vpop.f32.mrf.mxu0 }
 0x5d4   : > { %v2207_v1 = vadd.f32 %v2206_v63, %v2180_v0  ;;  %v2254_v20 = vpop.f32.mrf.mxu3  ;;  %v2874_v63 = vsub.f32 %v2872_v50, %v2873_v58  ;;  %v2665_v0 = vsub.f32 %v2663_v56, %v2664_v61 }
 0x5d6   : > { %v2231_v4 = vadd.f32 %v2230_v2, %v2207_v1  ;;  %v2671_v1 = vsub.f32 %v2643_v57, %v2670_v59  ;;  %v2979_v2 = vpop.permute.xlu0 %2978  ;;  %v2666_v6 = vand.u32 4294901760, %v2665_v0 }
 0x5d8   : > { %v2255_v21 = vadd.f32 %v2254_v20, %v2231_v4  ;;  %v2875_v4 = vand.u32 4294901760, %v2874_v63 }
 0x5da   : > { %v2406_v10 = vpop.f32.mrf.mxu1 }
 0x5db   : > { %v2278_v24 = vpop.f32.mrf.mxu0 }
 0x5dc   : > { %v2279_v25 = vadd.f32 %v2278_v24, %v2255_v21  ;;  %v2358_v34 = vpop.f32.mrf.mxu3 }
 0x5de   : > { %v2301_v28 = vadd.f32 %v2300_v27, %v2279_v25  ;;  %v2977_v27 = vpop.permute.xlu2 %2976 }
 0x5df   : > { %v2980_v30 = vsel %vm1136_vm3, %v2977_v27, 0 }
 0x5e0   : > { %v2457_v7 = vsel %vm1136_vm3, %v2301_v28, 0  ;;  %v2826_v28 = vsel %vm1136_vm3, %v2823_v26, 0 }
 0x5e1   : > { %v15109_v32 = vand.u32 4294901760, %v2457_v7  ;;  %v2847_v31 = vand.u32 4294901760, %v2826_v28 }
 0x5e3   : > { %v2480_v33 = vsub.f32 %v2457_v7, %v15109_v32  ;;  %2518 = vmatmul.f32.vlgmr.msrb.gmra.mxu1 %v15109_v32  ;;  %v2382_v37 = vpop.f32.mrf.mxu0  ;;  %v3001_v7 = vand.u32 4294901760, %v2980_v30  ;;  %v2848_v8 = vsub.f32 %v2826_v28, %v2847_v31 }
 0x5e4   : > { %v2332_v35 = vpop.f32.mrf.mxu2  ;;  %2754 = vmatpush.msrb.mxu1 %v2660_v5  ;;  %v2452_v49 = vpop.f32.mrf.mxu3 }
 0x5e5   : > { %v2359_v13 = vadd.f32 %v2358_v34, %v2332_v35  ;;  %2546 = vmatmul.f32.vlgmr.msrb.gmra.mxu2 %v2480_v33  ;;  %v2481_v16 = vand.u32 4294901760, %v2480_v33  ;;  %v2849_v12 = vand.u32 4294901760, %v2848_v8 }
 0x5e6   : > { %2786 = vmatpush.msrb.mxu2 %v2696_v22 }
 0x5e7   : > { %v2383_v38 = vadd.f32 %v2382_v37, %v2359_v13  ;;  %2575 = vmatmul.f32.vlgmr.msrb.gmra.mxu3 %v2481_v16  ;;  %v2482_v14 = vsub.f32 %v2480_v33, %v2481_v16  ;;  %v2850_v34 = vsub.f32 %v2848_v8, %v2849_v12 }
 0x5e8   : > { %2812 = vmatpush.msrb.mxu3 %v2660_v5  ;;  %v2982_v5 = vsel %vm1136_vm3, %v2979_v2, 0 }
 0x5e9   : > { %v2483_v42 = vand.u32 4294901760, %v2482_v14  ;;  %v2407_v44 = vadd.f32 %v2406_v10, %v2383_v38  ;;  %v2999_v20 = vand.u32 4294901760, %v2982_v5  ;;  %v2851_v9 = vand.u32 4294901760, %v2850_v34 }
 0x5eb   : > { %2484 = vmatmul.f32.vlgmr.msrb.gmra.mxu0 %v2483_v42  ;;  %v3026_v22 = vsub.f32 %v2982_v5, %v2999_v20 }
 0x5ec   : > { %v2430_v47 = vpop.f32.mrf.mxu2  ;;  %2726 = vmatpush.msrb.mxu0 %v2695_v18  ;;  %v2672_v18 = vand.u32 4294901760, %v2671_v1 }
 0x5ed   : > { %v2431_v48 = vadd.f32 %v2430_v47, %v2407_v44  ;;  %v3027_v24 = vand.u32 4294901760, %v3026_v22 }
 0x5ee   : > { %v2673_v21 = vsub.f32 %v2671_v1, %v2672_v18 }
 0x5ef   : > { %v2453_v51 = vadd.f32 %v2452_v49, %v2431_v48  ;;  %v3028_v25 = vsub.f32 %v3026_v22, %v3027_v24 }
 0x5f0   : > { %v2674_v23 = vand.u32 4294901760, %v2673_v21 }
 0x5f1   : > { %v2460_v55 = vsel %vm1136_vm3, %v2453_v51, 0  ;;  %v3029_v29 = vand.u32 4294901760, %v3028_v25 }
 0x5f2   : > { %v2487_v19 = vand.u32 4294901760, %v2460_v55 }
 0x5f4   : > { %2522 = vmatmul.f32.gmra.mxu1 %v2487_v19  ;;  %v2488_v60 = vsub.f32 %v2460_v55, %v2487_v19 }
 0x5f6   : > { %2551 = vmatmul.f32.gmra.mxu2 %v2488_v60  ;;  %v2489_v62 = vand.u32 4294901760, %v2488_v60 }
 0x5f8   : > { %2581 = vmatmul.f32.gmra.mxu3 %v2489_v62  ;;  %v2490_v17 = vsub.f32 %v2488_v60, %v2489_v62 }
 0x5fa   : > { %v2491_v3 = vand.u32 4294901760, %v2490_v17 }
 0x5fc   : > { %2492 = vmatmul.f32.gmra.mxu0 %v2491_v3  ;;  %2631 = vmatmul.f32.vlgmr.msra.gmra.mxu1 %v15109_v32 }
 0x5fd   : > { %2876 = vmatpush.xpose.msra.mxu1 %v2875_v4 }
 0x5fe   : > { %2667 = vmatmul.f32.vlgmr.msra.gmra.mxu2 %v2666_v6 }
 0x5ff   : > { %2899 = vmatpush.xpose.msra.mxu2 %v2872_v50 }
 0x600   : > { %2701 = vmatmul.f32.vlgmr.msra.gmra.mxu3 %v2662_v46 }
 0x601   : > { %2922 = vmatpush.xpose.msra.mxu3 %v2845_v43 }
 0x604   : > { %2605 = vmatmul.f32.vlgmr.msra.gmra.mxu0 %v15109_v32  ;;  %2635 = vmatmul.f32.gmra.mxu1 %v2487_v19  ;;  %v3002_v32 = vsub.f32 %v2980_v30, %v3001_v7 }
 0x605   : > { %2846 = vmatpush.xpose.msra.mxu0 %v2845_v43 }
 0x606   : > { %2675 = vmatmul.f32.gmra.mxu2 %v2674_v23  ;;  %v3003_v33 = vand.u32 4294901760, %v3002_v32 }
 0x608   : > { %2705 = vmatmul.f32.gmra.mxu3 %v2670_v59  ;;  %v3004_v35 = vsub.f32 %v3002_v32, %v3003_v33 }
 0x60a   : > { %v3005_v36 = vand.u32 4294901760, %v3004_v35 }
 0x60c   : > { %2609 = vmatmul.f32.gmra.mxu0 %v2487_v19  ;;  %2758 = vmatmul.f32.vlgmr.msrb.gmra.mxu1 %v2664_v61 }
 0x60d   : > { %2970 = vmatpush.xpose.msrb.mxu1 %v2845_v43 }
 0x60e   : > { %2788 = vmatmul.f32.vlgmr.msrb.gmra.mxu2 %v2662_v46 }
 0x60f   : > { %3000 = vmatpush.xpose.msrb.mxu2 %v2999_v20 }
 0x610   : > { %2814 = vmatmul.f32.vlgmr.msrb.gmra.mxu3 %v2662_v46 }
 0x611   : > { %3030 = vmatpush.xpose.msrb.mxu3 %v3029_v29 }
 0x614   : > { %2729 = vmatmul.f32.vlgmr.msrb.gmra.mxu0 %v2663_v56  ;;  %2764 = vmatmul.f32.gmra.mxu1 %v2672_v18 }
 0x615   : > { %2948 = vmatpush.xpose.msrb.mxu0 %v2873_v58 }
 0x616   : > { %2792 = vmatmul.f32.gmra.mxu2 %v2670_v59 }
 0x618   : > { %2818 = vmatmul.f32.gmra.mxu3 %v2670_v59 }
 0x61c   : > { %2734 = vmatmul.f32.gmra.mxu0 %v2671_v1  ;;  %2878 = vmatmul.f32.vlgmr.msra.gmra.mxu1 %v2847_v31 }
 0x61d   : > { %3076 = vmatpush.xpose.msra.mxu1 %v2999_v20 }
 0x61e   : > { %2902 = vmatmul.f32.vlgmr.msra.gmra.mxu2 %v2848_v8 }
 0x61f   : > { %3102 = vmatpush.xpose.msra.mxu2 %v3027_v24 }
 0x620   : > { %2926 = vmatmul.f32.vlgmr.msra.gmra.mxu3 %v2849_v12 }
 0x621   : > { %3124 = vmatpush.xpose.msra.mxu3 %v2999_v20 }
 0x624   : > { %2852 = vmatmul.f32.vlgmr.msra.gmra.mxu0 %v2851_v9  ;;  %2972 = vmatmul.f32.vlgmr.msrb.gmra.mxu1 %v2847_v31 }
 0x625   : > { %3053 = vmatpush.xpose.msra.mxu0 %v3026_v22 }
 0x626   : > { %3006 = vmatmul.f32.vlgmr.msrb.gmra.mxu2 %v3005_v36 }
 0x628   : > { %3032 = vmatmul.f32.vlgmr.msrb.gmra.mxu3 %v3001_v7 }
 0x62c   : > { %2950 = vmatmul.f32.vlgmr.msrb.gmra.mxu0 %v2847_v31  ;;  %3080 = vmatmul.f32.vlgmr.msra.gmra.mxu1 %v3003_v33 }
 0x62e   : > { %3104 = vmatmul.f32.vlgmr.msra.gmra.mxu2 %v3001_v7 }
 0x630   : > { %3126 = vmatmul.f32.vlgmr.msra.gmra.mxu3 %v3001_v7 }
 0x634   : > { %3056 = vmatmul.f32.vlgmr.msra.gmra.mxu0 %v3002_v32 }
 0x660   : > { %v15127_v13 = vpop.f32.mrf.mxu1 }
 0x668   : > { %v15129_v16 = vpop.f32.mrf.mxu0  ;;  %v15131_v37 = vpop.f32.mrf.mxu2 }
 0x66a   : > { %v15135_v38 = vpop.f32.mrf.mxu3 }
 0x671   : > { %v15133_v11 = vpop.f32.mrf.mxu1 }
 0x679   : > { %v15137_v14 = vpop.f32.mrf.mxu0  ;;  %v15139_v39 = vpop.f32.mrf.mxu2 }
 0x67a   : > { %v15141_v40 = vpop.f32.mrf.mxu1 }
 0x67b   : > { %v15143_v41 = vpop.f32.mrf.mxu3 }
 0x681   : > { %v15145_v42 = vpop.f32.mrf.mxu0  ;;  %v15147_v10 = vpop.f32.mrf.mxu2 }
 0x682   : > { %v15149_v43 = vpop.f32.mrf.mxu1 }
 0x683   : > { %v15151_v44 = vpop.f32.mrf.mxu3 }
 0x689   : > { %v15153_v46 = vpop.f32.mrf.mxu0  ;;  %v15155_v47 = vpop.f32.mrf.mxu2 }
 0x68a   : > { %v15157_v15 = vpop.f32.mrf.mxu1 }
 0x68b   : > { %v15159_v48 = vpop.f32.mrf.mxu3 }
 0x691   : > { %v15161_v49 = vpop.f32.mrf.mxu0  ;;  %v15163_v50 = vpop.f32.mrf.mxu2 }
 0x692   : > { %v15167_v56 = vpop.f32.mrf.mxu1 }
 0x693   : > { %v15165_v51 = vpop.f32.mrf.mxu3 }
 0x699   : > { %v15169_v57 = vpop.f32.mrf.mxu0  ;;  %v15171_v55 = vpop.f32.mrf.mxu2 }
 0x69a   : > { %v2879_v58 = vpop.f32.mrf.mxu1 }
 0x69b   : > { %v15173_v19 = vpop.f32.mrf.mxu3 }
 0x6a1   : > { %v2853_v59 = vpop.f32.mrf.mxu0  ;;  %v2903_v60 = vpop.f32.mrf.mxu2 }
 0x6a2   : > { %v2880_v61 = vadd.f32 %v2879_v58, %v2853_v59  ;;  %v2973_v0 = vpop.f32.mrf.mxu1 }
 0x6a3   : > { %v2927_v62 = vpop.f32.mrf.mxu3 }
 0x6a4   : > { %v2904_v63 = vadd.f32 %v2903_v60, %v2880_v61 }
 0x6a6   : > { %v2928_v17 = vadd.f32 %v2927_v62, %v2904_v63 }
 0x6a9   : > { %v2951_v1 = vpop.f32.mrf.mxu0  ;;  %v3007_v3 = vpop.f32.mrf.mxu2 }
 0x6aa   : > { %v2952_v2 = vadd.f32 %v2951_v1, %v2928_v17  ;;  %v3081_v22 = vpop.f32.mrf.mxu1 }
 0x6ab   : > { %v3033_v5 = vpop.f32.mrf.mxu3 }
 0x6ac   : > { %v2974_v4 = vadd.f32 %v2973_v0, %v2952_v2  ;;  %v3034_v18 = vadd.f32 %v3033_v5, %v3007_v3 }
 0x6ae   : > { %v3130_v6 = vsel %vm1136_vm3, %v2974_v4, -inf }
 0x6af   : > { %3131 = vmax.xlane.f32.xlu1 %v3130_v6 }
 0x6b1   : > { %v3057_v20 = vpop.f32.mrf.mxu0  ;;  %v3105_v24 = vpop.f32.mrf.mxu2 }
 0x6b2   : > { %v3058_v21 = vadd.f32 %v3057_v20, %v3034_v18 }
 0x6b3   : > { %v3127_v26 = vpop.f32.mrf.mxu3 }
 0x6b4   : > { %v3082_v23 = vadd.f32 %v3081_v22, %v3058_v21 }
 0x6b6   : > { %v3106_v25 = vadd.f32 %v3105_v24, %v3082_v23 }
 0x6b8   : > { %v3128_v27 = vadd.f32 %v3127_v26, %v3106_v25 }
 0x6ba   : > { %v3133_v28 = vsel %vm1136_vm3, %v3128_v27, -inf }
 0x6bb   : > { %3134 = vmax.xlane.f32.xlu0 %v3133_v28 }
 0x6cf   : > { %3178 = vrot.lane.b32.xlu0 %v15008_v45, %s14787_s30 }
 0x6d7   : > { %3668 = vrot.lane.b32.xlu0 %v15017_v53, %s14788_s3 }
 0x6df   : > { %3822 = vrot.lane.b32.xlu0 %v15023_v54, %s14788_s3 }
 0x722   : > { %v3132_v29 = vpop.xlane.xlu1 %3131 }
 0x723   : > { %v3136_v30 = vsub.f32 %v2974_v4, %v3132_v29 }
 0x725   : > { %v3138_v31 = vmul.f32 1.442695, %v3136_v30 }
 0x727   : > { %14708 = vpow2.f32 %v3138_v31 }
 0x72d   : > { %v14709_v7 = vpop.eup %14708 }
 0x72e   : > { %v3135_v8 = vpop.xlane.xlu0 %3134  ;;  %v3142_v32 = vsel %vm1136_vm3, %v14709_v7, 0.0 }
 0x72f   : > { %v3137_v12 = vsub.f32 %v3128_v27, %v3135_v8  ;;  %3143 = vadd.xlane.f32.xlu2 %v3142_v32 }
 0x731   : > { %v3140_v33 = vmul.f32 1.442695, %v3137_v12 }
 0x733   : > { %14710 = vpow2.f32 %v3140_v33 }
 0x739   : > { %v15181_v34 = vpop.eup %14710 }
 0x73a   : > { %v3145_v35 = vsel %vm1136_vm3, %v15181_v34, 0.0 }
 0x73b   : > { %3146 = vadd.xlane.f32.xlu1 %v3145_v35 }
 0x741   : > { %v3179_v53 = vpop.permute.xlu0 %3178 }
 0x742   : > { %v3199_v54 = vand.u32 4294901760, %v3179_v53 }
 0x744   : > { %v3226_v9 = vsub.f32 %v3179_v53, %v3199_v54  ;;  %3200 = vmatpush.msrb.mxu0 %v3199_v54  ;;  %3276 = vmatpush.msrb.mxu3 %v3199_v54 }
 0x746   : > { %v3227_v36 = vand.u32 4294901760, %v3226_v9  ;;  %3253 = vmatpush.msrb.mxu2 %v3226_v9 }
 0x747   : > { %3330 = vrot.lane.b32.xlu2 %v15011_v52, %s14787_s30  ;;  %s22015_s30 = scalar_lea.vmem %s21743_s9, %s14892_s23 }
 0x748   : > { %v3228_v58 = vsub.f32 %v3226_v9, %v3227_v36  ;;  %3302 = vmatpush.msra.mxu0 %v3227_v36 }
 0x74a   : > { %v3229_v59 = vand.u32 4294901760, %v3228_v58  ;;  %v3482_v58 = vld [vmem:[%s14907_s18 + $0x10] sm:$0xff] }
 0x74c   : > { %3230 = vmatpush.msrb.mxu1 %v3229_v59 }
 0x74e   : > { %3324 = vmatpush.msra.mxu1 %v3199_v54 }
 0x74f   : > { %3824 = vrot.lane.b32.xlu2 %v15011_v52, %s14789_s25 }
 0x754   : > { %3670 = vrot.lane.b32.xlu1 %v15008_v45, %s14789_s25 }
 0x7a2   : > { %v3144_v60 = vpop.xlane.xlu2 %3143 }
 0x7a3   : > { %14712 = vrcp.f32 %v3144_v60  ;;  %v3159_v1 = vand.u32 2147483648, %v3144_v60  ;;  %v3157_v4 = vand.u32 2147483647, %v3144_v60  ;;  %vm3153_vm7 = vweird.f32 %v3144_v60 }
 0x7a5   : > { %v3160_v20 = vor.u32 1.1754944e-38, %v3159_v1  ;;  %vm3158_vm9 = vcmp.eq.f32.partialorder %v3157_v4, 8.507059e+37 }
 0x7a9   : > { %v14713_v61 = vpop.eup %14712 }
 0x7aa   : > { %v3149_v62 = vmul.f32 %v14713_v61, %v3144_v60  ;;  %v3331_v63 = vpop.permute.xlu2 %3330  ;;  %vm3154_vm6 = vweird.f32 %v14713_v61 }
 0x7ab   : > { %v3351_v17 = vand.u32 4294901760, %v3331_v63  ;;  %vm3155_vm8 = vmor %vm3153_vm7, %vm3154_vm6 }
 0x7ac   : > { %v3150_v0 = vsub.f32 1.0, %v3149_v62 }
 0x7ad   : > { %v3378_v2 = vsub.f32 %v3331_v63, %v3351_v17  ;;  %3352 = vmatpush.msra.mxu2 %v3351_v17 }
 0x7ae   : > { %v3151_v3 = vmul.f32 %v14713_v61, %v3150_v0  ;;  %v3147_v5 = vpop.xlane.xlu1 %3146 }
 0x7af   : > { %v3379_v6 = vand.u32 4294901760, %v3378_v2  ;;  %14714 = vrcp.f32 %v3147_v5  ;;  %v3174_v31 = vand.u32 2147483648, %v3147_v5  ;;  %v3172_v12 = vand.u32 2147483647, %v3147_v5 }
 0x7b0   : > { %v3152_v18 = vadd.f32 %v14713_v61, %v3151_v3  ;;  %vm3168_vm11 = vweird.f32 %v3147_v5 }
 0x7b1   : > { %v3380_v21 = vsub.f32 %v3378_v2, %v3379_v6  ;;  %vm3173_vm13 = vcmp.eq.f32.partialorder %v3172_v12, 8.507059e+37 }
 0x7b2   : > { %v3156_v22 = vsel %vm3155_vm8, %v14713_v61, %v3152_v18  ;;  %v3504_v61 = vand.u32 4294901760, %v3482_v58 }
 0x7b3   : > { %v3161_v23 = vsel %vm3158_vm9, %v3160_v20, %v3156_v22  ;;  %v3381_v24 = vand.u32 4294901760, %v3380_v21 }
 0x7b4   : > { %v3162_v25 = vmul.f32 %v14709_v7, %v3161_v23  ;;  %v3175_v7 = vor.u32 1.1754944e-38, %v3174_v31 }
 0x7b5   : > { %v14715_v26 = vpop.eup %14714  ;;  %3382 = vmatpush.msra.mxu3 %v3381_v24 }
 0x7b6   : > { %v3164_v27 = vmul.f32 %v14715_v26, %v3147_v5  ;;  %v3182_v28 = vsel %vm1136_vm3, %v3162_v25, 0  ;;  %vm3169_vm10 = vweird.f32 %v14715_v26 }
 0x7b7   : > { %v3201_v29 = vand.u32 4294901760, %v3182_v28  ;;  %vm3170_vm12 = vmor %vm3168_vm11, %vm3169_vm10 }
 0x7b8   : > { %v3165_v30 = vsub.f32 1.0, %v3164_v27 }
 0x7b9   : > { %v3202_v8 = vsub.f32 %v3182_v28, %v3201_v29  ;;  %3232 = vmatmul.f32.vlgmr.msrb.gmra.mxu1 %v3201_v29 }
 0x7ba   : > { %v3166_v32 = vmul.f32 %v14715_v26, %v3165_v30  ;;  %3428 = vmatpush.msrb.mxu1 %v3351_v17 }
 0x7bb   : > { %3256 = vmatmul.f32.vlgmr.msrb.gmra.mxu2 %v3202_v8  ;;  %v3203_v33 = vand.u32 4294901760, %v3202_v8 }
 0x7bc   : > { %v3167_v35 = vadd.f32 %v14715_v26, %v3166_v32  ;;  %3454 = vmatpush.msrb.mxu2 %v3379_v6 }
 0x7bd   : > { %3280 = vmatmul.f32.vlgmr.msrb.gmra.mxu3 %v3203_v33  ;;  %v3204_v53 = vsub.f32 %v3202_v8, %v3203_v33 }
 0x7be   : > { %v3171_v54 = vsel %vm3170_vm12, %v14715_v26, %v3167_v35  ;;  %3476 = vmatpush.msrb.mxu3 %v3351_v17 }
 0x7bf   : > { %v3176_v9 = vsel %vm3173_vm13, %v3175_v7, %v3171_v54  ;;  %v3205_v36 = vand.u32 4294901760, %v3204_v53 }
 0x7c0   : > { %v3177_v59 = vmul.f32 %v15181_v34, %v3176_v9  ;;  %v3539_v34 = vsub.f32 %v3482_v58, %v3504_v61  ;;  %v3669_v58 = vpop.permute.xlu0 %3668 }
 0x7c1   : > { %3206 = vmatmul.f32.vlgmr.msrb.gmra.mxu0 %v3205_v36  ;;  %3326 = vmatmul.f32.vlgmr.msra.gmra.mxu1 %v3201_v29 }
 0x7c2   : > { %3405 = vmatpush.msrb.mxu0 %v3378_v2  ;;  %v3334_v60 = vsel %vm1136_vm3, %v3177_v59, 0  ;;  %v3540_v21 = vand.u32 4294901760, %v3539_v34 }
 0x7c3   : > { %v3353_v62 = vand.u32 4294901760, %v3334_v60 }
 0x7c4   : > { %v3541_v22 = vsub.f32 %v3539_v34, %v3540_v21 }
 0x7c5   : > { %v3354_v63 = vsub.f32 %v3334_v60, %v3353_v62  ;;  %3384 = vmatmul.f32.vlgmr.msra.gmra.mxu3 %v3353_v62 }
 0x7c6   : > { %v3671_v0 = vpop.permute.xlu1 %3670  ;;  %3598 = vmatpush.msra.mxu3 %v3504_v61  ;;  %v3542_v23 = vand.u32 4294901760, %v3541_v22 }
 0x7c7   : > { %v3674_v1 = vsel %vm1136_vm3, %v3671_v0, 0  ;;  %v3355_v3 = vand.u32 4294901760, %v3354_v63  ;;  %v3825_v0 = vpop.permute.xlu2 %3824 }
 0x7c8   : > { %v3691_v17 = vand.u32 4294901760, %v3674_v1  ;;  %3543 = vmatpush.msra.mxu1 %v3542_v23 }
 0x7c9   : > { %3304 = vmatmul.f32.vlgmr.msra.gmra.mxu0 %v3201_v29  ;;  %3432 = vmatmul.f32.vlgmr.msrb.gmra.mxu1 %v3355_v3  ;;  %v3356_v4 = vsub.f32 %v3354_v63, %v3355_v3 }
 0x7ca   : > { %v3718_v5 = vsub.f32 %v3674_v1, %v3691_v17  ;;  %3505 = vmatpush.msra.mxu0 %v3504_v61  ;;  %3656 = vmatpush.msrb.mxu1 %v3504_v61 }
 0x7cb   : > { %v3357_v6 = vand.u32 4294901760, %v3356_v4 }
 0x7cc   : > { %v3719_v2 = vand.u32 4294901760, %v3718_v5 }
 0x7cd   : > { %3358 = vmatmul.f32.vlgmr.msra.gmra.mxu2 %v3357_v6  ;;  %3478 = vmatmul.f32.vlgmr.msrb.gmra.mxu3 %v3353_v62 }
 0x7ce   : > { %v3720_v18 = vsub.f32 %v3718_v5, %v3719_v2  ;;  %3570 = vmatpush.msra.mxu2 %v3539_v34  ;;  %v3828_v34 = vsel %vm1136_vm3, %v3825_v0, 0 }
 0x7d0   : > { %v3721_v20 = vand.u32 4294901760, %v3720_v18 }
 0x7d1   : > { %3408 = vmatmul.f32.vlgmr.msrb.gmra.mxu0 %v3354_v63  ;;  %v3672_v63 = vsel %vm1136_vm3, %v3669_v58, 0 }
 0x7d2   : > { %3722 = vmatpush.xpose.msrb.mxu3 %v3721_v20  ;;  %3630 = vmatpush.msrb.mxu0 %v3540_v21  ;;  %v3693_v4 = vand.u32 4294901760, %v3672_v63  ;;  %v3845_v20 = vand.u32 4294901760, %v3828_v34 }
 0x7d4   : > { %v3694_v22 = vsub.f32 %v3672_v63, %v3693_v4 }
 0x7d5   : > { %3456 = vmatmul.f32.vlgmr.msrb.gmra.mxu2 %v3353_v62 }
 0x7d6   : > { %3692 = vmatpush.xpose.msrb.mxu2 %v3691_v17 }
 0x836   : > { %v3233_v24 = vpop.f32.mrf.mxu1 }
 0x83e   : > { %v3207_v25 = vpop.f32.mrf.mxu0  ;;  %v3257_v27 = vpop.f32.mrf.mxu2 }
 0x83f   : > { %v3234_v26 = vadd.f32 %v3233_v24, %v3207_v25  ;;  %v3327_v32 = vpop.f32.mrf.mxu1  ;;  %v3872_v24 = vsub.f32 %v3828_v34, %v3845_v20  ;;  %v3695_v25 = vand.u32 4294901760, %v3694_v22 }
 0x840   : > { %v3281_v29 = vpop.f32.mrf.mxu3 }
 0x841   : > { %v3258_v28 = vadd.f32 %v3257_v27, %v3234_v26  ;;  %v3823_v27 = vpop.permute.xlu0 %3822 }
 0x843   : > { %v3282_v30 = vadd.f32 %v3281_v29, %v3258_v28  ;;  %v3873_v28 = vand.u32 4294901760, %v3872_v24  ;;  %v3696_v29 = vsub.f32 %v3694_v22, %v3695_v25 }
 0x846   : > { %v3305_v31 = vpop.f32.mrf.mxu0 }
 0x847   : > { %v3306_v8 = vadd.f32 %v3305_v31, %v3282_v30  ;;  %v3433_v1 = vpop.f32.mrf.mxu1  ;;  %v3826_v31 = vsel %vm1136_vm3, %v3823_v27, 0 }
 0x848   : > { %v3385_v54 = vpop.f32.mrf.mxu3 }
 0x849   : > { %v3328_v12 = vadd.f32 %v3327_v32, %v3306_v8  ;;  %v3874_v32 = vsub.f32 %v3872_v24, %v3873_v28 }
 0x84b   : > { %v3484_v33 = vsel %vm1136_vm3, %v3328_v12, 0  ;;  %v3697_v12 = vand.u32 4294901760, %v3696_v29 }
 0x84c   : > { %v3506_v35 = vand.u32 4294901760, %v3484_v33 }
 0x84e   : > { %v3507_v7 = vsub.f32 %v3484_v33, %v3506_v35  ;;  %3545 = vmatmul.f32.vlgmr.msra.gmra.mxu1 %v3506_v35  ;;  %v3409_v60 = vpop.f32.mrf.mxu0  ;;  %v3847_v33 = vand.u32 4294901760, %v3826_v31 }
 0x84f   : > { %3816 = vmatpush.xpose.msra.mxu1 %v3691_v17 }
 0x850   : > { %v3508_v53 = vand.u32 4294901760, %v3507_v7  ;;  %v3359_v9 = vpop.f32.mrf.mxu2  ;;  %3573 = vmatmul.f32.vlgmr.msra.gmra.mxu2 %v3507_v7 }
 0x851   : > { %v3386_v36 = vadd.f32 %v3385_v54, %v3359_v9  ;;  %3745 = vmatpush.xpose.msra.mxu2 %v3718_v5  ;;  %v3479_v5 = vpop.f32.mrf.mxu3 }
 0x852   : > { %v3509_v59 = vsub.f32 %v3507_v7, %v3508_v53  ;;  %3602 = vmatmul.f32.vlgmr.msra.gmra.mxu3 %v3508_v53  ;;  %v3875_v7 = vand.u32 4294901760, %v3874_v32  ;;  %v3848_v53 = vsub.f32 %v3826_v31, %v3847_v33 }
 0x853   : > { %v3410_v61 = vadd.f32 %v3409_v60, %v3386_v36  ;;  %3768 = vmatpush.xpose.msra.mxu3 %v3691_v17 }
 0x854   : > { %v3510_v62 = vand.u32 4294901760, %v3509_v59  ;;  %v3849_v54 = vand.u32 4294901760, %v3848_v53 }
 0x855   : > { %v3434_v3 = vadd.f32 %v3433_v1, %v3410_v61 }
 0x856   : > { %3511 = vmatmul.f32.vlgmr.msra.gmra.mxu0 %v3510_v62  ;;  %v3850_v9 = vsub.f32 %v3848_v53, %v3849_v54 }
 0x857   : > { %3794 = vmatpush.xpose.msra.mxu0 %v3719_v2 }
 0x858   : > { %v3457_v6 = vpop.f32.mrf.mxu2  ;;  %v3851_v36 = vand.u32 4294901760, %v3850_v9 }
 0x859   : > { %v3458_v18 = vadd.f32 %v3457_v6, %v3434_v3 }
 0x85b   : > { %v3480_v21 = vadd.f32 %v3479_v5, %v3458_v18 }
 0x85d   : > { %v3487_v23 = vsel %vm1136_vm3, %v3480_v21, 0 }
 0x85e   : > { %v3514_v17 = vand.u32 4294901760, %v3487_v23 }
 0x860   : > { %3549 = vmatmul.f32.gmra.mxu1 %v3514_v17  ;;  %v3515_v26 = vsub.f32 %v3487_v23, %v3514_v17 }
 0x862   : > { %3578 = vmatmul.f32.gmra.mxu2 %v3515_v26  ;;  %v3516_v2 = vand.u32 4294901760, %v3515_v26 }
 0x864   : > { %3608 = vmatmul.f32.gmra.mxu3 %v3516_v2  ;;  %v3517_v30 = vsub.f32 %v3515_v26, %v3516_v2 }
 0x866   : > { %v3518_v8 = vand.u32 4294901760, %v3517_v30 }
 0x868   : > { %3519 = vmatmul.f32.gmra.mxu0 %v3518_v8  ;;  %3658 = vmatmul.f32.vlgmr.msrb.gmra.mxu1 %v3506_v35 }
 0x869   : > { %3922 = vmatpush.xpose.msrb.mxu1 %v3845_v20 }
 0x86a   : > { %3698 = vmatmul.f32.vlgmr.msrb.gmra.mxu2 %v3697_v12 }
 0x86b   : > { %3846 = vmatpush.xpose.msrb.mxu2 %v3845_v20 }
 0x86c   : > { %3724 = vmatmul.f32.vlgmr.msrb.gmra.mxu3 %v3693_v4 }
 0x86d   : > { %3876 = vmatpush.xpose.msrb.mxu3 %v3875_v7 }
 0x870   : > { %3632 = vmatmul.f32.vlgmr.msrb.gmra.mxu0 %v3506_v35  ;;  %3662 = vmatmul.f32.gmra.mxu1 %v3514_v17 }
 0x871   : > { %3899 = vmatpush.xpose.msrb.mxu0 %v3872_v24 }
 0x872   : > { %3748 = vmatmul.f32.vlgmr.msra.gmra.mxu2 %v3694_v22 }
 0x873   : > { %3948 = vmatpush.xpose.msra.mxu2 %v3873_v28 }
 0x874   : > { %3772 = vmatmul.f32.vlgmr.msra.gmra.mxu3 %v3695_v25 }
 0x875   : > { %3970 = vmatpush.xpose.msra.mxu3 %v3845_v20 }
 0x878   : > { %3636 = vmatmul.f32.gmra.mxu0 %v3514_v17  ;;  %3818 = vmatmul.f32.vlgmr.msra.gmra.mxu1 %v3693_v4 }
 0x87a   : > { %3852 = vmatmul.f32.vlgmr.msrb.gmra.mxu2 %v3851_v36 }
 0x87c   : > { %3878 = vmatmul.f32.vlgmr.msrb.gmra.mxu3 %v3847_v33 }
 0x880   : > { %3796 = vmatmul.f32.vlgmr.msra.gmra.mxu0 %v3693_v4  ;;  %3926 = vmatmul.f32.vlgmr.msrb.gmra.mxu1 %v3849_v54 }
 0x882   : > { %3950 = vmatmul.f32.vlgmr.msra.gmra.mxu2 %v3847_v33 }
 0x884   : > { %3972 = vmatmul.f32.vlgmr.msra.gmra.mxu3 %v3847_v33 }
 0x888   : > { %3902 = vmatmul.f32.vlgmr.msrb.gmra.mxu0 %v3848_v53 }
 0x8cb   : > { %v15198_v58 = vpop.f32.mrf.mxu1 }
 0x8d3   : > { %v15200_v35 = vpop.f32.mrf.mxu0  ;;  %v15202_v59 = vpop.f32.mrf.mxu2 }
 0x8d5   : > { %v15204_v60 = vpop.f32.mrf.mxu3 }
 0x8dd   : > { %v15206_v61 = vpop.f32.mrf.mxu1 }
 0x8e5   : > { %v15208_v62 = vpop.f32.mrf.mxu0  ;;  %v15210_v63 = vpop.f32.mrf.mxu2 }
 0x8e6   : > { %v15214_v1 = vpop.f32.mrf.mxu1 }
 0x8e7   : > { %v15212_v0 = vpop.f32.mrf.mxu3 }
 0x8ed   : > { %v15216_v3 = vpop.f32.mrf.mxu0  ;;  %v3699_v4 = vpop.f32.mrf.mxu2 }
 0x8ee   : > { %v15218_v6 = vpop.f32.mrf.mxu1 }
 0x8ef   : > { %v3725_v34 = vpop.f32.mrf.mxu3 }
 0x8f0   : > { %v3726_v20 = vadd.f32 %v3725_v34, %v3699_v4 }
 0x8f5   : > { %v15220_v18 = vpop.f32.mrf.mxu0  ;;  %v3749_v5 = vpop.f32.mrf.mxu2 }
 0x8f6   : > { %v3750_v22 = vadd.f32 %v3749_v5, %v3726_v20  ;;  %v3819_v17 = vpop.f32.mrf.mxu1 }
 0x8f7   : > { %v3773_v21 = vpop.f32.mrf.mxu3 }
 0x8f8   : > { %v3774_v23 = vadd.f32 %v3773_v21, %v3750_v22 }
 0x8fd   : > { %v3797_v24 = vpop.f32.mrf.mxu0  ;;  %v3853_v26 = vpop.f32.mrf.mxu2 }
 0x8fe   : > { %v3798_v25 = vadd.f32 %v3797_v24, %v3774_v23  ;;  %v3927_v8 = vpop.f32.mrf.mxu1 }
 0x8ff   : > { %v3879_v2 = vpop.f32.mrf.mxu3 }
 0x900   : > { %v3820_v27 = vadd.f32 %v3819_v17, %v3798_v25  ;;  %v3880_v29 = vadd.f32 %v3879_v2, %v3853_v26 }
 0x902   : > { %v3976_v28 = vsel %vm1136_vm3, %v3820_v27, -inf }
 0x903   : > { %3977 = vmax.xlane.f32.xlu1 %v3976_v28 }
 0x905   : > { %v3903_v30 = vpop.f32.mrf.mxu0  ;;  %v3951_v12 = vpop.f32.mrf.mxu2 }
 0x906   : > { %v3904_v31 = vadd.f32 %v3903_v30, %v3880_v29 }
 0x907   : > { %v3973_v7 = vpop.f32.mrf.mxu3 }
 0x908   : > { %v3928_v32 = vadd.f32 %v3927_v8, %v3904_v31 }
 0x90a   : > { %v3952_v33 = vadd.f32 %v3951_v12, %v3928_v32 }
 0x90c   : > { %v3974_v53 = vadd.f32 %v3973_v7, %v3952_v33 }
 0x90e   : > { %v3979_v54 = vsel %vm1136_vm3, %v3974_v53, -inf }
 0x90f   : > { %3980 = vmax.xlane.f32.xlu2 %v3979_v54 }
 0x927   : > { %4024 = vrot.lane.b32.xlu2 %v15008_v45, %s14790_s2 }
 0x976   : > { %v3978_v9 = vpop.xlane.xlu1 %3977 }
 0x977   : > { %v3982_v36 = vsub.f32 %v3820_v27, %v3978_v9 }
 0x979   : > { %v3984_v4 = vmul.f32 1.442695, %v3982_v36 }
 0x97b   : > { %14716 = vpow2.f32 %v3984_v4 }
 0x981   : > { %v14717_v34 = vpop.eup %14716 }
 0x982   : > { %v3981_v5 = vpop.xlane.xlu2 %3980  ;;  %v3988_v20 = vsel %vm1136_vm3, %v14717_v34, 0.0 }
 0x983   : > { %v3983_v21 = vsub.f32 %v3974_v53, %v3981_v5  ;;  %3989 = vadd.xlane.f32.xlu0 %v3988_v20 }
 0x985   : > { %v3986_v22 = vmul.f32 1.442695, %v3983_v21 }
 0x987   : > { %14718 = vpow2.f32 %v3986_v22 }
 0x98a   : > { %v4025_v23 = vpop.permute.xlu2 %4024 }
 0x98b   : > { %v4045_v17 = vand.u32 4294901760, %v4025_v23 }
 0x98d   : > { %v15226_v24 = vpop.eup %14718  ;;  %v4072_v25 = vsub.f32 %v4025_v23, %v4045_v17  ;;  %4046 = vmatpush.msra.mxu0 %v4045_v17  ;;  %4122 = vmatpush.msrb.mxu3 %v4045_v17 }
 0x98e   : > { %v3991_v45 = vsel %vm1136_vm3, %v15226_v24, 0.0 }
 0x98f   : > { %v4073_v26 = vand.u32 4294901760, %v4072_v25  ;;  %4099 = vmatpush.msrb.mxu2 %v4072_v25  ;;  %3992 = vadd.xlane.f32.xlu1 %v3991_v45 }
 0x991   : > { %v4074_v27 = vsub.f32 %v4072_v25, %v4073_v26  ;;  %4148 = vmatpush.msrb.mxu0 %v4073_v26 }
 0x993   : > { %v4075_v2 = vand.u32 4294901760, %v4074_v27 }
 0x995   : > { %4076 = vmatpush.msra.mxu1 %v4075_v2 }
 0x997   : > { %4170 = vmatpush.msrb.mxu1 %v4045_v17  ;;  %4176 = vrot.lane.b32.xlu0 %v15011_v52, %s14790_s2 }
 0x9f6   : > { %v3990_v28 = vpop.xlane.xlu0 %3989 }
 0x9f7   : > { %14720 = vrcp.f32 %v3990_v28  ;;  %v4005_v8 = vand.u32 2147483648, %v3990_v28  ;;  %v4003_v12 = vand.u32 2147483647, %v3990_v28  ;;  %vm3999_vm15 = vweird.f32 %v3990_v28 }
 0x9f9   : > { %v4006_v53 = vor.u32 1.1754944e-38, %v4005_v8  ;;  %vm4004_vm1 = vcmp.eq.f32.partialorder %v4003_v12, 8.507059e+37 }
 0x9fd   : > { %v14721_v29 = vpop.eup %14720 }
 0x9fe   : > { %v3995_v30 = vmul.f32 %v14721_v29, %v3990_v28  ;;  %vm4000_vm14 = vweird.f32 %v14721_v29 }
 0x9ff   : > { %vm4001_vm0 = vmor %vm3999_vm15, %vm4000_vm14 }
 0xa00   : > { %v3996_v31 = vsub.f32 1.0, %v3995_v30 }
 0xa02   : > { %v3997_v32 = vmul.f32 %v14721_v29, %v3996_v31  ;;  %v3993_v33 = vpop.xlane.xlu1 %3992 }
 0xa03   : > { %14722 = vrcp.f32 %v3993_v33  ;;  %v4020_v25 = vand.u32 2147483648, %v3993_v33  ;;  %v4018_v27 = vand.u32 2147483647, %v3993_v33  ;;  %vm4014_vm5 = vweird.f32 %v3993_v33 }
 0xa04   : > { %v3998_v7 = vadd.f32 %v14721_v29, %v3997_v32 }
 0xa05   : > { %v4021_v30 = vor.u32 1.1754944e-38, %v4020_v25  ;;  %vm4019_vm7 = vcmp.eq.f32.partialorder %v4018_v27, 8.507059e+37 }
 0xa06   : > { %v4002_v54 = vsel %vm4001_vm0, %v14721_v29, %v3998_v7 }
 0xa07   : > { %v4007_v9 = vsel %vm4004_vm1, %v4006_v53, %v4002_v54 }
 0xa08   : > { %v4008_v36 = vmul.f32 %v14717_v34, %v4007_v9 }
 0xa09   : > { %v14723_v52 = vpop.eup %14722  ;;  %v4177_v4 = vpop.permute.xlu0 %4176 }
 0xa0a   : > { %v4010_v5 = vmul.f32 %v14723_v52, %v3993_v33  ;;  %v4197_v20 = vand.u32 4294901760, %v4177_v4  ;;  %v4028_v21 = vsel %vm1136_vm3, %v4008_v36, 0  ;;  %vm4015_vm4 = vweird.f32 %v14723_v52 }
 0xa0b   : > { %v4047_v22 = vand.u32 4294901760, %v4028_v21  ;;  %vm4016_vm6 = vmor %vm4014_vm5, %vm4015_vm4 }
 0xa0c   : > { %v4011_v23 = vsub.f32 1.0, %v4010_v5  ;;  %v4224_v17 = vsub.f32 %v4177_v4, %v4197_v20  ;;  %4198 = vmatpush.msra.mxu2 %v4197_v20 }
 0xa0d   : > { %4078 = vmatmul.f32.vlgmr.msra.gmra.mxu1 %v4047_v22  ;;  %v4048_v45 = vsub.f32 %v4028_v21, %v4047_v22 }
 0xa0e   : > { %v4012_v26 = vmul.f32 %v14723_v52, %v4011_v23  ;;  %v4225_v2 = vand.u32 4294901760, %v4224_v17  ;;  %4274 = vmatpush.msra.mxu1 %v4197_v20 }
 0xa0f   : > { %4102 = vmatmul.f32.vlgmr.msrb.gmra.mxu2 %v4048_v45  ;;  %v4049_v34 = vand.u32 4294901760, %v4048_v45 }
 0xa10   : > { %v4013_v28 = vadd.f32 %v14723_v52, %v4012_v26  ;;  %v4226_v29 = vsub.f32 %v4224_v17, %v4225_v2  ;;  %4300 = vmatpush.msrb.mxu2 %v4225_v2 }
 0xa11   : > { %4126 = vmatmul.f32.vlgmr.msrb.gmra.mxu3 %v4049_v34  ;;  %v4050_v31 = vsub.f32 %v4048_v45, %v4049_v34 }
 0xa12   : > { %v4017_v8 = vsel %vm4016_vm6, %v14723_v52, %v4013_v28  ;;  %v4227_v32 = vand.u32 4294901760, %v4226_v29 }
 0xa13   : > { %v4022_v12 = vsel %vm4019_vm7, %v4021_v30, %v4017_v8  ;;  %v4051_v7 = vand.u32 4294901760, %v4050_v31 }
 0xa14   : > { %v4023_v53 = vmul.f32 %v15226_v24, %v4022_v12  ;;  %4228 = vmatpush.msra.mxu3 %v4227_v32  ;;  %v4328_v24 = vld [vmem:[%s14907_s18 + $0x18] sm:$0xff] }
 0xa15   : > { %4052 = vmatmul.f32.vlgmr.msra.gmra.mxu0 %v4051_v7  ;;  %4172 = vmatmul.f32.vlgmr.msrb.gmra.mxu1 %v4047_v22  ;;  %v4350_v5 = vand.u32 4294901760, %v4328_v24 }
 0xa16   : > { %4251 = vmatpush.msra.mxu0 %v4224_v17  ;;  %4322 = vmatpush.msrb.mxu3 %v4197_v20  ;;  %v4180_v33 = vsel %vm1136_vm3, %v4023_v53, 0 }
 0xa17   : > { %v4199_v54 = vand.u32 4294901760, %v4180_v33  ;;  %v4385_v21 = vsub.f32 %v4328_v24, %v4350_v5 }
 0xa19   : > { %v4200_v9 = vsub.f32 %v4180_v33, %v4199_v54  ;;  %4230 = vmatmul.f32.vlgmr.msra.gmra.mxu3 %v4199_v54  ;;  %v4386_v20 = vand.u32 4294901760, %v4385_v21 }
 0xa1a   : > { %4444 = vmatpush.msra.mxu3 %v4350_v5 }
 0xa1b   : > { %v4201_v36 = vand.u32 4294901760, %v4200_v9  ;;  %v4387_v23 = vsub.f32 %v4385_v21, %v4386_v20 }
 0xa1d   : > { %4150 = vmatmul.f32.vlgmr.msrb.gmra.mxu0 %v4047_v22  ;;  %4278 = vmatmul.f32.vlgmr.msra.gmra.mxu1 %v4201_v36  ;;  %v4202_v52 = vsub.f32 %v4200_v9, %v4201_v36  ;;  %v4388_v17 = vand.u32 4294901760, %v4387_v23 }
 0xa1e   : > { %4351 = vmatpush.msrb.mxu0 %v4350_v5 }
 0xa1f   : > { %v4203_v4 = vand.u32 4294901760, %v4202_v52  ;;  %4389 = vmatpush.msrb.mxu1 %v4388_v17 }
 0xa21   : > { %4204 = vmatmul.f32.vlgmr.msra.gmra.mxu2 %v4203_v4  ;;  %4324 = vmatmul.f32.vlgmr.msrb.gmra.mxu3 %v4199_v54 }
 0xa22   : > { %4416 = vmatpush.msra.mxu2 %v4385_v21  ;;  %4502 = vmatpush.msra.mxu1 %v4350_v5 }
 0xa25   : > { %4254 = vmatmul.f32.vlgmr.msra.gmra.mxu0 %v4200_v9 }
 0xa26   : > { %4476 = vmatpush.msra.mxu0 %v4386_v20 }
 0xa29   : > { %4302 = vmatmul.f32.vlgmr.msrb.gmra.mxu2 %v4199_v54 }
 0xa8a   : > { %v4079_v22 = vpop.f32.mrf.mxu1 }
 0xa92   : > { %v4053_v25 = vpop.f32.mrf.mxu0  ;;  %v4103_v26 = vpop.f32.mrf.mxu2 }
 0xa93   : > { %v4080_v45 = vadd.f32 %v4079_v22, %v4053_v25  ;;  %v4173_v30 = vpop.f32.mrf.mxu1 }
 0xa94   : > { %v4127_v2 = vpop.f32.mrf.mxu3 }
 0xa95   : > { %v4104_v27 = vadd.f32 %v4103_v26, %v4080_v45 }
 0xa97   : > { %v4128_v34 = vadd.f32 %v4127_v2, %v4104_v27 }
 0xa9a   : > { %v4151_v28 = vpop.f32.mrf.mxu0 }
 0xa9b   : > { %v4152_v29 = vadd.f32 %v4151_v28, %v4128_v34  ;;  %v4279_v24 = vpop.f32.mrf.mxu1  ;;  %v2520_v34 = vadd.f32 %v15127_v13, %v15129_v16 }
 0xa9c   : > { %v4231_v53 = vpop.f32.mrf.mxu3 }
 0xa9d   : > { %v4174_v31 = vadd.f32 %v4173_v30, %v4152_v29  ;;  %v2548_v28 = vadd.f32 %v15131_v37, %v2520_v34  ;;  %v2524_v30 = vadd.f32 %v15133_v11, %v15137_v14  ;;  %v3547_v37 = vadd.f32 %v15198_v58, %v15200_v35 }
 0xa9e   : > { %v3551_v58 = vadd.f32 %v15206_v61, %v15208_v62 }
 0xa9f   : > { %v4330_v8 = vsel %vm1136_vm3, %v4174_v31, 0  ;;  %v2577_v29 = vadd.f32 %v15135_v38, %v2548_v28 }
 0xaa0   : > { %v4352_v32 = vand.u32 4294901760, %v4330_v8 }
 0xaa1   : > { %v2607_v31 = vadd.f32 %v15145_v42, %v2577_v29  ;;  %v14735_v29 = vld [vmem:[#allocation2 + $0x8] sm:$0xff] }
 0xaa2   : > { %v4353_v12 = vsub.f32 %v4330_v8, %v4352_v32  ;;  %4391 = vmatmul.f32.vlgmr.msrb.gmra.mxu1 %v4352_v32  ;;  %v4255_v36 = vpop.f32.mrf.mxu0  ;;  %v2553_v8 = vadd.f32 %v15139_v39, %v2524_v30  ;;  %v3575_v39 = vadd.f32 %v15202_v59, %v3547_v37 }
 0xaa4   : > { %v4354_v7 = vand.u32 4294901760, %v4353_v12  ;;  %v4205_v33 = vpop.f32.mrf.mxu2  ;;  %4419 = vmatmul.f32.vlgmr.msra.gmra.mxu2 %v4353_v12  ;;  %v4325_v23 = vpop.f32.mrf.mxu3 }
 0xaa5   : > { %v4232_v54 = vadd.f32 %v4231_v53, %v4205_v33 }
 0xaa6   : > { %v4355_v9 = vsub.f32 %v4353_v12, %v4354_v7  ;;  %4448 = vmatmul.f32.vlgmr.msra.gmra.mxu3 %v4354_v7  ;;  %v2633_v12 = vadd.f32 %v15141_v40, %v2607_v31  ;;  %v14791_v31 = vmov 32.0  }
 0xaa7   : > { %v4256_v52 = vadd.f32 %v4255_v36, %v4232_v54  ;;  %14724 = vrcp.f32 %v14791_v31 }
 0xaa8   : > { %v4356_v4 = vand.u32 4294901760, %v4355_v9  ;;  %v2669_v53 = vadd.f32 %v15147_v10, %v2633_v12 }
 0xaa9   : > { %v4280_v5 = vadd.f32 %v4279_v24, %v4256_v52 }
 0xaaa   : > { %4357 = vmatmul.f32.vlgmr.msrb.gmra.mxu0 %v4356_v4  ;;  %v2703_v38 = vadd.f32 %v15151_v44, %v2669_v53 }
 0xaac   : > { %v4303_v21 = vpop.f32.mrf.mxu2  ;;  %v2731_v14 = vadd.f32 %v15161_v49, %v2703_v38 }
 0xaad   : > { %v4304_v20 = vadd.f32 %v4303_v21, %v4280_v5 }
 0xaae   : > { %v2760_v10 = vadd.f32 %v15157_v15, %v2731_v14 }
 0xaaf   : > { %v4326_v17 = vadd.f32 %v4325_v23, %v4304_v20 }
 0xab0   : > { %v2790_v59 = vadd.f32 %v15163_v50, %v2760_v10 }
 0xab1   : > { %v4333_v22 = vsel %vm1136_vm3, %v4326_v17, 0 }
 0xab2   : > { %v4360_v25 = vand.u32 4294901760, %v4333_v22  ;;  %v2816_v62 = vadd.f32 %v15165_v51, %v2790_v59 }
 0xab4   : > { %4395 = vmatmul.f32.gmra.mxu1 %v4360_v25  ;;  %v4361_v45 = vsub.f32 %v4333_v22, %v4360_v25 }
 0xab6   : > { %4424 = vmatmul.f32.gmra.mxu2 %v4361_v45  ;;  %v4362_v26 = vand.u32 4294901760, %v4361_v45 }
 0xab8   : > { %4454 = vmatmul.f32.gmra.mxu3 %v4362_v26  ;;  %v4363_v27 = vsub.f32 %v4361_v45, %v4362_v26 }
 0xaba   : > { %v4364_v2 = vand.u32 4294901760, %v4363_v27 }
 0xabc   : > { %4365 = vmatmul.f32.gmra.mxu0 %v4364_v2  ;;  %4504 = vmatmul.f32.vlgmr.msra.gmra.mxu1 %v4352_v32 }
 0xac4   : > { %4478 = vmatmul.f32.vlgmr.msra.gmra.mxu0 %v4352_v32  ;;  %4508 = vmatmul.f32.gmra.mxu1 %v4360_v25  ;;  %v2583_v32 = vadd.f32 %v15143_v41, %v2553_v8  ;;  %v14725_v8 = vpop.eup %14724 }
 0xac5   : > { %vm4535_vm3 = vweird.f32 %v14725_v8 }
 0xac6   : > { %v2611_v13 = vadd.f32 %v15153_v46, %v2583_v32  ;;  %v3604_v46 = vadd.f32 %v15204_v60, %v3575_v39 }
 0xac8   : > { %v2637_v11 = vadd.f32 %v15149_v43, %v2611_v13  ;;  %v3634_v43 = vadd.f32 %v15216_v3, %v3604_v46  ;;  %v4617_v46 = vld [vmem:[%s14925_s5 + $0x100] sm:$0xff] }
 0xaca   : > { %v2677_v41 = vadd.f32 %v15155_v47, %v2637_v11  ;;  %v3580_v47 = vadd.f32 %v15210_v63, %v3551_v58  ;;  %v3660_v15 = vadd.f32 %v15214_v1, %v3634_v43  ;;  %v14686_v1 = vld [vmem:[%s22012_s4] ss:$0 sm:$0xff] }
 0xacc   : > { %4482 = vmatmul.f32.gmra.mxu0 %v4360_v25  ;;  %v2707_v44 = vadd.f32 %v15159_v48, %v2677_v41  ;;  %v3610_v3 = vadd.f32 %v15212_v0, %v3580_v47  ;;  %v3666_v24 = vadd.f32 %v3660_v15, %v2816_v62 }
 0xace   : > { %v2736_v54 = vadd.f32 %v15169_v57, %v2707_v44  ;;  %v3638_v57 = vadd.f32 %v15220_v18, %v3610_v3  ;;  %v14734_v18 = vld [vmem:[#allocation2] sm:$0xff] }
 0xacf   : > { %v4601_v44 = vld [vmem:[%s14925_s5 + $0x80] sm:$0xff] }
 0xad0   : > { %v2766_v48 = vadd.f32 %v15167_v56, %v2736_v54  ;;  %v3664_v56 = vadd.f32 %v15218_v6, %v3638_v57  ;;  %v4707_v59 = vand.u32 4294901760, %v4601_v44  ;;  %v4585_v54 = vld [vmem:[%s14925_s5] sm:$0xff] }
 0xad2   : > { %v2794_v21 = vadd.f32 %v15171_v55, %v2766_v48  ;;  %v4753_v15 = vsub.f32 %v4601_v44, %v4707_v59 }
 0xad4   : > { %v2820_v22 = vadd.f32 %v15173_v19, %v2794_v21  ;;  %v4531_v19 = vmul.f32 32.0, %v14725_v8  ;;  %v4634_v21 = vld [vmem:[%s14925_s5 + $0x188] sm:$0xff] }
 0xad6   : > { %v3667_v27 = vadd.f32 %v3664_v56, %v2820_v22  ;;  %v4532_v12 = vsub.f32 1.0, %v4531_v19 }
 0xad8   : > { %v4533_v32 = vmul.f32 %v14725_v8, %v4532_v12 }
 0xb1f   : > { %v4392_v7 = vpop.f32.mrf.mxu1 }
 0xb27   : > { %v4358_v16 = vpop.f32.mrf.mxu0  ;;  %v4420_v35 = vpop.f32.mrf.mxu2 }
 0xb28   : > { %v4393_v42 = vadd.f32 %v4392_v7, %v4358_v16  ;;  %v4534_v7 = vadd.f32 %v14725_v8, %v4533_v32 }
 0xb29   : > { %v4449_v9 = vpop.f32.mrf.mxu3 }
 0xb2a   : > { %v4421_v49 = vadd.f32 %v4420_v35, %v4393_v42  ;;  %v15280_v53 = vsel %vm4535_vm3, %v14725_v8, %v4534_v7  ;;  %v4705_v35 = vand.u32 4294901760, %v4617_v46 }
 0xb2b   : > { %22013 = vst [vmem:[#allocation7_spill] sm:$0xff] %v15280_v53 }
 0xb2c   : > { %v4450_v60 = vadd.f32 %v4449_v9, %v4421_v49  ;;  %v4747_v49 = vsub.f32 %v4617_v46, %v4705_v35 }
 0xb2e   : > { %v4748_v9 = vand.u32 4294901760, %v4747_v49 }
 0xb31   : > { %v4396_v40 = vpop.f32.mrf.mxu1 }
 0xb39   : > { %v4366_v33 = vpop.f32.mrf.mxu0  ;;  %v4505_v52 = vpop.f32.mrf.mxu1 }
 0xb3a   : > { %v4397_v36 = vadd.f32 %v4396_v40, %v4366_v33  ;;  %v4425_v50 = vpop.f32.mrf.mxu2  ;;  %v4633_v33 = vld [vmem:[%s14925_s5 + $0x180] sm:$0xff] }
 0xb3b   : > { %v4455_v51 = vpop.f32.mrf.mxu3  ;;  %v4703_v10 = vand.u32 4294901760, %v4633_v33 }
 0xb3c   : > { %v4426_v63 = vadd.f32 %v4425_v50, %v4397_v36 }
 0xb3d   : > { %v4741_v58 = vsub.f32 %v4633_v33, %v4703_v10  ;;  %4821 = vmatpush.msrb.mxu1 %v4703_v10  ;;  %4704 = vmatpush.msrb.mxu2 %v4703_v10 }
 0xb3e   : > { %v4456_v23 = vadd.f32 %v4455_v51, %v4426_v63  ;;  %v4618_v51 = vld [vmem:[%s14925_s5 + $0x108] sm:$0xff] }
 0xb3f   : > { %v4742_v43 = vand.u32 4294901760, %v4741_v58  ;;  %4787 = vmatpush.msrb.mxu0 %v4741_v58  ;;  %4823 = vmatpush.msrb.mxu1 %v4705_v35 }
 0xb40   : > { %4706 = vmatpush.msrb.mxu2 %v4705_v35 }
 0xb41   : > { %v4479_v61 = vpop.f32.mrf.mxu0  ;;  %v4509_v26 = vpop.f32.mrf.mxu1  ;;  %v4743_v47 = vsub.f32 %v4741_v58, %v4742_v43  ;;  %4790 = vmatpush.msrb.mxu0 %v4747_v49  ;;  %4825 = vmatpush.msrb.mxu1 %v4707_v59 }
 0xb42   : > { %v4480_v4 = vadd.f32 %v4479_v61, %v4450_v60  ;;  %v4709_v60 = vand.u32 4294901760, %v4585_v54  ;;  %4708 = vmatpush.msrb.mxu2 %v4707_v59  ;;  %v4754_v61 = vand.u32 4294901760, %v4753_v15 }
 0xb43   : > { %v4744_v36 = vand.u32 4294901760, %v4743_v47  ;;  %4793 = vmatpush.msrb.mxu0 %v4753_v15 }
 0xb44   : > { %v4506_v5 = vadd.f32 %v4505_v52, %v4480_v4  ;;  %v4749_v52 = vsub.f32 %v4747_v49, %v4748_v9  ;;  %v4759_v62 = vsub.f32 %v4585_v54, %v4709_v60  ;;  %4827 = vmatpush.msrb.mxu1 %v4709_v60  ;;  %4710 = vmatpush.msrb.mxu2 %v4709_v60 }
 0xb45   : > { %4745 = vmatpush.msrb.mxu3 %v4744_v36  ;;  %v4755_v3 = vsub.f32 %v4753_v15, %v4754_v61 }
 0xb46   : > { %v4512_v20 = vadd.f32 %v4506_v5, %v3666_v24  ;;  %v4750_v48 = vand.u32 4294901760, %v4749_v52  ;;  %v4760_v4 = vand.u32 4294901760, %v4759_v62  ;;  %4796 = vmatpush.msrb.mxu0 %v4759_v62  ;;  %4856 = vmatpush.msra.mxu2 %v4742_v43  ;;  %v4635_v52 = vld [vmem:[%s14925_s5 + $0x190] sm:$0xff] }
 0xb47   : > { %v4756_v50 = vand.u32 4294901760, %v4755_v3  ;;  %v4619_v3 = vld [vmem:[%s14925_s5 + $0x110] sm:$0xff] }
 0xb48   : > { %v4518_v0 = vadd.f32 %v14686_v1, %v4512_v20  ;;  %4751 = vmatpush.msrb.mxu3 %v4750_v48  ;;  %v4761_v24 = vsub.f32 %v4759_v62, %v4760_v4  ;;  %4860 = vmatpush.msra.mxu2 %v4748_v9  ;;  %v15300_v20 = vand.u32 4294901760, %v4634_v21  ;;  %v15368_v62 = vand.u32 4294901760, %v4635_v52 }
 0xb49   : > { %v4483_v17 = vpop.f32.mrf.mxu0 }
 0xb4a   : > { %v4484_v25 = vadd.f32 %v4483_v17, %v4456_v23  ;;  %v4520_v45 = vadd.f32 %v14734_v18, %v4518_v0  ;;  %4757 = vmatpush.msrb.mxu3 %v4756_v50  ;;  %v4762_v57 = vand.u32 4294901760, %v4761_v24  ;;  %4864 = vmatpush.msra.mxu2 %v4754_v61  ;;  %v15305_v56 = vsub.f32 %v4634_v21, %v15300_v20  ;;  %v4602_v17 = vld [vmem:[%s14925_s5 + $0x88] sm:$0xff] }
 0xb4b   : > { %4920 = vmatpush.msra.mxu0 %v15300_v20  ;;  %v15307_v23 = vand.u32 4294901760, %v4618_v51  ;;  %v15313_v18 = vand.u32 4294901760, %v4602_v17  ;;  %v15383_v50 = vand.u32 4294901760, %v4619_v3 }
 0xb4c   : > { %v4510_v2 = vadd.f32 %v4509_v26, %v4484_v25  ;;  %v4524_v34 = vsel %vm908_vm2, %v4520_v45, 0.0  ;;  %4763 = vmatpush.msrb.mxu3 %v4762_v57  ;;  %4868 = vmatpush.msra.mxu2 %v4760_v4  ;;  %v4958_v25 = vand.u32 4294901760, %v15305_v56  ;;  %v4586_v26 = vld [vmem:[%s14925_s5 + $0x8] sm:$0xff]  ;;  %v4603_v57 = vld [vmem:[%s14925_s5 + $0x90] sm:$0xff] }
 0xb4d   : > { %4525 = vadd.xlane.f32.xlu1 %v4524_v34  ;;  %4922 = vmatpush.msra.mxu0 %v15307_v23  ;;  %v15398_v21 = vand.u32 4294901760, %v4603_v57 }
 0xb4e   : > { %v4513_v28 = vadd.f32 %v4510_v2, %v3667_v27  ;;  %4891 = vmatpush.msra.mxu3 %v4703_v10  ;;  %v4959_v34 = vsub.f32 %v15305_v56, %v4958_v25  ;;  %v14687_v10 = vld [vmem:[%s22014_s17] ss:$0 sm:$0xff] }
 0xb4f   : > { %4924 = vmatpush.msra.mxu0 %v15313_v18 }
 0xb50   : > { %v4519_v55 = vadd.f32 %v14686_v1, %v4513_v28  ;;  %4893 = vmatpush.msra.mxu3 %v4705_v35  ;;  %v14688_v35 = vld [vmem:[%s22015_s30] ss:$0 sm:$0xff] }
 0xb52   : > { %v4521_v30 = vadd.f32 %v14735_v29, %v4519_v55  ;;  %4895 = vmatpush.msra.mxu3 %v4707_v59  ;;  %v15324_v55 = vand.u32 4294901760, %v4586_v26 }
 0xb54   : > { %v4527_v6 = vsel %vm908_vm2, %v4521_v30, 0.0  ;;  %4897 = vmatpush.msra.mxu3 %v4709_v60  ;;  %4926 = vmatpush.msra.mxu0 %v15324_v55  ;;  %v15335_v12 = vsub.f32 %v4586_v26, %v15324_v55 }
 0xb55   : > { %4528 = vadd.xlane.f32.xlu1 %v4527_v6  ;;  %v4960_v6 = vand.u32 4294901760, %v4959_v34 }
 0xb57   : > { %4961 = vmatpush.msra.mxu1 %v4960_v6 }
 0xbc0   : > { %v4526_v13 = vpop.xlane.xlu1 %4525 }
 0xbc1   : > { %v4537_v16 = vmul.f32 %v15280_v53, %v4526_v13 }
 0xbc3   : > { %v15283_v37 = vsub.f32 %v4520_v45, %v4537_v16  ;;  %v15316_v45 = vsub.f32 %v4618_v51, %v15307_v23  ;;  %v4976_v16 = vand.u32 4294901760, %v15335_v12 }
 0xbc5   : > { %v4541_v38 = vmul.f32 %v15283_v37, %v15283_v37  ;;  %v4964_v28 = vand.u32 4294901760, %v15316_v45 }
 0xbc7   : > { %v4543_v11 = vsel %vm908_vm2, %v4541_v38, 0.0  ;;  %v4965_v31 = vsub.f32 %v15316_v45, %v4964_v28 }
 0xbc8   : > { %4544 = vadd.xlane.f32.xlu1 %v4543_v11  ;;  %v4529_v14 = vpop.xlane.xlu1 %4528 }
 0xbc9   : > { %v4538_v39 = vmul.f32 %v15280_v53, %v4529_v14  ;;  %v4966_v32 = vand.u32 4294901760, %v4965_v31  ;;  %v4977_v14 = vsub.f32 %v15335_v12, %v4976_v16 }
 0xbcb   : > { %v15289_v40 = vsub.f32 %v4521_v30, %v4538_v39  ;;  %v15327_v30 = vsub.f32 %v4602_v17, %v15313_v18  ;;  %4967 = vmatpush.msra.mxu1 %v4966_v32  ;;  %v4978_v33 = vand.u32 4294901760, %v4977_v14  ;;  %v4587_v17 = vld [vmem:[%s14925_s5 + $0x10] sm:$0xff] }
 0xbcc   : > { %v15413_v26 = vand.u32 4294901760, %v4587_v17 }
 0xbcd   : > { %v4542_v41 = vmul.f32 %v15289_v40, %v15289_v40  ;;  %v4970_v19 = vand.u32 4294901760, %v15327_v30 }
 0xbce   : > { %v15427_v34 = vsub.f32 %v4587_v17, %v15413_v26 }
 0xbcf   : > { %v4546_v42 = vsel %vm908_vm2, %v4542_v41, 0.0  ;;  %v4971_v13 = vsub.f32 %v15327_v30, %v4970_v19 }
 0xbd0   : > { %4547 = vadd.xlane.f32.xlu0 %v4546_v42 }
 0xbd1   : > { %v4972_v11 = vand.u32 4294901760, %v4971_v13 }
 0xbd3   : > { %4973 = vmatpush.msra.mxu1 %v4972_v11 }
 0xbd5   : > { %4979 = vmatpush.msra.mxu1 %v4978_v33 }
 0xc3b   : > { %v4545_v63 = vpop.xlane.xlu1 %4544 }
 0xc3c   : > { %v4549_v5 = vmul.f32 %v4545_v63, %v15280_v53 }
 0xc3e   : > { %v4551_v1 = vadd.f32 1e-05, %v4549_v5 }
 0xc40   : > { %14726 = vrsqrt.f32 %v4551_v1  ;;  %vm4559_vm9 = vweird.f32 %v4551_v1 }
 0xc43   : > { %v4548_v0 = vpop.xlane.xlu0 %4547 }
 0xc44   : > { %v4550_v22 = vmul.f32 %v4548_v0, %v15280_v53 }
 0xc46   : > { %v14727_v27 = vpop.eup %14726  ;;  %v4552_v2 = vadd.f32 1e-05, %v4550_v22 }
 0xc47   : > { %v4554_v29 = vmul.f32 %v14727_v27, %v4551_v1  ;;  %vm4560_vm8 = vweird.f32 %v14727_v27  ;;  %v15396_v1 = vsub.f32 %v4619_v3, %v15383_v50 }
 0xc48   : > { %14728 = vrsqrt.f32 %v4552_v2  ;;  %vm4561_vm10 = vmor %vm4559_vm9, %vm4560_vm8  ;;  %vm4569_vm12 = vweird.f32 %v4552_v2 }
 0xc49   : > { %v4555_v8 = vmul.f32 %v14727_v27, %v4554_v29  ;;  %v5180_v22 = vand.u32 4294901760, %v15396_v1 }
 0xc4b   : > { %v4556_v7 = vmul.f32 0.5, %v4555_v8 }
 0xc4d   : > { %v4557_v38 = vsub.f32 1.5, %v4556_v7 }
 0xc4e   : > { %v14729_v39 = vpop.eup %14728 }
 0xc4f   : > { %v4558_v41 = vmul.f32 %v14727_v27, %v4557_v38  ;;  %v4564_v42 = vmul.f32 %v14729_v39, %v4552_v2  ;;  %vm4570_vm11 = vweird.f32 %v14729_v39 }
 0xc50   : > { %vm4571_vm13 = vmor %vm4569_vm12, %vm4570_vm11 }
 0xc51   : > { %v4562_v46 = vsel %vm4561_vm10, %v14727_v27, %v4558_v41  ;;  %v4565_v58 = vmul.f32 %v14729_v39, %v4564_v42 }
 0xc52   : > { %v4573_v44 = vmul.f32 %v4562_v46, %v15283_v37 }
 0xc53   : > { %v4566_v43 = vmul.f32 0.5, %v4565_v58 }
 0xc54   : > { %v4578_v49 = vmul.f32 %v14687_v10, %v4573_v44 }
 0xc55   : > { %v4567_v59 = vsub.f32 1.5, %v4566_v43 }
 0xc56   : > { %v15355_v54 = vadd.f32 %v14688_v35, %v4578_v49 }
 0xc57   : > { %v4568_v47 = vmul.f32 %v14729_v39, %v4567_v59 }
 0xc58   : > { %22016 = vst [vmem:[#allocation8_spill] sm:$0xff] %v15355_v54  ;;  %v4686_v9 = vsel %vm908_vm2, %v15355_v54, 0 }
 0xc59   : > { %v15359_v15 = vand.u32 4294901760, %v4686_v9  ;;  %v4572_v60 = vsel %vm4571_vm13, %v14729_v39, %v4568_v47  ;;  %v4588_v39 = vld [vmem:[%s14925_s5 + $0x18] sm:$0xff] }
 0xc5a   : > { %v4574_v36 = vmul.f32 %v4572_v60, %v15289_v40  ;;  %v15381_v40 = vsub.f32 %v4635_v52, %v15368_v62  ;;  %v15487_v41 = vand.u32 4294901760, %v4588_v39 }
 0xc5b   : > { %v15363_v37 = vsub.f32 %v4686_v9, %v15359_v15  ;;  %4765 = vmatmul.f32.vlgmr.msrb.gmra.mxu3 %v15359_v15 }
 0xc5c   : > { %v4579_v61 = vmul.f32 %v14687_v10, %v4574_v36  ;;  %5037 = vmatpush.msrb.mxu3 %v15300_v20  ;;  %v5174_v5 = vand.u32 4294901760, %v15381_v40  ;;  %v15497_v10 = vsub.f32 %v4588_v39, %v15487_v41  ;;  %v4637_v36 = vld [vmem:[%s14925_s5 + $0x1a0] sm:$0xff] }
 0xc5d   : > { %4799 = vmatmul.f32.vlgmr.msrb.gmra.mxu0 %v15363_v37  ;;  %v15372_v48 = vand.u32 4294901760, %v15363_v37  ;;  %v15535_v52 = vand.u32 4294901760, %v4637_v36 }
 0xc5e   : > { %v15375_v4 = vadd.f32 %v14688_v35, %v4579_v61  ;;  %5039 = vmatpush.msrb.mxu3 %v15307_v23  ;;  %5072 = vmatpush.msrb.mxu0 %v4958_v25  ;;  %v15411_v25 = vsub.f32 %v4603_v57, %v15398_v21  ;;  %v5408_v44 = vand.u32 4294901760, %v15497_v10  ;;  %v4621_v61 = vld [vmem:[%s14925_s5 + $0x120] sm:$0xff] }
 0xc5f   : > { %4831 = vmatmul.f32.vlgmr.msrb.gmra.mxu1 %v15372_v48  ;;  %v4714_v24 = vsub.f32 %v15363_v37, %v15372_v48  ;;  %v15543_v3 = vand.u32 4294901760, %v4621_v61 }
 0xc60   : > { %22017 = vst [vmem:[#allocation9_spill] sm:$0xff] %v15375_v4  ;;  %v4689_v63 = vsel %vm908_vm2, %v15375_v4, 0  ;;  %5041 = vmatpush.msrb.mxu3 %v15313_v18  ;;  %5076 = vmatpush.msrb.mxu0 %v4964_v28  ;;  %v5186_v2 = vand.u32 4294901760, %v15411_v25  ;;  %v5409_v47 = vsub.f32 %v15497_v10, %v5408_v44 }
 0xc61   : > { %v15400_v51 = vand.u32 4294901760, %v4689_v63  ;;  %v15402_v0 = vand.u32 4294901760, %v4714_v24  ;;  %5107 = vmatpush.msrb.mxu1 %v15300_v20  ;;  %v5175_v20 = vsub.f32 %v15381_v40, %v5174_v5  ;;  %v15550_v24 = vsub.f32 %v4621_v61, %v15543_v3 }
 0xc62   : > { %5043 = vmatpush.msrb.mxu3 %v15324_v55  ;;  %5080 = vmatpush.msrb.mxu0 %v4970_v19  ;;  %v5410_v60 = vand.u32 4294901760, %v5409_v47  ;;  %v4623_v47 = vld [vmem:[%s14925_s5 + $0x130] sm:$0xff] }
 0xc63   : > { %v15416_v27 = vsub.f32 %v4689_v63, %v15400_v51  ;;  %4716 = vmatmul.f32.vlgmr.msrb.gmra.mxu2 %v15402_v0  ;;  %4769 = vmatmul.f32.gmra.mxu3 %v15400_v51  ;;  %v5176_v6 = vand.u32 4294901760, %v5175_v20  ;;  %v4589_v63 = vld [vmem:[%s14925_s5 + $0x20] sm:$0xff] }
 0xc64   : > { %5109 = vmatpush.msrb.mxu1 %v15307_v23  ;;  %5003 = vmatpush.msrb.mxu2 %v15305_v56  ;;  %v5181_v56 = vsub.f32 %v15396_v1, %v5180_v22  ;;  %v5192_v23 = vand.u32 4294901760, %v15427_v34 }
 0xc65   : > { %4804 = vmatmul.f32.gmra.mxu0 %v15416_v27  ;;  %v15431_v28 = vand.u32 4294901760, %v15416_v27 }
 0xc66   : > { %5084 = vmatpush.msrb.mxu0 %v4976_v16  ;;  %5111 = vmatpush.msrb.mxu1 %v15313_v18  ;;  %v5187_v18 = vsub.f32 %v15411_v25, %v5186_v2  ;;  %v5182_v8 = vand.u32 4294901760, %v5181_v56  ;;  %v5193_v19 = vsub.f32 %v15427_v34, %v5192_v23  ;;  %v4604_v16 = vld [vmem:[%s14925_s5 + $0x98] sm:$0xff] }
 0xc67   : > { %4837 = vmatmul.f32.gmra.mxu1 %v15431_v28  ;;  %v4722_v29 = vsub.f32 %v15416_v27, %v15431_v28  ;;  %5006 = vmatpush.msrb.mxu2 %v15316_v45  ;;  %v15477_v38 = vand.u32 4294901760, %v4604_v16 }
 0xc68   : > { %5113 = vmatpush.msrb.mxu1 %v15324_v55  ;;  %v5188_v45 = vand.u32 4294901760, %v5187_v18  ;;  %v5194_v55 = vand.u32 4294901760, %v5193_v19  ;;  %v4638_v18 = vld [vmem:[%s14925_s5 + $0x1a8] sm:$0xff] }
 0xc69   : > { %v15448_v31 = vand.u32 4294901760, %v4722_v29  ;;  %5009 = vmatpush.msrb.mxu2 %v15327_v30  ;;  %v4636_v30 = vld [vmem:[%s14925_s5 + $0x198] sm:$0xff]  ;;  %v15490_v42 = vsub.f32 %v4604_v16, %v15477_v38  ;;  %v4622_v19 = vld [vmem:[%s14925_s5 + $0x128] sm:$0xff] }
 0xc6a   : > { %v15462_v32 = vand.u32 4294901760, %v4636_v30 }
 0xc6b   : > { %4724 = vmatmul.f32.gmra.mxu2 %v15448_v31  ;;  %4899 = vmatmul.f32.vlgmr.msra.gmra.mxu3 %v15359_v15  ;;  %v5402_v58 = vand.u32 4294901760, %v15490_v42 }
 0xc6c   : > { %5012 = vmatpush.msrb.mxu2 %v15335_v12  ;;  %5177 = vmatpush.msra.mxu3 %v5176_v6  ;;  %v4620_v12 = vld [vmem:[%s14925_s5 + $0x118] sm:$0xff]  ;;  %v15468_v7 = vsub.f32 %v4636_v30, %v15462_v32  ;;  %v4606_v30 = vld [vmem:[%s14925_s5 + $0xa8] sm:$0xff] }
 0xc6d   : > { %4932 = vmatmul.f32.vlgmr.msra.gmra.mxu0 %v15402_v0  ;;  %v15470_v13 = vand.u32 4294901760, %v4620_v12  ;;  %v5403_v49 = vsub.f32 %v15490_v42, %v5402_v58 }
 0xc6e   : > { %5183 = vmatpush.msra.mxu3 %v5182_v8  ;;  %5219 = vmatpush.msra.mxu0 %v15381_v40  ;;  %v5390_v14 = vand.u32 4294901760, %v15468_v7  ;;  %v4605_v40 = vld [vmem:[%s14925_s5 + $0xa0] sm:$0xff]  ;;  %v15598_v8 = vand.u32 4294901760, %v4638_v18 }
 0xc6f   : > { %4981 = vmatmul.f32.vlgmr.msra.gmra.mxu1 %v15359_v15  ;;  %v15480_v11 = vsub.f32 %v4620_v12, %v15470_v13  ;;  %v5404_v9 = vand.u32 4294901760, %v5403_v49  ;;  %v15552_v57 = vand.u32 4294901760, %v4605_v40  ;;  %v4639_v49 = vld [vmem:[%s14925_s5 + $0x1b0] sm:$0xff] }
 0xc70   : > { %5189 = vmatpush.msra.mxu3 %v5188_v45  ;;  %5222 = vmatpush.msra.mxu0 %v15396_v1  ;;  %v5391_v46 = vsub.f32 %v15468_v7, %v5390_v14  ;;  %v15604_v45 = vsub.f32 %v4638_v18, %v15598_v8  ;;  %v4608_v18 = vld [vmem:[%s14925_s5 + $0xb8] sm:$0xff] }
 0xc71   : > { %5253 = vmatpush.msra.mxu1 %v15368_v62  ;;  %v5396_v33 = vand.u32 4294901760, %v15480_v11  ;;  %v15559_v1 = vsub.f32 %v4605_v40, %v15552_v57 }
 0xc72   : > { %5195 = vmatpush.msra.mxu3 %v5194_v55  ;;  %5225 = vmatpush.msra.mxu0 %v15411_v25  ;;  %v5392_v43 = vand.u32 4294901760, %v5391_v46  ;;  %v15606_v55 = vand.u32 4294901760, %v4622_v19 }
 0xc73   : > { %4870 = vmatmul.f32.vlgmr.msra.gmra.mxu2 %v15359_v15  ;;  %4903 = vmatmul.f32.gmra.mxu3 %v15400_v51  ;;  %v5397_v35 = vsub.f32 %v15480_v11, %v5396_v33 }
 0xc74   : > { %5255 = vmatpush.msra.mxu1 %v15383_v50  ;;  %5136 = vmatpush.msra.mxu2 %v15368_v62  ;;  %v15616_v12 = vsub.f32 %v4622_v19, %v15606_v55 }
 0xc75   : > { %4940 = vmatmul.f32.gmra.mxu0 %v15448_v31  ;;  %v5398_v59 = vand.u32 4294901760, %v5397_v35 }
 0xc76   : > { %5228 = vmatpush.msra.mxu0 %v15427_v34  ;;  %5257 = vmatpush.msra.mxu1 %v15398_v21 }
 0xc77   : > { %4985 = vmatmul.f32.gmra.mxu1 %v15400_v51  ;;  %5138 = vmatpush.msra.mxu2 %v15383_v50 }
 0xc78   : > { %5259 = vmatpush.msra.mxu1 %v15413_v26 }
 0xc79   : > { %5140 = vmatpush.msra.mxu2 %v15398_v21 }
 0xc7b   : > { %4874 = vmatmul.f32.gmra.mxu2 %v15400_v51  ;;  %5047 = vmatmul.f32.vlgmr.msrb.gmra.mxu3 %v15372_v48 }
 0xc7c   : > { %5142 = vmatpush.msra.mxu2 %v15413_v26  ;;  %5323 = vmatpush.msrb.mxu3 %v15368_v62  ;;  %v15541_v62 = vsub.f32 %v4637_v36, %v15535_v52  ;;  %v4607_v36 = vld [vmem:[%s14925_s5 + $0xb0] sm:$0xff] }
 0xc7d   : > { %5086 = vmatmul.f32.vlgmr.msrb.gmra.mxu0 %v15359_v15 }
 0xc7e   : > { %5325 = vmatpush.msrb.mxu3 %v15383_v50  ;;  %5352 = vmatpush.msrb.mxu0 %v15462_v32  ;;  %v5606_v50 = vand.u32 4294901760, %v15541_v62 }
 0xc7f   : > { %5115 = vmatmul.f32.vlgmr.msrb.gmra.mxu1 %v15359_v15 }
 0xc80   : > { %5327 = vmatpush.msrb.mxu3 %v15398_v21  ;;  %5354 = vmatpush.msrb.mxu0 %v15470_v13  ;;  %v15561_v21 = vand.u32 4294901760, %v4589_v63  ;;  %v5607_v17 = vsub.f32 %v15541_v62, %v5606_v50 }
 0xc81   : > { %5393 = vmatpush.msrb.mxu1 %v5392_v43 }
 0xc82   : > { %5329 = vmatpush.msrb.mxu3 %v15413_v26  ;;  %5356 = vmatpush.msrb.mxu0 %v15477_v38  ;;  %v15572_v25 = vsub.f32 %v4589_v63, %v15561_v21 }
 0xc83   : > { %5015 = vmatmul.f32.vlgmr.msrb.gmra.mxu2 %v15363_v37  ;;  %5053 = vmatmul.f32.gmra.mxu3 %v15431_v28 }
 0xc84   : > { %5399 = vmatpush.msrb.mxu1 %v5398_v59  ;;  %5288 = vmatpush.msrb.mxu2 %v5174_v5  ;;  %v5612_v5 = vand.u32 4294901760, %v15550_v24  ;;  %v5624_v20 = vand.u32 4294901760, %v15572_v25  ;;  %v15671_v59 = vand.u32 4294901760, %v4639_v49 }
 0xc85   : > { %5090 = vmatmul.f32.gmra.mxu0 %v15400_v51 }
 0xc86   : > { %5358 = vmatpush.msrb.mxu0 %v15487_v41  ;;  %5405 = vmatpush.msrb.mxu1 %v5404_v9  ;;  %v5613_v26 = vsub.f32 %v15550_v24, %v5612_v5  ;;  %v15677_v9 = vsub.f32 %v4639_v49, %v15671_v59 }
 0xc87   : > { %5119 = vmatmul.f32.gmra.mxu1 %v15400_v51  ;;  %5292 = vmatpush.msrb.mxu2 %v5180_v22  ;;  %v5618_v22 = vand.u32 4294901760, %v15559_v1 }
 0xc88   : > { %5411 = vmatpush.msrb.mxu1 %v5410_v60  ;;  %v5614_v56 = vand.u32 4294901760, %v5613_v26  ;;  %v15679_v60 = vand.u32 4294901760, %v4623_v47 }
 0xc89   : > { %5296 = vmatpush.msrb.mxu2 %v5186_v2  ;;  %v5608_v2 = vand.u32 4294901760, %v5607_v17  ;;  %v5619_v34 = vsub.f32 %v15559_v1, %v5618_v22 }
 0xc8a   : > { %v15686_v61 = vsub.f32 %v4623_v47, %v15679_v60 }
 0xc8b   : > { %5020 = vmatmul.f32.gmra.mxu2 %v15416_v27  ;;  %5197 = vmatmul.f32.vlgmr.msra.gmra.mxu3 %v15359_v15  ;;  %v5620_v29 = vand.u32 4294901760, %v5619_v34  ;;  %v4640_v34 = vld [vmem:[%s14925_s5 + $0x1b8] sm:$0xff] }
 0xc8c   : > { %5300 = vmatpush.msrb.mxu2 %v5192_v23  ;;  %5469 = vmatpush.msra.mxu3 %v15462_v32  ;;  %v5625_v23 = vsub.f32 %v15572_v25, %v5624_v20  ;;  %v6044_v40 = vand.u32 4294901760, %v15686_v61 }
 0xc8d   : > { %5231 = vmatmul.f32.vlgmr.msra.gmra.mxu0 %v15363_v37 }
 0xc8e   : > { %5471 = vmatpush.msra.mxu3 %v15470_v13  ;;  %5504 = vmatpush.msra.mxu0 %v5390_v14  ;;  %v5626_v6 = vand.u32 4294901760, %v5625_v23  ;;  %v4624_v23 = vld [vmem:[%s14925_s5 + $0x138] sm:$0xff] }
 0xc8f   : > { %5263 = vmatmul.f32.vlgmr.msra.gmra.mxu1 %v15372_v48 }
 0xc90   : > { %5473 = vmatpush.msra.mxu3 %v15477_v38  ;;  %5508 = vmatpush.msra.mxu0 %v5396_v33 }
 0xc91   : > { %5539 = vmatpush.msra.mxu1 %v15462_v32  ;;  %v15613_v32 = vand.u32 4294901760, %v4606_v30 }
 0xc92   : > { %5475 = vmatpush.msra.mxu3 %v15487_v41  ;;  %5512 = vmatpush.msra.mxu0 %v5402_v58 }
 0xc93   : > { %5148 = vmatmul.f32.vlgmr.msra.gmra.mxu2 %v15402_v0  ;;  %5201 = vmatmul.f32.gmra.mxu3 %v15400_v51 }
 0xc94   : > { %5541 = vmatpush.msra.mxu1 %v15470_v13  ;;  %5435 = vmatpush.msra.mxu2 %v15468_v7  ;;  %v5822_v7 = vand.u32 4294901760, %v15604_v45  ;;  %v4590_v13 = vld [vmem:[%s14925_s5 + $0x28] sm:$0xff] }
 0xc95   : > { %5236 = vmatmul.f32.gmra.mxu0 %v15416_v27  ;;  %v15623_v16 = vand.u32 4294901760, %v4590_v13 }
 0xc96   : > { %5516 = vmatpush.msra.mxu0 %v5408_v44  ;;  %5543 = vmatpush.msra.mxu1 %v15477_v38  ;;  %v15626_v38 = vsub.f32 %v4606_v30, %v15613_v32  ;;  %v5823_v39 = vsub.f32 %v15604_v45, %v5822_v7 }
 0xc97   : > { %5269 = vmatmul.f32.gmra.mxu1 %v15431_v28  ;;  %5438 = vmatpush.msra.mxu2 %v15480_v11  ;;  %v5828_v11 = vand.u32 4294901760, %v15616_v12  ;;  %v15633_v14 = vsub.f32 %v4590_v13, %v15623_v16 }
 0xc98   : > { %5545 = vmatpush.msra.mxu1 %v15487_v41  ;;  %v5834_v41 = vand.u32 4294901760, %v15626_v38 }
 0xc99   : > { %5441 = vmatpush.msra.mxu2 %v15490_v42  ;;  %v5829_v42 = vsub.f32 %v15616_v12, %v5828_v11  ;;  %v5840_v33 = vand.u32 4294901760, %v15633_v14 }
 0xc9a   : > { %v5835_v46 = vsub.f32 %v15626_v38, %v5834_v41 }
 0xc9b   : > { %5156 = vmatmul.f32.gmra.mxu2 %v15448_v31  ;;  %5331 = vmatmul.f32.vlgmr.msrb.gmra.mxu3 %v15359_v15  ;;  %v5830_v58 = vand.u32 4294901760, %v5829_v42  ;;  %v5841_v35 = vsub.f32 %v15633_v14, %v5840_v33 }
 0xc9c   : > { %5444 = vmatpush.msra.mxu2 %v15497_v10  ;;  %5609 = vmatpush.msrb.mxu3 %v5608_v2  ;;  %v5824_v10 = vand.u32 4294901760, %v5823_v39  ;;  %v5836_v44 = vand.u32 4294901760, %v5835_v46 }
 0xc9d   : > { %5364 = vmatmul.f32.vlgmr.msrb.gmra.mxu0 %v15402_v0  ;;  %v5842_v43 = vand.u32 4294901760, %v5841_v35 }
 0xc9e   : > { %5615 = vmatpush.msrb.mxu3 %v5614_v56  ;;  %5651 = vmatpush.msrb.mxu0 %v15541_v62  ;;  %v15688_v62 = vand.u32 4294901760, %v4607_v36  ;;  %v15734_v56 = vand.u32 4294901760, %v4640_v34 }
 0xc9f   : > { %5413 = vmatmul.f32.vlgmr.msrb.gmra.mxu1 %v15359_v15 }
 0xca0   : > { %5621 = vmatpush.msrb.mxu3 %v5620_v29  ;;  %5654 = vmatpush.msrb.mxu0 %v15550_v24  ;;  %v15740_v29 = vsub.f32 %v4640_v34, %v15734_v56 }
 0xca1   : > { %5685 = vmatpush.msrb.mxu1 %v15535_v52 }
 0xca2   : > { %5627 = vmatpush.msrb.mxu3 %v5626_v6  ;;  %5657 = vmatpush.msrb.mxu0 %v15559_v1  ;;  %v6045_v1 = vsub.f32 %v15686_v61, %v6044_v40  ;;  %v15742_v6 = vand.u32 4294901760, %v4624_v23 }
 0xca3   : > { %5302 = vmatmul.f32.vlgmr.msrb.gmra.mxu2 %v15359_v15  ;;  %5335 = vmatmul.f32.gmra.mxu3 %v15400_v51 }
 0xca4   : > { %5687 = vmatpush.msrb.mxu1 %v15543_v3  ;;  %5568 = vmatpush.msrb.mxu2 %v15535_v52  ;;  %v15752_v19 = vsub.f32 %v4624_v23, %v15742_v6 }
 0xca5   : > { %5372 = vmatmul.f32.gmra.mxu0 %v15448_v31 }
 0xca6   : > { %5660 = vmatpush.msrb.mxu0 %v15572_v25  ;;  %5689 = vmatpush.msrb.mxu1 %v15552_v57  ;;  %v6046_v25 = vand.u32 4294901760, %v6045_v1 }
 0xca7   : > { %5417 = vmatmul.f32.gmra.mxu1 %v15400_v51  ;;  %5570 = vmatpush.msrb.mxu2 %v15543_v3 }
 0xca8   : > { %5691 = vmatpush.msrb.mxu1 %v15561_v21 }
 0xca9   : > { %5572 = vmatpush.msrb.mxu2 %v15552_v57 }
 0xcab   : > { %5306 = vmatmul.f32.gmra.mxu2 %v15400_v51  ;;  %5479 = vmatmul.f32.vlgmr.msra.gmra.mxu3 %v15372_v48 }
 0xcac   : > { %5574 = vmatpush.msrb.mxu2 %v15561_v21  ;;  %5755 = vmatpush.msra.mxu3 %v15535_v52  ;;  %v6038_v52 = vand.u32 4294901760, %v15677_v9 }
 0xcad   : > { %5518 = vmatmul.f32.vlgmr.msra.gmra.mxu0 %v15359_v15 }
 0xcae   : > { %5757 = vmatpush.msra.mxu3 %v15543_v3  ;;  %5784 = vmatpush.msra.mxu0 %v15598_v8  ;;  %v4591_v3 = vld [vmem:[%s14925_s5 + $0x30] sm:$0xff] }
 0xcaf   : > { %5547 = vmatmul.f32.vlgmr.msra.gmra.mxu1 %v15359_v15  ;;  %v15697_v24 = vand.u32 4294901760, %v4591_v3 }
 0xcb0   : > { %5759 = vmatpush.msra.mxu3 %v15552_v57  ;;  %5786 = vmatpush.msra.mxu0 %v15606_v55  ;;  %v6039_v57 = vsub.f32 %v15677_v9, %v6038_v52 }
 0xcb1   : > { %5825 = vmatpush.msra.mxu1 %v5824_v10  ;;  %v15792_v10 = vld [vmem:[%s14931_s19] sm:$0xff] }
 0xcb2   : > { %5761 = vmatpush.msra.mxu3 %v15561_v21  ;;  %5788 = vmatpush.msra.mxu0 %v15613_v32  ;;  %v6040_v17 = vand.u32 4294901760, %v6039_v57 }
 0xcb3   : > { %5447 = vmatmul.f32.vlgmr.msra.gmra.mxu2 %v15363_v37  ;;  %5485 = vmatmul.f32.gmra.mxu3 %v15431_v28 }
 0xcb4   : > { %5831 = vmatpush.msra.mxu1 %v5830_v58  ;;  %5720 = vmatpush.msra.mxu2 %v5606_v50  ;;  %v15695_v50 = vsub.f32 %v4607_v36, %v15688_v62 }
 0xcb5   : > { %5522 = vmatmul.f32.gmra.mxu0 %v15400_v51 }
 0xcb6   : > { %5790 = vmatpush.msra.mxu0 %v15623_v16  ;;  %5837 = vmatpush.msra.mxu1 %v5836_v44  ;;  %v6050_v63 = vand.u32 4294901760, %v15695_v50 }
 0xcb7   : > { %5551 = vmatmul.f32.gmra.mxu1 %v15400_v51  ;;  %5724 = vmatpush.msra.mxu2 %v5612_v5  ;;  %v15708_v5 = vsub.f32 %v4591_v3, %v15697_v24  ;;  %v4641_v3 = vld [vmem:[%s14925_s5 + $0x1c0] sm:$0xff] }
 0xcb8   : > { %5843 = vmatpush.msra.mxu1 %v5842_v43  ;;  %v4653_v43 = vperm.slane %v15792_v10, 0 }
 0xcb9   : > { %5728 = vmatpush.msra.mxu2 %v5618_v22  ;;  %v6056_v21 = vand.u32 4294901760, %v15708_v5  ;;  %v6051_v22 = vsub.f32 %v15695_v50, %v6050_v63 }
 0xcbb   : > { %5452 = vmatmul.f32.gmra.mxu2 %v15416_v27  ;;  %5629 = vmatmul.f32.vlgmr.msrb.gmra.mxu3 %v15359_v15  ;;  %v6057_v26 = vsub.f32 %v15708_v5, %v6056_v21 }
 0xcbc   : > { %5732 = vmatpush.msra.mxu2 %v5624_v20  ;;  %5901 = vmatpush.msrb.mxu3 %v15598_v8  ;;  %v6052_v20 = vand.u32 4294901760, %v6051_v22 }
 0xcbd   : > { %5663 = vmatmul.f32.vlgmr.msrb.gmra.mxu0 %v15363_v37  ;;  %v6058_v2 = vand.u32 4294901760, %v6057_v26 }
 0xcbe   : > { %5903 = vmatpush.msrb.mxu3 %v15606_v55  ;;  %5936 = vmatpush.msrb.mxu0 %v5822_v7 }
 0xcbf   : > { %5695 = vmatmul.f32.vlgmr.msrb.gmra.mxu1 %v15372_v48 }
 0xcc0   : > { %5905 = vmatpush.msrb.mxu3 %v15613_v32  ;;  %5940 = vmatpush.msrb.mxu0 %v5828_v11 }
 0xcc1   : > { %5971 = vmatpush.msrb.mxu1 %v15598_v8  ;;  %v15749_v8 = vand.u32 4294901760, %v4608_v18 }
 0xcc2   : > { %5907 = vmatpush.msrb.mxu3 %v15623_v16  ;;  %5944 = vmatpush.msrb.mxu0 %v5834_v41 }
 0xcc3   : > { %5580 = vmatmul.f32.vlgmr.msrb.gmra.mxu2 %v15402_v0  ;;  %5633 = vmatmul.f32.gmra.mxu3 %v15400_v51 }
 0xcc4   : > { %5973 = vmatpush.msrb.mxu1 %v15606_v55  ;;  %5867 = vmatpush.msrb.mxu2 %v15604_v45  ;;  %v6254_v45 = vand.u32 4294901760, %v15740_v29  ;;  %v4592_v55 = vld [vmem:[%s14925_s5 + $0x38] sm:$0xff] }
 0xcc5   : > { %5668 = vmatmul.f32.gmra.mxu0 %v15416_v27  ;;  %v15759_v30 = vand.u32 4294901760, %v4592_v55 }
 0xcc6   : > { %5948 = vmatpush.msrb.mxu0 %v5840_v33  ;;  %5975 = vmatpush.msrb.mxu1 %v15613_v32  ;;  %v15762_v32 = vsub.f32 %v4608_v18, %v15749_v8  ;;  %v6255_v13 = vsub.f32 %v15740_v29, %v6254_v45 }
 0xcc7   : > { %5701 = vmatmul.f32.gmra.mxu1 %v15431_v28  ;;  %5870 = vmatpush.msrb.mxu2 %v15616_v12  ;;  %v6260_v12 = vand.u32 4294901760, %v15752_v19  ;;  %v15769_v7 = vsub.f32 %v4592_v55, %v15759_v30 }
 0xcc8   : > { %5977 = vmatpush.msrb.mxu1 %v15623_v16  ;;  %v6256_v41 = vand.u32 4294901760, %v6255_v13 }
 0xcc9   : > { %5873 = vmatpush.msrb.mxu2 %v15626_v38  ;;  %v6266_v38 = vand.u32 4294901760, %v15762_v32  ;;  %v6272_v39 = vand.u32 4294901760, %v15769_v7 }
 0xccb   : > { %5588 = vmatmul.f32.gmra.mxu2 %v15448_v31  ;;  %5763 = vmatmul.f32.vlgmr.msra.gmra.mxu3 %v15359_v15  ;;  %v6267_v33 = vsub.f32 %v15762_v32, %v6266_v38  ;;  %v6273_v58 = vsub.f32 %v15769_v7, %v6272_v39 }
 0xccc   : > { %5876 = vmatpush.msrb.mxu2 %v15633_v14  ;;  %6041 = vmatpush.msra.mxu3 %v6040_v17  ;;  %v6261_v14 = vsub.f32 %v15752_v19, %v6260_v12  ;;  %v4609_v17 = vld [vmem:[%s14925_s5 + $0xc0] sm:$0xff] }
 0xccd   : > { %5796 = vmatmul.f32.vlgmr.msra.gmra.mxu0 %v15402_v0  ;;  %v6268_v44 = vand.u32 4294901760, %v6267_v33  ;;  %v15844_v26 = vand.u32 4294901760, %v4609_v17 }
 0xcce   : > { %6047 = vmatpush.msra.mxu3 %v6046_v25  ;;  %6083 = vmatpush.msra.mxu0 %v15677_v9  ;;  %v6262_v46 = vand.u32 4294901760, %v6261_v14 }
 0xccf   : > { %5845 = vmatmul.f32.vlgmr.msra.gmra.mxu1 %v15359_v15  ;;  %v15855_v18 = vsub.f32 %v4609_v17, %v15844_v26  ;;  %v4594_v17 = vld [vmem:[%s14925_s5 + $0x48] sm:$0xff] }
 0xcd0   : > { %6053 = vmatpush.msra.mxu3 %v6052_v20  ;;  %6086 = vmatpush.msra.mxu0 %v15686_v61  ;;  %v15823_v61 = vand.u32 4294901760, %v4641_v3 }
 0xcd1   : > { %6117 = vmatpush.msra.mxu1 %v15671_v59  ;;  %v6482_v13 = vand.u32 4294901760, %v15855_v18 }
 0xcd2   : > { %6059 = vmatpush.msra.mxu3 %v6058_v2  ;;  %6089 = vmatpush.msra.mxu0 %v15695_v50  ;;  %v4625_v50 = vld [vmem:[%s14925_s5 + $0x140] sm:$0xff]  ;;  %v15831_v1 = vsub.f32 %v4641_v3, %v15823_v61 }
 0xcd3   : > { %5734 = vmatmul.f32.vlgmr.msra.gmra.mxu2 %v15359_v15  ;;  %5767 = vmatmul.f32.gmra.mxu3 %v15400_v51  ;;  %v4593_v2 = vld [vmem:[%s14925_s5 + $0x40] sm:$0xff] }
 0xcd4   : > { %6119 = vmatpush.msra.mxu1 %v15679_v60  ;;  %6000 = vmatpush.msra.mxu2 %v15671_v59  ;;  %v6470_v22 = vand.u32 4294901760, %v15831_v1 }
 0xcd5   : > { %5804 = vmatmul.f32.gmra.mxu0 %v15448_v31 }
 0xcd6   : > { %6092 = vmatpush.msra.mxu0 %v15708_v5  ;;  %6121 = vmatpush.msra.mxu1 %v15688_v62  ;;  %v15833_v5 = vand.u32 4294901760, %v4625_v50 }
 0xcd7   : > { %5849 = vmatmul.f32.gmra.mxu1 %v15400_v51  ;;  %6002 = vmatpush.msra.mxu2 %v15679_v60 }
 0xcd8   : > { %6123 = vmatpush.msra.mxu1 %v15697_v24  ;;  %v15842_v25 = vsub.f32 %v4625_v50, %v15833_v5 }
 0xcd9   : > { %6004 = vmatpush.msra.mxu2 %v15688_v62 }
 0xcda   : > { %v4800_v16 = vpop.f32.mrf.mxu0  ;;  %v6476_v23 = vand.u32 4294901760, %v15842_v25 }
 0xcdb   : > { %5738 = vmatmul.f32.gmra.mxu2 %v15400_v51  ;;  %5911 = vmatmul.f32.vlgmr.msrb.gmra.mxu3 %v15372_v48 }
 0xcdc   : > { %v4832_v11 = vpop.f32.mrf.mxu1  ;;  %6006 = vmatpush.msra.mxu2 %v15697_v24  ;;  %6187 = vmatpush.msrb.mxu3 %v15671_v59  ;;  %v6274_v59 = vand.u32 4294901760, %v6273_v58 }
 0xcdd   : > { %5950 = vmatmul.f32.vlgmr.msrb.gmra.mxu0 %v15359_v15 }
 0xcde   : > { %v4766_v42 = vpop.f32.mrf.mxu3  ;;  %6189 = vmatpush.msrb.mxu3 %v15679_v60  ;;  %6216 = vmatpush.msrb.mxu0 %v15734_v56 }
 0xcdf   : > { %5979 = vmatmul.f32.vlgmr.msrb.gmra.mxu1 %v15359_v15 }
 0xce0   : > { %6191 = vmatpush.msrb.mxu3 %v15688_v62  ;;  %6218 = vmatpush.msrb.mxu0 %v15742_v6 }
 0xce1   : > { %6257 = vmatpush.msrb.mxu1 %v6256_v41 }
 0xce2   : > { %v4805_v35 = vpop.f32.mrf.mxu0  ;;  %6193 = vmatpush.msrb.mxu3 %v15697_v24  ;;  %6220 = vmatpush.msrb.mxu0 %v15749_v8 }
 0xce3   : > { %5879 = vmatmul.f32.vlgmr.msrb.gmra.mxu2 %v15363_v37  ;;  %5917 = vmatmul.f32.gmra.mxu3 %v15431_v28 }
 0xce4   : > { %v4838_v49 = vpop.f32.mrf.mxu1  ;;  %6263 = vmatpush.msrb.mxu1 %v6262_v46  ;;  %6152 = vmatpush.msrb.mxu2 %v6038_v52 }
 0xce5   : > { %5954 = vmatmul.f32.gmra.mxu0 %v15400_v51 }
 0xce6   : > { %v4717_v47 = vpop.f32.mrf.mxu2  ;;  %v4770_v60 = vpop.f32.mrf.mxu3  ;;  %6222 = vmatpush.msrb.mxu0 %v15759_v30  ;;  %6269 = vmatpush.msrb.mxu1 %v6268_v44 }
 0xce7   : > { %v4718_v36 = vadd.f32 %v4717_v47, %v4653_v43  ;;  %5983 = vmatmul.f32.gmra.mxu1 %v15400_v51  ;;  %6156 = vmatpush.msrb.mxu2 %v6044_v40 }
 0xce8   : > { %6275 = vmatpush.msrb.mxu1 %v6274_v59  ;;  %v4642_v59 = vld [vmem:[%s14925_s5 + $0x1c8] sm:$0xff] }
 0xce9   : > { %v4767_v62 = vadd.f32 %v4766_v42, %v4718_v36  ;;  %6160 = vmatpush.msrb.mxu2 %v6050_v63  ;;  %v4626_v36 = vld [vmem:[%s14925_s5 + $0x148] sm:$0xff] }
 0xcea   : > { %v15813_v9 = vpop.f32.mrf.mxu0  ;;  %v15916_v3 = vand.u32 4294901760, %v4626_v36 }
 0xceb   : > { %5884 = vmatmul.f32.gmra.mxu2 %v15416_v27  ;;  %6061 = vmatmul.f32.vlgmr.msra.gmra.mxu3 %v15359_v15  ;;  %v4801_v52 = vadd.f32 %v4800_v16, %v4767_v62 }
 0xcec   : > { %v15818_v24 = vpop.f32.mrf.mxu1  ;;  %6164 = vmatpush.msrb.mxu2 %v6056_v21  ;;  %6333 = vmatpush.msra.mxu3 %v15734_v56 }
 0xced   : > { %6095 = vmatmul.f32.vlgmr.msra.gmra.mxu0 %v15363_v37  ;;  %v4833_v40 = vadd.f32 %v4832_v11, %v4801_v52 }
 0xcee   : > { %v4725_v57 = vpop.f32.mrf.mxu2  ;;  %v4900_v63 = vpop.f32.mrf.mxu3  ;;  %6335 = vmatpush.msra.mxu3 %v15742_v6  ;;  %6368 = vmatpush.msra.mxu0 %v6254_v45  ;;  %v15857_v45 = vand.u32 4294901760, %v4593_v2 }
 0xcef   : > { %v4726_v21 = vadd.f32 %v4725_v57, %v4653_v43  ;;  %6127 = vmatmul.f32.vlgmr.msra.gmra.mxu1 %v15372_v48  ;;  %v15928_v57 = vsub.f32 %v4626_v36, %v15916_v3 }
 0xcf0   : > { %6337 = vmatpush.msra.mxu3 %v15749_v8  ;;  %6372 = vmatpush.msra.mxu0 %v6260_v12  ;;  %v6471_v12 = vsub.f32 %v15831_v1, %v6470_v22  ;;  %v15870_v16 = vsub.f32 %v4593_v2, %v15857_v45 }
 0xcf1   : > { %v4771_v20 = vadd.f32 %v4770_v60, %v4726_v21  ;;  %6403 = vmatpush.msra.mxu1 %v15734_v56 }
 0xcf2   : > { %v15848_v34 = vpop.f32.mrf.mxu0  ;;  %6339 = vmatpush.msra.mxu3 %v15759_v30  ;;  %6376 = vmatpush.msra.mxu0 %v6266_v38  ;;  %v6472_v42 = vand.u32 4294901760, %v6471_v12 }
 0xcf3   : > { %6012 = vmatmul.f32.vlgmr.msra.gmra.mxu2 %v15402_v0  ;;  %6065 = vmatmul.f32.gmra.mxu3 %v15400_v51  ;;  %v4806_v56 = vadd.f32 %v4805_v35, %v4771_v20  ;;  %v4654_v35 = vperm.slane %v15792_v10, 1 }
 0xcf4   : > { %v15861_v55 = vpop.f32.mrf.mxu1  ;;  %6405 = vmatpush.msra.mxu1 %v15742_v6  ;;  %6299 = vmatpush.msra.mxu2 %v15740_v29  ;;  %v6477_v29 = vsub.f32 %v15842_v25, %v6476_v23  ;;  %v6488_v6 = vand.u32 4294901760, %v15870_v16 }
 0xcf5   : > { %6100 = vmatmul.f32.gmra.mxu0 %v15416_v27  ;;  %v4839_v38 = vadd.f32 %v4838_v49, %v4806_v56  ;;  %v4934_v47 = vadd.f32 %v15813_v9, %v4654_v35  ;;  %v4610_v9 = vld [vmem:[%s14925_s5 + $0xc8] sm:$0xff]  ;;  %v15936_v56 = vand.u32 4294901760, %v4594_v17 }
 0xcf6   : > { %v4871_v11 = vpop.f32.mrf.mxu2  ;;  %v4904_v14 = vpop.f32.mrf.mxu3  ;;  %6380 = vmatpush.msra.mxu0 %v6272_v39  ;;  %6407 = vmatpush.msra.mxu1 %v15749_v8  ;;  %v6483_v39 = vsub.f32 %v15855_v18, %v6482_v13  ;;  %v6478_v46 = vand.u32 4294901760, %v6477_v29  ;;  %v6489_v58 = vsub.f32 %v15870_v16, %v6488_v6  ;;  %v15925_v50 = vand.u32 4294901760, %v4610_v9 }
 0xcf7   : > { %v4872_v41 = vadd.f32 %v4871_v11, %v4833_v40  ;;  %6133 = vmatmul.f32.gmra.mxu1 %v15431_v28  ;;  %6302 = vmatpush.msra.mxu2 %v15752_v19  ;;  %v15946_v11 = vsub.f32 %v4594_v17, %v15936_v56 }
 0xcf8   : > { %6409 = vmatpush.msra.mxu1 %v15759_v30  ;;  %v6484_v30 = vand.u32 4294901760, %v6483_v39  ;;  %v6490_v43 = vand.u32 4294901760, %v6489_v58  ;;  %v15939_v12 = vsub.f32 %v4610_v9, %v15925_v50 }
 0xcf9   : > { %v15886_v33 = vadd.f32 %v4900_v63, %v4872_v41  ;;  %6305 = vmatpush.msra.mxu2 %v15762_v32  ;;  %v4983_v63 = vadd.f32 %v15818_v24, %v4934_v47  ;;  %v6692_v24 = vand.u32 4294901760, %v15928_v57 }
 0xcfa   : > { %v5087_v8 = vpop.f32.mrf.mxu0  ;;  %v6698_v39 = vand.u32 4294901760, %v15939_v12 }
 0xcfb   : > { %6020 = vmatmul.f32.gmra.mxu2 %v15448_v31  ;;  %6195 = vmatmul.f32.vlgmr.msrb.gmra.mxu3 %v15359_v15 }
 0xcfc   : > { %v15894_v19 = vpop.f32.mrf.mxu1  ;;  %6308 = vmatpush.msra.mxu2 %v15769_v7  ;;  %6473 = vmatpush.msrb.mxu3 %v6472_v42  ;;  %v15903_v7 = vand.u32 4294901760, %v4642_v59 }
 0xcfd   : > { %6228 = vmatmul.f32.vlgmr.msrb.gmra.mxu0 %v15402_v0 }
 0xcfe   : > { %v4875_v32 = vpop.f32.mrf.mxu2  ;;  %v5048_v44 = vpop.f32.mrf.mxu3  ;;  %6479 = vmatpush.msrb.mxu3 %v6478_v46  ;;  %6515 = vmatpush.msrb.mxu0 %v15831_v1  ;;  %v15914_v52 = vsub.f32 %v4642_v59, %v15903_v7 }
 0xcff   : > { %v4876_v49 = vadd.f32 %v4875_v32, %v4839_v38  ;;  %6277 = vmatmul.f32.vlgmr.msrb.gmra.mxu1 %v15359_v15 }
 0xd00   : > { %6485 = vmatpush.msrb.mxu3 %v6484_v30  ;;  %6518 = vmatpush.msrb.mxu0 %v15842_v25  ;;  %v6686_v21 = vand.u32 4294901760, %v15914_v52  ;;  %v6704_v30 = vand.u32 4294901760, %v15946_v11 }
 0xd01   : > { %v15906_v60 = vadd.f32 %v4904_v14, %v4876_v49  ;;  %6549 = vmatpush.msrb.mxu1 %v15823_v61  ;;  %v4942_v14 = vadd.f32 %v15848_v34, %v4654_v35  ;;  %v6693_v34 = vsub.f32 %v15928_v57, %v6692_v24 }
 0xd02   : > { %v15910_v62 = vpop.f32.mrf.mxu0  ;;  %6491 = vmatpush.msrb.mxu3 %v6490_v43  ;;  %6521 = vmatpush.msrb.mxu0 %v15855_v18  ;;  %v6687_v41 = vsub.f32 %v15914_v52, %v6686_v21  ;;  %v4627_v18 = vld [vmem:[%s14925_s5 + $0x150] sm:$0xff] }
 0xd03   : > { %6166 = vmatmul.f32.vlgmr.msrb.gmra.mxu2 %v15359_v15  ;;  %6199 = vmatmul.f32.gmra.mxu3 %v15400_v51  ;;  %v4987_v35 = vadd.f32 %v15861_v55, %v4942_v14  ;;  %v6694_v55 = vand.u32 4294901760, %v6693_v34  ;;  %v4595_v34 = vld [vmem:[%s14925_s5 + $0x50] sm:$0xff] }
 0xd04   : > { %v15921_v40 = vpop.f32.mrf.mxu1  ;;  %6551 = vmatpush.msrb.mxu1 %v15833_v5  ;;  %6432 = vmatpush.msrb.mxu2 %v15823_v61 }
 0xd05   : > { %6236 = vmatmul.f32.gmra.mxu0 %v15448_v31 }
 0xd06   : > { %v5016_v20 = vpop.f32.mrf.mxu2  ;;  %v5054_v2 = vpop.f32.mrf.mxu3  ;;  %6524 = vmatpush.msrb.mxu0 %v15870_v16  ;;  %6553 = vmatpush.msrb.mxu1 %v15844_v26  ;;  %v16016_v16 = vand.u32 4294901760, %v4627_v18 }
 0xd07   : > { %v5017_v38 = vadd.f32 %v5016_v20, %v4983_v63  ;;  %6281 = vmatmul.f32.gmra.mxu1 %v15400_v51  ;;  %6434 = vmatpush.msrb.mxu2 %v15833_v5 }
 0xd08   : > { %6555 = vmatpush.msrb.mxu1 %v15857_v45 }
 0xd09   : > { %v5049_v29 = vadd.f32 %v5048_v44, %v5017_v38  ;;  %6436 = vmatpush.msrb.mxu2 %v15844_v26 }
 0xd0a   : > { %v5232_v42 = vpop.f32.mrf.mxu0 }
 0xd0b   : > { %v5088_v46 = vadd.f32 %v5087_v8, %v5049_v29  ;;  %6170 = vmatmul.f32.gmra.mxu2 %v15400_v51  ;;  %6343 = vmatmul.f32.vlgmr.msra.gmra.mxu3 %v15372_v48  ;;  %v6688_v8 = vand.u32 4294901760, %v6687_v41  ;;  %v4611_v41 = vld [vmem:[%s14925_s5 + $0xd0] sm:$0xff] }
 0xd0c   : > { %v5264_v58 = vpop.f32.mrf.mxu1  ;;  %6438 = vmatpush.msrb.mxu2 %v15857_v45  ;;  %6619 = vmatpush.msra.mxu3 %v15823_v61  ;;  %v6699_v61 = vsub.f32 %v15939_v12, %v6698_v39 }
 0xd0d   : > { %v15964_v32 = vadd.f32 %v15894_v19, %v5088_v46  ;;  %6382 = vmatmul.f32.vlgmr.msra.gmra.mxu0 %v15359_v15  ;;  %v6705_v19 = vsub.f32 %v15946_v11, %v6704_v30  ;;  %v16025_v46 = vsub.f32 %v4627_v18, %v16016_v16 }
 0xd0e   : > { %v5021_v44 = vpop.f32.mrf.mxu2  ;;  %v5198_v43 = vpop.f32.mrf.mxu3  ;;  %6621 = vmatpush.msra.mxu3 %v15833_v5  ;;  %6648 = vmatpush.msra.mxu0 %v15903_v7  ;;  %v6700_v47 = vand.u32 4294901760, %v6699_v61 }
 0xd0f   : > { %v5022_v49 = vadd.f32 %v5021_v44, %v4987_v35  ;;  %6411 = vmatmul.f32.vlgmr.msra.gmra.mxu1 %v15359_v15  ;;  %v6706_v63 = vand.u32 4294901760, %v6705_v19  ;;  %v16040_v44 = vand.u32 4294901760, %v4595_v34 }
 0xd10   : > { %6623 = vmatpush.msra.mxu3 %v15844_v26  ;;  %6650 = vmatpush.msra.mxu0 %v15916_v3  ;;  %v4655_v26 = vperm.slane %v15792_v10, 2 }
 0xd11   : > { %v5055_v59 = vadd.f32 %v5054_v2, %v5022_v49  ;;  %6689 = vmatpush.msra.mxu1 %v6688_v8  ;;  %v4643_v2 = vld [vmem:[%s14925_s5 + $0x1d0] sm:$0xff]  ;;  %v16053_v49 = vsub.f32 %v4595_v34, %v16040_v44 }
 0xd12   : > { %v5237_v5 = vpop.f32.mrf.mxu0  ;;  %6625 = vmatpush.msra.mxu3 %v15857_v45  ;;  %6652 = vmatpush.msra.mxu0 %v15925_v50  ;;  %v16006_v25 = vand.u32 4294901760, %v4643_v2 }
 0xd13   : > { %v5092_v36 = vadd.f32 %v15910_v62, %v5055_v59  ;;  %6311 = vmatmul.f32.vlgmr.msra.gmra.mxu2 %v15363_v37  ;;  %6349 = vmatmul.f32.gmra.mxu3 %v15431_v28 }
 0xd14   : > { %v5270_v9 = vpop.f32.mrf.mxu1  ;;  %6695 = vmatpush.msra.mxu1 %v6694_v55  ;;  %6584 = vmatpush.msra.mxu2 %v6470_v22  ;;  %v16014_v29 = vsub.f32 %v4643_v2, %v16006_v25 }
 0xd15   : > { %v15987_v17 = vadd.f32 %v15921_v40, %v5092_v36  ;;  %6386 = vmatmul.f32.gmra.mxu0 %v15400_v51 }
 0xd16   : > { %v5149_v45 = vpop.f32.mrf.mxu2  ;;  %v5202_v62 = vpop.f32.mrf.mxu3  ;;  %6654 = vmatpush.msra.mxu0 %v15936_v56  ;;  %6701 = vmatpush.msra.mxu1 %v6700_v47 }
 0xd17   : > { %v5150_v20 = vadd.f32 %v5149_v45, %v4655_v26  ;;  %6415 = vmatmul.f32.gmra.mxu1 %v15400_v51  ;;  %6588 = vmatpush.msra.mxu2 %v6476_v23 }
 0xd18   : > { %6707 = vmatpush.msra.mxu1 %v6706_v63  ;;  %v4656_v63 = vperm.slane %v15792_v10, 3 }
 0xd19   : > { %v5199_v1 = vadd.f32 %v5198_v43, %v5150_v20  ;;  %6592 = vmatpush.msra.mxu2 %v6482_v13 }
 0xd1a   : > { %v15996_v22 = vpop.f32.mrf.mxu0 }
 0xd1b   : > { %6316 = vmatmul.f32.gmra.mxu2 %v15416_v27  ;;  %6493 = vmatmul.f32.vlgmr.msrb.gmra.mxu3 %v15359_v15  ;;  %v5233_v40 = vadd.f32 %v5232_v42, %v5199_v1  ;;  %v6902_v42 = vand.u32 4294901760, %v16014_v29  ;;  %v4644_v1 = vld [vmem:[%s14925_s5 + $0x1d8] sm:$0xff] }
 0xd1c   : > { %v16001_v38 = vpop.f32.mrf.mxu1  ;;  %6596 = vmatpush.msra.mxu2 %v6488_v6  ;;  %6765 = vmatpush.msrb.mxu3 %v15903_v7 }
 0xd1d   : > { %6527 = vmatmul.f32.vlgmr.msrb.gmra.mxu0 %v15363_v37  ;;  %v5265_v23 = vadd.f32 %v5264_v58, %v5233_v40  ;;  %v5366_v40 = vadd.f32 %v15996_v22, %v4656_v63  ;;  %v4612_v22 = vld [vmem:[%s14925_s5 + $0xd8] sm:$0xff] }
 0xd1e   : > { %v5157_v13 = vpop.f32.mrf.mxu2  ;;  %v5332_v14 = vpop.f32.mrf.mxu3  ;;  %6767 = vmatpush.msrb.mxu3 %v15916_v3  ;;  %6800 = vmatpush.msrb.mxu0 %v6686_v21  ;;  %v16027_v21 = vand.u32 4294901760, %v4611_v41 }
 0xd1f   : > { %v5158_v6 = vadd.f32 %v5157_v13, %v4655_v26  ;;  %6559 = vmatmul.f32.vlgmr.msrb.gmra.mxu1 %v15372_v48  ;;  %v5415_v34 = vadd.f32 %v16001_v38, %v5366_v40 }
 0xd20   : > { %6769 = vmatpush.msrb.mxu3 %v15925_v50  ;;  %6804 = vmatpush.msrb.mxu0 %v6692_v24  ;;  %v6908_v24 = vand.u32 4294901760, %v16025_v46  ;;  %v16038_v8 = vsub.f32 %v4611_v41, %v16027_v21  ;;  %v16108_v41 = vand.u32 4294901760, %v4612_v22 }
 0xd21   : > { %v5203_v58 = vadd.f32 %v5202_v62, %v5158_v6  ;;  %6835 = vmatpush.msrb.mxu1 %v15903_v7 }
 0xd22   : > { %v16031_v35 = vpop.f32.mrf.mxu0  ;;  %6771 = vmatpush.msrb.mxu3 %v15936_v56  ;;  %6808 = vmatpush.msrb.mxu0 %v6698_v39  ;;  %v6903_v39 = vsub.f32 %v16014_v29, %v6902_v42  ;;  %v6914_v61 = vand.u32 4294901760, %v16038_v8 }
 0xd23   : > { %6444 = vmatmul.f32.vlgmr.msrb.gmra.mxu2 %v15402_v0  ;;  %6497 = vmatmul.f32.gmra.mxu3 %v15400_v51  ;;  %v5238_v7 = vadd.f32 %v5237_v5, %v5203_v58 }
 0xd24   : > { %v16044_v43 = vpop.f32.mrf.mxu1  ;;  %6837 = vmatpush.msrb.mxu1 %v15916_v3  ;;  %6731 = vmatpush.msrb.mxu2 %v15914_v52  ;;  %v6909_v52 = vsub.f32 %v16025_v46, %v6908_v24  ;;  %v6920_v3 = vand.u32 4294901760, %v16053_v49  ;;  %v6904_v47 = vand.u32 4294901760, %v6903_v39  ;;  %v4596_v39 = vld [vmem:[%s14925_s5 + $0x58] sm:$0xff] }
 0xd25   : > { %6532 = vmatmul.f32.gmra.mxu0 %v15416_v27  ;;  %v5271_v55 = vadd.f32 %v5270_v9, %v5238_v7 }
 0xd26   : > { %v5303_v19 = vpop.f32.mrf.mxu2  ;;  %v5336_v59 = vpop.f32.mrf.mxu3  ;;  %6812 = vmatpush.msrb.mxu0 %v6704_v30  ;;  %6839 = vmatpush.msrb.mxu1 %v15925_v50  ;;  %v6915_v30 = vsub.f32 %v16038_v8, %v6914_v61  ;;  %v6910_v26 = vand.u32 4294901760, %v6909_v52  ;;  %v6921_v9 = vsub.f32 %v16053_v49, %v6920_v3  ;;  %v16122_v52 = vsub.f32 %v4612_v22, %v16108_v41 }
 0xd27   : > { %v5304_v5 = vadd.f32 %v5303_v19, %v5265_v23  ;;  %6565 = vmatmul.f32.gmra.mxu1 %v15431_v28  ;;  %6734 = vmatpush.msrb.mxu2 %v15928_v57  ;;  %v4628_v23 = vld [vmem:[%s14925_s5 + $0x158] sm:$0xff] }
 0xd28   : > { %6841 = vmatpush.msrb.mxu1 %v15936_v56  ;;  %v6916_v56 = vand.u32 4294901760, %v6915_v30  ;;  %v6922_v62 = vand.u32 4294901760, %v6921_v9  ;;  %v5374_v30 = vadd.f32 %v16031_v35, %v4656_v63 }
 0xd29   : > { %v16069_v36 = vadd.f32 %v5332_v14, %v5304_v5  ;;  %6737 = vmatpush.msrb.mxu2 %v15939_v12  ;;  %v16099_v14 = vand.u32 4294901760, %v4628_v23 }
 0xd2a   : > { %v5519_v50 = vpop.f32.mrf.mxu0 }
 0xd2b   : > { %22018 = vst [vmem:[#allocation10_spill] sm:$0xff] %v16069_v36  ;;  %6452 = vmatmul.f32.gmra.mxu2 %v15448_v31  ;;  %6627 = vmatmul.f32.vlgmr.msra.gmra.mxu3 %v15359_v15  ;;  %v16111_v58 = vsub.f32 %v4628_v23, %v16099_v14 }
 0xd2c   : > { %v16077_v57 = vpop.f32.mrf.mxu1  ;;  %6740 = vmatpush.msrb.mxu2 %v15946_v11  ;;  %6905 = vmatpush.msra.mxu3 %v6904_v47  ;;  %v16086_v11 = vand.u32 4294901760, %v4644_v1 }
 0xd2d   : > { %6660 = vmatmul.f32.vlgmr.msra.gmra.mxu0 %v15402_v0  ;;  %v7124_v38 = vand.u32 4294901760, %v16111_v58 }
 0xd2e   : > { %v5307_v12 = vpop.f32.mrf.mxu2  ;;  %v5480_v45 = vpop.f32.mrf.mxu3  ;;  %6911 = vmatpush.msra.mxu3 %v6910_v26  ;;  %6947 = vmatpush.msra.mxu0 %v16014_v29  ;;  %v16097_v13 = vsub.f32 %v4644_v1, %v16086_v11 }
 0xd2f   : > { %v5308_v20 = vadd.f32 %v5307_v12, %v5271_v55  ;;  %6709 = vmatmul.f32.vlgmr.msra.gmra.mxu1 %v15359_v15  ;;  %v7130_v12 = vand.u32 4294901760, %v16122_v52  ;;  %v7125_v35 = vsub.f32 %v16111_v58, %v7124_v38 }
 0xd30   : > { %6917 = vmatpush.msra.mxu3 %v6916_v56  ;;  %6950 = vmatpush.msra.mxu0 %v16025_v46  ;;  %v7118_v7 = vand.u32 4294901760, %v16097_v13 }
 0xd31   : > { %v16089_v2 = vadd.f32 %v5336_v59, %v5308_v20  ;;  %6981 = vmatpush.msra.mxu1 %v16006_v25  ;;  %v16119_v59 = vand.u32 4294901760, %v4596_v39 }
 0xd32   : > { %v16093_v18 = vpop.f32.mrf.mxu0  ;;  %6923 = vmatpush.msra.mxu3 %v6922_v62  ;;  %6953 = vmatpush.msra.mxu0 %v16038_v8  ;;  %v7119_v9 = vsub.f32 %v16097_v13, %v7118_v7  ;;  %v4629_v8 = vld [vmem:[%s14925_s5 + $0x160] sm:$0xff] }
 0xd33   : > { %22019 = vst [vmem:[#allocation11_spill] sm:$0xff] %v16089_v2  ;;  %6598 = vmatmul.f32.vlgmr.msra.gmra.mxu2 %v15359_v15  ;;  %6631 = vmatmul.f32.gmra.mxu3 %v15400_v51  ;;  %v16129_v47 = vsub.f32 %v4596_v39, %v16119_v59 }
 0xd34   : > { %v16104_v6 = vpop.f32.mrf.mxu1  ;;  %6983 = vmatpush.msra.mxu1 %v16016_v16  ;;  %6864 = vmatpush.msra.mxu2 %v16006_v25 }
 0xd35   : > { %6668 = vmatmul.f32.gmra.mxu0 %v15448_v31  ;;  %v7136_v63 = vand.u32 4294901760, %v16129_v47 }
 0xd36   : > { %v5448_v55 = vpop.f32.mrf.mxu2  ;;  %v5486_v19 = vpop.f32.mrf.mxu3  ;;  %6956 = vmatpush.msra.mxu0 %v16053_v49  ;;  %6985 = vmatpush.msra.mxu1 %v16027_v21  ;;  %v16199_v49 = vand.u32 4294901760, %v4629_v8 }
 0xd37   : > { %v5449_v5 = vadd.f32 %v5448_v55, %v5415_v34  ;;  %6713 = vmatmul.f32.gmra.mxu1 %v15400_v51  ;;  %6866 = vmatpush.msra.mxu2 %v16016_v16 }
 0xd38   : > { %6987 = vmatpush.msra.mxu1 %v16040_v44 }
 0xd39   : > { %v5481_v26 = vadd.f32 %v5480_v45, %v5449_v5  ;;  %6868 = vmatpush.msra.mxu2 %v16027_v21  ;;  %v5419_v45 = vadd.f32 %v16044_v43, %v5374_v30  ;;  %v7126_v43 = vand.u32 4294901760, %v7125_v35 }
 0xd3a   : > { %v5664_v56 = vpop.f32.mrf.mxu0 }
 0xd3b   : > { %v5520_v62 = vadd.f32 %v5519_v50, %v5481_v26  ;;  %6602 = vmatmul.f32.gmra.mxu2 %v15400_v51  ;;  %6775 = vmatmul.f32.vlgmr.msrb.gmra.mxu3 %v15372_v48  ;;  %v7120_v50 = vand.u32 4294901760, %v7119_v9  ;;  %v4645_v9 = vld [vmem:[%s14925_s5 + $0x1e0] sm:$0xff] }
 0xd3c   : > { %v5696_v20 = vpop.f32.mrf.mxu1  ;;  %6870 = vmatpush.msra.mxu2 %v16040_v44  ;;  %7051 = vmatpush.msrb.mxu3 %v16006_v25  ;;  %v7131_v25 = vsub.f32 %v16122_v52, %v7130_v12  ;;  %v16189_v46 = vand.u32 4294901760, %v4645_v9 }
 0xd3d   : > { %v16147_v1 = vadd.f32 %v16077_v57, %v5520_v62  ;;  %6814 = vmatmul.f32.vlgmr.msrb.gmra.mxu0 %v15359_v15  ;;  %v7137_v57 = vsub.f32 %v16129_v47, %v7136_v63 }
 0xd3e   : > { %v5453_v40 = vpop.f32.mrf.mxu2  ;;  %v5630_v23 = vpop.f32.mrf.mxu3  ;;  %7053 = vmatpush.msrb.mxu3 %v16016_v16  ;;  %7080 = vmatpush.msrb.mxu0 %v16086_v11  ;;  %v7132_v39 = vand.u32 4294901760, %v7131_v25 }
 0xd3f   : > { %22020 = vst [vmem:[#allocation12_spill] sm:$0xff] %v16147_v1  ;;  %v5454_v22 = vadd.f32 %v5453_v40, %v5419_v45  ;;  %6843 = vmatmul.f32.vlgmr.msrb.gmra.mxu1 %v15359_v15  ;;  %v4613_v45 = vld [vmem:[%s14925_s5 + $0xe0] sm:$0xff] }
 0xd40   : > { %7055 = vmatpush.msrb.mxu3 %v16027_v21  ;;  %7082 = vmatpush.msrb.mxu0 %v16099_v14  ;;  %v4657_v21 = vperm.slane %v15792_v10, 4 }
 0xd41   : > { %v5487_v34 = vadd.f32 %v5486_v19, %v5454_v22  ;;  %7121 = vmatpush.msrb.mxu1 %v7120_v50  ;;  %v7138_v19 = vand.u32 4294901760, %v7137_v57  ;;  %v16208_v50 = vsub.f32 %v4629_v8, %v16199_v49 }
 0xd42   : > { %v5669_v16 = vpop.f32.mrf.mxu0  ;;  %7057 = vmatpush.msrb.mxu3 %v16040_v44  ;;  %7084 = vmatpush.msrb.mxu0 %v16108_v41 }
 0xd43   : > { %v5524_v55 = vadd.f32 %v16093_v18, %v5487_v34  ;;  %6743 = vmatmul.f32.vlgmr.msrb.gmra.mxu2 %v15363_v37  ;;  %6781 = vmatmul.f32.gmra.mxu3 %v15431_v28 }
 0xd44   : > { %v5702_v5 = vpop.f32.mrf.mxu1  ;;  %7127 = vmatpush.msrb.mxu1 %v7126_v43  ;;  %7016 = vmatpush.msrb.mxu2 %v6902_v42 }
 0xd45   : > { %v16170_v30 = vadd.f32 %v16104_v6, %v5524_v55  ;;  %6818 = vmatmul.f32.gmra.mxu0 %v15400_v51 }
 0xd46   : > { %v5581_v44 = vpop.f32.mrf.mxu2  ;;  %v5634_v18 = vpop.f32.mrf.mxu3  ;;  %7086 = vmatpush.msrb.mxu0 %v16119_v59  ;;  %7133 = vmatpush.msrb.mxu1 %v7132_v39 }
 0xd47   : > { %22021 = vst [vmem:[#allocation13_spill] sm:$0xff] %v16170_v30  ;;  %v5582_v26 = vadd.f32 %v5581_v44, %v4657_v21  ;;  %6847 = vmatmul.f32.gmra.mxu1 %v15400_v51  ;;  %7020 = vmatpush.msrb.mxu2 %v6908_v24 }
 0xd48   : > { %7139 = vmatpush.msrb.mxu1 %v7138_v19 }
 0xd49   : > { %v5631_v29 = vadd.f32 %v5630_v23, %v5582_v26  ;;  %7024 = vmatpush.msrb.mxu2 %v6914_v61  ;;  %v4597_v23 = vld [vmem:[%s14925_s5 + $0x60] sm:$0xff] }
 0xd4a   : > { %v16179_v42 = vpop.f32.mrf.mxu0  ;;  %v16223_v43 = vand.u32 4294901760, %v4597_v23 }
 0xd4b   : > { %6748 = vmatmul.f32.gmra.mxu2 %v15416_v27  ;;  %6925 = vmatmul.f32.vlgmr.msra.gmra.mxu3 %v15359_v15  ;;  %v5665_v6 = vadd.f32 %v5664_v56, %v5631_v29  ;;  %v16197_v56 = vsub.f32 %v4645_v9, %v16189_v46 }
 0xd4c   : > { %v16184_v62 = vpop.f32.mrf.mxu1  ;;  %7028 = vmatpush.msrb.mxu2 %v6920_v3  ;;  %7197 = vmatpush.msra.mxu3 %v16086_v11  ;;  %v16234_v34 = vsub.f32 %v4597_v23, %v16223_v43 }
 0xd4d   : > { %6959 = vmatmul.f32.vlgmr.msra.gmra.mxu0 %v15363_v37  ;;  %v5697_v24 = vadd.f32 %v5696_v20, %v5665_v6  ;;  %v7334_v20 = vand.u32 4294901760, %v16197_v56 }
 0xd4e   : > { %v5589_v61 = vpop.f32.mrf.mxu2  ;;  %v5764_v35 = vpop.f32.mrf.mxu3  ;;  %7199 = vmatpush.msra.mxu3 %v16099_v14  ;;  %7232 = vmatpush.msra.mxu0 %v7118_v7  ;;  %v16210_v7 = vand.u32 4294901760, %v4613_v45 }
 0xd4f   : > { %v5590_v3 = vadd.f32 %v5589_v61, %v4657_v21  ;;  %6991 = vmatmul.f32.vlgmr.msra.gmra.mxu1 %v15372_v48 }
 0xd50   : > { %7201 = vmatpush.msra.mxu3 %v16108_v41  ;;  %7236 = vmatpush.msra.mxu0 %v7124_v38  ;;  %v7340_v38 = vand.u32 4294901760, %v16208_v50  ;;  %v16221_v22 = vsub.f32 %v4613_v45, %v16210_v7 }
 0xd51   : > { %v5635_v40 = vadd.f32 %v5634_v18, %v5590_v3  ;;  %7267 = vmatpush.msra.mxu1 %v16086_v11 }
 0xd52   : > { %v16214_v25 = vpop.f32.mrf.mxu0  ;;  %7203 = vmatpush.msra.mxu3 %v16119_v59  ;;  %7240 = vmatpush.msra.mxu0 %v7130_v12  ;;  %v7335_v12 = vsub.f32 %v16197_v56, %v7334_v20  ;;  %v7346_v57 = vand.u32 4294901760, %v16221_v22 }
 0xd53   : > { %6876 = vmatmul.f32.vlgmr.msra.gmra.mxu2 %v15402_v0  ;;  %6929 = vmatmul.f32.gmra.mxu3 %v15400_v51  ;;  %v5670_v11 = vadd.f32 %v5669_v16, %v5635_v40  ;;  %v4614_v40 = vld [vmem:[%s14925_s5 + $0xe8] sm:$0xff] }
 0xd54   : > { %7269 = vmatpush.msra.mxu1 %v16099_v14  ;;  %7163 = vmatpush.msra.mxu2 %v16097_v13  ;;  %v16236_v39 = vpop.f32.mrf.mxu1  ;;  %v7341_v13 = vsub.f32 %v16208_v50, %v7340_v38  ;;  %v7352_v14 = vand.u32 4294901760, %v16234_v34 }
 0xd55   : > { %6964 = vmatmul.f32.gmra.mxu0 %v15416_v27  ;;  %v5703_v55 = vadd.f32 %v5702_v5, %v5670_v11  ;;  %v7336_v5 = vand.u32 4294901760, %v7335_v12 }
 0xd56   : > { %v5735_v21 = vpop.f32.mrf.mxu2  ;;  %v5768_v16 = vpop.f32.mrf.mxu3  ;;  %7244 = vmatpush.msra.mxu0 %v7136_v63  ;;  %7271 = vmatpush.msra.mxu1 %v16108_v41  ;;  %v7347_v63 = vsub.f32 %v16221_v22, %v7346_v57  ;;  %v7342_v41 = vand.u32 4294901760, %v7341_v13  ;;  %v7353_v18 = vsub.f32 %v16234_v34, %v7352_v14 }
 0xd57   : > { %v5736_v19 = vadd.f32 %v5735_v21, %v5697_v24  ;;  %6997 = vmatmul.f32.gmra.mxu1 %v15431_v28  ;;  %7166 = vmatpush.msra.mxu2 %v16111_v58  ;;  %v4646_v24 = vld [vmem:[%s14925_s5 + $0x1e8] sm:$0xff] }
 0xd58   : > { %7273 = vmatpush.msra.mxu1 %v16119_v59  ;;  %v7348_v58 = vand.u32 4294901760, %v7347_v63  ;;  %v4658_v59 = vperm.slane %v15792_v10, 5  ;;  %v7354_v6 = vand.u32 4294901760, %v7353_v18  ;;  %v4598_v21 = vld [vmem:[%s14925_s5 + $0x68] sm:$0xff] }
 0xd59   : > { %v16252_v44 = vadd.f32 %v5764_v35, %v5736_v19  ;;  %7169 = vmatpush.msra.mxu2 %v16122_v52  ;;  %v4630_v35 = vld [vmem:[%s14925_s5 + $0x168] sm:$0xff]  ;;  %v16296_v19 = vand.u32 4294901760, %v4598_v21 }
 0xd5a   : > { %v5951_v26 = vpop.f32.mrf.mxu0  ;;  %v5798_v10 = vadd.f32 %v16179_v42, %v4658_v59  ;;  %v16278_v45 = vand.u32 4294901760, %v4630_v35  ;;  %v16285_v42 = vand.u32 4294901760, %v4614_v40  ;;  %v5806_v18 = vadd.f32 %v16214_v25, %v4658_v59 }
 0xd5b   : > { %22022 = vst [vmem:[#allocation14_spill] sm:$0xff] %v16252_v44  ;;  %6884 = vmatmul.f32.gmra.mxu2 %v15448_v31  ;;  %7059 = vmatmul.f32.vlgmr.msrb.gmra.mxu3 %v15359_v15 }
 0xd5c   : > { %7172 = vmatpush.msra.mxu2 %v16129_v47  ;;  %7337 = vmatpush.msrb.mxu3 %v7336_v5  ;;  %v5980_v8 = vpop.f32.mrf.mxu1  ;;  %v16267_v47 = vand.u32 4294901760, %v4646_v24  ;;  %v16288_v23 = vsub.f32 %v4630_v35, %v16278_v45  ;;  %v5847_v11 = vadd.f32 %v16184_v62, %v5798_v10  ;;  %v16299_v5 = vsub.f32 %v4614_v40, %v16285_v42 }
 0xd5d   : > { %7092 = vmatmul.f32.vlgmr.msrb.gmra.mxu0 %v15402_v0 }
 0xd5e   : > { %v5739_v52 = vpop.f32.mrf.mxu2  ;;  %v5912_v29 = vpop.f32.mrf.mxu3  ;;  %7343 = vmatpush.msrb.mxu3 %v7342_v41  ;;  %7379 = vmatpush.msrb.mxu0 %v16197_v56  ;;  %v16276_v3 = vsub.f32 %v4646_v24, %v16267_v47  ;;  %v7556_v62 = vand.u32 4294901760, %v16288_v23  ;;  %v16306_v41 = vsub.f32 %v4598_v21, %v16296_v19 }
 0xd5f   : > { %v5740_v9 = vadd.f32 %v5739_v52, %v5703_v55  ;;  %7141 = vmatmul.f32.vlgmr.msrb.gmra.mxu1 %v15359_v15 }
 0xd60   : > { %7349 = vmatpush.msrb.mxu3 %v7348_v58  ;;  %7382 = vmatpush.msrb.mxu0 %v16208_v50  ;;  %v7550_v55 = vand.u32 4294901760, %v16276_v3  ;;  %v7557_v25 = vsub.f32 %v16288_v23, %v7556_v62  ;;  %v7568_v59 = vand.u32 4294901760, %v16306_v41 }
 0xd61   : > { %v16270_v61 = vadd.f32 %v5768_v16, %v5740_v9  ;;  %7413 = vmatpush.msrb.mxu1 %v16189_v46  ;;  %v7562_v9 = vand.u32 4294901760, %v16299_v5 }
 0xd62   : > { %7355 = vmatpush.msrb.mxu3 %v7354_v6  ;;  %7385 = vmatpush.msrb.mxu0 %v16221_v22  ;;  %v5955_v12 = vpop.f32.mrf.mxu0  ;;  %v7551_v52 = vsub.f32 %v16276_v3, %v7550_v55  ;;  %v4631_v22 = vld [vmem:[%s14925_s5 + $0x170] sm:$0xff] }
 0xd63   : > { %22023 = vst [vmem:[#allocation15_spill] sm:$0xff] %v16270_v61  ;;  %7030 = vmatmul.f32.vlgmr.msrb.gmra.mxu2 %v15359_v15  ;;  %7063 = vmatmul.f32.gmra.mxu3 %v15400_v51 }
 0xd64   : > { %7415 = vmatpush.msrb.mxu1 %v16199_v49  ;;  %7296 = vmatpush.msrb.mxu2 %v16189_v46  ;;  %v5984_v6 = vpop.f32.mrf.mxu1 }
 0xd65   : > { %7100 = vmatmul.f32.gmra.mxu0 %v15448_v31 }
 0xd66   : > { %v5880_v16 = vpop.f32.mrf.mxu2  ;;  %v5918_v13 = vpop.f32.mrf.mxu3  ;;  %7388 = vmatpush.msrb.mxu0 %v16234_v34  ;;  %7417 = vmatpush.msrb.mxu1 %v16210_v7  ;;  %v16372_v34 = vand.u32 4294901760, %v4631_v22 }
 0xd67   : > { %v5881_v63 = vadd.f32 %v5880_v16, %v5847_v11  ;;  %7145 = vmatmul.f32.gmra.mxu1 %v15400_v51  ;;  %7298 = vmatpush.msrb.mxu2 %v16199_v49 }
 0xd68   : > { %7419 = vmatpush.msrb.mxu1 %v16223_v43 }
 0xd69   : > { %v5913_v58 = vadd.f32 %v5912_v29, %v5881_v63  ;;  %7300 = vmatpush.msrb.mxu2 %v16210_v7  ;;  %v5851_v29 = vadd.f32 %v16236_v39, %v5806_v18 }
 0xd6a   : > { %v6096_v39 = vpop.f32.mrf.mxu0 }
 0xd6b   : > { %v5952_v24 = vadd.f32 %v5951_v26, %v5913_v58  ;;  %7034 = vmatmul.f32.gmra.mxu2 %v15400_v51  ;;  %7207 = vmatmul.f32.vlgmr.msra.gmra.mxu3 %v15372_v48  ;;  %v7552_v26 = vand.u32 4294901760, %v7551_v52 }
 0xd6c   : > { %7302 = vmatpush.msrb.mxu2 %v16223_v43  ;;  %7483 = vmatpush.msra.mxu3 %v16189_v46  ;;  %v7563_v46 = vsub.f32 %v16299_v5, %v7562_v9  ;;  %v6128_v58 = vpop.f32.mrf.mxu1 }
 0xd6d   : > { %v16323_v10 = vadd.f32 %v5980_v8, %v5952_v24  ;;  %7246 = vmatmul.f32.vlgmr.msra.gmra.mxu0 %v15359_v15  ;;  %v7558_v8 = vand.u32 4294901760, %v7557_v25  ;;  %v4647_v25 = vld [vmem:[%s14925_s5 + $0x1f0] sm:$0xff] }
 0xd6e   : > { %v5885_v35 = vpop.f32.mrf.mxu2  ;;  %v6062_v40 = vpop.f32.mrf.mxu3  ;;  %7485 = vmatpush.msra.mxu3 %v16199_v49  ;;  %7512 = vmatpush.msra.mxu0 %v16267_v47  ;;  %v7569_v49 = vsub.f32 %v16306_v41, %v7568_v59  ;;  %v7564_v16 = vand.u32 4294901760, %v7563_v46  ;;  %v16362_v50 = vand.u32 4294901760, %v4647_v25  ;;  %v16381_v46 = vsub.f32 %v4631_v22, %v16372_v34 }
 0xd6f   : > { %22024 = vst [vmem:[#allocation16_spill] sm:$0xff] %v16323_v10  ;;  %v5886_v11 = vadd.f32 %v5885_v35, %v5851_v29  ;;  %7275 = vmatmul.f32.vlgmr.msra.gmra.mxu1 %v15359_v15  ;;  %v4615_v35 = vld [vmem:[%s14925_s5 + $0xf0] sm:$0xff]  ;;  %v8203_v10 = vld [vmem:[%s14937_s16 + $0xc0] sm:$0xff] }
 0xd70   : > { %7487 = vmatpush.msra.mxu3 %v16210_v7  ;;  %7514 = vmatpush.msra.mxu0 %v16278_v45  ;;  %v16342_v7 = vld [vmem:[%s14931_s19] sm:$0xff]  ;;  %v16838_v1 = vand.u32 4294901760, %v8203_v10 }
 0xd71   : > { %v5919_v21 = vadd.f32 %v5918_v13, %v5886_v11  ;;  %7553 = vmatpush.msra.mxu1 %v7552_v26  ;;  %v4659_v18 = vperm.slane %v16342_v7, 6  ;;  %v7570_v13 = vand.u32 4294901760, %v7569_v49  ;;  %v16370_v26 = vsub.f32 %v4647_v25, %v16362_v50 }
 0xd72   : > { %7489 = vmatpush.msra.mxu3 %v16223_v43  ;;  %7516 = vmatpush.msra.mxu0 %v16285_v42  ;;  %v7772_v49 = vand.u32 4294901760, %v16381_v46  ;;  %v4660_v25 = vperm.slane %v16342_v7, 7 }
 0xd73   : > { %v5956_v63 = vadd.f32 %v5955_v12, %v5919_v21  ;;  %7175 = vmatmul.f32.vlgmr.msra.gmra.mxu2 %v15363_v37  ;;  %7213 = vmatmul.f32.gmra.mxu3 %v15431_v28 }
 0xd74   : > { %7559 = vmatpush.msra.mxu1 %v7558_v8  ;;  %7448 = vmatpush.msra.mxu2 %v7334_v20  ;;  %v6101_v20 = vpop.f32.mrf.mxu0 }
 0xd75   : > { %v16347_v52 = vadd.f32 %v5984_v6, %v5956_v63  ;;  %7250 = vmatmul.f32.gmra.mxu0 %v15400_v51 }
 0xd76   : > { %v6013_v43 = vpop.f32.mrf.mxu2  ;;  %7518 = vmatpush.msra.mxu0 %v16296_v19  ;;  %7565 = vmatpush.msra.mxu1 %v7564_v16  ;;  %v6066_v24 = vpop.f32.mrf.mxu3 }
 0xd77   : > { %22025 = vst [vmem:[#allocation17_spill] sm:$0xff] %v16347_v52  ;;  %v6014_v12 = vadd.f32 %v6013_v43, %v4659_v18  ;;  %7279 = vmatmul.f32.gmra.mxu1 %v15400_v51  ;;  %7452 = vmatpush.msra.mxu2 %v7340_v38 }
 0xd78   : > { %7571 = vmatpush.msra.mxu1 %v7570_v13 }
 0xd79   : > { %v6063_v56 = vadd.f32 %v6062_v40, %v6014_v12  ;;  %7456 = vmatpush.msra.mxu2 %v7346_v57  ;;  %v6134_v57 = vpop.f32.mrf.mxu1  ;;  %v7766_v40 = vand.u32 4294901760, %v16370_v26 }
 0xd7b   : > { %7180 = vmatmul.f32.gmra.mxu2 %v15416_v27  ;;  %7357 = vmatmul.f32.vlgmr.msrb.gmra.mxu3 %v15359_v15  ;;  %v6097_v6 = vadd.f32 %v6096_v39, %v6063_v56  ;;  %v4599_v39 = vld [vmem:[%s14925_s5 + $0x70] sm:$0xff] }
 0xd7c   : > { %7460 = vmatpush.msra.mxu2 %v7352_v14  ;;  %7629 = vmatpush.msrb.mxu3 %v16267_v47  ;;  %v16394_v21 = vand.u32 4294901760, %v4599_v39 }
 0xd7d   : > { %7391 = vmatmul.f32.vlgmr.msrb.gmra.mxu0 %v15363_v37  ;;  %v6129_v38 = vadd.f32 %v6128_v58, %v6097_v6  ;;  %v4648_v6 = vld [vmem:[%s14925_s5 + $0x1f8] sm:$0xff] }
 0xd7e   : > { %v6021_v29 = vpop.f32.mrf.mxu2  ;;  %7631 = vmatpush.msrb.mxu3 %v16278_v45  ;;  %7664 = vmatpush.msrb.mxu0 %v7550_v55  ;;  %v16383_v55 = vand.u32 4294901760, %v4615_v35  ;;  %v6196_v8 = vpop.f32.mrf.mxu3 }
 0xd7f   : > { %v6022_v14 = vadd.f32 %v6021_v29, %v4659_v18  ;;  %7423 = vmatmul.f32.vlgmr.msrb.gmra.mxu1 %v15372_v48  ;;  %v16405_v18 = vsub.f32 %v4599_v39, %v16394_v21 }
 0xd80   : > { %7633 = vmatpush.msrb.mxu3 %v16285_v42  ;;  %7668 = vmatpush.msrb.mxu0 %v7556_v62  ;;  %v16392_v62 = vsub.f32 %v4615_v35, %v16383_v55 }
 0xd81   : > { %v6067_v11 = vadd.f32 %v6066_v24, %v6022_v14  ;;  %7699 = vmatpush.msrb.mxu1 %v16267_v47  ;;  %v6229_v47 = vpop.f32.mrf.mxu0  ;;  %v6278_v12 = vpop.f32.mrf.mxu1 }
 0xd82   : > { %7635 = vmatpush.msrb.mxu3 %v16296_v19  ;;  %7672 = vmatpush.msrb.mxu0 %v7562_v9  ;;  %v7767_v9 = vsub.f32 %v16370_v26, %v7766_v40  ;;  %v7778_v63 = vand.u32 4294901760, %v16392_v62  ;;  %v6230_v35 = vadd.f32 %v6229_v47, %v4660_v25 }
 0xd83   : > { %7308 = vmatmul.f32.vlgmr.msrb.gmra.mxu2 %v15402_v0  ;;  %7361 = vmatmul.f32.gmra.mxu3 %v15400_v51  ;;  %v6102_v16 = vadd.f32 %v6101_v20, %v6067_v11 }
 0xd84   : > { %7701 = vmatpush.msrb.mxu1 %v16278_v45  ;;  %7595 = vmatpush.msrb.mxu2 %v16276_v3  ;;  %v7773_v3 = vsub.f32 %v16381_v46, %v7772_v49  ;;  %v7784_v45 = vand.u32 4294901760, %v16405_v18  ;;  %v7768_v24 = vand.u32 4294901760, %v7767_v9 }
 0xd85   : > { %7396 = vmatmul.f32.gmra.mxu0 %v15416_v27  ;;  %v6135_v58 = vadd.f32 %v6134_v57, %v6102_v16 }
 0xd86   : > { %v6167_v13 = vpop.f32.mrf.mxu2  ;;  %7676 = vmatpush.msrb.mxu0 %v7568_v59  ;;  %7703 = vmatpush.msrb.mxu1 %v16285_v42  ;;  %v7779_v42 = vsub.f32 %v16392_v62, %v7778_v63  ;;  %v7774_v56 = vand.u32 4294901760, %v7773_v3  ;;  %v7785_v20 = vsub.f32 %v16405_v18, %v7784_v45 }
 0xd87   : > { %v6168_v43 = vadd.f32 %v6167_v13, %v6129_v38  ;;  %7429 = vmatmul.f32.gmra.mxu1 %v15431_v28  ;;  %7598 = vmatpush.msrb.mxu2 %v16288_v23  ;;  %v6200_v23 = vpop.f32.mrf.mxu3  ;;  %v4632_v38 = vld [vmem:[%s14925_s5 + $0x178] sm:$0xff]  ;;  %v6279_v13 = vadd.f32 %v6278_v12, %v6230_v35 }
 0xd88   : > { %7705 = vmatpush.msrb.mxu1 %v16296_v19  ;;  %v7780_v19 = vand.u32 4294901760, %v7779_v42  ;;  %v7786_v29 = vand.u32 4294901760, %v7785_v20  ;;  %v16440_v7 = vand.u32 4294901760, %v4632_v38 }
 0xd89   : > { %v16421_v59 = vadd.f32 %v6196_v8, %v6168_v43  ;;  %7601 = vmatpush.msrb.mxu2 %v16299_v5  ;;  %v16433_v5 = vand.u32 4294901760, %v4648_v6  ;;  %v6237_v22 = vpop.f32.mrf.mxu0  ;;  %v4600_v8 = vld [vmem:[%s14925_s5 + $0x78] sm:$0xff]  ;;  %v6282_v16 = vpop.f32.mrf.mxu1 }
 0xd8a   : > { %v16457_v47 = vsub.f32 %v4632_v38, %v16440_v7 }
 0xd8b   : > { %22026 = vst [vmem:[#allocation18_spill] sm:$0xff] %v16421_v59  ;;  %7316 = vmatmul.f32.gmra.mxu2 %v15448_v31  ;;  %7491 = vmatmul.f32.vlgmr.msra.gmra.mxu3 %v15359_v15  ;;  %v16446_v39 = vsub.f32 %v4648_v6, %v16433_v5 }
 0xd8c   : > { %7604 = vmatpush.msrb.mxu2 %v16306_v41  ;;  %7769 = vmatpush.msra.mxu3 %v7768_v24  ;;  %v4616_v41 = vld [vmem:[%s14925_s5 + $0xf8] sm:$0xff]  ;;  %v7988_v12 = vand.u32 4294901760, %v16457_v47 }
 0xd8d   : > { %7524 = vmatmul.f32.vlgmr.msra.gmra.mxu0 %v15402_v0  ;;  %v16450_v9 = vand.u32 4294901760, %v4616_v41  ;;  %v7982_v3 = vand.u32 4294901760, %v16446_v39 }
 0xd8e   : > { %v6171_v57 = vpop.f32.mrf.mxu2  ;;  %7775 = vmatpush.msra.mxu3 %v7774_v56  ;;  %7811 = vmatpush.msra.mxu0 %v16370_v26  ;;  %v8192_v26 = vld [vmem:[%s14937_s16 + $0x68] sm:$0xff] }
 0xd8f   : > { %v6172_v14 = vadd.f32 %v6171_v57, %v6135_v58  ;;  %7573 = vmatmul.f32.vlgmr.msra.gmra.mxu1 %v15359_v15  ;;  %v16459_v58 = vand.u32 4294901760, %v4600_v8  ;;  %v6344_v43 = vpop.f32.mrf.mxu3  ;;  %v16466_v42 = vsub.f32 %v4616_v41, %v16450_v9  ;;  %v7983_v38 = vsub.f32 %v16446_v39, %v7982_v3 }
 0xd90   : > { %7781 = vmatpush.msra.mxu3 %v7780_v19  ;;  %7814 = vmatpush.msra.mxu0 %v16381_v46 }
 0xd91   : > { %v16442_v11 = vadd.f32 %v6200_v23, %v6172_v14  ;;  %7845 = vmatpush.msra.mxu1 %v16362_v50  ;;  %v6383_v20 = vpop.f32.mrf.mxu0  ;;  %v16473_v6 = vsub.f32 %v4600_v8, %v16459_v58  ;;  %v6238_v23 = vadd.f32 %v6237_v22, %v4660_v25  ;;  %v7994_v57 = vand.u32 4294901760, %v16466_v42  ;;  %v6412_v14 = vpop.f32.mrf.mxu1 }
 0xd92   : > { %7787 = vmatpush.msra.mxu3 %v7786_v29  ;;  %7817 = vmatpush.msra.mxu0 %v16392_v62  ;;  %v7989_v25 = vsub.f32 %v16457_v47, %v7988_v12  ;;  %v7984_v8 = vand.u32 4294901760, %v7983_v38  ;;  %v8194_v38 = vld [vmem:[%s14937_s16 + $0x78] sm:$0xff] }
 0xd93   : > { %22027 = vst [vmem:[#allocation19_spill] sm:$0xff] %v16442_v11  ;;  %7462 = vmatmul.f32.vlgmr.msra.gmra.mxu2 %v15359_v15  ;;  %7495 = vmatmul.f32.gmra.mxu3 %v15400_v51  ;;  %v8000_v22 = vand.u32 4294901760, %v16473_v6  ;;  %v6283_v41 = vadd.f32 %v6282_v16, %v6238_v23 }
 0xd94   : > { %7847 = vmatpush.msra.mxu1 %v16372_v34  ;;  %7728 = vmatpush.msra.mxu2 %v16362_v50  ;;  %v7990_v16 = vand.u32 4294901760, %v7989_v25  ;;  %v8190_v25 = vld [vmem:[%s14937_s16 + $0x58] sm:$0xff] }
 0xd95   : > { %7532 = vmatmul.f32.gmra.mxu0 %v15448_v31 }
 0xd96   : > { %v6312_v24 = vpop.f32.mrf.mxu2  ;;  %7820 = vmatpush.msra.mxu0 %v16405_v18  ;;  %7849 = vmatpush.msra.mxu1 %v16383_v55 }
 0xd97   : > { %v6313_v56 = vadd.f32 %v6312_v24, %v6279_v13  ;;  %7577 = vmatmul.f32.gmra.mxu1 %v15400_v51  ;;  %7730 = vmatpush.msra.mxu2 %v16372_v34  ;;  %v6350_v24 = vpop.f32.mrf.mxu3 }
 0xd98   : > { %7851 = vmatpush.msra.mxu1 %v16394_v21 }
 0xd99   : > { %v6345_v19 = vadd.f32 %v6344_v43, %v6313_v56  ;;  %7732 = vmatpush.msra.mxu2 %v16383_v55  ;;  %v16780_v59 = vpop.f32.mrf.mxu1 }
 0xd9a   : > { %22035 = vst [vmem:[#allocation23_spill] sm:$0xff] %v16780_v59 }
 0xd9b   : > { %v6384_v29 = vadd.f32 %v6383_v20, %v6345_v19  ;;  %7466 = vmatmul.f32.gmra.mxu2 %v15400_v51  ;;  %7639 = vmatmul.f32.vlgmr.msrb.gmra.mxu3 %v15372_v48  ;;  %v6387_v20 = vpop.f32.mrf.mxu0 }
 0xd9c   : > { %7915 = vmatpush.msrb.mxu3 %v16362_v50  ;;  %7734 = vmatpush.msra.mxu2 %v16394_v21  ;;  %v7995_v50 = vsub.f32 %v16466_v42, %v7994_v57 }
 0xd9d   : > { %v16488_v35 = vadd.f32 %v6412_v14, %v6384_v29  ;;  %7678 = vmatmul.f32.vlgmr.msrb.gmra.mxu0 %v15359_v15  ;;  %v16517_v29 = vand.u32 4294901760, %v8194_v38  ;;  %v8191_v14 = vld [vmem:[%s14937_s16 + $0x60] sm:$0xff] }
 0xd9e   : > { %v6317_v13 = vpop.f32.mrf.mxu2  ;;  %7917 = vmatpush.msrb.mxu3 %v16372_v34  ;;  %7944 = vmatpush.msrb.mxu0 %v16433_v5  ;;  %v8001_v34 = vsub.f32 %v16473_v6, %v8000_v22  ;;  %v7996_v23 = vand.u32 4294901760, %v7995_v50 }
 0xd9f   : > { %22028 = vst [vmem:[#allocation20_spill] sm:$0xff] %v16488_v35  ;;  %v6318_v43 = vadd.f32 %v6317_v13, %v6283_v41  ;;  %7707 = vmatmul.f32.vlgmr.msrb.gmra.mxu1 %v15359_v15  ;;  %v16531_v46 = vsub.f32 %v8194_v38, %v16517_v29  ;;  %v16555_v41 = vand.u32 4294901760, %v8190_v25  ;;  %v8207_v35 = vld [vmem:[%s14937_s16 + $0xe0] sm:$0xff] }
 0xda0   : > { %7919 = vmatpush.msrb.mxu3 %v16383_v55  ;;  %7946 = vmatpush.msrb.mxu0 %v16440_v7  ;;  %v8002_v55 = vand.u32 4294901760, %v8001_v34  ;;  %v16778_v11 = vand.u32 4294901760, %v8207_v35 }
 0xda1   : > { %v6351_v56 = vadd.f32 %v6350_v24, %v6318_v43  ;;  %7985 = vmatpush.msrb.mxu1 %v7984_v8  ;;  %v21761_v18 = vand.u32 4294901760, %v16531_v46  ;;  %v16577_v43 = vsub.f32 %v8190_v25, %v16555_v41  ;;  %v8187_v24 = vld [vmem:[%s14937_s16 + $0x40] sm:$0xff] }
 0xda2   : > { %7921 = vmatpush.msrb.mxu3 %v16394_v21  ;;  %7948 = vmatpush.msrb.mxu0 %v16450_v9  ;;  %v8193_v21 = vld [vmem:[%s14937_s16 + $0x70] sm:$0xff] }
 0xda3   : > { %v16504_v19 = vadd.f32 %v6387_v20, %v6351_v56  ;;  %7607 = vmatmul.f32.vlgmr.msrb.gmra.mxu2 %v15363_v37  ;;  %7645 = vmatmul.f32.gmra.mxu3 %v15431_v28  ;;  %v8491_v50 = vsub.f32 %v16531_v46, %v21761_v18  ;;  %v8186_v20 = vld [vmem:[%s14937_s16 + $0x38] sm:$0xff]  ;;  %v16840_v2 = vpop.f32.mrf.mxu0 }
 0xda4   : > { %7991 = vmatpush.msrb.mxu1 %v7990_v16  ;;  %7880 = vmatpush.msrb.mxu2 %v7766_v40  ;;  %v16522_v40 = vand.u32 4294901760, %v8193_v21  ;;  %22044 = vst [vmem:[#allocation29_spill] sm:$0xff] %v16840_v2 }
 0xda5   : > { %22029 = vst [vmem:[#allocation21_spill] sm:$0xff] %v16504_v19  ;;  %7682 = vmatmul.f32.gmra.mxu0 %v15400_v51  ;;  %v8492_v56 = vand.u32 4294901760, %v8491_v50 }
 0xda6   : > { %7950 = vmatpush.msrb.mxu0 %v16459_v58  ;;  %7997 = vmatpush.msrb.mxu1 %v7996_v23  ;;  %v16540_v62 = vsub.f32 %v8193_v21, %v16522_v40  ;;  %v21754_v23 = vand.u32 4294901760, %v16577_v43 }
 0xda7   : > { %7711 = vmatmul.f32.gmra.mxu1 %v15400_v51  ;;  %7884 = vmatpush.msrb.mxu2 %v7772_v49  ;;  %v16533_v49 = vand.u32 4294901760, %v8192_v26 }
 0xda8   : > { %8003 = vmatpush.msrb.mxu1 %v8002_v55  ;;  %v21758_v8 = vand.u32 4294901760, %v16540_v62  ;;  %v8515_v25 = vsub.f32 %v16577_v43, %v21754_v23 }
 0xda9   : > { %7888 = vmatpush.msrb.mxu2 %v7778_v63  ;;  %v16542_v63 = vand.u32 4294901760, %v8191_v14 }
 0xdab   : > { %7612 = vmatmul.f32.gmra.mxu2 %v15416_v27  ;;  %7789 = vmatmul.f32.vlgmr.msra.gmra.mxu3 %v15359_v15 }
 0xdac   : > { %8061 = vmatpush.msra.mxu3 %v16433_v5  ;;  %7892 = vmatpush.msrb.mxu2 %v7784_v45  ;;  %v16551_v45 = vsub.f32 %v8192_v26, %v16533_v49  ;;  %v16613_v26 = vand.u32 4294901760, %v8186_v20 }
 0xdad   : > { %7823 = vmatmul.f32.vlgmr.msra.gmra.mxu0 %v15363_v37 }
 0xdae   : > { %8063 = vmatpush.msra.mxu3 %v16440_v7  ;;  %8096 = vmatpush.msra.mxu0 %v7982_v3  ;;  %v8189_v3 = vld [vmem:[%s14937_s16 + $0x50] sm:$0xff] }
 0xdaf   : > { %7855 = vmatmul.f32.vlgmr.msra.gmra.mxu1 %v15372_v48  ;;  %v16566_v13 = vand.u32 4294901760, %v8189_v3 }
 0xdb0   : > { %8065 = vmatpush.msra.mxu3 %v16450_v9  ;;  %8100 = vmatpush.msra.mxu0 %v7988_v12  ;;  %v16562_v12 = vsub.f32 %v8191_v14, %v16542_v63 }
 0xdb1   : > { %8131 = vmatpush.msra.mxu1 %v16433_v5  ;;  %v8188_v5 = vld [vmem:[%s14937_s16 + $0x48] sm:$0xff]  ;;  %v16592_v34 = vsub.f32 %v8189_v3, %v16566_v13 }
 0xdb2   : > { %8067 = vmatpush.msra.mxu3 %v16459_v58  ;;  %8104 = vmatpush.msra.mxu0 %v7994_v57  ;;  %v21757_v57 = vand.u32 4294901760, %v16551_v45  ;;  %v16587_v16 = vand.u32 4294901760, %v8188_v5 }
 0xdb3   : > { %7740 = vmatmul.f32.vlgmr.msra.gmra.mxu2 %v15402_v0  ;;  %7793 = vmatmul.f32.gmra.mxu3 %v15400_v51  ;;  %v21753_v21 = vand.u32 4294901760, %v16592_v34 }
 0xdb4   : > { %8133 = vmatpush.msra.mxu1 %v16440_v7  ;;  %8027 = vmatpush.msra.mxu2 %v16446_v39  ;;  %v8497_v7 = vsub.f32 %v16540_v62, %v21758_v8  ;;  %v21756_v39 = vand.u32 4294901760, %v16562_v12  ;;  %v16607_v38 = vsub.f32 %v8188_v5, %v16587_v16  ;;  %v8184_v5 = vld [vmem:[%s14937_s16 + $0x28] sm:$0xff] }
 0xdb5   : > { %7828 = vmatmul.f32.gmra.mxu0 %v15416_v27 }
 0xdb6   : > { %8108 = vmatpush.msra.mxu0 %v8000_v22  ;;  %8135 = vmatpush.msra.mxu1 %v16450_v9  ;;  %v8503_v9 = vsub.f32 %v16551_v45, %v21757_v57  ;;  %v16598_v22 = vand.u32 4294901760, %v8187_v24  ;;  %v8498_v55 = vand.u32 4294901760, %v8497_v7  ;;  %v21755_v7 = vand.u32 4294901760, %v16607_v38 }
 0xdb7   : > { %7861 = vmatmul.f32.gmra.mxu1 %v15431_v28  ;;  %8030 = vmatpush.msra.mxu2 %v16457_v47  ;;  %v8509_v47 = vsub.f32 %v16562_v12, %v21756_v39 }
 0xdb8   : > { %8137 = vmatpush.msra.mxu1 %v16459_v58  ;;  %v8185_v58 = vld [vmem:[%s14937_s16 + $0x30] sm:$0xff]  ;;  %v16617_v14 = vsub.f32 %v8187_v24, %v16598_v22  ;;  %v8183_v24 = vld [vmem:[%s14937_s16 + $0x20] sm:$0xff] }
 0xdb9   : > { %8033 = vmatpush.msra.mxu2 %v16466_v42  ;;  %v8504_v42 = vand.u32 4294901760, %v8503_v9  ;;  %v16623_v3 = vand.u32 4294901760, %v8185_v58  ;;  %v8510_v50 = vand.u32 4294901760, %v8509_v47  ;;  %v16638_v9 = vand.u32 4294901760, %v8184_v5 }
 0xdbb   : > { %7748 = vmatmul.f32.gmra.mxu2 %v15448_v31  ;;  %7923 = vmatmul.f32.vlgmr.msrb.gmra.mxu3 %v15359_v15  ;;  %v16642_v47 = vsub.f32 %v8185_v58, %v16623_v3 }
 0xdbc   : > { %8493 = vmatpush.msrb.mxu3 %v8492_v56  ;;  %8036 = vmatpush.msra.mxu2 %v16473_v6  ;;  %v16633_v6 = vsub.f32 %v8186_v20, %v16613_v26  ;;  %v21759_v56 = vand.u32 4294901760, %v16617_v14  ;;  %v8527_v20 = vsub.f32 %v16607_v38, %v21755_v7  ;;  %v8181_v7 = vld [vmem:[%s14937_s16 + $0x10] sm:$0xff] }
 0xdbd   : > { %7956 = vmatmul.f32.vlgmr.msrb.gmra.mxu0 %v15402_v0  ;;  %v8521_v0 = vsub.f32 %v16592_v34, %v21753_v21  ;;  %v8182_v21 = vld [vmem:[%s14937_s16 + $0x18] sm:$0xff] }
 0xdbe   : > { %8499 = vmatpush.msrb.mxu3 %v8498_v55  ;;  %8595 = vmatpush.msrb.mxu0 %v16531_v46  ;;  %v8516_v55 = vand.u32 4294901760, %v8515_v25  ;;  %v21760_v25 = vand.u32 4294901760, %v16633_v6  ;;  %v8533_v58 = vsub.f32 %v16617_v14, %v21759_v56  ;;  %v16665_v39 = vand.u32 4294901760, %v8182_v21  ;;  %v8180_v56 = vld [vmem:[%s14937_s16 + $0x8] sm:$0xff] }
 0xdbf   : > { %8005 = vmatmul.f32.vlgmr.msrb.gmra.mxu1 %v15359_v15  ;;  %v8522_v23 = vand.u32 4294901760, %v8521_v0  ;;  %v21764_v0 = vand.u32 4294901760, %v16642_v47  ;;  %v8528_v57 = vand.u32 4294901760, %v8527_v20 }
 0xdc0   : > { %8505 = vmatpush.msrb.mxu3 %v8504_v42  ;;  %8598 = vmatpush.msrb.mxu0 %v16540_v62  ;;  %v16648_v42 = vand.u32 4294901760, %v8183_v24 }
 0xdc1   : > { %8653 = vmatpush.msrb.mxu1 %v16517_v29 }
 0xdc2   : > { %8511 = vmatpush.msrb.mxu3 %v8510_v50  ;;  %8601 = vmatpush.msrb.mxu0 %v16551_v45  ;;  %v16660_v50 = vsub.f32 %v8184_v5, %v16638_v9  ;;  %v16670_v8 = vsub.f32 %v8183_v24, %v16648_v42  ;;  %v8539_v5 = vsub.f32 %v16633_v6, %v21760_v25  ;;  %v8179_v25 = vld [vmem:[%s14937_s16] sm:$0xff] }
 0xdc3   : > { %8655 = vmatpush.msrb.mxu1 %v16522_v40  ;;  %7894 = vmatmul.f32.vlgmr.msrb.gmra.mxu2 %v15359_v15  ;;  %v16688_v24 = vsub.f32 %v8182_v21, %v16665_v39 }
 0xdc4   : > { %7927 = vmatmul.f32.gmra.mxu3 %v15400_v51  ;;  %8440 = vmatpush.msrb.mxu2 %v16517_v29  ;;  %v8540_v20 = vand.u32 4294901760, %v8539_v5  ;;  %v22030_v21 = vand.u32 4294901760, %v16660_v50 }
 0xdc5   : > { %8517 = vmatpush.msrb.mxu3 %v8516_v55  ;;  %8604 = vmatpush.msrb.mxu0 %v16562_v12  ;;  %v16676_v55 = vand.u32 4294901760, %v8181_v7  ;;  %v21766_v5 = vand.u32 4294901760, %v16688_v24 }
 0xdc6   : > { %8657 = vmatpush.msrb.mxu1 %v16533_v49  ;;  %7964 = vmatmul.f32.gmra.mxu0 %v15448_v31  ;;  %v8534_v31 = vand.u32 4294901760, %v8533_v58  ;;  %v16693_v58 = vand.u32 4294901760, %v8180_v56 }
 0xdc7   : > { %8442 = vmatpush.msrb.mxu2 %v16522_v40  ;;  %8523 = vmatpush.msrb.mxu3 %v8522_v23  ;;  %v8545_v23 = vsub.f32 %v16642_v47, %v21764_v0  ;;  %v16698_v53 = vsub.f32 %v8181_v7, %v16676_v55  ;;  %v16704_v0 = vand.u32 4294901760, %v8179_v25  ;;  %v22031_v7 = vand.u32 4294901760, %v16670_v8 }
 0xdc8   : > { %8607 = vmatpush.msrb.mxu0 %v16577_v43  ;;  %8659 = vmatpush.msrb.mxu1 %v16542_v63 }
 0xdc9   : > { %8009 = vmatmul.f32.gmra.mxu1 %v15400_v51  ;;  %8444 = vmatpush.msrb.mxu2 %v16533_v49  ;;  %v8546_v18 = vand.u32 4294901760, %v8545_v23  ;;  %v16722_v23 = vsub.f32 %v8179_v25, %v16704_v0  ;;  %v22033_v25 = vand.u32 4294901760, %v16698_v53 }
 0xdca   : > { %8529 = vmatpush.msrb.mxu3 %v8528_v57  ;;  %8610 = vmatpush.msrb.mxu0 %v16592_v34  ;;  %v8551_v57 = vsub.f32 %v16660_v50, %v22030_v21  ;;  %v16715_v21 = vsub.f32 %v8180_v56, %v16693_v58  ;;  %v8563_v56 = vsub.f32 %v16688_v24, %v21766_v5  ;;  %v8147_v5 = vmax.f32 %v15886_v33, 0.0 }
 0xdcb   : > { %8661 = vmatpush.msrb.mxu1 %v16555_v41  ;;  %8446 = vmatpush.msrb.mxu2 %v16542_v63  ;;  %22032 = vst [vmem:[#allocation22_spill] sm:$0xff] %v16722_v23 }
 0xdcc   : > { %8535 = vmatpush.msrb.mxu3 %v8534_v31  ;;  %8613 = vmatpush.msrb.mxu0 %v16607_v38  ;;  %v8557_v31 = vsub.f32 %v16670_v8, %v22031_v7  ;;  %v21768_v4 = vand.u32 4294901760, %v16715_v21 }
 0xdcd   : > { %8663 = vmatpush.msrb.mxu1 %v16566_v13  ;;  %7898 = vmatmul.f32.gmra.mxu2 %v15400_v51 }
 0xdce   : > { %8071 = vmatmul.f32.vlgmr.msra.gmra.mxu3 %v15372_v48  ;;  %8448 = vmatpush.msrb.mxu2 %v16555_v41  ;;  %v8552_v48 = vand.u32 4294901760, %v8551_v57  ;;  %v8558_v7 = vand.u32 4294901760, %v8557_v31  ;;  %v8209_v57 = vld [vmem:[%s14937_s16 + $0xf0] sm:$0xff]  ;;  %v8564_v31 = vand.u32 4294901760, %v8563_v56  ;;  %v22034_v56 = vand.u32 4294901760, %v16722_v23 }
 0xdcf   : > { %8541 = vmatpush.msrb.mxu3 %v8540_v20  ;;  %8616 = vmatpush.msrb.mxu0 %v16617_v14  ;;  %v8210_v20 = vld [vmem:[%s14937_s16 + $0xf8] sm:$0xff] }
 0xdd0   : > { %8665 = vmatpush.msrb.mxu1 %v16587_v16  ;;  %8110 = vmatmul.f32.vlgmr.msra.gmra.mxu0 %v15359_v15  ;;  %v16740_v54 = vand.u32 4294901760, %v8210_v20 }
 0xdd1   : > { %8450 = vmatpush.msrb.mxu2 %v16566_v13  ;;  %8547 = vmatpush.msrb.mxu3 %v8546_v18  ;;  %v8569_v18 = vsub.f32 %v16698_v53, %v22033_v25  ;;  %v8208_v25 = vld [vmem:[%s14937_s16 + $0xe8] sm:$0xff] }
 0xdd2   : > { %8619 = vmatpush.msrb.mxu0 %v16633_v6  ;;  %8667 = vmatpush.msrb.mxu1 %v16598_v22  ;;  %v16763_v33 = vand.u32 4294901760, %v8208_v25 }
 0xdd3   : > { %8139 = vmatmul.f32.vlgmr.msra.gmra.mxu1 %v15359_v15  ;;  %8452 = vmatpush.msrb.mxu2 %v16587_v16  ;;  %v8575_v15 = vsub.f32 %v16715_v21, %v21768_v4  ;;  %v8570_v19 = vand.u32 4294901760, %v8569_v18  ;;  %v16760_v4 = vsub.f32 %v8210_v20, %v16740_v54  ;;  %v16771_v18 = vand.u32 4294901760, %v8147_v5  ;;  %v8206_v20 = vld [vmem:[%s14937_s16 + $0xd8] sm:$0xff] }
 0xdd4   : > { %8553 = vmatpush.msrb.mxu3 %v8552_v48  ;;  %8622 = vmatpush.msrb.mxu0 %v16642_v47  ;;  %v16748_v48 = vand.u32 4294901760, %v8209_v57 }
 0xdd5   : > { %8669 = vmatpush.msrb.mxu1 %v16613_v26  ;;  %8454 = vmatpush.msrb.mxu2 %v16598_v22 }
 0xdd6   : > { %8559 = vmatpush.msrb.mxu3 %v8558_v7  ;;  %8625 = vmatpush.msrb.mxu0 %v16660_v50  ;;  %v8581_v7 = vsub.f32 %v16722_v23, %v22034_v56  ;;  %v8472_v56 = vsub.f32 %v8147_v5, %v16771_v18  ;;  %v8204_v5 = vld [vmem:[%s14937_s16 + $0xc8] sm:$0xff] }
 0xdd7   : > { %8671 = vmatpush.msrb.mxu1 %v16623_v3  ;;  %8039 = vmatmul.f32.vlgmr.msra.gmra.mxu2 %v15363_v37  ;;  %v8576_v37 = vand.u32 4294901760, %v8575_v15  ;;  %v16801_v15 = vsub.f32 %v8207_v35, %v16778_v11 }
 0xdd8   : > { %8077 = vmatmul.f32.gmra.mxu3 %v15431_v28  ;;  %8456 = vmatpush.msrb.mxu2 %v16613_v26  ;;  %v16769_v28 = vsub.f32 %v8209_v57, %v16748_v48  ;;  %v16785_v57 = vsub.f32 %v8208_v25, %v16763_v33  ;;  %v22037_v25 = vand.u32 4294901760, %v16760_v4  ;;  %v8473_v61 = vand.u32 4294901760, %v8472_v56 }
 0xdd9   : > { %8565 = vmatpush.msrb.mxu3 %v8564_v31  ;;  %8628 = vmatpush.msrb.mxu0 %v16670_v8  ;;  %v8582_v31 = vand.u32 4294901760, %v8581_v7  ;;  %v16790_v7 = vand.u32 4294901760, %v8206_v20  ;;  %22038 = vst [vmem:[#allocation25_spill] sm:$0xff] %v16801_v15  ;;  %v22045_v2 = vand.u32 4294901760, %v16801_v15 }
 0xdda   : > { %8673 = vmatpush.msrb.mxu1 %v16638_v9  ;;  %8114 = vmatmul.f32.gmra.mxu0 %v15400_v51  ;;  %22036 = vst [vmem:[#allocation24_spill] sm:$0xff] %v16785_v57  ;;  %v22043_v44 = vand.u32 4294901760, %v16785_v57 }
 0xddb   : > { %8458 = vmatpush.msrb.mxu2 %v16623_v3  ;;  %8571 = vmatpush.msrb.mxu3 %v8570_v19  ;;  %v8205_v19 = vld [vmem:[%s14937_s16 + $0xd0] sm:$0xff] }
 0xddc   : > { %8631 = vmatpush.msrb.mxu0 %v16688_v24  ;;  %8675 = vmatpush.msrb.mxu1 %v16648_v42  ;;  %v16803_v59 = vand.u32 4294901760, %v8205_v19  ;;  %v8875_v30 = vsub.f32 %v16785_v57, %v22043_v44  ;;  %v16863_v57 = vsub.f32 %v8203_v10, %v16838_v1 }
 0xddd   : > { %8143 = vmatmul.f32.gmra.mxu1 %v15400_v51  ;;  %8460 = vmatpush.msrb.mxu2 %v16638_v9  ;;  %v8163_v51 = vmax.f32 %v15906_v60, 0.0  ;;  %v16809_v60 = vpop.f32.mrf.mxu3 }
 0xdde   : > { %8577 = vmatpush.msrb.mxu3 %v8576_v37  ;;  %8634 = vmatpush.msrb.mxu0 %v16698_v53  ;;  %v8863_v37 = vsub.f32 %v16760_v4, %v22037_v25  ;;  %22039 = vst [vmem:[#allocation26_spill] sm:$0xff] %v16809_v60  ;;  %v16817_v25 = vsub.f32 %v8206_v20, %v16790_v7  ;;  %v8202_v60 = vld [vmem:[%s14937_s16 + $0xb8] sm:$0xff] }
 0xddf   : > { %8677 = vmatpush.msrb.mxu1 %v16665_v39  ;;  %8462 = vmatpush.msrb.mxu2 %v16648_v42  ;;  %v16824_v52 = vand.u32 4294901760, %v8163_v51  ;;  %v16830_v20 = vsub.f32 %v8205_v19, %v16803_v59  ;;  %v16850_v44 = vand.u32 4294901760, %v8202_v60 }
 0xde0   : > { %8583 = vmatpush.msrb.mxu3 %v8582_v31  ;;  %8637 = vmatpush.msrb.mxu0 %v16715_v21  ;;  %v22040_v31 = vand.u32 4294901760, %v16769_v28  ;;  %22041 = vst [vmem:[#allocation27_spill] sm:$0xff] %v16817_v25 }
 0xde1   : > { %8679 = vmatpush.msrb.mxu1 %v16676_v55  ;;  %8044 = vmatmul.f32.gmra.mxu2 %v15416_v27  ;;  %v8864_v27 = vand.u32 4294901760, %v8863_v37  ;;  %22042 = vst [vmem:[#allocation28_spill] sm:$0xff] %v16830_v20  ;;  %v8201_v37 = vld [vmem:[%s14937_s16 + $0xb0] sm:$0xff]  ;;  %v8480_v19 = vsub.f32 %v8163_v51, %v16824_v52 }
 0xde2   : > { %8771 = vmatpush.msra.mxu3 %v16517_v29  ;;  %v8869_v35 = vsub.f32 %v16769_v28, %v22040_v31  ;;  %8464 = vmatpush.msrb.mxu2 %v16665_v39  ;;  %v16822_v29 = vand.u32 4294901760, %v8204_v5  ;;  %v8474_v31 = vsub.f32 %v8472_v56, %v8473_v61 }
 0xde3   : > { %8585 = vmatmul.f32.vlgmr.msrb.gmra.mxu3 %v16771_v18  ;;  %8640 = vmatpush.msrb.mxu0 %v16722_v23  ;;  %v16859_v23 = vpop.f32.mrf.mxu1 }
 0xde4   : > { %8681 = vmatpush.msrb.mxu1 %v16693_v58  ;;  %8773 = vmatpush.msra.mxu3 %v16522_v40  ;;  %v8870_v40 = vand.u32 4294901760, %v8869_v35  ;;  %v16848_v36 = vsub.f32 %v8204_v5, %v16822_v29  ;;  %v8881_v35 = vsub.f32 %v16801_v15, %v22045_v2  ;;  %22046 = vst [vmem:[#allocation30_spill] sm:$0xff] %v16859_v23  ;;  %v8876_v5 = vand.u32 4294901760, %v8875_v30 }
 0xde5   : > { %8812 = vmatpush.msra.mxu0 %v16740_v54  ;;  %8466 = vmatpush.msrb.mxu2 %v16676_v55  ;;  %v22047_v2 = vand.u32 4294901760, %v16817_v25  ;;  %v8475_v15 = vand.u32 4294901760, %v8474_v31  ;;  %v22049_v31 = vand.u32 4294901760, %v16830_v20 }
 0xde6   : > { %8643 = vmatmul.f32.vlgmr.msrb.gmra.mxu0 %v8472_v56  ;;  %8683 = vmatpush.msrb.mxu1 %v16704_v0  ;;  %v8199_v56 = vld [vmem:[%s14937_s16 + $0xa0] sm:$0xff] }
 0xde7   : > { %8775 = vmatpush.msra.mxu3 %v16533_v49  ;;  %8814 = vmatpush.msra.mxu0 %v16748_v48  ;;  %v8200_v49 = vld [vmem:[%s14937_s16 + $0xa8] sm:$0xff]  ;;  %v8887_v51 = vsub.f32 %v16817_v25, %v22047_v2  ;;  %v8481_v2 = vand.u32 4294901760, %v8480_v19  ;;  %v8893_v23 = vsub.f32 %v16830_v20, %v22049_v31  ;;  %v16887_v25 = vpop.f32.mrf.mxu2  ;;  %v8197_v20 = vld [vmem:[%s14937_s16 + $0x90] sm:$0xff] }
 0xde8   : > { %8865 = vmatpush.msra.mxu1 %v8864_v27  ;;  %8468 = vmatpush.msrb.mxu2 %v16693_v58  ;;  %v16865_v27 = vand.u32 4294901760, %v8201_v37  ;;  %v16878_v10 = vand.u32 4294901760, %v8200_v49  ;;  %22050 = vst [vmem:[#allocation31_spill] sm:$0xff] %v16887_v25 }
 0xde9   : > { %8687 = vmatmul.f32.vlgmr.msrb.gmra.mxu1 %v8473_v61  ;;  %8777 = vmatpush.msra.mxu3 %v16542_v63  ;;  %v16876_v61 = vsub.f32 %v8202_v60, %v16850_v44  ;;  %v22048_v63 = vand.u32 4294901760, %v16531_v46  ;;  %v16893_v46 = vand.u32 4294901760, %v8199_v56  ;;  %v8888_v31 = vand.u32 4294901760, %v8887_v51 }
 0xdea   : > { %8816 = vmatpush.msra.mxu0 %v16763_v33  ;;  %8871 = vmatpush.msra.mxu1 %v8870_v40  ;;  %v8882_v40 = vand.u32 4294901760, %v8881_v35  ;;  %v16891_v30 = vsub.f32 %v8201_v37, %v16865_v27  ;;  %v22052_v35 = vand.u32 4294901760, %v16540_v62  ;;  %v16908_v60 = vsub.f32 %v8200_v49, %v16878_v10  ;;  %v16912_v62 = vpop.f32.mrf.mxu0 }
 0xdeb   : > { %8470 = vmatpush.msrb.mxu2 %v16704_v0  ;;  %8779 = vmatpush.msra.mxu3 %v16555_v41  ;;  %v8198_v41 = vld [vmem:[%s14937_s16 + $0x98] sm:$0xff]  ;;  %22054 = vst [vmem:[#allocation33_spill] sm:$0xff] %v16912_v62  ;;  %v8894_v51 = vand.u32 4294901760, %v8893_v23  ;;  %v16922_v25 = vsub.f32 %v8199_v56, %v16893_v46  ;;  %v16924_v62 = vand.u32 4294901760, %v8197_v20  ;;  %v8148_v23 = vmax.f32 %v15964_v32, 0.0  ;;  %v8195_v32 = vld [vmem:[%s14937_s16 + $0x80] sm:$0xff] }
 0xdec   : > { %8818 = vmatpush.msra.mxu0 %v16778_v11  ;;  %8877 = vmatpush.msra.mxu1 %v8876_v5 }
 0xded   : > { %8700 = vmatpush.msra.mxu2 %v22048_v63  ;;  %v16895_v63 = vpop.f32.mrf.mxu3  ;;  %8589 = vmatmul.f32.gmra.mxu3 %v16824_v52 }
 0xdee   : > { %8476 = vmatmul.f32.vlgmr.msrb.gmra.mxu2 %v8475_v15  ;;  %22051 = vst [vmem:[#allocation32_spill] sm:$0xff] %v16895_v63  ;;  %8781 = vmatpush.msra.mxu3 %v16566_v13  ;;  %v22053_v15 = vand.u32 4294901760, %v16848_v36  ;;  %v16910_v63 = vand.u32 4294901760, %v8198_v41  ;;  %v8482_v13 = vsub.f32 %v8480_v19, %v8481_v2 }
 0xdef   : > { %8704 = vmatpush.msra.mxu2 %v22052_v35  ;;  %8820 = vmatpush.msra.mxu0 %v16790_v7  ;;  %v22055_v35 = vand.u32 4294901760, %v16551_v45  ;;  %v16929_v45 = vpop.f32.mrf.mxu1 }
 0xdf0   : > { %v8899_v37 = vsub.f32 %v16848_v36, %v22053_v15  ;;  %8883 = vmatpush.msra.mxu1 %v8882_v40  ;;  %8648 = vmatmul.f32.gmra.mxu0 %v8480_v19  ;;  %v22056_v15 = vand.u32 4294901760, %v16863_v57  ;;  %v8196_v40 = vld [vmem:[%s14937_s16 + $0x88] sm:$0xff]  ;;  %22057 = vst [vmem:[#allocation34_spill] sm:$0xff] %v16929_v45  ;;  %v16938_v49 = vsub.f32 %v8198_v41, %v16910_v63  ;;  %v8928_v41 = vand.u32 4294901760, %v16922_v25  ;;  %v8233_v45 = vld [vmem:[%s14937_s16 + $0x1b0] sm:$0xff] }
 0xdf1   : > { %8708 = vmatpush.msra.mxu2 %v22055_v35  ;;  %8783 = vmatpush.msra.mxu3 %v16587_v16  ;;  %v22058_v16 = vand.u32 4294901760, %v16562_v12  ;;  %v22059_v35 = vand.u32 4294901760, %v16876_v61  ;;  %v22060_v12 = vand.u32 4294901760, %v16577_v43  ;;  %v16960_v43 = vpop.f32.mrf.mxu2 }
 0xdf2   : > { %v8905_v5 = vsub.f32 %v16863_v57, %v22056_v15  ;;  %8822 = vmatpush.msra.mxu0 %v16803_v59  ;;  %8889 = vmatpush.msra.mxu1 %v8888_v31  ;;  %v8900_v19 = vand.u32 4294901760, %v8899_v37  ;;  %v8483_v31 = vand.u32 4294901760, %v8482_v13  ;;  %v16952_v15 = vsub.f32 %v8197_v20, %v16924_v62  ;;  %22062 = vst [vmem:[#allocation35_spill] sm:$0xff] %v16960_v43  ;;  %v8231_v43 = vld [vmem:[%s14937_s16 + $0x1a0] sm:$0xff] }
 0xdf3   : > { %8693 = vmatmul.f32.gmra.mxu1 %v8481_v2  ;;  %8712 = vmatpush.msra.mxu2 %v22058_v16  ;;  %v8911_v56 = vsub.f32 %v16876_v61, %v22059_v35  ;;  %v16943_v2 = vand.u32 4294901760, %v8196_v40  ;;  %v22061_v16 = vand.u32 4294901760, %v16891_v30  ;;  %v22063_v13 = vand.u32 4294901760, %v16908_v60 }
 0xdf4   : > { %8785 = vmatpush.msra.mxu3 %v16598_v22  ;;  %8824 = vmatpush.msra.mxu0 %v16822_v29  ;;  %v8906_v37 = vand.u32 4294901760, %v8905_v5  ;;  %v16954_v22 = vand.u32 4294901760, %v8148_v23  ;;  %v8934_v20 = vand.u32 4294901760, %v16938_v49 }
 0xdf5   : > { %8895 = vmatpush.msra.mxu1 %v8894_v51  ;;  %8716 = vmatpush.msra.mxu2 %v22060_v12  ;;  %v8917_v35 = vsub.f32 %v16891_v30, %v22061_v16  ;;  %v16958_v51 = vand.u32 4294901760, %v8195_v32  ;;  %v8912_v5 = vand.u32 4294901760, %v8911_v56  ;;  %v8923_v12 = vsub.f32 %v16908_v60, %v22063_v13 }
 0xdf6   : > { %8787 = vmatpush.msra.mxu3 %v16613_v26  ;;  %8826 = vmatpush.msra.mxu0 %v16838_v1  ;;  %v22064_v16 = vand.u32 4294901760, %v16592_v34  ;;  %v16970_v26 = vsub.f32 %v8196_v40, %v16943_v2  ;;  %v8929_v56 = vsub.f32 %v16922_v25, %v8928_v41  ;;  %v16978_v13 = vsub.f32 %v8148_v23, %v16954_v22 }
 0xdf7   : > { %8901 = vmatpush.msra.mxu1 %v8900_v19  ;;  %8484 = vmatmul.f32.gmra.mxu2 %v8483_v31  ;;  %v8918_v19 = vand.u32 4294901760, %v8917_v35  ;;  %v8940_v31 = vand.u32 4294901760, %v16952_v15  ;;  %v22065_v34 = vand.u32 4294901760, %v16607_v38  ;;  %v8924_v40 = vand.u32 4294901760, %v8923_v12 }
 0xdf8   : > { %8720 = vmatpush.msra.mxu2 %v22064_v16  ;;  %8789 = vmatpush.msra.mxu3 %v16623_v3  ;;  %v16984_v3 = vsub.f32 %v8195_v32, %v16958_v51  ;;  %v8164_v35 = vmax.f32 %v15987_v17, 0.0  ;;  %v22066_v23 = vand.u32 4294901760, %v16617_v14  ;;  %v8946_v38 = vand.u32 4294901760, %v16970_v26 }
 0xdf9   : > { %8828 = vmatpush.msra.mxu0 %v16850_v44  ;;  %8907 = vmatpush.msra.mxu1 %v8906_v37  ;;  %v8935_v37 = vsub.f32 %v16938_v49, %v8934_v20  ;;  %v8941_v32 = vsub.f32 %v16952_v15, %v8940_v31  ;;  %v8845_v17 = vand.u32 4294901760, %v16978_v13  ;;  %v22068_v16 = vand.u32 4294901760, %v16642_v47 }
 0xdfa   : > { %8724 = vmatpush.msra.mxu2 %v22065_v34  ;;  %8791 = vmatpush.msra.mxu3 %v16638_v9  ;;  %v8930_v9 = vand.u32 4294901760, %v8929_v56  ;;  %v8952_v14 = vand.u32 4294901760, %v16984_v3  ;;  %v17005_v12 = vand.u32 4294901760, %v8164_v35  ;;  %v22070_v56 = vand.u32 4294901760, %v16670_v8  ;;  %v17038_v8 = vpop.f32.mrf.mxu0 }
 0xdfb   : > { %8830 = vmatpush.msra.mxu0 %v16865_v27  ;;  %8913 = vmatpush.msra.mxu1 %v8912_v5  ;;  %v22067_v5 = vand.u32 4294901760, %v16633_v6  ;;  %v8947_v6 = vsub.f32 %v16970_v26, %v8946_v38  ;;  %v8846_v47 = vsub.f32 %v16978_v13, %v8845_v17  ;;  %22073 = vst [vmem:[#allocation37_spill] sm:$0xff] %v17038_v8 }
 0xdfc   : > { %8728 = vmatpush.msra.mxu2 %v22066_v23  ;;  %8793 = vmatpush.msra.mxu3 %v16648_v42  ;;  %v8936_v42 = vand.u32 4294901760, %v8935_v37  ;;  %v17028_v34 = vsub.f32 %v8164_v35, %v17005_v12  ;;  %v22074_v35 = vand.u32 4294901760, %v16760_v4 }
 0xdfd   : > { %8832 = vmatpush.msra.mxu0 %v16878_v10  ;;  %8919 = vmatpush.msra.mxu1 %v8918_v19  ;;  %v22069_v19 = vand.u32 4294901760, %v16660_v50  ;;  %v8948_v50 = vand.u32 4294901760, %v8947_v6  ;;  %v8847_v37 = vand.u32 4294901760, %v8846_v47  ;;  %v17062_v6 = vpop.f32.mrf.mxu2  ;;  %v22085_v47 = vld [vmem:[#allocation25_spill] sm:$0xff] }
 0xdfe   : > { %8732 = vmatpush.msra.mxu2 %v22067_v5  ;;  %8795 = vmatpush.msra.mxu3 %v16665_v39  ;;  %v8942_v39 = vand.u32 4294901760, %v8941_v32  ;;  %v22077_v32 = vand.u32 4294901760, %v16769_v28 }
 0xdff   : > { %8834 = vmatpush.msra.mxu0 %v16893_v46  ;;  %8925 = vmatpush.msra.mxu1 %v8924_v40  ;;  %v22072_v40 = vand.u32 4294901760, %v16688_v24  ;;  %v22075_v24 = vand.u32 4294901760, %v16698_v53  ;;  %v22079_v53 = vld [vmem:[#allocation24_spill] sm:$0xff] }
 0xe00   : > { %8736 = vmatpush.msra.mxu2 %v22068_v16  ;;  %8797 = vmatpush.msra.mxu3 %v16676_v55  ;;  %v8953_v55 = vsub.f32 %v16984_v3, %v8952_v14  ;;  %v22080_v16 = vand.u32 4294901760, %v22079_v53  ;;  %22081 = vst [vmem:[#allocation24_spill] sm:$0xff] %v17062_v6 }
 0xe01   : > { %8836 = vmatpush.msra.mxu0 %v16910_v63  ;;  %8931 = vmatpush.msra.mxu1 %v8930_v9  ;;  %v17046_v9 = vpop.f32.mrf.mxu1 }
 0xe02   : > { %8740 = vmatpush.msra.mxu2 %v22069_v19  ;;  %8799 = vmatpush.msra.mxu3 %v16693_v58  ;;  %v17030_v58 = vpop.f32.mrf.mxu3  ;;  %v8954_v23 = vand.u32 4294901760, %v8953_v55  ;;  %22076 = vst [vmem:[#allocation38_spill] sm:$0xff] %v17046_v9  ;;  %v17074_v55 = vpop.f32.mrf.mxu0 }
 0xe03   : > { %8838 = vmatpush.msra.mxu0 %v16924_v62  ;;  %8937 = vmatpush.msra.mxu1 %v8936_v42  ;;  %22071 = vst [vmem:[#allocation36_spill] sm:$0xff] %v17030_v58  ;;  %v22078_v42 = vand.u32 4294901760, %v16715_v21 }
 0xe04   : > { %8744 = vmatpush.msra.mxu2 %v22070_v56  ;;  %8801 = vmatpush.msra.mxu3 %v16704_v0  ;;  %v8853_v0 = vand.u32 4294901760, %v17028_v34 }
 0xe05   : > { %8840 = vmatpush.msra.mxu0 %v16943_v2  ;;  %8943 = vmatpush.msra.mxu1 %v8942_v39 }
 0xe06   : > { %8803 = vmatmul.f32.vlgmr.msra.gmra.mxu3 %v16771_v18  ;;  %8748 = vmatpush.msra.mxu2 %v22072_v40  ;;  %v8854_v5 = vsub.f32 %v17028_v34, %v8853_v0  ;;  %v8225_v40 = vld [vmem:[%s14937_s16 + $0x170] sm:$0xff] }
 0xe07   : > { %9025 = vmatpush.msrb.mxu3 %v16740_v54  ;;  %8842 = vmatpush.msra.mxu0 %v16958_v51 }
 0xe08   : > { %8949 = vmatpush.msra.mxu1 %v8948_v50  ;;  %8848 = vmatmul.f32.vlgmr.msra.gmra.mxu0 %v8847_v37  ;;  %v8855_v21 = vand.u32 4294901760, %v8854_v5  ;;  %v8226_v50 = vld [vmem:[%s14937_s16 + $0x178] sm:$0xff] }
 0xe09   : > { %9027 = vmatpush.msrb.mxu3 %v16748_v48  ;;  %9072 = vmatpush.msrb.mxu0 %v22074_v35  ;;  %v17093_v37 = vand.u32 4294901760, %v8226_v50  ;;  %v17099_v35 = vpop.f32.mrf.mxu2 }
 0xe0a   : > { %8752 = vmatpush.msra.mxu2 %v22075_v24  ;;  %8955 = vmatpush.msra.mxu1 %v8954_v23  ;;  %v17064_v39 = vpop.f32.mrf.mxu3  ;;  %v8224_v23 = vld [vmem:[%s14937_s16 + $0x168] sm:$0xff]  ;;  %v17103_v24 = vand.u32 4294901760, %v8225_v40 }
 0xe0b   : > { %8957 = vmatmul.f32.vlgmr.msra.gmra.mxu1 %v16954_v22  ;;  %9029 = vmatpush.msrb.mxu3 %v16763_v33  ;;  %22082 = vst [vmem:[#allocation39_spill] sm:$0xff] %v17064_v39  ;;  %v17112_v5 = vsub.f32 %v8226_v50, %v17093_v37 }
 0xe0c   : > { %9076 = vmatpush.msrb.mxu0 %v22077_v32  ;;  %9143 = vmatpush.msrb.mxu1 %v16740_v54  ;;  %v22083_v54 = vld [vmem:[#allocation22_spill] sm:$0xff]  ;;  %v22095_v32 = vand.u32 4294901760, %v16863_v57 }
 0xe0d   : > { %8756 = vmatpush.msra.mxu2 %v22078_v42  ;;  %9031 = vmatpush.msrb.mxu3 %v16778_v11  ;;  %v22084_v19 = vand.u32 4294901760, %v22083_v54  ;;  %22087 = vst [vmem:[#allocation22_spill] sm:$0xff] %v17074_v55  ;;  %v17114_v42 = vand.u32 4294901760, %v8224_v23  ;;  %v21790_v54 = vand.u32 4294901760, %v17112_v5 }
 0xe0e   : > { %9080 = vmatpush.msrb.mxu0 %v22080_v16  ;;  %9145 = vmatpush.msrb.mxu1 %v16748_v48  ;;  %v22086_v48 = vand.u32 4294901760, %v22085_v47  ;;  %v22097_v16 = vand.u32 4294901760, %v16891_v30 }
 0xe0f   : > { %8760 = vmatpush.msra.mxu2 %v22084_v19  ;;  %8807 = vmatmul.f32.gmra.mxu3 %v16824_v52 }
 0xe10   : > { %8762 = vmatmul.f32.vlgmr.msra.gmra.mxu2 %v16771_v18  ;;  %9033 = vmatpush.msrb.mxu3 %v16790_v7  ;;  %v22088_v18 = vld [vmem:[#allocation27_spill] sm:$0xff] }
 0xe11   : > { %8967 = vmatpush.msrb.mxu2 %v16760_v4  ;;  %9084 = vmatpush.msrb.mxu0 %v22086_v48  ;;  %v22089_v56 = vand.u32 4294901760, %v22088_v18  ;;  %v17083_v4 = vpop.f32.mrf.mxu1  ;;  %22094 = vst [vmem:[#allocation27_spill] sm:$0xff] %v17099_v35  ;;  %v9235_v48 = vsub.f32 %v17112_v5, %v21790_v54 }
 0xe12   : > { %9147 = vmatpush.msrb.mxu1 %v16763_v33  ;;  %8856 = vmatmul.f32.gmra.mxu0 %v8855_v21  ;;  %22090 = vst [vmem:[#allocation25_spill] sm:$0xff] %v17083_v4  ;;  %v22091_v33 = vld [vmem:[#allocation28_spill] sm:$0xff]  ;;  %v22098_v21 = vand.u32 4294901760, %v16908_v60 }
 0xe13   : > { %8970 = vmatpush.msrb.mxu2 %v16769_v28  ;;  %9035 = vmatpush.msrb.mxu3 %v16803_v59  ;;  %v22092_v28 = vand.u32 4294901760, %v22091_v33 }
 0xe14   : > { %9088 = vmatpush.msrb.mxu0 %v22089_v56  ;;  %9149 = vmatpush.msrb.mxu1 %v16778_v11  ;;  %v22093_v11 = vand.u32 4294901760, %v16848_v36  ;;  %v8219_v56 = vld [vmem:[%s14937_s16 + $0x140] sm:$0xff] }
 0xe15   : > { %8961 = vmatmul.f32.gmra.mxu1 %v17005_v12  ;;  %8973 = vmatpush.msrb.mxu2 %v22079_v53 }
 0xe16   : > { %9037 = vmatpush.msrb.mxu3 %v16822_v29  ;;  %9092 = vmatpush.msrb.mxu0 %v22092_v28  ;;  %v8218_v28 = vld [vmem:[%s14937_s16 + $0x138] sm:$0xff] }
 0xe17   : > { %9151 = vmatpush.msrb.mxu1 %v16790_v7  ;;  %8976 = vmatpush.msrb.mxu2 %v22085_v47  ;;  %v8223_v7 = vld [vmem:[%s14937_s16 + $0x160] sm:$0xff] }
 0xe18   : > { %9039 = vmatpush.msrb.mxu3 %v16838_v1  ;;  %9096 = vmatpush.msrb.mxu0 %v22093_v11  ;;  %v17124_v53 = vand.u32 4294901760, %v8223_v7 }
 0xe19   : > { %9153 = vmatpush.msrb.mxu1 %v16803_v59  ;;  %8766 = vmatmul.f32.gmra.mxu2 %v16824_v52  ;;  %v22096_v52 = vand.u32 4294901760, %v16876_v61  ;;  %v17122_v59 = vsub.f32 %v8225_v40, %v17103_v24 }
 0xe1a   : > { %8979 = vmatpush.msrb.mxu2 %v22088_v18  ;;  %9041 = vmatpush.msrb.mxu3 %v16850_v44  ;;  %v17146_v47 = vsub.f32 %v8223_v7, %v17124_v53 }
 0xe1b   : > { %9100 = vmatpush.msrb.mxu0 %v22095_v32  ;;  %9155 = vmatpush.msrb.mxu1 %v16822_v29  ;;  %v8222_v29 = vld [vmem:[%s14937_s16 + $0x158] sm:$0xff]  ;;  %v8216_v32 = vld [vmem:[%s14937_s16 + $0x128] sm:$0xff] }
 0xe1c   : > { %8982 = vmatpush.msrb.mxu2 %v22091_v33  ;;  %9043 = vmatpush.msrb.mxu3 %v16865_v27  ;;  %v17138_v19 = vand.u32 4294901760, %v8222_v29  ;;  %v17186_v33 = vand.u32 4294901760, %v8219_v56 }
 0xe1d   : > { %9104 = vmatpush.msrb.mxu0 %v22096_v52  ;;  %9157 = vmatpush.msrb.mxu1 %v16838_v1  ;;  %v17134_v1 = vsub.f32 %v8224_v23, %v17114_v42  ;;  %v17207_v23 = vand.u32 4294901760, %v8218_v28  ;;  %v17216_v52 = vpop.f32.mrf.mxu0 }
 0xe1e   : > { %8985 = vmatpush.msrb.mxu2 %v16848_v36  ;;  %9045 = vmatpush.msrb.mxu3 %v16878_v10  ;;  %v8221_v36 = vld [vmem:[%s14937_s16 + $0x150] sm:$0xff]  ;;  %v17213_v7 = vsub.f32 %v8219_v56, %v17186_v33  ;;  %22100 = vst [vmem:[#allocation40_spill] sm:$0xff] %v17216_v52 }
 0xe1f   : > { %9108 = vmatpush.msrb.mxu0 %v22097_v16  ;;  %9159 = vmatpush.msrb.mxu1 %v16850_v44  ;;  %v21788_v44 = vand.u32 4294901760, %v17122_v59  ;;  %v17158_v18 = vand.u32 4294901760, %v8221_v36  ;;  %v8215_v16 = vld [vmem:[%s14937_s16 + $0x120] sm:$0xff] }
 0xe20   : > { %8988 = vmatpush.msrb.mxu2 %v16863_v57  ;;  %9047 = vmatpush.msrb.mxu3 %v16893_v46  ;;  %v8220_v57 = vld [vmem:[%s14937_s16 + $0x148] sm:$0xff] }
 0xe21   : > { %9112 = vmatpush.msrb.mxu0 %v22098_v21  ;;  %9161 = vmatpush.msrb.mxu1 %v16865_v27  ;;  %v21787_v27 = vand.u32 4294901760, %v17134_v1  ;;  %v17173_v50 = vand.u32 4294901760, %v8220_v57  ;;  %v17235_v21 = vpop.f32.mrf.mxu1 }
 0xe22   : > { %8991 = vmatpush.msrb.mxu2 %v16876_v61  ;;  %9049 = vmatpush.msrb.mxu3 %v16910_v63  ;;  %v17163_v61 = vsub.f32 %v8222_v29, %v17138_v19  ;;  %22101 = vst [vmem:[#allocation41_spill] sm:$0xff] %v17235_v21 }
 0xe23   : > { %9116 = vmatpush.msrb.mxu0 %v8928_v41  ;;  %9163 = vmatpush.msrb.mxu1 %v16878_v10  ;;  %v9241_v10 = vsub.f32 %v17122_v59, %v21788_v44  ;;  %v21783_v41 = vand.u32 4294901760, %v17146_v47  ;;  %v17201_v11 = vsub.f32 %v8220_v57, %v17173_v50 }
 0xe24   : > { %8994 = vmatpush.msrb.mxu2 %v16891_v30  ;;  %9051 = vmatpush.msrb.mxu3 %v16924_v62  ;;  %v9236_v30 = vand.u32 4294901760, %v9235_v48  ;;  %v21779_v48 = vand.u32 4294901760, %v17213_v7 }
 0xe25   : > { %9120 = vmatpush.msrb.mxu0 %v8934_v20  ;;  %9165 = vmatpush.msrb.mxu1 %v16893_v46  ;;  %v9247_v46 = vsub.f32 %v17134_v1, %v21787_v27  ;;  %v17184_v20 = vsub.f32 %v8221_v36, %v17158_v18  ;;  %v9253_v40 = vsub.f32 %v17146_v47, %v21783_v41  ;;  %v21778_v29 = vand.u32 4294901760, %v17201_v11 }
 0xe26   : > { %8997 = vmatpush.msrb.mxu2 %v16908_v60  ;;  %9053 = vmatpush.msrb.mxu3 %v16943_v2  ;;  %v21782_v60 = vand.u32 4294901760, %v17163_v61  ;;  %v17233_v36 = vand.u32 4294901760, %v8216_v32 }
 0xe27   : > { %9124 = vmatpush.msrb.mxu0 %v8940_v31  ;;  %9167 = vmatpush.msrb.mxu1 %v16910_v63  ;;  %v17192_v31 = vpop.f32.mrf.mxu3  ;;  %v9242_v63 = vand.u32 4294901760, %v9241_v10  ;;  %v17248_v10 = vand.u32 4294901760, %v8215_v16 }
 0xe28   : > { %9000 = vmatpush.msrb.mxu2 %v16922_v25  ;;  %9055 = vmatpush.msrb.mxu3 %v16958_v51  ;;  %22099 = vst [vmem:[#allocation28_spill] sm:$0xff] %v17192_v31  ;;  %v8217_v25 = vld [vmem:[%s14937_s16 + $0x130] sm:$0xff] }
 0xe29   : > { %9128 = vmatpush.msrb.mxu0 %v8946_v38  ;;  %9169 = vmatpush.msrb.mxu1 %v16924_v62  ;;  %v9248_v62 = vand.u32 4294901760, %v9247_v46  ;;  %v21780_v38 = vand.u32 4294901760, %v17184_v20  ;;  %v17309_v41 = vpop.f32.mrf.mxu1 }
 0xe2a   : > { %9059 = vmatmul.f32.vlgmr.msrb.gmra.mxu3 %v8845_v17  ;;  %9003 = vmatpush.msrb.mxu2 %v16938_v49  ;;  %v9259_v49 = vsub.f32 %v17163_v61, %v21782_v60  ;;  %v17223_v17 = vand.u32 4294901760, %v8217_v25  ;;  %22105 = vst [vmem:[#allocation45_spill] sm:$0xff] %v17309_v41 }
 0xe2b   : > { %9237 = vmatpush.msra.mxu3 %v9236_v30  ;;  %9132 = vmatpush.msrb.mxu0 %v8952_v14  ;;  %v9254_v14 = vand.u32 4294901760, %v9253_v40  ;;  %v9265_v57 = vsub.f32 %v17184_v20, %v21780_v38  ;;  %v8213_v30 = vld [vmem:[%s14937_s16 + $0x110] sm:$0xff]  ;;  %v17263_v40 = vpop.f32.mrf.mxu2 }
 0xe2c   : > { %9171 = vmatpush.msrb.mxu1 %v16943_v2  ;;  %9134 = vmatmul.f32.vlgmr.msrb.gmra.mxu0 %v16954_v22  ;;  %v17231_v2 = vsub.f32 %v8218_v28, %v17207_v23  ;;  %v17246_v56 = vsub.f32 %v8217_v25, %v17223_v17  ;;  %v17259_v28 = vsub.f32 %v8216_v32, %v17233_v36 }
 0xe2d   : > { %9243 = vmatpush.msra.mxu3 %v9242_v63  ;;  %9339 = vmatpush.msra.mxu0 %v17112_v5  ;;  %22102 = vst [vmem:[#allocation42_spill] sm:$0xff] %v17263_v40  ;;  %v9266_v25 = vand.u32 4294901760, %v9265_v57  ;;  %v17284_v57 = vpop.f32.mrf.mxu0 }
 0xe2e   : > { %9006 = vmatpush.msrb.mxu2 %v16952_v15  ;;  %9173 = vmatpush.msrb.mxu1 %v16958_v51  ;;  %v8214_v15 = vld [vmem:[%s14937_s16 + $0x118] sm:$0xff]  ;;  %v9260_v51 = vand.u32 4294901760, %v9259_v49  ;;  %v21781_v46 = vand.u32 4294901760, %v17231_v2  ;;  %v8212_v49 = vld [vmem:[%s14937_s16 + $0x108] sm:$0xff]  ;;  %v21784_v32 = vand.u32 4294901760, %v17246_v56  ;;  %22104 = vst [vmem:[#allocation44_spill] sm:$0xff] %v17284_v57 }
 0xe2f   : > { %9175 = vmatmul.f32.vlgmr.msrb.gmra.mxu1 %v16954_v22  ;;  %9249 = vmatpush.msra.mxu3 %v9248_v62  ;;  %v9271_v22 = vsub.f32 %v17201_v11, %v21778_v29  ;;  %v17261_v63 = vand.u32 4294901760, %v8214_v15  ;;  %v9277_v62 = vsub.f32 %v17213_v7, %v21779_v48  ;;  %v17279_v29 = vand.u32 4294901760, %v8213_v30  ;;  %v8239_v57 = vld [vmem:[%s14937_s16 + $0x1e0] sm:$0xff] }
 0xe30   : > { %9342 = vmatpush.msra.mxu0 %v17122_v59  ;;  %9397 = vmatpush.msra.mxu1 %v17093_v37  ;;  %v17295_v48 = vand.u32 4294901760, %v8212_v49  ;;  %v9289_v38 = vsub.f32 %v17246_v56, %v21784_v32 }
 0xe31   : > { %9009 = vmatpush.msrb.mxu2 %v16970_v26  ;;  %9255 = vmatpush.msra.mxu3 %v9254_v14  ;;  %v17265_v26 = vpop.f32.mrf.mxu3  ;;  %v17277_v14 = vsub.f32 %v8215_v16, %v17248_v10  ;;  %v21785_v16 = vand.u32 4294901760, %v17259_v28  ;;  %v17305_v60 = vsub.f32 %v8213_v30, %v17279_v29 }
 0xe32   : > { %9345 = vmatpush.msra.mxu0 %v17134_v1  ;;  %9399 = vmatpush.msra.mxu1 %v17103_v24  ;;  %22103 = vst [vmem:[#allocation43_spill] sm:$0xff] %v17265_v26  ;;  %v17319_v32 = vsub.f32 %v8212_v49, %v17295_v48 }
 0xe33   : > { %9012 = vmatpush.msrb.mxu2 %v16984_v3  ;;  %9065 = vmatmul.f32.gmra.mxu3 %v8853_v0  ;;  %v9272_v3 = vand.u32 4294901760, %v9271_v22  ;;  %v8211_v0 = vld [vmem:[%s14937_s16 + $0x100] sm:$0xff]  ;;  %v9278_v22 = vand.u32 4294901760, %v9277_v62  ;;  %v9295_v62 = vsub.f32 %v17259_v28, %v21785_v16  ;;  %v17331_v49 = vpop.f32.mrf.mxu2 }
 0xe34   : > { %9015 = vmatmul.f32.vlgmr.msrb.gmra.mxu2 %v16978_v13  ;;  %9261 = vmatpush.msra.mxu3 %v9260_v51  ;;  %v9283_v13 = vsub.f32 %v17231_v2, %v21781_v46  ;;  %v17293_v51 = vsub.f32 %v8214_v15, %v17261_v63  ;;  %v21786_v46 = vand.u32 4294901760, %v17277_v14  ;;  %v17307_v15 = vand.u32 4294901760, %v8211_v0  ;;  %22106 = vst [vmem:[#allocation46_spill] sm:$0xff] %v17331_v49 }
 0xe35   : > { %9184 = vmatpush.msra.mxu2 %v17093_v37  ;;  %9348 = vmatpush.msra.mxu0 %v17146_v47  ;;  %v21792_v27 = vand.u32 4294901760, %v17319_v32  ;;  %v17386_v49 = vand.u32 4294901760, %v8239_v57  ;;  %v17432_v39 = vpop.f32.mrf.mxu0 }
 0xe36   : > { %9401 = vmatpush.msra.mxu1 %v17114_v42  ;;  %9138 = vmatmul.f32.gmra.mxu0 %v17005_v12  ;;  %v21789_v30 = vand.u32 4294901760, %v17293_v51  ;;  %v17329_v16 = vsub.f32 %v8211_v0, %v17307_v15  ;;  %v8241_v0 = vld [vmem:[%s14937_s16 + $0x1f0] sm:$0xff]  ;;  %22116 = vst [vmem:[#allocation49_spill] sm:$0xff] %v17432_v39 }
 0xe37   : > { %9186 = vmatpush.msra.mxu2 %v17103_v24  ;;  %9267 = vmatpush.msra.mxu3 %v9266_v25  ;;  %v9284_v25 = vand.u32 4294901760, %v9283_v13  ;;  %v21791_v13 = vand.u32 4294901760, %v17305_v60 }
 0xe38   : > { %9351 = vmatpush.msra.mxu0 %v17163_v61  ;;  %9403 = vmatpush.msra.mxu1 %v17124_v53  ;;  %v22108_v41 = vand.u32 4294901760, %v17329_v16 }
 0xe39   : > { %9179 = vmatmul.f32.gmra.mxu1 %v17005_v12  ;;  %9188 = vmatpush.msra.mxu2 %v17114_v42  ;;  %v9290_v12 = vand.u32 4294901760, %v9289_v38  ;;  %v9296_v38 = vand.u32 4294901760, %v9295_v62  ;;  %v17412_v31 = vpop.f32.mrf.mxu3 }
 0xe3a   : > { %9273 = vmatpush.msra.mxu3 %v9272_v3  ;;  %9354 = vmatpush.msra.mxu0 %v17184_v20  ;;  %v9301_v3 = vsub.f32 %v17277_v14, %v21786_v46  ;;  %v9307_v46 = vsub.f32 %v17293_v51, %v21789_v30  ;;  %v22107_v30 = vld [vmem:[#allocation10_spill] sm:$0xff] }
 0xe3b   : > { %9405 = vmatpush.msra.mxu1 %v17138_v19  ;;  %9190 = vmatpush.msra.mxu2 %v17124_v53  ;;  %v8149_v54 = vmax.f32 %v22107_v30, 0.0  ;;  %v8240_v30 = vld [vmem:[%s14937_s16 + $0x1e8] sm:$0xff] }
 0xe3c   : > { %9279 = vmatpush.msra.mxu3 %v9278_v22  ;;  %9357 = vmatpush.msra.mxu0 %v17201_v11  ;;  %v8242_v22 = vld [vmem:[%s14937_s16 + $0x1f8] sm:$0xff] }
 0xe3d   : > { %9407 = vmatpush.msra.mxu1 %v17158_v18  ;;  %9020 = vmatmul.f32.gmra.mxu2 %v17028_v34  ;;  %v9302_v34 = vand.u32 4294901760, %v9301_v3  ;;  %v17349_v44 = vand.u32 4294901760, %v8242_v22  ;;  %v9319_v3 = vsub.f32 %v17319_v32, %v21792_v27  ;;  %v17370_v27 = vand.u32 4294901760, %v8149_v54 }
 0xe3e   : > { %9192 = vmatpush.msra.mxu2 %v17138_v19  ;;  %9285 = vmatpush.msra.mxu3 %v9284_v25  ;;  %v9313_v25 = vsub.f32 %v17305_v60, %v21791_v13  ;;  %v17358_v13 = vand.u32 4294901760, %v8241_v0 }
 0xe3f   : > { %9360 = vmatpush.msra.mxu0 %v17213_v7  ;;  %9409 = vmatpush.msra.mxu1 %v17173_v50 }
 0xe40   : > { %9194 = vmatpush.msra.mxu2 %v17158_v18  ;;  %9291 = vmatpush.msra.mxu3 %v9290_v12  ;;  %v9308_v12 = vand.u32 4294901760, %v9307_v46  ;;  %v9314_v62 = vand.u32 4294901760, %v9313_v25  ;;  %v9325_v46 = vsub.f32 %v17329_v16, %v22108_v41  ;;  %v17376_v25 = vand.u32 4294901760, %v8240_v30  ;;  %v8238_v41 = vld [vmem:[%s14937_s16 + $0x1d8] sm:$0xff] }
 0xe41   : > { %9363 = vmatpush.msra.mxu0 %v17231_v2  ;;  %9411 = vmatpush.msra.mxu1 %v17186_v33  ;;  %v17379_v26 = vsub.f32 %v8241_v0, %v17358_v13  ;;  %v8237_v0 = vld [vmem:[%s14937_s16 + $0x1d0] sm:$0xff]  ;;  %v17398_v21 = vand.u32 4294901760, %v8238_v41 }
 0xe42   : > { %9196 = vmatpush.msra.mxu2 %v17173_v50  ;;  %9297 = vmatpush.msra.mxu3 %v9296_v38  ;;  %v17368_v38 = vsub.f32 %v8242_v22, %v17349_v44  ;;  %v9326_v22 = vand.u32 4294901760, %v9325_v46  ;;  %v17396_v46 = vsub.f32 %v8240_v30, %v17376_v25  ;;  %v8236_v30 = vld [vmem:[%s14937_s16 + $0x1c8] sm:$0xff] }
 0xe43   : > { %9366 = vmatpush.msra.mxu0 %v17246_v56  ;;  %9413 = vmatpush.msra.mxu1 %v17207_v23  ;;  %v17425_v40 = vsub.f32 %v8238_v41, %v17398_v21  ;;  %v17430_v9 = vand.u32 4294901760, %v8236_v30  ;;  %v8234_v41 = vld [vmem:[%s14937_s16 + $0x1b8] sm:$0xff] }
 0xe44   : > { %9198 = vmatpush.msra.mxu2 %v17186_v33  ;;  %9303 = vmatpush.msra.mxu3 %v9302_v34  ;;  %v9320_v34 = vand.u32 4294901760, %v9319_v3  ;;  %v22109_v3 = vld [vmem:[#allocation11_spill] sm:$0xff]  ;;  %v17458_v6 = vand.u32 4294901760, %v8234_v41 }
 0xe45   : > { %9369 = vmatpush.msra.mxu0 %v17259_v28  ;;  %9415 = vmatpush.msra.mxu1 %v17223_v17  ;;  %v8165_v52 = vmax.f32 %v22109_v3, 0.0  ;;  %22112 = vst [vmem:[#allocation11_spill] sm:$0xff] %v17412_v31  ;;  %v8235_v31 = vld [vmem:[%s14937_s16 + $0x1c0] sm:$0xff]  ;;  %v17456_v58 = vsub.f32 %v8236_v30, %v17430_v9 }
 0xe46   : > { %9200 = vmatpush.msra.mxu2 %v17207_v23  ;;  %9309 = vmatpush.msra.mxu3 %v9308_v12  ;;  %v9216_v12 = vsub.f32 %v8149_v54, %v17370_v27  ;;  %v22110_v54 = vand.u32 4294901760, %v17368_v38  ;;  %22115 = vst [vmem:[#allocation48_spill] sm:$0xff] %v17425_v40 }
 0xe47   : > { %9372 = vmatpush.msra.mxu0 %v17277_v14  ;;  %9417 = vmatpush.msra.mxu1 %v17233_v36  ;;  %v17416_v55 = vand.u32 4294901760, %v8165_v52 }
 0xe48   : > { %9202 = vmatpush.msra.mxu2 %v17223_v17  ;;  %9315 = vmatpush.msra.mxu3 %v9314_v62  ;;  %v9607_v3 = vsub.f32 %v17368_v38, %v22110_v54  ;;  %v17409_v62 = vand.u32 4294901760, %v8237_v0  ;;  %v9217_v4 = vand.u32 4294901760, %v9216_v12 }
 0xe49   : > { %9375 = vmatpush.msra.mxu0 %v17293_v51  ;;  %9419 = vmatpush.msra.mxu1 %v17248_v10  ;;  %22113 = vst [vmem:[#allocation47_spill] sm:$0xff] %v17416_v55 }
 0xe4a   : > { %9204 = vmatpush.msra.mxu2 %v17233_v36  ;;  %9321 = vmatpush.msra.mxu3 %v9320_v34  ;;  %v17407_v34 = vsub.f32 %v8239_v57, %v17386_v49  ;;  %v22114_v57 = vand.u32 4294901760, %v17379_v26  ;;  %v9608_v8 = vand.u32 4294901760, %v9607_v3  ;;  %v17437_v54 = vsub.f32 %v8237_v0, %v17409_v62 }
 0xe4b   : > { %9378 = vmatpush.msra.mxu0 %v17305_v60  ;;  %9421 = vmatpush.msra.mxu1 %v17261_v63  ;;  %v9218_v35 = vsub.f32 %v9216_v12, %v9217_v4  ;;  %v22118_v3 = vand.u32 4294901760, %v17396_v46  ;;  %v9224_v0 = vsub.f32 %v8165_v52, %v17416_v55 }
 0xe4c   : > { %9206 = vmatpush.msra.mxu2 %v17248_v10  ;;  %9327 = vmatpush.msra.mxu3 %v9326_v22  ;;  %22111 = vst [vmem:[#allocation10_spill] sm:$0xff] %v17407_v34  ;;  %v9613_v22 = vsub.f32 %v17379_v26, %v22114_v57 }
 0xe4d   : > { %9381 = vmatpush.msra.mxu0 %v17319_v32  ;;  %9423 = vmatpush.msra.mxu1 %v17279_v29  ;;  %22117 = vst [vmem:[#allocation50_spill] sm:$0xff] %v17437_v54  ;;  %v9619_v57 = vsub.f32 %v17396_v46, %v22118_v3  ;;  %v9219_v30 = vand.u32 4294901760, %v9218_v35 }
 0xe4e   : > { %9329 = vmatmul.f32.vlgmr.msra.gmra.mxu3 %v17370_v27  ;;  %9208 = vmatpush.msra.mxu2 %v17261_v63  ;;  %v9614_v39 = vand.u32 4294901760, %v9613_v22  ;;  %v22120_v22 = vand.u32 4294901760, %v17407_v34 }
 0xe4f   : > { %9515 = vmatpush.msrb.mxu3 %v17093_v37  ;;  %9384 = vmatpush.msra.mxu0 %v17329_v16  ;;  %v17442_v37 = vand.u32 4294901760, %v8235_v31 }
 0xe50   : > { %9425 = vmatpush.msra.mxu1 %v17295_v48  ;;  %9387 = vmatmul.f32.vlgmr.msra.gmra.mxu0 %v9216_v12  ;;  %v9625_v52 = vsub.f32 %v17407_v34, %v22120_v22  ;;  %v8232_v12 = vld [vmem:[%s14937_s16 + $0x1a8] sm:$0xff]  ;;  %v22121_v22 = vand.u32 4294901760, %v17425_v40  ;;  %v17478_v34 = vpop.f32.mrf.mxu2 }
 0xe51   : > { %9517 = vmatpush.msrb.mxu3 %v17103_v24  ;;  %9556 = vmatpush.msrb.mxu0 %v17349_v44  ;;  %v17452_v24 = vpop.f32.mrf.mxu1  ;;  %22122 = vst [vmem:[#allocation52_spill] sm:$0xff] %v17478_v34  ;;  %v8230_v34 = vld [vmem:[%s14937_s16 + $0x198] sm:$0xff] }
 0xe52   : > { %9210 = vmatpush.msra.mxu2 %v17279_v29  ;;  %9427 = vmatpush.msra.mxu1 %v17307_v15  ;;  %22119 = vst [vmem:[#allocation51_spill] sm:$0xff] %v17452_v24  ;;  %v9225_v24 = vand.u32 4294901760, %v9224_v0  ;;  %v9631_v3 = vsub.f32 %v17425_v40, %v22121_v22  ;;  %v22124_v22 = vand.u32 4294901760, %v17437_v54  ;;  %v22125_v40 = vand.u32 4294901760, %v17112_v5 }
 0xe53   : > { %9431 = vmatmul.f32.vlgmr.msra.gmra.mxu1 %v9217_v4  ;;  %9519 = vmatpush.msrb.mxu3 %v17114_v42  ;;  %v17469_v4 = vsub.f32 %v8235_v31, %v17442_v37  ;;  %v17471_v42 = vand.u32 4294901760, %v8233_v45  ;;  %v17488_v31 = vand.u32 4294901760, %v8232_v12  ;;  %v22128_v5 = vand.u32 4294901760, %v17456_v58 }
 0xe54   : > { %9558 = vmatpush.msrb.mxu0 %v17358_v13  ;;  %9609 = vmatpush.msrb.mxu1 %v9608_v8  ;;  %v9620_v8 = vand.u32 4294901760, %v9619_v57  ;;  %v9626_v57 = vand.u32 4294901760, %v9625_v52  ;;  %v9226_v52 = vsub.f32 %v9224_v0, %v9225_v24 }
 0xe55   : > { %9212 = vmatpush.msra.mxu2 %v17295_v48  ;;  %9521 = vmatpush.msrb.mxu3 %v17124_v53  ;;  %v17480_v53 = vpop.f32.mrf.mxu3  ;;  %v17500_v35 = vsub.f32 %v8233_v45, %v17471_v42  ;;  %v9643_v45 = vsub.f32 %v17456_v58, %v22128_v5 }
 0xe56   : > { %9560 = vmatpush.msrb.mxu0 %v17376_v25  ;;  %9615 = vmatpush.msrb.mxu1 %v9614_v39  ;;  %22123 = vst [vmem:[#allocation53_spill] sm:$0xff] %v17480_v53  ;;  %v17486_v39 = vsub.f32 %v8234_v41, %v17458_v6  ;;  %v9637_v53 = vsub.f32 %v17437_v54, %v22124_v22  ;;  %v8229_v22 = vld [vmem:[%s14937_s16 + $0x190] sm:$0xff]  ;;  %v22127_v54 = vand.u32 4294901760, %v17122_v59 }
 0xe57   : > { %9214 = vmatpush.msra.mxu2 %v17307_v15  ;;  %9333 = vmatmul.f32.gmra.mxu3 %v17416_v55  ;;  %v17502_v55 = vand.u32 4294901760, %v8231_v43  ;;  %v17515_v41 = vsub.f32 %v8232_v12, %v17488_v31 }
 0xe58   : > { %9220 = vmatmul.f32.vlgmr.msra.gmra.mxu2 %v9219_v30  ;;  %9523 = vmatpush.msrb.mxu3 %v17138_v19  ;;  %v17504_v30 = vpop.f32.mrf.mxu0  ;;  %v9632_v19 = vand.u32 4294901760, %v9631_v3 }
 0xe59   : > { %9444 = vmatpush.msrb.mxu2 %v22125_v40  ;;  %9562 = vmatpush.msrb.mxu0 %v17386_v49  ;;  %22126 = vst [vmem:[#allocation54_spill] sm:$0xff] %v17504_v30  ;;  %v17520_v59 = vpop.f32.mrf.mxu1  ;;  %v17529_v5 = vsub.f32 %v8231_v43, %v17502_v55  ;;  %v17531_v40 = vand.u32 4294901760, %v8229_v22 }
 0xe5a   : > { %9621 = vmatpush.msrb.mxu1 %v9620_v8  ;;  %9392 = vmatmul.f32.gmra.mxu0 %v9224_v0  ;;  %v17517_v8 = vand.u32 4294901760, %v8230_v34  ;;  %v9638_v0 = vand.u32 4294901760, %v9637_v53  ;;  %22129 = vst [vmem:[#allocation55_spill] sm:$0xff] %v17520_v59  ;;  %v22132_v53 = vld [vmem:[#allocation12_spill] sm:$0xff] }
 0xe5b   : > { %9448 = vmatpush.msrb.mxu2 %v22127_v54  ;;  %9525 = vmatpush.msrb.mxu3 %v17158_v18  ;;  %v22130_v18 = vand.u32 4294901760, %v17134_v1  ;;  %v22131_v54 = vand.u32 4294901760, %v17469_v4  ;;  %v8150_v30 = vmax.f32 %v22132_v53, 0.0  ;;  %v9227_v1 = vand.u32 4294901760, %v9226_v52  ;;  %v8227_v53 = vld [vmem:[%s14937_s16 + $0x180] sm:$0xff] }
 0xe5c   : > { %9564 = vmatpush.msrb.mxu0 %v17398_v21  ;;  %9627 = vmatpush.msrb.mxu1 %v9626_v57  ;;  %v8228_v57 = vld [vmem:[%s14937_s16 + $0x188] sm:$0xff]  ;;  %v17544_v59 = vsub.f32 %v8230_v34, %v17517_v8  ;;  %v22136_v52 = vand.u32 4294901760, %v17500_v35  ;;  %v17558_v34 = vsub.f32 %v8229_v22, %v17531_v40  ;;  %v17565_v12 = vand.u32 4294901760, %v8227_v53 }
 0xe5d   : > { %9437 = vmatmul.f32.gmra.mxu1 %v9225_v24  ;;  %9452 = vmatpush.msrb.mxu2 %v22130_v18  ;;  %v9649_v3 = vsub.f32 %v17469_v4, %v22131_v54  ;;  %v22133_v24 = vand.u32 4294901760, %v17146_v47  ;;  %v9644_v18 = vand.u32 4294901760, %v9643_v45  ;;  %v22134_v54 = vand.u32 4294901760, %v17486_v39 }
 0xe5e   : > { %9527 = vmatpush.msrb.mxu3 %v17173_v50  ;;  %9566 = vmatpush.msrb.mxu0 %v17409_v62  ;;  %v17549_v50 = vand.u32 4294901760, %v8228_v57  ;;  %v9661_v45 = vsub.f32 %v17500_v35, %v22136_v52  ;;  %v9678_v22 = vand.u32 4294901760, %v17544_v59  ;;  %v22139_v52 = vand.u32 4294901760, %v17184_v20 }
 0xe5f   : > { %9633 = vmatpush.msrb.mxu1 %v9632_v19  ;;  %9456 = vmatpush.msrb.mxu2 %v22133_v24  ;;  %v9655_v43 = vsub.f32 %v17486_v39, %v22134_v54  ;;  %v17551_v19 = vpop.f32.mrf.mxu2  ;;  %v9650_v47 = vand.u32 4294901760, %v9649_v3  ;;  %v9672_v24 = vand.u32 4294901760, %v17529_v5  ;;  %v17560_v54 = vand.u32 4294901760, %v8150_v30 }
 0xe60   : > { %9529 = vmatpush.msrb.mxu3 %v17186_v33  ;;  %9568 = vmatpush.msrb.mxu0 %v17430_v9  ;;  %22135 = vst [vmem:[#allocation12_spill] sm:$0xff] %v17551_v19  ;;  %v22137_v33 = vand.u32 4294901760, %v17163_v61  ;;  %v22138_v3 = vand.u32 4294901760, %v17515_v41  ;;  %v17576_v61 = vsub.f32 %v8228_v57, %v17549_v50  ;;  %v22140_v20 = vand.u32 4294901760, %v17201_v11  ;;  %v8263_v19 = vld [vmem:[%s14937_s16 + $0x2a0] sm:$0xff] }
 0xe61   : > { %9639 = vmatpush.msrb.mxu1 %v9638_v0  ;;  %9228 = vmatmul.f32.gmra.mxu2 %v9227_v1  ;;  %v9656_v0 = vand.u32 4294901760, %v9655_v43  ;;  %v9684_v43 = vand.u32 4294901760, %v17558_v34 }
 0xe62   : > { %9460 = vmatpush.msrb.mxu2 %v22137_v33  ;;  %9531 = vmatpush.msrb.mxu3 %v17207_v23  ;;  %v9667_v1 = vsub.f32 %v17515_v41, %v22138_v3  ;;  %v9662_v23 = vand.u32 4294901760, %v9661_v45  ;;  %v17584_v33 = vsub.f32 %v8150_v30, %v17560_v54  ;;  %v22141_v45 = vld [vmem:[#allocation13_spill] sm:$0xff]  ;;  %v22142_v30 = vand.u32 4294901760, %v17213_v7 }
 0xe63   : > { %9570 = vmatpush.msrb.mxu0 %v17442_v37  ;;  %9645 = vmatpush.msrb.mxu1 %v9644_v18  ;;  %v9673_v18 = vsub.f32 %v17529_v5, %v9672_v24  ;;  %v8166_v3 = vmax.f32 %v22141_v45, 0.0  ;;  %v9690_v11 = vand.u32 4294901760, %v17576_v61 }
 0xe64   : > { %9464 = vmatpush.msrb.mxu2 %v22139_v52  ;;  %9533 = vmatpush.msrb.mxu3 %v17223_v17  ;;  %v17590_v17 = vsub.f32 %v8227_v53, %v17565_v12  ;;  %v9668_v57 = vand.u32 4294901760, %v9667_v1  ;;  %v9685_v53 = vsub.f32 %v17558_v34, %v9684_v43  ;;  %v9589_v7 = vand.u32 4294901760, %v17584_v33 }
 0xe65   : > { %9572 = vmatpush.msrb.mxu0 %v17458_v6  ;;  %9651 = vmatpush.msrb.mxu1 %v9650_v47  ;;  %v9679_v47 = vsub.f32 %v17544_v59, %v9678_v22  ;;  %v17611_v52 = vand.u32 4294901760, %v8166_v3 }
 0xe66   : > { %9468 = vmatpush.msrb.mxu2 %v22140_v20  ;;  %9535 = vmatpush.msrb.mxu3 %v17233_v36  ;;  %v9674_v36 = vand.u32 4294901760, %v9673_v18  ;;  %v9696_v1 = vand.u32 4294901760, %v17590_v17  ;;  %v22145_v18 = vand.u32 4294901760, %v17259_v28  ;;  %v22146_v20 = vand.u32 4294901760, %v17277_v14  ;;  %v17644_v14 = vpop.f32.mrf.mxu0 }
 0xe67   : > { %9574 = vmatpush.msrb.mxu0 %v17471_v42  ;;  %9657 = vmatpush.msrb.mxu1 %v9656_v0  ;;  %v22143_v0 = vand.u32 4294901760, %v17231_v2  ;;  %v9691_v2 = vsub.f32 %v17576_v61, %v9690_v11  ;;  %22149 = vst [vmem:[#allocation56_spill] sm:$0xff] %v17644_v14 }
 0xe68   : > { %9472 = vmatpush.msrb.mxu2 %v22142_v30  ;;  %9537 = vmatpush.msrb.mxu3 %v17248_v10  ;;  %v9680_v10 = vand.u32 4294901760, %v9679_v47  ;;  %v22148_v47 = vand.u32 4294901760, %v17293_v51  ;;  %v22151_v51 = vand.u32 4294901760, %v17305_v60  ;;  %v22155_v60 = vand.u32 4294901760, %v17396_v46 }
 0xe69   : > { %9576 = vmatpush.msrb.mxu0 %v17488_v31  ;;  %9663 = vmatpush.msrb.mxu1 %v9662_v23  ;;  %v22144_v23 = vand.u32 4294901760, %v17246_v56  ;;  %v9590_v56 = vsub.f32 %v17584_v33, %v9589_v7  ;;  %v9692_v28 = vand.u32 4294901760, %v9691_v2 }
 0xe6a   : > { %9476 = vmatpush.msrb.mxu2 %v22143_v0  ;;  %9539 = vmatpush.msrb.mxu3 %v17261_v63  ;;  %v9686_v63 = vand.u32 4294901760, %v9685_v53  ;;  %v22153_v53 = vand.u32 4294901760, %v17379_v26 }
 0xe6b   : > { %9578 = vmatpush.msrb.mxu0 %v17502_v55  ;;  %9669 = vmatpush.msrb.mxu1 %v9668_v57  ;;  %v17634_v57 = vsub.f32 %v8166_v3, %v17611_v52  ;;  %v9591_v45 = vand.u32 4294901760, %v9590_v56  ;;  %v22150_v3 = vand.u32 4294901760, %v17368_v38 }
 0xe6c   : > { %9480 = vmatpush.msrb.mxu2 %v22144_v23  ;;  %9541 = vmatpush.msrb.mxu3 %v17279_v29  ;;  %v9697_v29 = vsub.f32 %v17590_v17, %v9696_v1  ;;  %v17668_v23 = vpop.f32.mrf.mxu2 }
 0xe6d   : > { %9580 = vmatpush.msrb.mxu0 %v17517_v8  ;;  %9675 = vmatpush.msrb.mxu1 %v9674_v36  ;;  %v17652_v36 = vpop.f32.mrf.mxu1  ;;  %22156 = vst [vmem:[#allocation58_spill] sm:$0xff] %v17668_v23 }
 0xe6e   : > { %9484 = vmatpush.msrb.mxu2 %v22145_v18  ;;  %9543 = vmatpush.msrb.mxu3 %v17295_v48  ;;  %v17636_v48 = vpop.f32.mrf.mxu3  ;;  %v9698_v30 = vand.u32 4294901760, %v9697_v29  ;;  %22152 = vst [vmem:[#allocation57_spill] sm:$0xff] %v17652_v36  ;;  %v22160_v18 = vld [vmem:[#allocation10_spill] sm:$0xff]  ;;  %v17680_v56 = vpop.f32.mrf.mxu0 }
 0xe6f   : > { %9582 = vmatpush.msrb.mxu0 %v17531_v40  ;;  %9681 = vmatpush.msrb.mxu1 %v9680_v10  ;;  %22147 = vst [vmem:[#allocation13_spill] sm:$0xff] %v17636_v48  ;;  %v22154_v10 = vand.u32 4294901760, %v17319_v32  ;;  %v8258_v29 = vld [vmem:[%s14937_s16 + $0x278] sm:$0xff] }
 0xe70   : > { %9488 = vmatpush.msrb.mxu2 %v22146_v20  ;;  %9545 = vmatpush.msrb.mxu3 %v17307_v15  ;;  %v9597_v15 = vand.u32 4294901760, %v17634_v57  ;;  %v8257_v20 = vld [vmem:[%s14937_s16 + $0x270] sm:$0xff] }
 0xe71   : > { %9584 = vmatpush.msrb.mxu0 %v17549_v50  ;;  %9687 = vmatpush.msrb.mxu1 %v9686_v63  ;;  %v22159_v63 = vld [vmem:[#allocation47_spill] sm:$0xff] }
 0xe72   : > { %9547 = vmatmul.f32.vlgmr.msrb.gmra.mxu3 %v17370_v27  ;;  %9492 = vmatpush.msrb.mxu2 %v22148_v47  ;;  %v9598_v0 = vsub.f32 %v17634_v57, %v9597_v15  ;;  %22162 = vst [vmem:[#allocation47_spill] sm:$0xff] %v17680_v56  ;;  %v8256_v47 = vld [vmem:[%s14937_s16 + $0x268] sm:$0xff] }
 0xe73   : > { %9769 = vmatpush.msra.mxu3 %v17349_v44  ;;  %9586 = vmatpush.msrb.mxu0 %v17565_v12 }
 0xe74   : > { %9693 = vmatpush.msrb.mxu1 %v9692_v28  ;;  %9592 = vmatmul.f32.vlgmr.msrb.gmra.mxu0 %v9591_v45  ;;  %v9599_v32 = vand.u32 4294901760, %v9598_v0  ;;  %v17699_v28 = vand.u32 4294901760, %v8258_v29  ;;  %v17709_v45 = vand.u32 4294901760, %v8257_v20 }
 0xe75   : > { %9771 = vmatpush.msra.mxu3 %v17358_v13  ;;  %9816 = vmatpush.msra.mxu0 %v22150_v3 }
 0xe76   : > { %9496 = vmatpush.msrb.mxu2 %v22151_v51  ;;  %9699 = vmatpush.msrb.mxu1 %v9698_v30  ;;  %v17670_v2 = vpop.f32.mrf.mxu3  ;;  %v22170_v30 = vand.u32 4294901760, %v17469_v4  ;;  %v17718_v3 = vsub.f32 %v8258_v29, %v17699_v28  ;;  %v17720_v51 = vand.u32 4294901760, %v8256_v47 }
 0xe77   : > { %9701 = vmatmul.f32.vlgmr.msrb.gmra.mxu1 %v17560_v54  ;;  %9773 = vmatpush.msra.mxu3 %v17376_v25  ;;  %22157 = vst [vmem:[#allocation59_spill] sm:$0xff] %v17670_v2 }
 0xe78   : > { %9820 = vmatpush.msra.mxu0 %v22153_v53  ;;  %9887 = vmatpush.msra.mxu1 %v17349_v44  ;;  %v22158_v44 = vand.u32 4294901760, %v17329_v16  ;;  %v17728_v53 = vsub.f32 %v8257_v20, %v17709_v45 }
 0xe79   : > { %9500 = vmatpush.msrb.mxu2 %v22154_v10  ;;  %9775 = vmatpush.msra.mxu3 %v17386_v49  ;;  %v22172_v10 = vand.u32 4294901760, %v17500_v35 }
 0xe7a   : > { %9824 = vmatpush.msra.mxu0 %v22155_v60  ;;  %9889 = vmatpush.msra.mxu1 %v17358_v13  ;;  %v22161_v13 = vand.u32 4294901760, %v22160_v18  ;;  %v21814_v60 = vand.u32 4294901760, %v17718_v3 }
 0xe7b   : > { %9504 = vmatpush.msrb.mxu2 %v22158_v44  ;;  %9551 = vmatmul.f32.gmra.mxu3 %v22159_v63 }
 0xe7c   : > { %9506 = vmatmul.f32.vlgmr.msrb.gmra.mxu2 %v17370_v27  ;;  %9777 = vmatpush.msra.mxu3 %v17398_v21  ;;  %v22163_v27 = vld [vmem:[#allocation48_spill] sm:$0xff] }
 0xe7d   : > { %9711 = vmatpush.msra.mxu2 %v17368_v38  ;;  %9828 = vmatpush.msra.mxu0 %v22161_v13  ;;  %v22164_v16 = vand.u32 4294901760, %v22163_v27  ;;  %v17689_v38 = vpop.f32.mrf.mxu1 }
 0xe7e   : > { %9891 = vmatpush.msra.mxu1 %v17376_v25  ;;  %9600 = vmatmul.f32.gmra.mxu0 %v9599_v32  ;;  %22165 = vst [vmem:[#allocation10_spill] sm:$0xff] %v17689_v38  ;;  %v22166_v25 = vld [vmem:[#allocation50_spill] sm:$0xff] }
 0xe7f   : > { %9714 = vmatpush.msra.mxu2 %v17379_v26  ;;  %9779 = vmatpush.msra.mxu3 %v17409_v62  ;;  %v22167_v26 = vand.u32 4294901760, %v22166_v25 }
 0xe80   : > { %9832 = vmatpush.msra.mxu0 %v22164_v16  ;;  %9893 = vmatpush.msra.mxu1 %v17386_v49  ;;  %v22168_v49 = vand.u32 4294901760, %v17456_v58 }
 0xe81   : > { %9705 = vmatmul.f32.gmra.mxu1 %v17611_v52  ;;  %9717 = vmatpush.msra.mxu2 %v17396_v46  ;;  %v17705_v46 = vpop.f32.mrf.mxu2 }
 0xe82   : > { %9781 = vmatpush.msra.mxu3 %v17430_v9  ;;  %9836 = vmatpush.msra.mxu0 %v22167_v26  ;;  %22169 = vst [vmem:[#allocation48_spill] sm:$0xff] %v17705_v46  ;;  %v8265_v46 = vld [vmem:[%s14937_s16 + $0x2b0] sm:$0xff] }
 0xe83   : > { %9895 = vmatpush.msra.mxu1 %v17398_v21  ;;  %9720 = vmatpush.msra.mxu2 %v22160_v18  ;;  %v8255_v21 = vld [vmem:[%s14937_s16 + $0x260] sm:$0xff]  ;;  %v9979_v18 = vsub.f32 %v17718_v3, %v21814_v60 }
 0xe84   : > { %9783 = vmatpush.msra.mxu3 %v17442_v37  ;;  %9840 = vmatpush.msra.mxu0 %v22168_v49  ;;  %v17730_v0 = vand.u32 4294901760, %v8255_v21 }
 0xe85   : > { %9897 = vmatpush.msra.mxu1 %v17409_v62  ;;  %9510 = vmatmul.f32.gmra.mxu2 %v22159_v63  ;;  %v22171_v62 = vand.u32 4294901760, %v17486_v39  ;;  %v22173_v63 = vand.u32 4294901760, %v17515_v41 }
 0xe86   : > { %9723 = vmatpush.msra.mxu2 %v22163_v27  ;;  %9785 = vmatpush.msra.mxu3 %v17458_v6  ;;  %v17752_v32 = vsub.f32 %v8255_v21, %v17730_v0  ;;  %v8251_v27 = vld [vmem:[%s14937_s16 + $0x240] sm:$0xff]  ;;  %v8248_v21 = vld [vmem:[%s14937_s16 + $0x228] sm:$0xff] }
 0xe87   : > { %9844 = vmatpush.msra.mxu0 %v22170_v30  ;;  %9899 = vmatpush.msra.mxu1 %v17430_v9  ;;  %v8254_v9 = vld [vmem:[%s14937_s16 + $0x258] sm:$0xff]  ;;  %v17792_v29 = vand.u32 4294901760, %v8251_v27  ;;  %v17822_v30 = vpop.f32.mrf.mxu0 }
 0xe88   : > { %9726 = vmatpush.msra.mxu2 %v22166_v25  ;;  %9787 = vmatpush.msra.mxu3 %v17471_v42  ;;  %v17744_v44 = vand.u32 4294901760, %v8254_v9  ;;  %v8250_v25 = vld [vmem:[%s14937_s16 + $0x238] sm:$0xff]  ;;  %22175 = vst [vmem:[#allocation60_spill] sm:$0xff] %v17822_v30 }
 0xe89   : > { %9848 = vmatpush.msra.mxu0 %v22171_v62  ;;  %9901 = vmatpush.msra.mxu1 %v17442_v37  ;;  %v17740_v37 = vsub.f32 %v8256_v47, %v17720_v51  ;;  %v17813_v49 = vand.u32 4294901760, %v8250_v25  ;;  %v17819_v47 = vsub.f32 %v8251_v27, %v17792_v29 }
 0xe8a   : > { %9729 = vmatpush.msra.mxu2 %v17456_v58  ;;  %9789 = vmatpush.msra.mxu3 %v17488_v31  ;;  %v8253_v58 = vld [vmem:[%s14937_s16 + $0x250] sm:$0xff] }
 0xe8b   : > { %9852 = vmatpush.msra.mxu0 %v22172_v10  ;;  %9903 = vmatpush.msra.mxu1 %v17458_v6  ;;  %v21812_v6 = vand.u32 4294901760, %v17728_v53  ;;  %v17764_v13 = vand.u32 4294901760, %v8253_v58  ;;  %v17839_v10 = vand.u32 4294901760, %v8248_v21 }
 0xe8c   : > { %9732 = vmatpush.msra.mxu2 %v17469_v4  ;;  %9791 = vmatpush.msra.mxu3 %v17502_v55  ;;  %v8252_v4 = vld [vmem:[%s14937_s16 + $0x248] sm:$0xff] }
 0xe8d   : > { %9856 = vmatpush.msra.mxu0 %v22173_v63  ;;  %9905 = vmatpush.msra.mxu1 %v17471_v42  ;;  %v21810_v42 = vand.u32 4294901760, %v17740_v37  ;;  %v17779_v16 = vand.u32 4294901760, %v8252_v4 }
 0xe8e   : > { %9735 = vmatpush.msra.mxu2 %v17486_v39  ;;  %9793 = vmatpush.msra.mxu3 %v17517_v8  ;;  %v17769_v39 = vsub.f32 %v8254_v9, %v17744_v44  ;;  %v8247_v9 = vld [vmem:[%s14937_s16 + $0x220] sm:$0xff] }
 0xe8f   : > { %9860 = vmatpush.msra.mxu0 %v9672_v24  ;;  %9907 = vmatpush.msra.mxu1 %v17488_v31  ;;  %v9985_v31 = vsub.f32 %v17728_v53, %v21812_v6  ;;  %v21809_v24 = vand.u32 4294901760, %v17752_v32  ;;  %v17807_v20 = vsub.f32 %v8252_v4, %v17779_v16  ;;  %v21801_v4 = vand.u32 4294901760, %v17819_v47 }
 0xe90   : > { %9738 = vmatpush.msra.mxu2 %v17500_v35  ;;  %9795 = vmatpush.msra.mxu3 %v17531_v40  ;;  %v9980_v35 = vand.u32 4294901760, %v9979_v18  ;;  %v17854_v27 = vand.u32 4294901760, %v8247_v9 }
 0xe91   : > { %9864 = vmatpush.msra.mxu0 %v9678_v22  ;;  %9909 = vmatpush.msra.mxu1 %v17502_v55  ;;  %v9991_v55 = vsub.f32 %v17740_v37, %v21810_v42  ;;  %v17790_v22 = vsub.f32 %v8253_v58, %v17764_v13  ;;  %v9997_v26 = vsub.f32 %v17752_v32, %v21809_v24  ;;  %v21802_v62 = vand.u32 4294901760, %v17807_v20  ;;  %v17841_v58 = vpop.f32.mrf.mxu1 }
 0xe92   : > { %9741 = vmatpush.msra.mxu2 %v17515_v41  ;;  %9797 = vmatpush.msra.mxu3 %v17549_v50  ;;  %v21805_v41 = vand.u32 4294901760, %v17769_v39  ;;  %22176 = vst [vmem:[#allocation61_spill] sm:$0xff] %v17841_v58 }
 0xe93   : > { %9868 = vmatpush.msra.mxu0 %v9684_v43  ;;  %9911 = vmatpush.msra.mxu1 %v17517_v8  ;;  %v17798_v43 = vpop.f32.mrf.mxu3  ;;  %v9986_v8 = vand.u32 4294901760, %v9985_v31  ;;  %v8245_v31 = vld [vmem:[%s14937_s16 + $0x210] sm:$0xff] }
 0xe94   : > { %9744 = vmatpush.msra.mxu2 %v17529_v5  ;;  %9799 = vmatpush.msra.mxu3 %v17565_v12  ;;  %22174 = vst [vmem:[#allocation50_spill] sm:$0xff] %v17798_v43  ;;  %v8249_v5 = vld [vmem:[%s14937_s16 + $0x230] sm:$0xff] }
 0xe95   : > { %9872 = vmatpush.msra.mxu0 %v9690_v11  ;;  %9913 = vmatpush.msra.mxu1 %v17531_v40  ;;  %v9992_v40 = vand.u32 4294901760, %v9991_v55  ;;  %v21804_v11 = vand.u32 4294901760, %v17790_v22  ;;  %v17865_v55 = vsub.f32 %v8248_v21, %v17839_v10 }
 0xe96   : > { %9803 = vmatmul.f32.vlgmr.msra.gmra.mxu3 %v9589_v7  ;;  %9747 = vmatpush.msra.mxu2 %v17544_v59  ;;  %v10003_v59 = vsub.f32 %v17769_v39, %v21805_v41  ;;  %v17829_v7 = vand.u32 4294901760, %v8249_v5 }
 0xe97   : > { %9981 = vmatpush.msrb.mxu3 %v9980_v35  ;;  %9876 = vmatpush.msra.mxu0 %v9696_v1  ;;  %v9998_v1 = vand.u32 4294901760, %v9997_v26  ;;  %v10009_v63 = vsub.f32 %v17790_v22, %v21804_v11 }
 0xe98   : > { %9915 = vmatpush.msra.mxu1 %v17549_v50  ;;  %9878 = vmatmul.f32.vlgmr.msra.gmra.mxu0 %v17560_v54  ;;  %v17837_v50 = vsub.f32 %v8250_v25, %v17813_v49  ;;  %v17852_v18 = vsub.f32 %v8249_v5, %v17829_v7  ;;  %v10021_v5 = vsub.f32 %v17819_v47, %v21801_v4 }
 0xe99   : > { %9987 = vmatpush.msrb.mxu3 %v9986_v8  ;;  %10083 = vmatpush.msrb.mxu0 %v17718_v3  ;;  %v17869_v8 = vpop.f32.mrf.mxu2  ;;  %v10010_v26 = vand.u32 4294901760, %v10009_v63  ;;  %v17890_v63 = vpop.f32.mrf.mxu0 }
 0xe9a   : > { %9750 = vmatpush.msra.mxu2 %v17558_v34  ;;  %9917 = vmatpush.msra.mxu1 %v17565_v12  ;;  %v8246_v34 = vld [vmem:[%s14937_s16 + $0x218] sm:$0xff]  ;;  %v10004_v12 = vand.u32 4294901760, %v10003_v59  ;;  %v21803_v35 = vand.u32 4294901760, %v17837_v50  ;;  %22177 = vst [vmem:[#allocation62_spill] sm:$0xff] %v17869_v8  ;;  %v21806_v21 = vand.u32 4294901760, %v17852_v18  ;;  %v17883_v59 = vsub.f32 %v8247_v9, %v17854_v27  ;;  %v17915_v41 = vpop.f32.mrf.mxu1 }
 0xe9b   : > { %9919 = vmatmul.f32.vlgmr.msra.gmra.mxu1 %v17560_v54  ;;  %9993 = vmatpush.msrb.mxu3 %v9992_v40  ;;  %v10015_v54 = vsub.f32 %v17807_v20, %v21802_v62  ;;  %v17867_v25 = vand.u32 4294901760, %v8246_v34  ;;  %v8244_v40 = vld [vmem:[%s14937_s16 + $0x208] sm:$0xff]  ;;  %22179 = vst [vmem:[#allocation64_spill] sm:$0xff] %v17890_v63  ;;  %v21807_v9 = vand.u32 4294901760, %v17865_v55 }
 0xe9c   : > { %10086 = vmatpush.msrb.mxu0 %v17728_v53  ;;  %10141 = vmatpush.msrb.mxu1 %v17699_v28  ;;  %v17901_v4 = vand.u32 4294901760, %v8244_v40  ;;  %v10033_v62 = vsub.f32 %v17852_v18, %v21806_v21  ;;  %22180 = vst [vmem:[#allocation65_spill] sm:$0xff] %v17915_v41  ;;  %v8271_v41 = vld [vmem:[%s14937_s16 + $0x2e0] sm:$0xff] }
 0xe9d   : > { %9753 = vmatpush.msra.mxu2 %v17576_v61  ;;  %9999 = vmatpush.msrb.mxu3 %v9998_v1  ;;  %v17871_v61 = vpop.f32.mrf.mxu3  ;;  %v17885_v1 = vand.u32 4294901760, %v8245_v31  ;;  %v17992_v58 = vand.u32 4294901760, %v8271_v41 }
 0xe9e   : > { %10089 = vmatpush.msrb.mxu0 %v17740_v37  ;;  %10143 = vmatpush.msrb.mxu1 %v17709_v45  ;;  %22178 = vst [vmem:[#allocation63_spill] sm:$0xff] %v17871_v61  ;;  %v17925_v21 = vsub.f32 %v8244_v40, %v17901_v4 }
 0xe9f   : > { %9756 = vmatpush.msra.mxu2 %v17590_v17  ;;  %9809 = vmatmul.f32.gmra.mxu3 %v9597_v15  ;;  %v10016_v17 = vand.u32 4294901760, %v10015_v54  ;;  %v8243_v15 = vld [vmem:[%s14937_s16 + $0x200] sm:$0xff]  ;;  %v10022_v54 = vand.u32 4294901760, %v10021_v5  ;;  %v17911_v11 = vsub.f32 %v8245_v31, %v17885_v1  ;;  %v10039_v5 = vsub.f32 %v17865_v55, %v21807_v9 }
 0xea0   : > { %9759 = vmatmul.f32.vlgmr.msra.gmra.mxu2 %v17584_v33  ;;  %10005 = vmatpush.msrb.mxu3 %v10004_v12  ;;  %v10027_v33 = vsub.f32 %v17837_v50, %v21803_v35  ;;  %v17899_v12 = vsub.f32 %v8246_v34, %v17867_v25  ;;  %v21808_v35 = vand.u32 4294901760, %v17883_v59  ;;  %v17913_v34 = vand.u32 4294901760, %v8243_v15 }
 0xea1   : > { %9928 = vmatpush.msrb.mxu2 %v17699_v28  ;;  %10092 = vmatpush.msrb.mxu0 %v17752_v32  ;;  %v17937_v40 = vpop.f32.mrf.mxu2  ;;  %v21815_v24 = vand.u32 4294901760, %v17925_v21  ;;  %v18038_v36 = vpop.f32.mrf.mxu0 }
 0xea2   : > { %10145 = vmatpush.msrb.mxu1 %v17720_v51  ;;  %9882 = vmatmul.f32.gmra.mxu0 %v17611_v52  ;;  %v21811_v31 = vand.u32 4294901760, %v17899_v12  ;;  %v17935_v9 = vsub.f32 %v8243_v15, %v17913_v34  ;;  %22181 = vst [vmem:[#allocation66_spill] sm:$0xff] %v17937_v40  ;;  %v8273_v15 = vld [vmem:[%s14937_s16 + $0x2f0] sm:$0xff] }
 0xea3   : > { %9930 = vmatpush.msrb.mxu2 %v17709_v45  ;;  %10011 = vmatpush.msrb.mxu3 %v10010_v26  ;;  %v10028_v26 = vand.u32 4294901760, %v10027_v33  ;;  %v21813_v33 = vand.u32 4294901760, %v17911_v11  ;;  %22190 = vst [vmem:[#allocation69_spill] sm:$0xff] %v18038_v36 }
 0xea4   : > { %10095 = vmatpush.msrb.mxu0 %v17769_v39  ;;  %10147 = vmatpush.msrb.mxu1 %v17730_v0 }
 0xea5   : > { %9923 = vmatmul.f32.gmra.mxu1 %v17611_v52  ;;  %9932 = vmatpush.msrb.mxu2 %v17720_v51  ;;  %v10034_v52 = vand.u32 4294901760, %v10033_v62  ;;  %v10040_v62 = vand.u32 4294901760, %v10039_v5  ;;  %v21816_v5 = vand.u32 4294901760, %v17935_v9  ;;  %v18018_v38 = vpop.f32.mrf.mxu3 }
 0xea6   : > { %10017 = vmatpush.msrb.mxu3 %v10016_v17  ;;  %10098 = vmatpush.msrb.mxu0 %v17790_v22  ;;  %v10045_v17 = vsub.f32 %v17883_v59, %v21808_v35  ;;  %v10051_v35 = vsub.f32 %v17899_v12, %v21811_v31  ;;  %v22182_v31 = vld [vmem:[#allocation14_spill] sm:$0xff] }
 0xea7   : > { %10149 = vmatpush.msrb.mxu1 %v17744_v44  ;;  %9934 = vmatpush.msrb.mxu2 %v17730_v0  ;;  %v8151_v6 = vmax.f32 %v22182_v31, 0.0  ;;  %v8272_v31 = vld [vmem:[%s14937_s16 + $0x2e8] sm:$0xff] }
 0xea8   : > { %10023 = vmatpush.msrb.mxu3 %v10022_v54  ;;  %10101 = vmatpush.msrb.mxu0 %v17807_v20  ;;  %v8274_v54 = vld [vmem:[%s14937_s16 + $0x2f8] sm:$0xff] }
 0xea9   : > { %10151 = vmatpush.msrb.mxu1 %v17764_v13  ;;  %9764 = vmatmul.f32.gmra.mxu2 %v17634_v57  ;;  %v10046_v57 = vand.u32 4294901760, %v10045_v17  ;;  %v17955_v42 = vand.u32 4294901760, %v8274_v54  ;;  %v10063_v17 = vsub.f32 %v17925_v21, %v21815_v24  ;;  %v17976_v24 = vand.u32 4294901760, %v8151_v6 }
 0xeaa   : > { %9936 = vmatpush.msrb.mxu2 %v17744_v44  ;;  %10029 = vmatpush.msrb.mxu3 %v10028_v26  ;;  %v10057_v26 = vsub.f32 %v17911_v11, %v21813_v33  ;;  %v17964_v33 = vand.u32 4294901760, %v8273_v15 }
 0xeab   : > { %10104 = vmatpush.msrb.mxu0 %v17819_v47  ;;  %10153 = vmatpush.msrb.mxu1 %v17779_v16 }
 0xeac   : > { %9938 = vmatpush.msrb.mxu2 %v17764_v13  ;;  %10035 = vmatpush.msrb.mxu3 %v10034_v52  ;;  %v10052_v52 = vand.u32 4294901760, %v10051_v35  ;;  %v10058_v60 = vand.u32 4294901760, %v10057_v26  ;;  %v10069_v35 = vsub.f32 %v17935_v9, %v21816_v5  ;;  %v17982_v26 = vand.u32 4294901760, %v8272_v31 }
 0xead   : > { %10107 = vmatpush.msrb.mxu0 %v17837_v50  ;;  %10155 = vmatpush.msrb.mxu1 %v17792_v29  ;;  %v17985_v63 = vsub.f32 %v8273_v15, %v17964_v33  ;;  %v8269_v15 = vld [vmem:[%s14937_s16 + $0x2d0] sm:$0xff] }
 0xeae   : > { %9940 = vmatpush.msrb.mxu2 %v17779_v16  ;;  %10041 = vmatpush.msrb.mxu3 %v10040_v62  ;;  %v17974_v62 = vsub.f32 %v8274_v54, %v17955_v42  ;;  %v8270_v54 = vld [vmem:[%s14937_s16 + $0x2d8] sm:$0xff]  ;;  %v10070_v5 = vand.u32 4294901760, %v10069_v35  ;;  %v18002_v35 = vsub.f32 %v8272_v31, %v17982_v26  ;;  %v8268_v31 = vld [vmem:[%s14937_s16 + $0x2c8] sm:$0xff] }
 0xeaf   : > { %10110 = vmatpush.msrb.mxu0 %v17852_v18  ;;  %10157 = vmatpush.msrb.mxu1 %v17813_v49  ;;  %v18004_v61 = vand.u32 4294901760, %v8270_v54  ;;  %v18036_v8 = vand.u32 4294901760, %v8268_v31 }
 0xeb0   : > { %9942 = vmatpush.msrb.mxu2 %v17792_v29  ;;  %10047 = vmatpush.msrb.mxu3 %v10046_v57  ;;  %v10064_v57 = vand.u32 4294901760, %v10063_v17  ;;  %v22183_v17 = vld [vmem:[#allocation15_spill] sm:$0xff] }
 0xeb1   : > { %10113 = vmatpush.msrb.mxu0 %v17865_v55  ;;  %10159 = vmatpush.msrb.mxu1 %v17829_v7  ;;  %v8167_v40 = vmax.f32 %v22183_v17, 0.0  ;;  %22186 = vst [vmem:[#allocation15_spill] sm:$0xff] %v18018_v38  ;;  %v18031_v56 = vsub.f32 %v8270_v54, %v18004_v61  ;;  %v8267_v38 = vld [vmem:[%s14937_s16 + $0x2c0] sm:$0xff]  ;;  %v8266_v54 = vld [vmem:[%s14937_s16 + $0x2b8] sm:$0xff]  ;;  %v18062_v48 = vsub.f32 %v8268_v31, %v18036_v8 }
 0xeb2   : > { %9944 = vmatpush.msrb.mxu2 %v17813_v49  ;;  %10053 = vmatpush.msrb.mxu3 %v10052_v52  ;;  %v9960_v52 = vsub.f32 %v8151_v6, %v17976_v24  ;;  %v22184_v6 = vand.u32 4294901760, %v17974_v62  ;;  %v18064_v23 = vand.u32 4294901760, %v8266_v54 }
 0xeb3   : > { %10116 = vmatpush.msrb.mxu0 %v17883_v59  ;;  %10161 = vmatpush.msrb.mxu1 %v17839_v10  ;;  %v18022_v43 = vand.u32 4294901760, %v8167_v40  ;;  %22189 = vst [vmem:[#allocation68_spill] sm:$0xff] %v18031_v56 }
 0xeb4   : > { %9946 = vmatpush.msrb.mxu2 %v17829_v7  ;;  %10059 = vmatpush.msrb.mxu3 %v10058_v60  ;;  %v10351_v17 = vsub.f32 %v17974_v62, %v22184_v6  ;;  %v18015_v60 = vand.u32 4294901760, %v8269_v15  ;;  %v9961_v30 = vand.u32 4294901760, %v9960_v52 }
 0xeb5   : > { %10119 = vmatpush.msrb.mxu0 %v17899_v12  ;;  %10163 = vmatpush.msrb.mxu1 %v17854_v27  ;;  %22187 = vst [vmem:[#allocation67_spill] sm:$0xff] %v18022_v43 }
 0xeb6   : > { %9948 = vmatpush.msrb.mxu2 %v17839_v10  ;;  %10065 = vmatpush.msrb.mxu3 %v10064_v57  ;;  %v18013_v57 = vsub.f32 %v8271_v41, %v17992_v58  ;;  %v22188_v41 = vand.u32 4294901760, %v17985_v63  ;;  %v10352_v14 = vand.u32 4294901760, %v10351_v17  ;;  %v18043_v6 = vsub.f32 %v8269_v15, %v18015_v60 }
 0xeb7   : > { %10122 = vmatpush.msrb.mxu0 %v17911_v11  ;;  %10165 = vmatpush.msrb.mxu1 %v17867_v25  ;;  %v9962_v2 = vsub.f32 %v9960_v52, %v9961_v30  ;;  %v22192_v17 = vand.u32 4294901760, %v18002_v35  ;;  %v9968_v15 = vsub.f32 %v8167_v40, %v18022_v43 }
 0xeb8   : > { %9950 = vmatpush.msrb.mxu2 %v17854_v27  ;;  %10071 = vmatpush.msrb.mxu3 %v10070_v5  ;;  %22185 = vst [vmem:[#allocation14_spill] sm:$0xff] %v18013_v57  ;;  %v10357_v5 = vsub.f32 %v17985_v63, %v22188_v41 }
 0xeb9   : > { %10125 = vmatpush.msrb.mxu0 %v17925_v21  ;;  %10167 = vmatpush.msrb.mxu1 %v17885_v1  ;;  %22191 = vst [vmem:[#allocation70_spill] sm:$0xff] %v18043_v6  ;;  %v10363_v41 = vsub.f32 %v18002_v35, %v22192_v17  ;;  %v9963_v31 = vand.u32 4294901760, %v9962_v2 }
 0xeba   : > { %10073 = vmatmul.f32.vlgmr.msrb.gmra.mxu3 %v17976_v24  ;;  %9952 = vmatpush.msrb.mxu2 %v17867_v25  ;;  %v10358_v36 = vand.u32 4294901760, %v10357_v5  ;;  %v22194_v5 = vand.u32 4294901760, %v18013_v57 }
 0xebb   : > { %10259 = vmatpush.msra.mxu3 %v17699_v28  ;;  %10128 = vmatpush.msrb.mxu0 %v17935_v9  ;;  %v18048_v28 = vand.u32 4294901760, %v8267_v38 }
 0xebc   : > { %10169 = vmatpush.msrb.mxu1 %v17901_v4  ;;  %10131 = vmatmul.f32.vlgmr.msrb.gmra.mxu0 %v9960_v52  ;;  %v10369_v40 = vsub.f32 %v18013_v57, %v22194_v5  ;;  %v8264_v52 = vld [vmem:[%s14937_s16 + $0x2a8] sm:$0xff]  ;;  %v22195_v5 = vand.u32 4294901760, %v18031_v56  ;;  %v18084_v57 = vpop.f32.mrf.mxu2 }
 0xebd   : > { %10261 = vmatpush.msra.mxu3 %v17709_v45  ;;  %10300 = vmatpush.msra.mxu0 %v17955_v42  ;;  %v18058_v45 = vpop.f32.mrf.mxu1  ;;  %22196 = vst [vmem:[#allocation72_spill] sm:$0xff] %v18084_v57  ;;  %v8262_v57 = vld [vmem:[%s14937_s16 + $0x298] sm:$0xff] }
 0xebe   : > { %9954 = vmatpush.msrb.mxu2 %v17885_v1  ;;  %10171 = vmatpush.msrb.mxu1 %v17913_v34  ;;  %22193 = vst [vmem:[#allocation71_spill] sm:$0xff] %v18058_v45  ;;  %v9969_v45 = vand.u32 4294901760, %v9968_v15  ;;  %v10375_v17 = vsub.f32 %v18031_v56, %v22195_v5  ;;  %v22198_v5 = vand.u32 4294901760, %v18043_v6  ;;  %v22199_v56 = vand.u32 4294901760, %v17718_v3 }
 0xebf   : > { %10175 = vmatmul.f32.vlgmr.msrb.gmra.mxu1 %v9961_v30  ;;  %10263 = vmatpush.msra.mxu3 %v17720_v51  ;;  %v18075_v51 = vsub.f32 %v8267_v38, %v18048_v28  ;;  %v18077_v30 = vand.u32 4294901760, %v8265_v46  ;;  %v18094_v38 = vand.u32 4294901760, %v8264_v52 }
 0xec0   : > { %10302 = vmatpush.msra.mxu0 %v17964_v33  ;;  %10353 = vmatpush.msra.mxu1 %v10352_v14  ;;  %v10364_v14 = vand.u32 4294901760, %v10363_v41  ;;  %v10370_v41 = vand.u32 4294901760, %v10369_v40  ;;  %v9970_v40 = vsub.f32 %v9968_v15, %v9969_v45 }
 0xec1   : > { %9956 = vmatpush.msrb.mxu2 %v17901_v4  ;;  %10265 = vmatpush.msra.mxu3 %v17730_v0  ;;  %v18086_v0 = vpop.f32.mrf.mxu3  ;;  %v18106_v2 = vsub.f32 %v8265_v46, %v18077_v30 }
 0xec2   : > { %10304 = vmatpush.msra.mxu0 %v17982_v26  ;;  %10359 = vmatpush.msra.mxu1 %v10358_v36  ;;  %22197 = vst [vmem:[#allocation73_spill] sm:$0xff] %v18086_v0  ;;  %v18092_v36 = vsub.f32 %v8266_v54, %v18064_v23  ;;  %v10381_v0 = vsub.f32 %v18043_v6, %v22198_v5  ;;  %v8261_v5 = vld [vmem:[%s14937_s16 + $0x290] sm:$0xff]  ;;  %v22201_v6 = vand.u32 4294901760, %v17728_v53 }
 0xec3   : > { %9958 = vmatpush.msrb.mxu2 %v17913_v34  ;;  %10077 = vmatmul.f32.gmra.mxu3 %v18022_v43  ;;  %v18108_v43 = vand.u32 4294901760, %v8263_v19  ;;  %v18121_v54 = vsub.f32 %v8264_v52, %v18094_v38  ;;  %v18137_v3 = vand.u32 4294901760, %v8261_v5 }
 0xec4   : > { %9964 = vmatmul.f32.vlgmr.msrb.gmra.mxu2 %v9963_v31  ;;  %10267 = vmatpush.msra.mxu3 %v17744_v44  ;;  %v18110_v31 = vpop.f32.mrf.mxu0  ;;  %v10376_v44 = vand.u32 4294901760, %v10375_v17 }
 0xec5   : > { %10188 = vmatpush.msra.mxu2 %v22199_v56  ;;  %10306 = vmatpush.msra.mxu0 %v17992_v58  ;;  %22200 = vst [vmem:[#allocation74_spill] sm:$0xff] %v18110_v31  ;;  %v22202_v56 = vand.u32 4294901760, %v18062_v48  ;;  %v18126_v53 = vpop.f32.mrf.mxu1 }
 0xec6   : > { %10365 = vmatpush.msra.mxu1 %v10364_v14  ;;  %10136 = vmatmul.f32.gmra.mxu0 %v9968_v15  ;;  %v18123_v14 = vand.u32 4294901760, %v8262_v57  ;;  %v10382_v15 = vand.u32 4294901760, %v10381_v0  ;;  %22203 = vst [vmem:[#allocation75_spill] sm:$0xff] %v18126_v53  ;;  %v22206_v0 = vld [vmem:[#allocation16_spill] sm:$0xff] }
 0xec7   : > { %10192 = vmatpush.msra.mxu2 %v22201_v6  ;;  %10269 = vmatpush.msra.mxu3 %v17764_v13  ;;  %v10387_v46 = vsub.f32 %v18062_v48, %v22202_v56  ;;  %v22204_v13 = vand.u32 4294901760, %v17740_v37  ;;  %v22205_v6 = vand.u32 4294901760, %v18075_v51  ;;  %v18135_v56 = vsub.f32 %v8263_v19, %v18108_v43 }
 0xec8   : > { %10308 = vmatpush.msra.mxu0 %v18004_v61  ;;  %10371 = vmatpush.msra.mxu1 %v10370_v41  ;;  %v8260_v41 = vld [vmem:[%s14937_s16 + $0x288] sm:$0xff]  ;;  %v8152_v31 = vmax.f32 %v22206_v0, 0.0  ;;  %v9971_v37 = vand.u32 4294901760, %v9970_v40  ;;  %v18150_v53 = vsub.f32 %v8262_v57, %v18123_v14  ;;  %v8259_v0 = vld [vmem:[%s14937_s16 + $0x280] sm:$0xff]  ;;  %v22210_v40 = vand.u32 4294901760, %v18106_v2 }
 0xec9   : > { %10181 = vmatmul.f32.gmra.mxu1 %v9969_v45  ;;  %10196 = vmatpush.msra.mxu2 %v22204_v13  ;;  %v10393_v17 = vsub.f32 %v18075_v51, %v22205_v6  ;;  %v22207_v45 = vand.u32 4294901760, %v17752_v32  ;;  %v10388_v13 = vand.u32 4294901760, %v10387_v46  ;;  %v22208_v6 = vand.u32 4294901760, %v18092_v36 }
 0xeca   : > { %10271 = vmatpush.msra.mxu3 %v17779_v16  ;;  %10310 = vmatpush.msra.mxu0 %v18015_v60  ;;  %v18155_v16 = vand.u32 4294901760, %v8260_v41  ;;  %v10405_v46 = vsub.f32 %v18106_v2, %v22210_v40  ;;  %v18164_v57 = vsub.f32 %v8261_v5, %v18137_v3  ;;  %v18171_v52 = vand.u32 4294901760, %v8259_v0 }
 0xecb   : > { %10377 = vmatpush.msra.mxu1 %v10376_v44  ;;  %10200 = vmatpush.msra.mxu2 %v22207_v45  ;;  %v10399_v19 = vsub.f32 %v18092_v36, %v22208_v6  ;;  %v18157_v44 = vpop.f32.mrf.mxu2  ;;  %v10394_v32 = vand.u32 4294901760, %v10393_v17  ;;  %v10416_v45 = vand.u32 4294901760, %v18135_v56  ;;  %v18166_v6 = vand.u32 4294901760, %v8152_v31 }
 0xecc   : > { %10273 = vmatpush.msra.mxu3 %v17792_v29  ;;  %10312 = vmatpush.msra.mxu0 %v18036_v8  ;;  %22209 = vst [vmem:[#allocation16_spill] sm:$0xff] %v18157_v44  ;;  %v22211_v29 = vand.u32 4294901760, %v17769_v39  ;;  %v22212_v17 = vand.u32 4294901760, %v18121_v54  ;;  %v10422_v5 = vand.u32 4294901760, %v18150_v53  ;;  %v22213_v40 = vand.u32 4294901760, %v17790_v22 }
 0xecd   : > { %10383 = vmatpush.msra.mxu1 %v10382_v15  ;;  %9972 = vmatmul.f32.gmra.mxu2 %v9971_v37  ;;  %v10400_v15 = vand.u32 4294901760, %v10399_v19  ;;  %v18182_v39 = vsub.f32 %v8260_v41, %v18155_v16  ;;  %v10428_v19 = vand.u32 4294901760, %v18164_v57  ;;  %v22214_v22 = vand.u32 4294901760, %v17807_v20 }
 0xece   : > { %10204 = vmatpush.msra.mxu2 %v22211_v29  ;;  %10275 = vmatpush.msra.mxu3 %v17813_v49  ;;  %v10411_v37 = vsub.f32 %v18121_v54, %v22212_v17  ;;  %v10406_v49 = vand.u32 4294901760, %v10405_v46  ;;  %v18190_v29 = vsub.f32 %v8152_v31, %v18166_v6  ;;  %v22215_v46 = vld [vmem:[#allocation17_spill] sm:$0xff]  ;;  %v22216_v31 = vand.u32 4294901760, %v17819_v47 }
 0xecf   : > { %10314 = vmatpush.msra.mxu0 %v18048_v28  ;;  %10389 = vmatpush.msra.mxu1 %v10388_v13  ;;  %v10417_v13 = vsub.f32 %v18135_v56, %v10416_v45  ;;  %v8168_v17 = vmax.f32 %v22215_v46, 0.0  ;;  %v10434_v20 = vand.u32 4294901760, %v18182_v39 }
 0xed0   : > { %10208 = vmatpush.msra.mxu2 %v22213_v40  ;;  %10277 = vmatpush.msra.mxu3 %v17829_v7  ;;  %v18196_v7 = vsub.f32 %v8259_v0, %v18171_v52  ;;  %v10412_v41 = vand.u32 4294901760, %v10411_v37  ;;  %v10429_v0 = vsub.f32 %v18164_v57, %v10428_v19  ;;  %v10333_v47 = vand.u32 4294901760, %v18190_v29 }
 0xed1   : > { %10316 = vmatpush.msra.mxu0 %v18064_v23  ;;  %10395 = vmatpush.msra.mxu1 %v10394_v32  ;;  %v10423_v32 = vsub.f32 %v18150_v53, %v10422_v5  ;;  %v18217_v40 = vand.u32 4294901760, %v8168_v17 }
 0xed2   : > { %10212 = vmatpush.msra.mxu2 %v22214_v22  ;;  %10279 = vmatpush.msra.mxu3 %v17839_v10  ;;  %v10418_v10 = vand.u32 4294901760, %v10417_v13  ;;  %v10440_v37 = vand.u32 4294901760, %v18196_v7  ;;  %v22219_v13 = vand.u32 4294901760, %v17865_v55  ;;  %v22220_v22 = vand.u32 4294901760, %v17883_v59  ;;  %v18250_v59 = vpop.f32.mrf.mxu0 }
 0xed3   : > { %10318 = vmatpush.msra.mxu0 %v18077_v30  ;;  %10401 = vmatpush.msra.mxu1 %v10400_v15  ;;  %v22217_v15 = vand.u32 4294901760, %v17837_v50  ;;  %v10435_v50 = vsub.f32 %v18182_v39, %v10434_v20  ;;  %22223 = vst [vmem:[#allocation76_spill] sm:$0xff] %v18250_v59 }
 0xed4   : > { %10216 = vmatpush.msra.mxu2 %v22216_v31  ;;  %10281 = vmatpush.msra.mxu3 %v17854_v27  ;;  %v10424_v27 = vand.u32 4294901760, %v10423_v32  ;;  %v22222_v32 = vand.u32 4294901760, %v17899_v12  ;;  %v22225_v12 = vand.u32 4294901760, %v17911_v11  ;;  %v22229_v11 = vand.u32 4294901760, %v17925_v21 }
 0xed5   : > { %10320 = vmatpush.msra.mxu0 %v18094_v38  ;;  %10407 = vmatpush.msra.mxu1 %v10406_v49  ;;  %v22218_v49 = vand.u32 4294901760, %v17852_v18  ;;  %v10334_v18 = vsub.f32 %v18190_v29, %v10333_v47  ;;  %v10436_v55 = vand.u32 4294901760, %v10435_v50 }
 0xed6   : > { %10220 = vmatpush.msra.mxu2 %v22217_v15  ;;  %10283 = vmatpush.msra.mxu3 %v17867_v25  ;;  %v10430_v25 = vand.u32 4294901760, %v10429_v0  ;;  %v18260_v0 = vpop.f32.mrf.mxu2  ;;  %v22228_v15 = vand.u32 4294901760, %v17985_v63 }
 0xed7   : > { %10322 = vmatpush.msra.mxu0 %v18108_v43  ;;  %10413 = vmatpush.msra.mxu1 %v10412_v41  ;;  %v18240_v41 = vsub.f32 %v8168_v17, %v18217_v40  ;;  %v10335_v46 = vand.u32 4294901760, %v10334_v18  ;;  %v22224_v17 = vand.u32 4294901760, %v17974_v62  ;;  %22227 = vst [vmem:[#allocation78_spill] sm:$0xff] %v18260_v0 }
 0xed8   : > { %10224 = vmatpush.msra.mxu2 %v22218_v49  ;;  %10285 = vmatpush.msra.mxu3 %v17885_v1  ;;  %v10441_v1 = vsub.f32 %v18196_v7, %v10440_v37  ;;  %v22230_v49 = vand.u32 4294901760, %v18002_v35 }
 0xed9   : > { %10324 = vmatpush.msra.mxu0 %v18123_v14  ;;  %10419 = vmatpush.msra.mxu1 %v10418_v10  ;;  %v18258_v10 = vpop.f32.mrf.mxu1 }
 0xeda   : > { %10228 = vmatpush.msra.mxu2 %v22219_v13  ;;  %10287 = vmatpush.msra.mxu3 %v17901_v4  ;;  %v18242_v4 = vpop.f32.mrf.mxu3  ;;  %v10442_v31 = vand.u32 4294901760, %v10441_v1  ;;  %22226 = vst [vmem:[#allocation77_spill] sm:$0xff] %v18258_v10  ;;  %v22234_v13 = vld [vmem:[#allocation14_spill] sm:$0xff] }
 0xedb   : > { %10326 = vmatpush.msra.mxu0 %v18137_v3  ;;  %10425 = vmatpush.msra.mxu1 %v10424_v27  ;;  %22221 = vst [vmem:[#allocation17_spill] sm:$0xff] %v18242_v4  ;;  %v22235_v18 = vand.u32 4294901760, %v22234_v13 }
 0xedc   : > { %10232 = vmatpush.msra.mxu2 %v22220_v22  ;;  %10289 = vmatpush.msra.mxu3 %v17913_v34  ;;  %v10341_v34 = vand.u32 4294901760, %v18240_v41 }
 0xedd   : > { %10328 = vmatpush.msra.mxu0 %v18155_v16  ;;  %10431 = vmatpush.msra.mxu1 %v10430_v25  ;;  %v22232_v25 = vand.u32 4294901760, %v17935_v9  ;;  %v22237_v9 = vld [vmem:[#allocation68_spill] sm:$0xff] }
 0xede   : > { %10291 = vmatmul.f32.vlgmr.msra.gmra.mxu3 %v17976_v24  ;;  %10236 = vmatpush.msra.mxu2 %v22222_v32  ;;  %v10342_v27 = vsub.f32 %v18240_v41, %v10341_v34  ;;  %v18297_v22 = vpop.f32.mrf.mxu2  ;;  %v22243_v32 = vand.u32 4294901760, %v18062_v48 }
 0xedf   : > { %10513 = vmatpush.msrb.mxu3 %v17955_v42  ;;  %10330 = vmatpush.msra.mxu0 %v18171_v52  ;;  %22240 = vst [vmem:[#allocation68_spill] sm:$0xff] %v18297_v22 }
 0xee0   : > { %10437 = vmatpush.msra.mxu1 %v10436_v55  ;;  %10336 = vmatmul.f32.vlgmr.msra.gmra.mxu0 %v10335_v46  ;;  %v10343_v21 = vand.u32 4294901760, %v10342_v27  ;;  %v8289_v55 = vld [vmem:[%s14937_s16 + $0x370] sm:$0xff]  ;;  %v8288_v46 = vld [vmem:[%s14937_s16 + $0x368] sm:$0xff] }
 0xee1   : > { %10515 = vmatpush.msrb.mxu3 %v17964_v33  ;;  %10560 = vmatpush.msrb.mxu0 %v22224_v17  ;;  %v18295_v1 = vpop.f32.mrf.mxu1 }
 0xee2   : > { %10240 = vmatpush.msra.mxu2 %v22225_v12  ;;  %10443 = vmatpush.msra.mxu1 %v10442_v31  ;;  %v18276_v50 = vpop.f32.mrf.mxu3  ;;  %22239 = vst [vmem:[#allocation14_spill] sm:$0xff] %v18295_v1  ;;  %v22244_v31 = vand.u32 4294901760, %v18075_v51  ;;  %v18326_v12 = vand.u32 4294901760, %v8288_v46 }
 0xee3   : > { %10445 = vmatmul.f32.vlgmr.msra.gmra.mxu1 %v18166_v6  ;;  %10517 = vmatpush.msrb.mxu3 %v17982_v26  ;;  %22231 = vst [vmem:[#allocation79_spill] sm:$0xff] %v18276_v50 }
 0xee4   : > { %10564 = vmatpush.msrb.mxu0 %v22228_v15  ;;  %10631 = vmatpush.msrb.mxu1 %v17955_v42  ;;  %v22233_v42 = vld [vmem:[#allocation67_spill] sm:$0xff] }
 0xee5   : > { %10244 = vmatpush.msra.mxu2 %v22229_v11  ;;  %10519 = vmatpush.msrb.mxu3 %v17992_v58 }
 0xee6   : > { %10568 = vmatpush.msrb.mxu0 %v22230_v49  ;;  %10633 = vmatpush.msrb.mxu1 %v17964_v33  ;;  %v18286_v33 = vpop.f32.mrf.mxu0  ;;  %v18341_v11 = vpop.f32.mrf.mxu2  ;;  %v22247_v49 = vand.u32 4294901760, %v18106_v2 }
 0xee7   : > { %10248 = vmatpush.msra.mxu2 %v22232_v25  ;;  %10295 = vmatmul.f32.gmra.mxu3 %v22233_v42  ;;  %22236 = vst [vmem:[#allocation67_spill] sm:$0xff] %v18286_v33  ;;  %v18348_v25 = vsub.f32 %v8288_v46, %v18326_v12  ;;  %v8282_v46 = vld [vmem:[%s14937_s16 + $0x338] sm:$0xff]  ;;  %v8299_v33 = vld [vmem:[%s14937_s16 + $0x3c0] sm:$0xff] }
 0xee8   : > { %10250 = vmatmul.f32.vlgmr.msra.gmra.mxu2 %v17976_v24  ;;  %10521 = vmatpush.msrb.mxu3 %v18004_v61  ;;  %v22238_v24 = vand.u32 4294901760, %v22237_v9 }
 0xee9   : > { %10455 = vmatpush.msrb.mxu2 %v17974_v62  ;;  %10572 = vmatpush.msrb.mxu0 %v22235_v18  ;;  %v8290_v62 = vld [vmem:[%s14937_s16 + $0x378] sm:$0xff] }
 0xeea   : > { %10635 = vmatpush.msrb.mxu1 %v17982_v26  ;;  %10344 = vmatmul.f32.gmra.mxu0 %v10343_v21  ;;  %v8285_v21 = vld [vmem:[%s14937_s16 + $0x350] sm:$0xff] }
 0xeeb   : > { %10458 = vmatpush.msrb.mxu2 %v17985_v63  ;;  %10523 = vmatpush.msrb.mxu3 %v18015_v60  ;;  %v22241_v63 = vld [vmem:[#allocation70_spill] sm:$0xff] }
 0xeec   : > { %10576 = vmatpush.msrb.mxu0 %v22238_v24  ;;  %10637 = vmatpush.msrb.mxu1 %v17992_v58  ;;  %v22242_v26 = vand.u32 4294901760, %v22241_v63  ;;  %v18307_v58 = vand.u32 4294901760, %v8290_v62  ;;  %22246 = vst [vmem:[#allocation70_spill] sm:$0xff] %v18341_v11  ;;  %v21830_v24 = vand.u32 4294901760, %v18348_v25 }
 0xeed   : > { %10449 = vmatmul.f32.gmra.mxu1 %v18217_v40  ;;  %10461 = vmatpush.msrb.mxu2 %v18002_v35  ;;  %v18315_v35 = vand.u32 4294901760, %v8289_v55 }
 0xeee   : > { %10525 = vmatpush.msrb.mxu3 %v18036_v8  ;;  %10580 = vmatpush.msrb.mxu0 %v22242_v26  ;;  %v18324_v17 = vsub.f32 %v8290_v62, %v18307_v58  ;;  %v18376_v62 = vand.u32 4294901760, %v8285_v21 }
 0xeef   : > { %10639 = vmatpush.msrb.mxu1 %v18004_v61  ;;  %10464 = vmatpush.msrb.mxu2 %v22234_v13  ;;  %v8287_v61 = vld [vmem:[%s14937_s16 + $0x360] sm:$0xff]  ;;  %v18334_v15 = vsub.f32 %v8289_v55, %v18315_v35  ;;  %v22249_v13 = vand.u32 4294901760, %v18121_v54 }
 0xef0   : > { %10527 = vmatpush.msrb.mxu3 %v18048_v28  ;;  %10584 = vmatpush.msrb.mxu0 %v22243_v32  ;;  %v18336_v27 = vand.u32 4294901760, %v8287_v61 }
 0xef1   : > { %10641 = vmatpush.msrb.mxu1 %v18015_v60  ;;  %10254 = vmatmul.f32.gmra.mxu2 %v22233_v42  ;;  %v22245_v60 = vand.u32 4294901760, %v18092_v36  ;;  %v18350_v42 = vpop.f32.mrf.mxu3 }
 0xef2   : > { %10467 = vmatpush.msrb.mxu2 %v22237_v9  ;;  %10529 = vmatpush.msrb.mxu3 %v18064_v23  ;;  %22248 = vst [vmem:[#allocation80_spill] sm:$0xff] %v18350_v42  ;;  %v18362_v18 = vsub.f32 %v8287_v61, %v18336_v27  ;;  %v18364_v9 = vpop.f32.mrf.mxu0 }
 0xef3   : > { %10588 = vmatpush.msrb.mxu0 %v22244_v31  ;;  %10643 = vmatpush.msrb.mxu1 %v18036_v8  ;;  %v8286_v8 = vld [vmem:[%s14937_s16 + $0x358] sm:$0xff]  ;;  %22250 = vst [vmem:[#allocation81_spill] sm:$0xff] %v18364_v9 }
 0xef4   : > { %10470 = vmatpush.msrb.mxu2 %v22241_v63  ;;  %10531 = vmatpush.msrb.mxu3 %v18077_v30  ;;  %v18378_v63 = vpop.f32.mrf.mxu1  ;;  %v21828_v26 = vand.u32 4294901760, %v18362_v18 }
 0xef5   : > { %10592 = vmatpush.msrb.mxu0 %v22245_v60  ;;  %10645 = vmatpush.msrb.mxu1 %v18048_v28  ;;  %v21833_v28 = vand.u32 4294901760, %v18324_v17  ;;  %22251 = vst [vmem:[#allocation82_spill] sm:$0xff] %v18378_v63 }
 0xef6   : > { %10473 = vmatpush.msrb.mxu2 %v18062_v48  ;;  %10533 = vmatpush.msrb.mxu3 %v18094_v38  ;;  %v18354_v48 = vand.u32 4294901760, %v8286_v8  ;;  %v10741_v61 = vsub.f32 %v18362_v18, %v21828_v26 }
 0xef7   : > { %10596 = vmatpush.msrb.mxu0 %v22247_v49  ;;  %10647 = vmatpush.msrb.mxu1 %v18064_v23  ;;  %v21831_v23 = vand.u32 4294901760, %v18334_v15 }
 0xef8   : > { %10476 = vmatpush.msrb.mxu2 %v18075_v51  ;;  %10535 = vmatpush.msrb.mxu3 %v18108_v43  ;;  %v8284_v51 = vld [vmem:[%s14937_s16 + $0x348] sm:$0xff] }
 0xef9   : > { %10600 = vmatpush.msrb.mxu0 %v22249_v13  ;;  %10649 = vmatpush.msrb.mxu1 %v18077_v30  ;;  %v10723_v30 = vsub.f32 %v18324_v17, %v21833_v28  ;;  %v18393_v55 = vand.u32 4294901760, %v8284_v51  ;;  %v18424_v60 = vpop.f32.mrf.mxu3 }
 0xefa   : > { %10479 = vmatpush.msrb.mxu2 %v18092_v36  ;;  %10537 = vmatpush.msrb.mxu3 %v18123_v14  ;;  %v18383_v36 = vsub.f32 %v8286_v8, %v18354_v48  ;;  %22253 = vst [vmem:[#allocation84_spill] sm:$0xff] %v18424_v60  ;;  %v18429_v8 = vand.u32 4294901760, %v8282_v46  ;;  %v18438_v13 = vpop.f32.mrf.mxu0 }
 0xefb   : > { %10604 = vmatpush.msrb.mxu0 %v10416_v45  ;;  %10651 = vmatpush.msrb.mxu1 %v18094_v38  ;;  %v8283_v45 = vld [vmem:[%s14937_s16 + $0x340] sm:$0xff]  ;;  %v10729_v38 = vsub.f32 %v18334_v15, %v21831_v23  ;;  %v18421_v31 = vsub.f32 %v8284_v51, %v18393_v55  ;;  %22254 = vst [vmem:[#allocation85_spill] sm:$0xff] %v18438_v13 }
 0xefc   : > { %10482 = vmatpush.msrb.mxu2 %v18106_v2  ;;  %10539 = vmatpush.msrb.mxu3 %v18137_v3  ;;  %v10724_v2 = vand.u32 4294901760, %v10723_v30  ;;  %v18406_v32 = vand.u32 4294901760, %v8283_v45  ;;  %v8279_v30 = vld [vmem:[%s14937_s16 + $0x320] sm:$0xff] }
 0xefd   : > { %10608 = vmatpush.msrb.mxu0 %v10422_v5  ;;  %10653 = vmatpush.msrb.mxu1 %v18108_v43  ;;  %v10735_v43 = vsub.f32 %v18348_v25, %v21830_v24  ;;  %v18404_v5 = vsub.f32 %v8285_v21, %v18376_v62  ;;  %v8280_v21 = vld [vmem:[%s14937_s16 + $0x328] sm:$0xff]  ;;  %v21826_v51 = vand.u32 4294901760, %v18421_v31 }
 0xefe   : > { %10485 = vmatpush.msrb.mxu2 %v18121_v54  ;;  %10541 = vmatpush.msrb.mxu3 %v18155_v16  ;;  %v21827_v54 = vand.u32 4294901760, %v18383_v36  ;;  %v18435_v49 = vsub.f32 %v8283_v45, %v18406_v32  ;;  %v18450_v45 = vpop.f32.mrf.mxu1 }
 0xeff   : > { %10612 = vmatpush.msrb.mxu0 %v10428_v19  ;;  %10655 = vmatpush.msrb.mxu1 %v18123_v14  ;;  %v18412_v19 = vpop.f32.mrf.mxu2  ;;  %v10730_v14 = vand.u32 4294901760, %v10729_v38  ;;  %22255 = vst [vmem:[#allocation86_spill] sm:$0xff] %v18450_v45  ;;  %v18457_v38 = vand.u32 4294901760, %v8280_v21  ;;  %v8303_v45 = vld [vmem:[%s14937_s16 + $0x3e0] sm:$0xff] }
 0xf00   : > { %10488 = vmatpush.msrb.mxu2 %v18135_v56  ;;  %10543 = vmatpush.msrb.mxu3 %v18171_v52  ;;  %22252 = vst [vmem:[#allocation83_spill] sm:$0xff] %v18412_v19  ;;  %v8281_v56 = vld [vmem:[%s14937_s16 + $0x330] sm:$0xff]  ;;  %v18618_v63 = vand.u32 4294901760, %v8303_v45  ;;  %v22274_v19 = vld [vmem:[#allocation19_spill] sm:$0xff] }
 0xf01   : > { %10616 = vmatpush.msrb.mxu0 %v10434_v20  ;;  %10657 = vmatpush.msrb.mxu1 %v18137_v3  ;;  %v10736_v3 = vand.u32 4294901760, %v10735_v43  ;;  %v21825_v20 = vand.u32 4294901760, %v18404_v5  ;;  %v21829_v43 = vand.u32 4294901760, %v18435_v49  ;;  %v8169_v9 = vmax.f32 %v22274_v19, 0.0 }
 0xf02   : > { %10547 = vmatmul.f32.vlgmr.msrb.gmra.mxu3 %v10333_v47  ;;  %10491 = vmatpush.msrb.mxu2 %v18150_v53  ;;  %v10747_v53 = vsub.f32 %v18383_v36, %v21827_v54  ;;  %v18445_v47 = vand.u32 4294901760, %v8281_v56  ;;  %v18494_v54 = vpop.f32.mrf.mxu3 }
 0xf03   : > { %10725 = vmatpush.msra.mxu3 %v10724_v2  ;;  %10620 = vmatpush.msrb.mxu0 %v10440_v37  ;;  %v10742_v37 = vand.u32 4294901760, %v10741_v61  ;;  %v10753_v2 = vsub.f32 %v18404_v5, %v21825_v20  ;;  %v8277_v61 = vld [vmem:[%s14937_s16 + $0x310] sm:$0xff]  ;;  %22257 = vst [vmem:[#allocation88_spill] sm:$0xff] %v18494_v54 }
 0xf04   : > { %10659 = vmatpush.msrb.mxu1 %v18155_v16  ;;  %10622 = vmatmul.f32.vlgmr.msrb.gmra.mxu0 %v18166_v6  ;;  %v18455_v16 = vsub.f32 %v8282_v46, %v18429_v8  ;;  %v18470_v46 = vand.u32 4294901760, %v8279_v30 }
 0xf05   : > { %10731 = vmatpush.msra.mxu3 %v10730_v14  ;;  %10827 = vmatpush.msra.mxu0 %v18324_v17  ;;  %v8278_v14 = vld [vmem:[%s14937_s16 + $0x318] sm:$0xff] }
 0xf06   : > { %10494 = vmatpush.msrb.mxu2 %v18164_v57  ;;  %10661 = vmatpush.msrb.mxu1 %v18171_v52  ;;  %v10748_v52 = vand.u32 4294901760, %v10747_v53  ;;  %v18468_v57 = vsub.f32 %v8281_v56, %v18445_v47  ;;  %v18481_v56 = vsub.f32 %v8280_v21, %v18457_v38  ;;  %v18483_v53 = vand.u32 4294901760, %v8278_v14  ;;  %v18520_v23 = vpop.f32.mrf.mxu1 }
 0xf07   : > { %10663 = vmatmul.f32.vlgmr.msrb.gmra.mxu1 %v18166_v6  ;;  %10737 = vmatpush.msra.mxu3 %v10736_v3  ;;  %v10759_v6 = vsub.f32 %v18421_v31, %v21826_v51  ;;  %v21832_v3 = vand.u32 4294901760, %v18455_v16  ;;  %v18485_v20 = vpop.f32.mrf.mxu2  ;;  %v8276_v51 = vld [vmem:[%s14937_s16 + $0x308] sm:$0xff]  ;;  %v18499_v26 = vsub.f32 %v8279_v30, %v18470_v46  ;;  %22259 = vst [vmem:[#allocation90_spill] sm:$0xff] %v18520_v23 }
 0xf08   : > { %10830 = vmatpush.msra.mxu0 %v18334_v15  ;;  %10885 = vmatpush.msra.mxu1 %v18307_v58  ;;  %22256 = vst [vmem:[#allocation87_spill] sm:$0xff] %v18485_v20  ;;  %v21834_v21 = vand.u32 4294901760, %v18468_v57  ;;  %v18517_v24 = vand.u32 4294901760, %v8276_v51 }
 0xf09   : > { %10497 = vmatpush.msrb.mxu2 %v18182_v39  ;;  %10743 = vmatpush.msra.mxu3 %v10742_v37  ;;  %v10754_v39 = vand.u32 4294901760, %v10753_v2  ;;  %v10765_v37 = vsub.f32 %v18435_v49, %v21829_v43  ;;  %v8275_v2 = vld [vmem:[%s14937_s16 + $0x300] sm:$0xff]  ;;  %v18506_v43 = vpop.f32.mrf.mxu0 }
 0xf0a   : > { %10833 = vmatpush.msra.mxu0 %v18348_v25  ;;  %10887 = vmatpush.msra.mxu1 %v18315_v35  ;;  %22258 = vst [vmem:[#allocation89_spill] sm:$0xff] %v18506_v43  ;;  %v18531_v30 = vand.u32 4294901760, %v8275_v2  ;;  %v18558_v23 = vpop.f32.mrf.mxu3  ;;  %v8305_v43 = vld [vmem:[%s14937_s16 + $0x3f0] sm:$0xff] }
 0xf0b   : > { %10500 = vmatpush.msrb.mxu2 %v18196_v7  ;;  %10553 = vmatmul.f32.gmra.mxu3 %v10341_v34  ;;  %v18501_v7 = vand.u32 4294901760, %v8277_v61  ;;  %v10760_v34 = vand.u32 4294901760, %v10759_v6  ;;  %v10766_v6 = vand.u32 4294901760, %v10765_v37  ;;  %v22260_v37 = vand.u32 4294901760, %v18481_v56  ;;  %22264 = vst [vmem:[#allocation93_spill] sm:$0xff] %v18558_v23 }
 0xf0c   : > { %10503 = vmatmul.f32.vlgmr.msrb.gmra.mxu2 %v18190_v29  ;;  %10749 = vmatpush.msra.mxu3 %v10748_v52  ;;  %v10771_v29 = vsub.f32 %v18455_v16, %v21832_v3  ;;  %v18515_v52 = vsub.f32 %v8278_v14, %v18483_v53  ;;  %v10777_v3 = vsub.f32 %v18468_v57, %v21834_v21 }
 0xf0d   : > { %10672 = vmatpush.msra.mxu2 %v18307_v58  ;;  %10836 = vmatpush.msra.mxu0 %v18362_v18  ;;  %v18529_v14 = vsub.f32 %v8277_v61, %v18501_v7  ;;  %v10783_v21 = vsub.f32 %v18481_v56, %v22260_v37  ;;  %v18541_v61 = vsub.f32 %v8276_v51, %v18517_v24 }
 0xf0e   : > { %10889 = vmatpush.msra.mxu1 %v18326_v12  ;;  %10626 = vmatmul.f32.gmra.mxu0 %v18217_v40  ;;  %v18551_v28 = vsub.f32 %v8275_v2, %v18531_v30  ;;  %v22268_v2 = vld [vmem:[#allocation18_spill] sm:$0xff] }
 0xf0f   : > { %10674 = vmatpush.msra.mxu2 %v18315_v35  ;;  %10755 = vmatpush.msra.mxu3 %v10754_v39  ;;  %v10772_v39 = vand.u32 4294901760, %v10771_v29  ;;  %v18553_v51 = vpop.f32.mrf.mxu2  ;;  %v8153_v54 = vmax.f32 %v22268_v2, 0.0  ;;  %v8304_v2 = vld [vmem:[%s14937_s16 + $0x3e8] sm:$0xff] }
 0xf10   : > { %10839 = vmatpush.msra.mxu0 %v18383_v36  ;;  %10891 = vmatpush.msra.mxu1 %v18336_v27  ;;  %22262 = vst [vmem:[#allocation91_spill] sm:$0xff] %v18551_v28  ;;  %v22271_v20 = vand.u32 4294901760, %v18551_v28 }
 0xf11   : > { %10667 = vmatmul.f32.gmra.mxu1 %v18217_v40  ;;  %10676 = vmatpush.msra.mxu2 %v18326_v12  ;;  %v10778_v40 = vand.u32 4294901760, %v10777_v3  ;;  %22263 = vst [vmem:[#allocation92_spill] sm:$0xff] %v18553_v51  ;;  %v10784_v3 = vand.u32 4294901760, %v10783_v21  ;;  %v18568_v51 = vpop.f32.mrf.mxu0  ;;  %v22267_v21 = vand.u32 4294901760, %v18529_v14 }
 0xf12   : > { %10761 = vmatpush.msra.mxu3 %v10760_v34  ;;  %10842 = vmatpush.msra.mxu0 %v18404_v5  ;;  %v22261_v34 = vand.u32 4294901760, %v18499_v26  ;;  %22266 = vst [vmem:[#allocation94_spill] sm:$0xff] %v18568_v51  ;;  %v18580_v51 = vpop.f32.mrf.mxu1  ;;  %v18614_v60 = vpop.f32.mrf.mxu3 }
 0xf13   : > { %10893 = vmatpush.msra.mxu1 %v18354_v48  ;;  %10678 = vmatpush.msra.mxu2 %v18336_v27  ;;  %22269 = vst [vmem:[#allocation18_spill] sm:$0xff] %v18580_v51 }
 0xf14   : > { %10767 = vmatpush.msra.mxu3 %v10766_v6  ;;  %10845 = vmatpush.msra.mxu0 %v18421_v31  ;;  %v10789_v29 = vsub.f32 %v18499_v26, %v22261_v34  ;;  %v8306_v6 = vld [vmem:[%s14937_s16 + $0x3f8] sm:$0xff]  ;;  %v22265_v34 = vand.u32 4294901760, %v18515_v52  ;;  %22273 = vst [vmem:[#allocation96_spill] sm:$0xff] %v18614_v60 }
 0xf15   : > { %10895 = vmatpush.msra.mxu1 %v18376_v62  ;;  %10508 = vmatmul.f32.gmra.mxu2 %v18240_v41  ;;  %v18575_v23 = vand.u32 4294901760, %v8306_v6 }
 0xf16   : > { %10680 = vmatpush.msra.mxu2 %v18354_v48  ;;  %10773 = vmatpush.msra.mxu3 %v10772_v39  ;;  %v10795_v37 = vsub.f32 %v18515_v52, %v22265_v34  ;;  %v10790_v41 = vand.u32 4294901760, %v10789_v29  ;;  %v10801_v39 = vsub.f32 %v18529_v14, %v22267_v21  ;;  %v22270_v29 = vand.u32 4294901760, %v18541_v61 }
 0xf17   : > { %10848 = vmatpush.msra.mxu0 %v18435_v49  ;;  %10897 = vmatpush.msra.mxu1 %v18393_v55  ;;  %v18586_v34 = vand.u32 4294901760, %v8305_v43 }
 0xf18   : > { %10682 = vmatpush.msra.mxu2 %v18376_v62  ;;  %10779 = vmatpush.msra.mxu3 %v10778_v40  ;;  %v10796_v40 = vand.u32 4294901760, %v10795_v37  ;;  %v10807_v21 = vsub.f32 %v18541_v61, %v22270_v29  ;;  %v10802_v51 = vand.u32 4294901760, %v10801_v39  ;;  %v10813_v37 = vsub.f32 %v18551_v28, %v22271_v20  ;;  %v18609_v20 = vpop.f32.mrf.mxu2 }
 0xf19   : > { %10851 = vmatpush.msra.mxu0 %v18455_v16  ;;  %10899 = vmatpush.msra.mxu1 %v18406_v32  ;;  %v18598_v29 = vand.u32 4294901760, %v8153_v54  ;;  %v18604_v39 = vand.u32 4294901760, %v8304_v2  ;;  %v18607_v13 = vsub.f32 %v8305_v43, %v18586_v34  ;;  %22272 = vst [vmem:[#allocation95_spill] sm:$0xff] %v18609_v20  ;;  %v8301_v20 = vld [vmem:[%s14937_s16 + $0x3d0] sm:$0xff]  ;;  %v18625_v1 = vpop.f32.mrf.mxu0 }
 0xf1a   : > { %10684 = vmatpush.msra.mxu2 %v18393_v55  ;;  %10785 = vmatpush.msra.mxu3 %v10784_v3  ;;  %v18596_v3 = vsub.f32 %v8306_v6, %v18575_v23  ;;  %v8302_v6 = vld [vmem:[%s14937_s16 + $0x3d8] sm:$0xff]  ;;  %22275 = vst [vmem:[#allocation19_spill] sm:$0xff] %v18625_v1  ;;  %v8300_v1 = vld [vmem:[%s14937_s16 + $0x3c8] sm:$0xff]  ;;  %v18678_v22 = vpop.f32.mrf.mxu3 }
 0xf1b   : > { %10854 = vmatpush.msra.mxu0 %v18468_v57  ;;  %10901 = vmatpush.msra.mxu1 %v18429_v8  ;;  %v10704_v43 = vsub.f32 %v8153_v54, %v18598_v29  ;;  %v18636_v54 = vpop.f32.mrf.mxu1  ;;  %v18664_v11 = vand.u32 4294901760, %v8300_v1  ;;  %22283 = vst [vmem:[#allocation102_spill] sm:$0xff] %v18678_v22 }
 0xf1c   : > { %10686 = vmatpush.msra.mxu2 %v18406_v32  ;;  %10791 = vmatpush.msra.mxu3 %v10790_v41  ;;  %v10808_v41 = vand.u32 4294901760, %v10807_v21  ;;  %v18632_v21 = vand.u32 4294901760, %v8302_v6  ;;  %22276 = vst [vmem:[#allocation97_spill] sm:$0xff] %v18636_v54  ;;  %v22277_v19 = vand.u32 4294901760, %v18596_v3  ;;  %v18650_v54 = vand.u32 4294901760, %v8169_v9 }
 0xf1d   : > { %10857 = vmatpush.msra.mxu0 %v18481_v56  ;;  %10903 = vmatpush.msra.mxu1 %v18445_v47  ;;  %v10705_v60 = vand.u32 4294901760, %v10704_v43  ;;  %v18690_v22 = vsub.f32 %v8300_v1, %v18664_v11 }
 0xf1e   : > { %10688 = vmatpush.msra.mxu2 %v18429_v8  ;;  %10797 = vmatpush.msra.mxu3 %v10796_v40  ;;  %v10814_v40 = vand.u32 4294901760, %v10813_v37  ;;  %v18630_v37 = vsub.f32 %v8304_v2, %v18604_v39  ;;  %v18645_v2 = vand.u32 4294901760, %v8301_v20  ;;  %22279 = vst [vmem:[#allocation99_spill] sm:$0xff] %v18650_v54  ;;  %v18659_v42 = vsub.f32 %v8302_v6, %v18632_v21 }
 0xf1f   : > { %10860 = vmatpush.msra.mxu0 %v18499_v26  ;;  %10905 = vmatpush.msra.mxu1 %v18457_v38  ;;  %v10706_v6 = vsub.f32 %v10704_v43, %v10705_v60  ;;  %v10712_v59 = vsub.f32 %v8169_v9, %v18650_v54 }
 0xf20   : > { %10690 = vmatpush.msra.mxu2 %v18445_v47  ;;  %10803 = vmatpush.msra.mxu3 %v10802_v51  ;;  %v18643_v51 = vsub.f32 %v8303_v45, %v18618_v63  ;;  %22281 = vst [vmem:[#allocation100_spill] sm:$0xff] %v18659_v42  ;;  %v18672_v50 = vpop.f32.mrf.mxu2 }
 0xf21   : > { %10863 = vmatpush.msra.mxu0 %v18515_v52  ;;  %10907 = vmatpush.msra.mxu1 %v18470_v46  ;;  %22282 = vst [vmem:[#allocation101_spill] sm:$0xff] %v18672_v50  ;;  %v8297_v50 = vld [vmem:[%s14937_s16 + $0x3b0] sm:$0xff]  ;;  %v18694_v0 = vpop.f32.mrf.mxu0 }
 0xf22   : > { %10692 = vmatpush.msra.mxu2 %v18457_v38  ;;  %10809 = vmatpush.msra.mxu3 %v10808_v41  ;;  %v11095_v41 = vsub.f32 %v18596_v3, %v22277_v19  ;;  %22278 = vst [vmem:[#allocation98_spill] sm:$0xff] %v18643_v51  ;;  %v8298_v19 = vld [vmem:[%s14937_s16 + $0x3b8] sm:$0xff] }
 0xf23   : > { %10866 = vmatpush.msra.mxu0 %v18529_v14  ;;  %10909 = vmatpush.msra.mxu1 %v18483_v53  ;;  %v18692_v4 = vand.u32 4294901760, %v8298_v19  ;;  %22285 = vst [vmem:[#allocation103_spill] sm:$0xff] %v18694_v0  ;;  %v18709_v0 = vpop.f32.mrf.mxu1 }
 0xf24   : > { %10694 = vmatpush.msra.mxu2 %v18470_v46  ;;  %10815 = vmatpush.msra.mxu3 %v10814_v40  ;;  %v22280_v40 = vand.u32 4294901760, %v18607_v13  ;;  %v11096_v10 = vand.u32 4294901760, %v11095_v41  ;;  %22288 = vst [vmem:[#allocation105_spill] sm:$0xff] %v18709_v0  ;;  %v8294_v0 = vld [vmem:[%s14937_s16 + $0x398] sm:$0xff] }
 0xf25   : > { %10869 = vmatpush.msra.mxu0 %v18541_v61  ;;  %10911 = vmatpush.msra.mxu1 %v18501_v7 }
 0xf26   : > { %10817 = vmatmul.f32.vlgmr.msra.gmra.mxu3 %v18598_v29  ;;  %10696 = vmatpush.msra.mxu2 %v18483_v53  ;;  %v11101_v45 = vsub.f32 %v18607_v13, %v22280_v40  ;;  %v18669_v40 = vsub.f32 %v8301_v20, %v18645_v2  ;;  %v22284_v20 = vand.u32 4294901760, %v18630_v37 }
 0xf27   : > { %11003 = vmatpush.msrb.mxu3 %v18307_v58  ;;  %10872 = vmatpush.msra.mxu0 %v18551_v28  ;;  %v18676_v58 = vand.u32 4294901760, %v8299_v33 }
 0xf28   : > { %10913 = vmatpush.msra.mxu1 %v18517_v24  ;;  %10875 = vmatmul.f32.vlgmr.msra.gmra.mxu0 %v10704_v43  ;;  %v11102_v41 = vand.u32 4294901760, %v11101_v45  ;;  %v11107_v43 = vsub.f32 %v18630_v37, %v22284_v20  ;;  %v22286_v45 = vand.u32 4294901760, %v18643_v51  ;;  %v22289_v20 = vand.u32 4294901760, %v18659_v42  ;;  %v18739_v28 = vpop.f32.mrf.mxu2 }
 0xf29   : > { %11005 = vmatpush.msrb.mxu3 %v18315_v35  ;;  %11044 = vmatpush.msrb.mxu0 %v18575_v23  ;;  %v18705_v1 = vsub.f32 %v8299_v33, %v18676_v58  ;;  %v10707_v35 = vand.u32 4294901760, %v10706_v6  ;;  %22292 = vst [vmem:[#allocation106_spill] sm:$0xff] %v18739_v28  ;;  %v22297_v28 = vld [vmem:[#allocation20_spill] sm:$0xff] }
 0xf2a   : > { %10698 = vmatpush.msra.mxu2 %v18501_v7  ;;  %10915 = vmatpush.msra.mxu1 %v18531_v30  ;;  %v11113_v9 = vsub.f32 %v18643_v51, %v22286_v45  ;;  %v10713_v45 = vand.u32 4294901760, %v10712_v59  ;;  %v11119_v44 = vsub.f32 %v18659_v42, %v22289_v20  ;;  %v8295_v51 = vld [vmem:[%s14937_s16 + $0x3a0] sm:$0xff]  ;;  %v22291_v42 = vand.u32 4294901760, %v18324_v17 }
 0xf2b   : > { %10919 = vmatmul.f32.vlgmr.msra.gmra.mxu1 %v10705_v60  ;;  %11007 = vmatpush.msrb.mxu3 %v18326_v12  ;;  %v8296_v60 = vld [vmem:[%s14937_s16 + $0x3a8] sm:$0xff]  ;;  %22287 = vst [vmem:[#allocation104_spill] sm:$0xff] %v18705_v1  ;;  %v18707_v12 = vand.u32 4294901760, %v8297_v50  ;;  %v22294_v17 = vand.u32 4294901760, %v18690_v22 }
 0xf2c   : > { %11046 = vmatpush.msrb.mxu0 %v18586_v34  ;;  %11097 = vmatpush.msrb.mxu1 %v11096_v10  ;;  %v11108_v10 = vand.u32 4294901760, %v11107_v43  ;;  %v18722_v6 = vand.u32 4294901760, %v8296_v60  ;;  %v22290_v43 = vand.u32 4294901760, %v18669_v40 }
 0xf2d   : > { %10700 = vmatpush.msra.mxu2 %v18517_v24  ;;  %11009 = vmatpush.msrb.mxu3 %v18336_v27  ;;  %v18720_v27 = vsub.f32 %v8298_v19, %v18692_v4  ;;  %v21842_v19 = vand.u32 4294901760, %v18705_v1  ;;  %v18734_v33 = vsub.f32 %v8297_v50, %v18707_v12  ;;  %v11131_v50 = vsub.f32 %v18690_v22, %v22294_v17 }
 0xf2e   : > { %11048 = vmatpush.msrb.mxu0 %v18604_v39  ;;  %11103 = vmatpush.msrb.mxu1 %v11102_v41  ;;  %v11114_v41 = vand.u32 4294901760, %v11113_v9  ;;  %v11125_v20 = vsub.f32 %v18669_v40, %v22290_v43  ;;  %v8293_v9 = vld [vmem:[%s14937_s16 + $0x390] sm:$0xff]  ;;  %v22293_v43 = vand.u32 4294901760, %v18334_v15 }
 0xf2f   : > { %10702 = vmatpush.msra.mxu2 %v18531_v30  ;;  %10821 = vmatmul.f32.gmra.mxu3 %v18650_v54  ;;  %v18736_v54 = vand.u32 4294901760, %v8295_v51 }
 0xf30   : > { %10708 = vmatmul.f32.vlgmr.msra.gmra.mxu2 %v10707_v35  ;;  %11011 = vmatpush.msrb.mxu3 %v18354_v48  ;;  %v11120_v48 = vand.u32 4294901760, %v11119_v44  ;;  %v10714_v35 = vsub.f32 %v10712_v59, %v10713_v45  ;;  %v18751_v44 = vand.u32 4294901760, %v8294_v0  ;;  %v11126_v15 = vand.u32 4294901760, %v11125_v20  ;;  %v18769_v20 = vpop.f32.mrf.mxu0 }
 0xf31   : > { %10932 = vmatpush.msrb.mxu2 %v22291_v42  ;;  %11050 = vmatpush.msrb.mxu0 %v18618_v63  ;;  %v18763_v17 = vsub.f32 %v8295_v51, %v18736_v54  ;;  %v18765_v42 = vand.u32 4294901760, %v8293_v9  ;;  %22298 = vst [vmem:[#allocation20_spill] sm:$0xff] %v18769_v20  ;;  %v22300_v51 = vand.u32 4294901760, %v18720_v27  ;;  %v8291_v20 = vld [vmem:[%s14937_s16 + $0x380] sm:$0xff] }
 0xf32   : > { %11109 = vmatpush.msrb.mxu1 %v11108_v10  ;;  %10880 = vmatmul.f32.gmra.mxu0 %v10712_v59  ;;  %v18749_v10 = vsub.f32 %v8296_v60, %v18722_v6  ;;  %v18753_v59 = vpop.f32.mrf.mxu3 }
 0xf33   : > { %10936 = vmatpush.msrb.mxu2 %v22293_v43  ;;  %11013 = vmatpush.msrb.mxu3 %v18376_v62  ;;  %22295 = vst [vmem:[#allocation107_spill] sm:$0xff] %v18753_v59  ;;  %v22296_v62 = vand.u32 4294901760, %v18348_v25  ;;  %v11137_v43 = vsub.f32 %v18705_v1, %v21842_v19  ;;  %v8292_v59 = vld [vmem:[%s14937_s16 + $0x388] sm:$0xff]  ;;  %v10715_v25 = vand.u32 4294901760, %v10714_v35  ;;  %v11143_v19 = vsub.f32 %v18720_v27, %v22300_v51  ;;  %v18783_v1 = vpop.f32.mrf.mxu1 }
 0xf34   : > { %11052 = vmatpush.msrb.mxu0 %v18632_v21  ;;  %11115 = vmatpush.msrb.mxu1 %v11114_v41  ;;  %v8154_v41 = vmax.f32 %v22297_v28, 0.0  ;;  %v21845_v60 = vand.u32 4294901760, %v18749_v10  ;;  %v18780_v28 = vsub.f32 %v8294_v0, %v18751_v44  ;;  %22301 = vst [vmem:[#allocation108_spill] sm:$0xff] %v18783_v1  ;;  %v18794_v0 = vsub.f32 %v8293_v9, %v18765_v42 }
 0xf35   : > { %10925 = vmatmul.f32.gmra.mxu1 %v10713_v45  ;;  %10940 = vmatpush.msrb.mxu2 %v22296_v62  ;;  %v22299_v45 = vand.u32 4294901760, %v18362_v18  ;;  %v11132_v62 = vand.u32 4294901760, %v11131_v50  ;;  %v11138_v18 = vand.u32 4294901760, %v11137_v43  ;;  %v18801_v51 = vand.u32 4294901760, %v8291_v20 }
 0xf36   : > { %11015 = vmatpush.msrb.mxu3 %v18393_v55  ;;  %11054 = vmatpush.msrb.mxu0 %v18645_v2  ;;  %v18787_v55 = vand.u32 4294901760, %v8292_v59  ;;  %v11155_v43 = vsub.f32 %v18749_v10, %v21845_v60  ;;  %v11166_v9 = vand.u32 4294901760, %v18780_v28 }
 0xf37   : > { %11121 = vmatpush.msrb.mxu1 %v11120_v48  ;;  %10944 = vmatpush.msrb.mxu2 %v22299_v45  ;;  %v22302_v48 = vand.u32 4294901760, %v18734_v33  ;;  %v18796_v45 = vand.u32 4294901760, %v8154_v41 }
 0xf38   : > { %11017 = vmatpush.msrb.mxu3 %v18406_v32  ;;  %11056 = vmatpush.msrb.mxu0 %v18664_v11  ;;  %v22303_v32 = vand.u32 4294901760, %v18383_v36  ;;  %v22306_v36 = vand.u32 4294901760, %v18404_v5 }
 0xf39   : > { %11127 = vmatpush.msrb.mxu1 %v11126_v15  ;;  %10716 = vmatmul.f32.gmra.mxu2 %v10715_v25  ;;  %v11149_v35 = vsub.f32 %v18734_v33, %v22302_v48  ;;  %v11144_v15 = vand.u32 4294901760, %v11143_v19  ;;  %v22304_v25 = vld [vmem:[#allocation21_spill] sm:$0xff]  ;;  %v22305_v48 = vld [vmem:[#allocation23_spill] sm:$0xff]  ;;  %v18824_v5 = vsub.f32 %v8154_v41, %v18796_v45 }
 0xf3a   : > { %10948 = vmatpush.msrb.mxu2 %v22303_v32  ;;  %11019 = vmatpush.msrb.mxu3 %v18429_v8  ;;  %v6417_v50 = vadd.f32 %v22305_v48, %v22304_v25  ;;  %v18814_v8 = vsub.f32 %v8292_v59, %v18787_v55  ;;  %v18816_v32 = vpop.f32.mrf.mxu2  ;;  %v11172_v25 = vand.u32 4294901760, %v18794_v0  ;;  %v18826_v48 = vpop.f32.mrf.mxu3  ;;  %v18832_v59 = vsub.f32 %v8291_v20, %v18801_v51 }
 0xf3b   : > { %11058 = vmatpush.msrb.mxu0 %v18676_v58  ;;  %11133 = vmatpush.msrb.mxu1 %v11132_v62  ;;  %22307 = vst [vmem:[#allocation21_spill] sm:$0xff] %v18816_v32  ;;  %v11150_v19 = vand.u32 4294901760, %v11149_v35  ;;  %v22308_v62 = vand.u32 4294901760, %v18763_v17  ;;  %v11167_v35 = vsub.f32 %v18780_v28, %v11166_v9 }
 0xf3c   : > { %10952 = vmatpush.msrb.mxu2 %v22306_v36  ;;  %11021 = vmatpush.msrb.mxu3 %v18445_v47  ;;  %22309 = vst [vmem:[#allocation23_spill] sm:$0xff] %v18826_v48  ;;  %v22310_v47 = vand.u32 4294901760, %v18421_v31  ;;  %v8170_v41 = vmax.f32 %v6417_v50, 0.0  ;;  %v18838_v36 = vpop.f32.mrf.mxu0  ;;  %v11178_v31 = vand.u32 4294901760, %v18814_v8  ;;  %v11173_v20 = vsub.f32 %v18794_v0, %v11172_v25  ;;  %v8311_v48 = vld [vmem:[%s14937_s16 + $0x420] sm:$0xff] }
 0xf3d   : > { %11060 = vmatpush.msrb.mxu0 %v18692_v4  ;;  %11139 = vmatpush.msrb.mxu1 %v11138_v18  ;;  %v11161_v60 = vsub.f32 %v18763_v17, %v22308_v62  ;;  %v11156_v18 = vand.u32 4294901760, %v11155_v43  ;;  %22311 = vst [vmem:[#allocation109_spill] sm:$0xff] %v18838_v36  ;;  %v22312_v62 = vand.u32 4294901760, %v18435_v49  ;;  %v22314_v50 = vand.u32 4294901760, %v18455_v16 }
 0xf3e   : > { %10956 = vmatpush.msrb.mxu2 %v22310_v47  ;;  %11023 = vmatpush.msrb.mxu3 %v18457_v38  ;;  %v21850_v49 = vand.u32 4294901760, %v18824_v5  ;;  %v11168_v43 = vand.u32 4294901760, %v11167_v35  ;;  %v11179_v16 = vsub.f32 %v18814_v8, %v11178_v31  ;;  %v22316_v47 = vand.u32 4294901760, %v18481_v56 }
 0xf3f   : > { %11062 = vmatpush.msrb.mxu0 %v18707_v12  ;;  %11145 = vmatpush.msrb.mxu1 %v11144_v15  ;;  %v11162_v38 = vand.u32 4294901760, %v11161_v60  ;;  %v18848_v15 = vpop.f32.mrf.mxu1  ;;  %v18856_v60 = vand.u32 4294901760, %v8170_v41  ;;  %v22317_v56 = vand.u32 4294901760, %v18499_v26  ;;  %v22346_v36 = vand.u32 4294901760, %v18824_v5 }
 0xf40   : > { %10960 = vmatpush.msrb.mxu2 %v22312_v62  ;;  %11025 = vmatpush.msrb.mxu3 %v18470_v46  ;;  %22313 = vst [vmem:[#allocation110_spill] sm:$0xff] %v18848_v15  ;;  %v21849_v46 = vand.u32 4294901760, %v18832_v59  ;;  %v8313_v15 = vld [vmem:[%s14937_s16 + $0x430] sm:$0xff] }
 0xf41   : > { %11064 = vmatpush.msrb.mxu0 %v18722_v6  ;;  %11151 = vmatpush.msrb.mxu1 %v11150_v19  ;;  %v22315_v19 = vand.u32 4294901760, %v18468_v57  ;;  %v11078_v57 = vsub.f32 %v18824_v5, %v21850_v49  ;;  %v18883_v62 = vsub.f32 %v8170_v41, %v18856_v60  ;;  %v22319_v41 = vand.u32 4294901760, %v18596_v3 }
 0xf42   : > { %10964 = vmatpush.msrb.mxu2 %v22314_v50  ;;  %11027 = vmatpush.msrb.mxu3 %v18483_v53  ;;  %v11174_v53 = vand.u32 4294901760, %v11173_v20  ;;  %v18877_v35 = vpop.f32.mrf.mxu3  ;;  %v22318_v20 = vand.u32 4294901760, %v18515_v52  ;;  %v22320_v52 = vand.u32 4294901760, %v18529_v14 }
 0xf43   : > { %11066 = vmatpush.msrb.mxu0 %v18736_v54  ;;  %11157 = vmatpush.msrb.mxu1 %v11156_v18  ;;  %v18874_v18 = vpop.f32.mrf.mxu2  ;;  %v11079_v50 = vand.u32 4294901760, %v11078_v57  ;;  %v22323_v57 = vand.u32 4294901760, %v18630_v37 }
 0xf44   : > { %10968 = vmatpush.msrb.mxu2 %v22315_v19  ;;  %11029 = vmatpush.msrb.mxu3 %v18501_v7  ;;  %v11185_v7 = vsub.f32 %v18832_v59, %v21849_v46  ;;  %v22321_v19 = vand.u32 4294901760, %v18607_v13 }
 0xf45   : > { %11068 = vmatpush.msrb.mxu0 %v18751_v44  ;;  %11163 = vmatpush.msrb.mxu1 %v11162_v38  ;;  %v18886_v38 = vpop.f32.mrf.mxu0 }
 0xf46   : > { %10972 = vmatpush.msrb.mxu2 %v22316_v47  ;;  %11031 = vmatpush.msrb.mxu3 %v18517_v24  ;;  %v11180_v24 = vand.u32 4294901760, %v11179_v16  ;;  %v22322_v47 = vand.u32 4294901760, %v18541_v61 }
 0xf47   : > { %11070 = vmatpush.msrb.mxu0 %v18765_v42  ;;  %11169 = vmatpush.msrb.mxu1 %v11168_v43  ;;  %v11186_v43 = vand.u32 4294901760, %v11185_v7  ;;  %v18893_v26 = vpop.f32.mrf.mxu1  ;;  %v22324_v7 = vld [vmem:[#allocation91_spill] sm:$0xff] }
 0xf48   : > { %10976 = vmatpush.msrb.mxu2 %v22317_v56  ;;  %11033 = vmatpush.msrb.mxu3 %v18531_v30  ;;  %v21847_v30 = vand.u32 4294901760, %v18883_v62  ;;  %v22326_v56 = vld [vmem:[#allocation99_spill] sm:$0xff] }
 0xf49   : > { %11072 = vmatpush.msrb.mxu0 %v18787_v55  ;;  %11175 = vmatpush.msrb.mxu1 %v11174_v53 }
 0xf4a   : > { %11035 = vmatmul.f32.vlgmr.msrb.gmra.mxu3 %v18598_v29  ;;  %10980 = vmatpush.msrb.mxu2 %v22318_v20  ;;  %v11086_v16 = vsub.f32 %v18883_v62, %v21847_v30  ;;  %v18914_v14 = vpop.f32.mrf.mxu3  ;;  %v22327_v20 = vld [vmem:[#allocation98_spill] sm:$0xff] }
 0xf4b   : > { %11257 = vmatpush.msra.mxu3 %v18575_v23  ;;  %11074 = vmatpush.msrb.mxu0 %v18801_v51  ;;  %v18909_v53 = vpop.f32.mrf.mxu2 }
 0xf4c   : > { %11181 = vmatpush.msrb.mxu1 %v11180_v24  ;;  %11080 = vmatmul.f32.vlgmr.msrb.gmra.mxu0 %v11079_v50  ;;  %v11087_v61 = vand.u32 4294901760, %v11086_v16  ;;  %v22328_v50 = vand.u32 4294901760, %v22327_v20  ;;  %v8320_v16 = vld [vmem:[%s14937_s16 + $0x468] sm:$0xff] }
 0xf4d   : > { %11259 = vmatpush.msra.mxu3 %v18586_v34  ;;  %11304 = vmatpush.msra.mxu0 %v22319_v41  ;;  %v18922_v24 = vpop.f32.mrf.mxu0 }
 0xf4e   : > { %10984 = vmatpush.msrb.mxu2 %v22320_v52  ;;  %11187 = vmatpush.msrb.mxu1 %v11186_v43  ;;  %v22329_v43 = vld [vmem:[#allocation100_spill] sm:$0xff] }
 0xf4f   : > { %11189 = vmatmul.f32.vlgmr.msrb.gmra.mxu1 %v18796_v45  ;;  %11261 = vmatpush.msra.mxu3 %v18604_v39 }
 0xf50   : > { %11308 = vmatpush.msra.mxu0 %v22321_v19  ;;  %11375 = vmatpush.msra.mxu1 %v18575_v23  ;;  %v22325_v23 = vand.u32 4294901760, %v22324_v7  ;;  %v22333_v7 = vld [vmem:[#allocation104_spill] sm:$0xff] }
 0xf51   : > { %10988 = vmatpush.msrb.mxu2 %v22322_v47  ;;  %11263 = vmatpush.msra.mxu3 %v18618_v63 }
 0xf52   : > { %11312 = vmatpush.msra.mxu0 %v22323_v57  ;;  %11377 = vmatpush.msra.mxu1 %v18586_v34  ;;  %v18929_v34 = vpop.f32.mrf.mxu1  ;;  %v18942_v52 = vpop.f32.mrf.mxu3  ;;  %v8319_v57 = vld [vmem:[%s14937_s16 + $0x460] sm:$0xff] }
 0xf53   : > { %10992 = vmatpush.msrb.mxu2 %v22325_v23  ;;  %11039 = vmatmul.f32.gmra.mxu3 %v22326_v56  ;;  %v18938_v41 = vpop.f32.mrf.mxu2  ;;  %v22334_v23 = vand.u32 4294901760, %v22333_v7 }
 0xf54   : > { %10994 = vmatmul.f32.vlgmr.msrb.gmra.mxu2 %v18598_v29  ;;  %11265 = vmatpush.msra.mxu3 %v18632_v21  ;;  %v22330_v29 = vand.u32 4294901760, %v22329_v43 }
 0xf55   : > { %11199 = vmatpush.msra.mxu2 %v18596_v3  ;;  %11316 = vmatpush.msra.mxu0 %v22328_v50  ;;  %v8322_v3 = vld [vmem:[%s14937_s16 + $0x478] sm:$0xff]  ;;  %v18952_v19 = vpop.f32.mrf.mxu0  ;;  %v18983_v50 = vand.u32 4294901760, %v8319_v57 }
 0xf56   : > { %11379 = vmatpush.msra.mxu1 %v18604_v39  ;;  %11088 = vmatmul.f32.gmra.mxu0 %v11087_v61  ;;  %v8321_v39 = vld [vmem:[%s14937_s16 + $0x470] sm:$0xff] }
 0xf57   : > { %11202 = vmatpush.msra.mxu2 %v18607_v13  ;;  %11267 = vmatpush.msra.mxu3 %v18645_v2  ;;  %v22331_v13 = vand.u32 4294901760, %v18669_v40  ;;  %v18960_v47 = vand.u32 4294901760, %v8321_v39 }
 0xf58   : > { %11320 = vmatpush.msra.mxu0 %v22330_v29  ;;  %11381 = vmatpush.msra.mxu1 %v18618_v63  ;;  %v18950_v63 = vand.u32 4294901760, %v8322_v3 }
 0xf59   : > { %11193 = vmatmul.f32.gmra.mxu1 %v18856_v60  ;;  %11205 = vmatpush.msra.mxu2 %v18630_v37  ;;  %v22332_v37 = vand.u32 4294901760, %v18690_v22 }
 0xf5a   : > { %11269 = vmatpush.msra.mxu3 %v18664_v11  ;;  %11324 = vmatpush.msra.mxu0 %v22331_v13  ;;  %v18971_v61 = vsub.f32 %v8322_v3, %v18950_v63  ;;  %v18997_v3 = vpop.f32.mrf.mxu3  ;;  %v8317_v13 = vld [vmem:[%s14937_s16 + $0x450] sm:$0xff] }
 0xf5b   : > { %11383 = vmatpush.msra.mxu1 %v18632_v21  ;;  %11208 = vmatpush.msra.mxu2 %v22327_v20  ;;  %v18962_v21 = vpop.f32.mrf.mxu1  ;;  %v18981_v20 = vsub.f32 %v8321_v39, %v18960_v47  ;;  %v22340_v39 = vand.u32 4294901760, %v18749_v10 }
 0xf5c   : > { %11271 = vmatpush.msra.mxu3 %v18676_v58  ;;  %11328 = vmatpush.msra.mxu0 %v22332_v37  ;;  %22335 = vst [vmem:[#allocation91_spill] sm:$0xff] %v18971_v61  ;;  %v19009_v37 = vsub.f32 %v8319_v57, %v18983_v50 }
 0xf5d   : > { %11385 = vmatpush.msra.mxu1 %v18645_v2  ;;  %10998 = vmatmul.f32.gmra.mxu2 %v22326_v56  ;;  %v18973_v2 = vand.u32 4294901760, %v8320_v16  ;;  %v22336_v56 = vand.u32 4294901760, %v18720_v27  ;;  %22337 = vst [vmem:[#allocation99_spill] sm:$0xff] %v18981_v20 }
 0xf5e   : > { %11211 = vmatpush.msra.mxu2 %v22329_v43  ;;  %11273 = vmatpush.msra.mxu3 %v18692_v4  ;;  %v22338_v43 = vand.u32 4294901760, %v18734_v33  ;;  %22341 = vst [vmem:[#allocation100_spill] sm:$0xff] %v19009_v37 }
 0xf5f   : > { %11332 = vmatpush.msra.mxu0 %v22334_v23  ;;  %11387 = vmatpush.msra.mxu1 %v18664_v11  ;;  %v8318_v11 = vld [vmem:[%s14937_s16 + $0x458] sm:$0xff]  ;;  %v18995_v29 = vsub.f32 %v8320_v16, %v18973_v2  ;;  %v19012_v16 = vld [vmem:[%s14931_s19 + $0x8] sm:$0xff]  ;;  %v19014_v23 = vpop.f32.mrf.mxu0 }
 0xf60   : > { %11214 = vmatpush.msra.mxu2 %v18669_v40  ;;  %11275 = vmatpush.msra.mxu3 %v18707_v12  ;;  %v18988_v40 = vpop.f32.mrf.mxu2 }
 0xf61   : > { %11336 = vmatpush.msra.mxu0 %v22336_v56  ;;  %11389 = vmatpush.msra.mxu1 %v18676_v58  ;;  %v21846_v58 = vand.u32 4294901760, %v18971_v61  ;;  %22339 = vst [vmem:[#allocation98_spill] sm:$0xff] %v18995_v29  ;;  %v22342_v56 = vand.u32 4294901760, %v18763_v17  ;;  %v21851_v57 = vand.u32 4294901760, %v18995_v29 }
 0xf62   : > { %11217 = vmatpush.msra.mxu2 %v18690_v22  ;;  %11277 = vmatpush.msra.mxu3 %v18722_v6  ;;  %v19001_v22 = vand.u32 4294901760, %v8318_v11  ;;  %v19062_v49 = vpop.f32.mrf.mxu3 }
 0xf63   : > { %11340 = vmatpush.msra.mxu0 %v22338_v43  ;;  %11391 = vmatpush.msra.mxu1 %v18692_v4  ;;  %v21848_v4 = vand.u32 4294901760, %v18981_v20  ;;  %v19026_v43 = vand.u32 4294901760, %v8317_v13 }
 0xf64   : > { %11220 = vmatpush.msra.mxu2 %v22333_v7  ;;  %11279 = vmatpush.msra.mxu3 %v18736_v54  ;;  %v8316_v7 = vld [vmem:[%s14937_s16 + $0x448] sm:$0xff] }
 0xf65   : > { %11344 = vmatpush.msra.mxu0 %v22340_v39  ;;  %11393 = vmatpush.msra.mxu1 %v18707_v12  ;;  %v11467_v12 = vsub.f32 %v18971_v61, %v21846_v58  ;;  %v19028_v39 = vpop.f32.mrf.mxu1  ;;  %v11473_v58 = vsub.f32 %v18981_v20, %v21848_v4  ;;  %v19044_v30 = vand.u32 4294901760, %v8316_v7  ;;  %v19057_v4 = vsub.f32 %v8317_v13, %v19026_v43 }
 0xf66   : > { %11223 = vmatpush.msra.mxu2 %v18720_v27  ;;  %11281 = vmatpush.msra.mxu3 %v18751_v44  ;;  %v19033_v27 = vsub.f32 %v8318_v11, %v19001_v22 }
 0xf67   : > { %11348 = vmatpush.msra.mxu0 %v22342_v56  ;;  %11395 = vmatpush.msra.mxu1 %v18722_v6  ;;  %v8315_v56 = vld [vmem:[%s14937_s16 + $0x440] sm:$0xff]  ;;  %v21853_v6 = vperm.slane %v19012_v16, 0  ;;  %v11474_v13 = vand.u32 4294901760, %v11473_v58 }
 0xf68   : > { %11226 = vmatpush.msra.mxu2 %v18734_v33  ;;  %11283 = vmatpush.msra.mxu3 %v18765_v42  ;;  %v21852_v33 = vand.u32 4294901760, %v19009_v37  ;;  %v19048_v11 = vpop.f32.mrf.mxu2  ;;  %v19059_v46 = vand.u32 4294901760, %v8315_v56 }
 0xf69   : > { %11352 = vmatpush.msra.mxu0 %v11166_v9  ;;  %11397 = vmatpush.msra.mxu1 %v18736_v54  ;;  %v11468_v54 = vand.u32 4294901760, %v11467_v12  ;;  %v11479_v9 = vsub.f32 %v18995_v29, %v21851_v57 }
 0xf6a   : > { %11229 = vmatpush.msra.mxu2 %v18749_v10  ;;  %11285 = vmatpush.msra.mxu3 %v18787_v55  ;;  %v8314_v10 = vld [vmem:[%s14937_s16 + $0x438] sm:$0xff]  ;;  %v11485_v57 = vsub.f32 %v19009_v37, %v21852_v33  ;;  %v8312_v33 = vld [vmem:[%s14937_s16 + $0x428] sm:$0xff] }
 0xf6b   : > { %11356 = vmatpush.msra.mxu0 %v11172_v25  ;;  %11399 = vmatpush.msra.mxu1 %v18751_v44  ;;  %v22343_v25 = vld [vmem:[#allocation31_spill] sm:$0xff]  ;;  %v19080_v44 = vpop.f32.mrf.mxu0  ;;  %v11480_v58 = vand.u32 4294901760, %v11479_v9 }
 0xf6c   : > { %11232 = vmatpush.msra.mxu2 %v18763_v17  ;;  %11287 = vmatpush.msra.mxu3 %v18801_v51  ;;  %v6446_v12 = vadd.f32 %v22343_v25, %v21853_v6  ;;  %v19077_v17 = vsub.f32 %v8316_v7, %v19044_v30  ;;  %22345 = vst [vmem:[#allocation31_spill] sm:$0xff] %v19080_v44  ;;  %v8310_v7 = vld [vmem:[%s14937_s16 + $0x418] sm:$0xff] }
 0xf6d   : > { %11360 = vmatpush.msra.mxu0 %v11178_v31  ;;  %11401 = vmatpush.msra.mxu1 %v18765_v42  ;;  %v19085_v31 = vand.u32 4294901760, %v8314_v10  ;;  %v22347_v42 = vand.u32 4294901760, %v18832_v59  ;;  %v19091_v25 = vsub.f32 %v8315_v56, %v19059_v46  ;;  %v19094_v6 = vpop.f32.mrf.mxu1  ;;  %v19109_v56 = vld [vmem:[%s676_s27] ss:$0 sm:$0xff] }
 0xf6e   : > { %22344 = vst [vmem:[#allocation104_spill] sm:$0xff] %v19077_v17  ;;  %11291 = vmatmul.f32.vlgmr.msra.gmra.mxu3 %v22346_v36  ;;  %11235 = vmatpush.msra.mxu2 %v18780_v28  ;;  %v22350_v28 = vand.u32 4294901760, %v19033_v27 }
 0xf6f   : > { %11469 = vmatpush.msrb.mxu3 %v11468_v54  ;;  %11364 = vmatpush.msra.mxu0 %v22347_v42  ;;  %22348 = vst [vmem:[#allocation111_spill] sm:$0xff] %v19091_v25  ;;  %v19101_v54 = vand.u32 4294901760, %v8313_v15  ;;  %v22351_v42 = vld [vmem:[#allocation26_spill] sm:$0xff] }
 0xf70   : > { %22349 = vst [vmem:[#allocation112_spill] sm:$0xff] %v19094_v6  ;;  %11403 = vmatpush.msra.mxu1 %v18787_v55  ;;  %11366 = vmatmul.f32.vlgmr.msra.gmra.mxu0 %v18796_v45  ;;  %v11491_v36 = vsub.f32 %v19033_v27, %v22350_v28  ;;  %v6495_v9 = vadd.f32 %v22351_v42, %v6446_v12  ;;  %v11486_v55 = vand.u32 4294901760, %v11485_v57  ;;  %v19119_v12 = vand.u32 4294901760, %v8312_v33  ;;  %v19137_v32 = vpop.f32.mrf.mxu2  ;;  %v8309_v42 = vld [vmem:[%s14937_s16 + $0x410] sm:$0xff] }
 0xf71   : > { %11475 = vmatpush.msrb.mxu3 %v11474_v13  ;;  %11571 = vmatpush.msrb.mxu0 %v18971_v61  ;;  %v19117_v28 = vsub.f32 %v8314_v10, %v19085_v31  ;;  %v22353_v13 = vand.u32 4294901760, %v19057_v4  ;;  %v19132_v10 = vand.u32 4294901760, %v8311_v48  ;;  %v22362_v6 = vand.u32 4294901760, %v19091_v25 }
 0xf72   : > { %11238 = vmatpush.msra.mxu2 %v18794_v0  ;;  %11405 = vmatpush.msra.mxu1 %v18801_v51  ;;  %v11492_v0 = vand.u32 4294901760, %v11491_v36  ;;  %v19130_v51 = vsub.f32 %v8313_v15, %v19101_v54  ;;  %v19144_v15 = vpop.f32.mrf.mxu3 }
 0xf73   : > { %22352 = vst [vmem:[#allocation26_spill] sm:$0xff] %v19117_v28  ;;  %11407 = vmatmul.f32.vlgmr.msra.gmra.mxu1 %v18796_v45  ;;  %11481 = vmatpush.msrb.mxu3 %v11480_v58  ;;  %v11497_v57 = vsub.f32 %v19057_v4, %v22353_v13  ;;  %v22355_v45 = vld [vmem:[#allocation29_spill] sm:$0xff]  ;;  %v8478_v58 = vadd.f32 %v19109_v56, %v18874_v18  ;;  %v22356_v13 = vand.u32 4294901760, %v19077_v17 }
 0xf74   : > { %11574 = vmatpush.msrb.mxu0 %v18981_v20  ;;  %11629 = vmatpush.msrb.mxu1 %v18950_v63  ;;  %22354 = vst [vmem:[#allocation113_spill] sm:$0xff] %v19130_v51  ;;  %v6529_v1 = vadd.f32 %v22355_v45, %v6495_v9  ;;  %v19150_v18 = vsub.f32 %v8312_v33, %v19119_v12  ;;  %v19152_v45 = vand.u32 4294901760, %v8310_v7  ;;  %v19164_v33 = vpop.f32.mrf.mxu0 }
 0xf75   : > { %11241 = vmatpush.msra.mxu2 %v18814_v8  ;;  %11487 = vmatpush.msrb.mxu3 %v11486_v55  ;;  %v11503_v36 = vsub.f32 %v19077_v17, %v22356_v13  ;;  %22357 = vst [vmem:[#allocation29_spill] sm:$0xff] %v19144_v15  ;;  %v22359_v8 = vperm.slane %v19012_v16, 0  ;;  %v22360_v55 = vld [vmem:[#allocation35_spill] sm:$0xff]  ;;  %v22361_v13 = vand.u32 4294901760, %v18883_v62  ;;  %v11509_v9 = vsub.f32 %v19091_v25, %v22362_v6  ;;  %v8308_v15 = vld [vmem:[%s14937_s16 + $0x408] sm:$0xff]  ;;  %v19178_v44 = vpop.f32.mrf.mxu1 }
 0xf76   : > { %11577 = vmatpush.msrb.mxu0 %v18995_v29  ;;  %11631 = vmatpush.msrb.mxu1 %v18960_v47  ;;  %22358 = vst [vmem:[#allocation114_spill] sm:$0xff] %v19150_v18  ;;  %v11498_v29 = vand.u32 4294901760, %v11497_v57  ;;  %v8587_v57 = vadd.f32 %v18877_v35, %v8478_v58  ;;  %v19187_v35 = vsub.f32 %v8310_v7, %v19152_v45  ;;  %v22369_v58 = vld [vmem:[#allocation32_spill] sm:$0xff] }
 0xf77   : > { %v6454_v20 = vadd.f32 %v22360_v55, %v22359_v8  ;;  %11244 = vmatpush.msra.mxu2 %v18832_v59  ;;  %11297 = vmatmul.f32.gmra.mxu3 %v22361_v13  ;;  %22363 = vst [vmem:[#allocation35_spill] sm:$0xff] %v19164_v33  ;;  %v19169_v8 = vsub.f32 %v8311_v48, %v19132_v10  ;;  %v19171_v59 = vand.u32 4294901760, %v8309_v42  ;;  %v22365_v55 = vld [vmem:[#allocation30_spill] sm:$0xff]  ;;  %v11504_v6 = vand.u32 4294901760, %v11503_v36  ;;  %v8307_v33 = vld [vmem:[%s14937_s16 + $0x400] sm:$0xff] }
 0xf78   : > { %11247 = vmatmul.f32.vlgmr.msra.gmra.mxu2 %v18824_v5  ;;  %11493 = vmatpush.msrb.mxu3 %v11492_v0  ;;  %v6561_v13 = vadd.f32 %v22365_v55, %v6529_v1  ;;  %22366 = vst [vmem:[#allocation30_spill] sm:$0xff] %v19178_v44  ;;  %v22367_v5 = vand.u32 4294901760, %v19117_v28  ;;  %v19189_v0 = vand.u32 4294901760, %v8308_v15  ;;  %v22370_v55 = vld [vmem:[#allocation24_spill] sm:$0xff]  ;;  %v11510_v44 = vand.u32 4294901760, %v11509_v9  ;;  %v19208_v9 = vpop.f32.mrf.mxu2 }
 0xf79   : > { %22364 = vst [vmem:[#allocation115_spill] sm:$0xff] %v19169_v8  ;;  %11416 = vmatpush.msrb.mxu2 %v18950_v63  ;;  %11580 = vmatpush.msrb.mxu0 %v19009_v37  ;;  %v6499_v36 = vadd.f32 %v22369_v58, %v6454_v20  ;;  %v19201_v37 = vsub.f32 %v8309_v42, %v19171_v59  ;;  %v19203_v20 = vand.u32 4294901760, %v8307_v33 }
 0xf7a   : > { %11633 = vmatpush.msrb.mxu1 %v18973_v2  ;;  %11370 = vmatmul.f32.gmra.mxu0 %v18856_v60  ;;  %v11515_v48 = vsub.f32 %v19117_v28, %v22367_v5  ;;  %22368 = vst [vmem:[#allocation116_spill] sm:$0xff] %v19187_v35  ;;  %v6600_v61 = vadd.f32 %v22370_v55, %v6561_v13  ;;  %v22371_v5 = vand.u32 4294901760, %v19130_v51  ;;  %v19212_v58 = vpop.f32.mrf.mxu3  ;;  %v22373_v55 = vand.u32 4294901760, %v19150_v18 }
 0xf7b   : > { %11418 = vmatpush.msrb.mxu2 %v18960_v47  ;;  %11499 = vmatpush.msrb.mxu3 %v11498_v29  ;;  %22372 = vst [vmem:[#allocation32_spill] sm:$0xff] %v19201_v37  ;;  %v8486_v13 = vadd.f32 %v19109_v56, %v18909_v53  ;;  %v8645_v29 = vadd.f32 %v18886_v38, %v8587_v57  ;;  %v22375_v56 = vld [vmem:[#allocation36_spill] sm:$0xff]  ;;  %v22376_v57 = vld [vmem:[#allocation33_spill] sm:$0xff]  ;;  %v22381_v53 = vld [vmem:[#allocation34_spill] sm:$0xff] }
 0xf7c   : > { %11583 = vmatpush.msrb.mxu0 %v19033_v27  ;;  %11635 = vmatpush.msrb.mxu1 %v18983_v50  ;;  %v11521_v1 = vsub.f32 %v19130_v51, %v22371_v5  ;;  %v11516_v42 = vand.u32 4294901760, %v11515_v48  ;;  %v11527_v5 = vsub.f32 %v19150_v18, %v22373_v55  ;;  %v19220_v38 = vsub.f32 %v8308_v15, %v19189_v0 }
 0xf7d   : > { %11411 = vmatmul.f32.gmra.mxu1 %v18856_v60  ;;  %11420 = vmatpush.msrb.mxu2 %v18973_v2  ;;  %v19223_v60 = vadd.f32 %v22375_v56, %v6600_v61  ;;  %v6534_v7 = vadd.f32 %v22376_v57, %v6499_v36  ;;  %v22377_v55 = vand.u32 4294901760, %v19169_v8  ;;  %v19236_v61 = vsub.f32 %v8307_v33, %v19203_v20 }
 0xf7e   : > { %11505 = vmatpush.msrb.mxu3 %v11504_v6  ;;  %11586 = vmatpush.msrb.mxu0 %v19057_v4  ;;  %22374 = vst [vmem:[#allocation24_spill] sm:$0xff] %v19220_v38  ;;  %v19228_v6 = vpop.f32.mrf.mxu0  ;;  %v11522_v48 = vand.u32 4294901760, %v11521_v1  ;;  %v8689_v36 = vadd.f32 %v18893_v26, %v8645_v29  ;;  %v8591_v56 = vadd.f32 %v18914_v14, %v8486_v13  ;;  %v19243_v1 = vpop.f32.mrf.mxu1  ;;  %v11528_v57 = vand.u32 4294901760, %v11527_v5  ;;  %v8337_v14 = vld [vmem:[%s14937_s16 + $0x4f0] sm:$0xff] }
 0xf7f   : > { %11637 = vmatpush.msrb.mxu1 %v19001_v22  ;;  %11422 = vmatpush.msrb.mxu2 %v18983_v50  ;;  %v11533_v15 = vsub.f32 %v19169_v8, %v22377_v55  ;;  %22378 = vst [vmem:[#allocation36_spill] sm:$0xff] %v19236_v61  ;;  %v22380_v55 = vand.u32 4294901760, %v19187_v35  ;;  %v21859_v26 = vand.u32 4294901760, %v19220_v38  ;;  %v8155_v29 = vmax.f32 %v19223_v60, 0.0 }
 0xf80   : > { %11511 = vmatpush.msrb.mxu3 %v11510_v44  ;;  %11589 = vmatpush.msrb.mxu0 %v19077_v17  ;;  %v8338_v44 = vld [vmem:[%s14937_s16 + $0x4f8] sm:$0xff]  ;;  %22379 = vst [vmem:[#allocation33_spill] sm:$0xff] %v19243_v1  ;;  %v6567_v17 = vadd.f32 %v22381_v53, %v6534_v7  ;;  %v22383_v7 = vld [vmem:[#allocation27_spill] sm:$0xff] }
 0xf81   : > { %11639 = vmatpush.msrb.mxu1 %v19026_v43  ;;  %11252 = vmatmul.f32.gmra.mxu2 %v18883_v62  ;;  %v11539_v33 = vsub.f32 %v19187_v35, %v22380_v55  ;;  %v8764_v62 = vadd.f32 %v18938_v41, %v8689_v36  ;;  %v11534_v13 = vand.u32 4294901760, %v11533_v15  ;;  %v19261_v60 = vand.u32 4294901760, %v8338_v44 }
 0xf82   : > { %11424 = vmatpush.msrb.mxu2 %v19001_v22  ;;  %11517 = vmatpush.msrb.mxu3 %v11516_v42  ;;  %v22382_v42 = vand.u32 4294901760, %v19201_v37  ;;  %v6604_v53 = vadd.f32 %v22383_v7, %v6567_v17  ;;  %v11551_v36 = vsub.f32 %v19220_v38, %v21859_v26  ;;  %v19274_v55 = vand.u32 4294901760, %v8155_v29  ;;  %v19277_v7 = vpop.f32.mrf.mxu2 }
 0xf83   : > { %11592 = vmatpush.msrb.mxu0 %v19091_v25  ;;  %11641 = vmatpush.msrb.mxu1 %v19044_v30  ;;  %v11540_v15 = vand.u32 4294901760, %v11539_v33  ;;  %v8805_v17 = vadd.f32 %v18942_v52, %v8764_v62  ;;  %v22385_v33 = vand.u32 4294901760, %v19236_v61  ;;  %v19289_v41 = vsub.f32 %v8338_v44, %v19261_v60  ;;  %v22388_v62 = vld [vmem:[#allocation37_spill] sm:$0xff] }
 0xf84   : > { %11426 = vmatpush.msrb.mxu2 %v19026_v43  ;;  %11523 = vmatpush.msrb.mxu3 %v11522_v48  ;;  %v11545_v5 = vsub.f32 %v19201_v37, %v22382_v42  ;;  %v8650_v48 = vadd.f32 %v18922_v24, %v8591_v56  ;;  %v19272_v42 = vand.u32 4294901760, %v8337_v14  ;;  %22384 = vst [vmem:[#allocation34_spill] sm:$0xff] %v19274_v55  ;;  %v8336_v24 = vld [vmem:[%s14937_s16 + $0x4e8] sm:$0xff]  ;;  %v19282_v56 = vpop.f32.mrf.mxu3  ;;  %v22387_v52 = vperm.slane %v19012_v16, 1 }
 0xf85   : > { %11595 = vmatpush.msrb.mxu0 %v19117_v28  ;;  %11643 = vmatpush.msrb.mxu1 %v19059_v46  ;;  %v11557_v26 = vsub.f32 %v19236_v61, %v22385_v33  ;;  %22386 = vst [vmem:[#allocation27_spill] sm:$0xff] %v19289_v41  ;;  %v22389_v28 = vld [vmem:[#allocation39_spill] sm:$0xff]  ;;  %v11552_v44 = vand.u32 4294901760, %v11551_v36  ;;  %v19304_v33 = vand.u32 4294901760, %v8336_v24 }
 0xf86   : > { %11428 = vmatpush.msrb.mxu2 %v19044_v30  ;;  %11529 = vmatpush.msrb.mxu3 %v11528_v57  ;;  %v11546_v57 = vand.u32 4294901760, %v11545_v5  ;;  %v19295_v25 = vadd.f32 %v22389_v28, %v6604_v53  ;;  %v8695_v5 = vadd.f32 %v18929_v34, %v8650_v48  ;;  %v19301_v1 = vpop.f32.mrf.mxu0  ;;  %v19310_v28 = vsub.f32 %v8155_v29, %v19274_v55  ;;  %v8334_v34 = vld [vmem:[%s14937_s16 + $0x4d8] sm:$0xff] }
 0xf87   : > { %11598 = vmatpush.msrb.mxu0 %v19130_v51  ;;  %11645 = vmatpush.msrb.mxu1 %v19085_v31  ;;  %v6662_v51 = vadd.f32 %v22388_v62, %v22387_v52  ;;  %22390 = vst [vmem:[#allocation37_spill] sm:$0xff] %v19304_v33  ;;  %v19307_v52 = vsub.f32 %v8337_v14, %v19272_v42  ;;  %v11558_v14 = vand.u32 4294901760, %v11557_v26  ;;  %v22392_v62 = vld [vmem:[#allocation38_spill] sm:$0xff] }
 0xf88   : > { %11430 = vmatpush.msrb.mxu2 %v19059_v46  ;;  %11535 = vmatpush.msrb.mxu3 %v11534_v13  ;;  %v8335_v13 = vld [vmem:[%s14937_s16 + $0x4e0] sm:$0xff]  ;;  %v8850_v53 = vadd.f32 %v18952_v19, %v8805_v17  ;;  %v8768_v48 = vadd.f32 %v18988_v40, %v8695_v5  ;;  %v8171_v19 = vmax.f32 %v19295_v25, 0.0  ;;  %v8333_v17 = vld [vmem:[%s14937_s16 + $0x4d0] sm:$0xff]  ;;  %v19331_v26 = vsub.f32 %v8336_v24, %v19304_v33  ;;  %v22394_v5 = vld [vmem:[#allocation42_spill] sm:$0xff] }
 0xf89   : > { %11601 = vmatpush.msrb.mxu0 %v19150_v18  ;;  %11647 = vmatpush.msrb.mxu1 %v19101_v54  ;;  %22391 = vst [vmem:[#allocation39_spill] sm:$0xff] %v19307_v52  ;;  %v19321_v29 = vand.u32 4294901760, %v8335_v13  ;;  %v6711_v18 = vadd.f32 %v22392_v62, %v6662_v51  ;;  %v11449_v51 = vand.u32 4294901760, %v19310_v28  ;;  %v22395_v24 = vand.u32 4294901760, %v19289_v41 }
 0xf8a   : > { %11432 = vmatpush.msrb.mxu2 %v19085_v31  ;;  %11541 = vmatpush.msrb.mxu3 %v11540_v15  ;;  %v19317_v15 = vpop.f32.mrf.mxu1  ;;  %22393 = vst [vmem:[#allocation38_spill] sm:$0xff] %v19331_v26  ;;  %v8959_v62 = vadd.f32 %v18962_v21, %v8850_v53  ;;  %v19338_v36 = vpop.f32.mrf.mxu2  ;;  %v19352_v53 = vand.u32 4294901760, %v8333_v17 }
 0xf8b   : > { %11604 = vmatpush.msrb.mxu0 %v19169_v8  ;;  %11649 = vmatpush.msrb.mxu1 %v19119_v12  ;;  %v6745_v25 = vadd.f32 %v22394_v5, %v6711_v18  ;;  %v11839_v18 = vsub.f32 %v19289_v41, %v22395_v24  ;;  %v19350_v21 = vsub.f32 %v8335_v13, %v19321_v29  ;;  %v8332_v5 = vld [vmem:[%s14937_s16 + $0x4c8] sm:$0xff]  ;;  %v22399_v13 = vand.u32 4294901760, %v19307_v52 }
 0xf8c   : > { %11434 = vmatpush.msrb.mxu2 %v19101_v54  ;;  %11547 = vmatpush.msrb.mxu3 %v11546_v57  ;;  %v19333_v57 = vand.u32 4294901760, %v8334_v34  ;;  %v19343_v40 = vpop.f32.mrf.mxu3 }
 0xf8d   : > { %11607 = vmatpush.msrb.mxu0 %v19187_v35  ;;  %11651 = vmatpush.msrb.mxu1 %v19132_v10  ;;  %22396 = vst [vmem:[#allocation42_spill] sm:$0xff] %v19350_v21  ;;  %v22401_v35 = vperm.slane %v19012_v16, 1  ;;  %v11840_v16 = vand.u32 4294901760, %v11839_v18  ;;  %v8329_v18 = vld [vmem:[%s14937_s16 + $0x4b0] sm:$0xff] }
 0xf8e   : > { %11436 = vmatpush.msrb.mxu2 %v19119_v12  ;;  %11553 = vmatpush.msrb.mxu3 %v11552_v44  ;;  %v8809_v44 = vadd.f32 %v18997_v3, %v8768_v48  ;;  %v9017_v3 = vadd.f32 %v19048_v11, %v8959_v62  ;;  %v19360_v48 = vpop.f32.mrf.mxu0  ;;  %v19369_v41 = vsub.f32 %v8334_v34, %v19333_v57  ;;  %v22402_v11 = vld [vmem:[#allocation22_spill] sm:$0xff] }
 0xf8f   : > { %11610 = vmatpush.msrb.mxu0 %v19201_v37  ;;  %11653 = vmatpush.msrb.mxu1 %v19152_v45  ;;  %v19355_v37 = vand.u32 4294901760, %v8171_v19  ;;  %22398 = vst [vmem:[#allocation118_spill] sm:$0xff] %v19360_v48  ;;  %v6670_v62 = vadd.f32 %v22402_v11, %v22401_v35  ;;  %v11450_v48 = vsub.f32 %v19310_v28, %v11449_v51  ;;  %v22407_v11 = vld [vmem:[#allocation25_spill] sm:$0xff] }
 0xf90   : > { %11438 = vmatpush.msrb.mxu2 %v19132_v10  ;;  %11559 = vmatpush.msrb.mxu3 %v11558_v14  ;;  %v11845_v14 = vsub.f32 %v19307_v52, %v22399_v13  ;;  %22400 = vst [vmem:[#allocation119_spill] sm:$0xff] %v19369_v41  ;;  %v19379_v13 = vand.u32 4294901760, %v8332_v5  ;;  %v8858_v24 = vadd.f32 %v19014_v23, %v8809_v44 }
 0xf91   : > { %22397 = vst [vmem:[#allocation117_spill] sm:$0xff] %v19355_v37  ;;  %11613 = vmatpush.msrb.mxu0 %v19220_v38  ;;  %11655 = vmatpush.msrb.mxu1 %v19171_v59  ;;  %v8331_v38 = vld [vmem:[%s14937_s16 + $0x4c0] sm:$0xff]  ;;  %v19394_v23 = vsub.f32 %v8171_v19, %v19355_v37  ;;  %v6715_v19 = vadd.f32 %v22407_v11, %v6670_v62  ;;  %v11451_v35 = vand.u32 4294901760, %v11450_v48  ;;  %v22411_v48 = vld [vmem:[#allocation46_spill] sm:$0xff] }
 0xf92   : > { %11561 = vmatmul.f32.vlgmr.msrb.gmra.mxu3 %v19274_v55  ;;  %11440 = vmatpush.msrb.mxu2 %v19152_v45  ;;  %v22403_v55 = vld [vmem:[#allocation28_spill] sm:$0xff]  ;;  %v19382_v52 = vpop.f32.mrf.mxu1  ;;  %v19396_v34 = vand.u32 4294901760, %v8331_v38  ;;  %v19422_v11 = vpop.f32.mrf.mxu2 }
 0xf93   : > { %v6777_v8 = vadd.f32 %v22403_v55, %v6745_v25  ;;  %11747 = vmatpush.msra.mxu3 %v18950_v63  ;;  %11616 = vmatpush.msrb.mxu0 %v19236_v61  ;;  %22404 = vst [vmem:[#allocation22_spill] sm:$0xff] %v19382_v52  ;;  %v19388_v55 = vsub.f32 %v8333_v17, %v19352_v53  ;;  %v8330_v63 = vld [vmem:[%s14937_s16 + $0x4b8] sm:$0xff]  ;;  %v22406_v17 = vand.u32 4294901760, %v19331_v26 }
 0xf94   : > { %11657 = vmatpush.msrb.mxu1 %v19189_v0  ;;  %11619 = vmatmul.f32.vlgmr.msrb.gmra.mxu0 %v19310_v28  ;;  %v9061_v25 = vadd.f32 %v19062_v49, %v9017_v3  ;;  %v11846_v28 = vand.u32 4294901760, %v11845_v14  ;;  %v19409_v49 = vsub.f32 %v8332_v5, %v19379_v13  ;;  %v19411_v3 = vand.u32 4294901760, %v8330_v63  ;;  %v22409_v14 = vld [vmem:[#allocation40_spill] sm:$0xff] }
 0xf95   : > { %22405 = vst [vmem:[#allocation28_spill] sm:$0xff] %v19388_v55  ;;  %11749 = vmatpush.msra.mxu3 %v18960_v47  ;;  %11788 = vmatpush.msra.mxu0 %v19261_v60  ;;  %v11851_v44 = vsub.f32 %v19331_v26, %v22406_v17  ;;  %v21875_v47 = vand.u32 4294901760, %v19369_v41  ;;  %v6816_v61 = vadd.f32 %v22409_v14, %v6777_v8  ;;  %v22410_v17 = vand.u32 4294901760, %v19350_v21  ;;  %v22413_v14 = vld [vmem:[#allocation31_spill] sm:$0xff] }
 0xf96   : > { %11442 = vmatpush.msrb.mxu2 %v19171_v59  ;;  %11659 = vmatpush.msrb.mxu1 %v19203_v20  ;;  %22408 = vst [vmem:[#allocation25_spill] sm:$0xff] %v19409_v49  ;;  %v8963_v52 = vadd.f32 %v19028_v39, %v8858_v24  ;;  %v6750_v5 = vadd.f32 %v22411_v48, %v6715_v19  ;;  %v11457_v39 = vand.u32 4294901760, %v19394_v23  ;;  %v19430_v24 = vand.u32 4294901760, %v8329_v18  ;;  %v8327_v48 = vld [vmem:[%s14937_s16 + $0x4a0] sm:$0xff] }
 0xf97   : > { %11663 = vmatmul.f32.vlgmr.msrb.gmra.mxu1 %v11449_v51  ;;  %11751 = vmatpush.msra.mxu3 %v18973_v2  ;;  %v11857_v62 = vsub.f32 %v19350_v21, %v22410_v17  ;;  %v8328_v2 = vld [vmem:[%s14937_s16 + $0x4a8] sm:$0xff]  ;;  %v19428_v8 = vsub.f32 %v8331_v38, %v19396_v34  ;;  %v9136_v17 = vadd.f32 %v22413_v14, %v9061_v25  ;;  %v19434_v51 = vpop.f32.mrf.mxu3  ;;  %v11852_v19 = vand.u32 4294901760, %v11851_v44  ;;  %v22414_v25 = vld [vmem:[#allocation41_spill] sm:$0xff]  ;;  %v22417_v21 = vld [vmem:[#allocation43_spill] sm:$0xff] }
 0xf98   : > { %11790 = vmatpush.msra.mxu0 %v19272_v42  ;;  %11841 = vmatpush.msra.mxu1 %v11840_v16  ;;  %v9022_v16 = vadd.f32 %v19137_v32, %v8963_v52  ;;  %v19445_v38 = vsub.f32 %v8330_v63, %v19411_v3  ;;  %v19447_v52 = vand.u32 4294901760, %v8328_v2  ;;  %v19450_v14 = vadd.f32 %v22414_v25, %v6816_v61  ;;  %v8326_v32 = vld [vmem:[%s14937_s16 + $0x498] sm:$0xff] }
 0xf99   : > { %11444 = vmatpush.msrb.mxu2 %v19189_v0  ;;  %11753 = vmatpush.msra.mxu3 %v18983_v50  ;;  %22412 = vst [vmem:[#allocation40_spill] sm:$0xff] %v19428_v8  ;;  %v11863_v50 = vsub.f32 %v19369_v41, %v21875_v47  ;;  %v11858_v44 = vand.u32 4294901760, %v11857_v62  ;;  %v22416_v47 = vand.u32 4294901760, %v19388_v55  ;;  %v6783_v63 = vadd.f32 %v22417_v21, %v6750_v5  ;;  %v22420_v62 = vld [vmem:[#allocation29_spill] sm:$0xff]  ;;  %v22422_v5 = vld [vmem:[#allocation99_spill] sm:$0xff] }
 0xf9a   : > { %11792 = vmatpush.msra.mxu0 %v19304_v33  ;;  %11847 = vmatpush.msra.mxu1 %v11846_v28  ;;  %v19452_v28 = vpop.f32.mrf.mxu0  ;;  %v9067_v25 = vadd.f32 %v22420_v62, %v9022_v16  ;;  %v8325_v21 = vld [vmem:[%s14937_s16 + $0x490] sm:$0xff]  ;;  %v22423_v61 = vand.u32 4294901760, %v22422_v5  ;;  %v22427_v5 = vand.u32 4294901760, %v19428_v8 }
 0xf9b   : > { %11446 = vmatpush.msrb.mxu2 %v19203_v20  ;;  %11565 = vmatmul.f32.gmra.mxu3 %v19355_v37  ;;  %22415 = vst [vmem:[#allocation46_spill] sm:$0xff] %v19452_v28  ;;  %v11869_v41 = vsub.f32 %v19388_v55, %v22416_v47  ;;  %v22418_v37 = vld [vmem:[#allocation91_spill] sm:$0xff]  ;;  %v22421_v28 = vld [vmem:[#allocation112_spill] sm:$0xff]  ;;  %v19471_v47 = vpop.f32.mrf.mxu1  ;;  %v22432_v55 = vand.u32 4294901760, %v19445_v38 }
 0xf9c   : > { %11452 = vmatmul.f32.vlgmr.msrb.gmra.mxu2 %v11451_v35  ;;  %11755 = vmatpush.msra.mxu3 %v19001_v22  ;;  %v22419_v26 = vand.u32 4294901760, %v22418_v37  ;;  %v19465_v35 = vsub.f32 %v8329_v18, %v19430_v24  ;;  %v19467_v22 = vand.u32 4294901760, %v8327_v48  ;;  %v9177_v33 = vadd.f32 %v22421_v28, %v9136_v17 }
 0xf9d   : > { %11794 = vmatpush.msra.mxu0 %v19321_v29  ;;  %11853 = vmatpush.msra.mxu1 %v11852_v19  ;;  %v11864_v37 = vand.u32 4294901760, %v11863_v50  ;;  %v22424_v18 = vand.u32 4294901760, %v19409_v49  ;;  %v19484_v19 = vsub.f32 %v8328_v2, %v19447_v52  ;;  %v19486_v28 = vand.u32 4294901760, %v8326_v32 }
 0xf9e   : > { %11676 = vmatpush.msra.mxu2 %v22419_v26  ;;  %11624 = vmatmul.f32.gmra.mxu0 %v19394_v23  ;;  %v11458_v26 = vsub.f32 %v19394_v23, %v11457_v39  ;;  %v9222_v23 = vadd.f32 %v19208_v9, %v9177_v33  ;;  %v11870_v50 = vand.u32 4294901760, %v11869_v41  ;;  %v19499_v17 = vsub.f32 %v8327_v48, %v19467_v22  ;;  %v8324_v33 = vld [vmem:[%s14937_s16 + $0x488] sm:$0xff] }
 0xf9f   : > { %11757 = vmatpush.msra.mxu3 %v19026_v43  ;;  %v11875_v16 = vsub.f32 %v19409_v49, %v22424_v18  ;;  %11796 = vmatpush.msra.mxu0 %v19333_v57  ;;  %v22425_v43 = vld [vmem:[#allocation98_spill] sm:$0xff]  ;;  %v11881_v18 = vsub.f32 %v19428_v8, %v22427_v5  ;;  %v19501_v9 = vand.u32 4294901760, %v8325_v21  ;;  %v8156_v41 = vmax.f32 %v19450_v14, 0.0  ;;  %v22429_v49 = vld [vmem:[#allocation35_spill] sm:$0xff]  ;;  %v22430_v48 = vld [vmem:[#allocation100_spill] sm:$0xff] }
 0xfa0   : > { %11680 = vmatpush.msra.mxu2 %v22423_v61  ;;  %11859 = vmatpush.msra.mxu1 %v11858_v44  ;;  %v19490_v61 = vpop.f32.mrf.mxu2  ;;  %v22426_v62 = vand.u32 4294901760, %v22425_v43  ;;  %v22428_v44 = vld [vmem:[#allocation44_spill] sm:$0xff]  ;;  %v9140_v43 = vadd.f32 %v22429_v49, %v9067_v25  ;;  %v11459_v5 = vand.u32 4294901760, %v11458_v26  ;;  %v22431_v2 = vand.u32 4294901760, %v22430_v48  ;;  %v8323_v25 = vld [vmem:[%s14937_s16 + $0x480] sm:$0xff] }
 0xfa1   : > { %11669 = vmatmul.f32.gmra.mxu1 %v11457_v39  ;;  %v6820_v39 = vadd.f32 %v22428_v44, %v6783_v63  ;;  %11759 = vmatpush.msra.mxu3 %v19044_v30  ;;  %v11876_v8 = vand.u32 4294901760, %v11875_v16  ;;  %v11887_v14 = vsub.f32 %v19445_v38, %v22432_v55  ;;  %v19518_v49 = vsub.f32 %v8326_v32, %v19486_v28 }
 0xfa2   : > { %11684 = vmatpush.msra.mxu2 %v22426_v62  ;;  %v19507_v62 = vpop.f32.mrf.mxu3  ;;  %11798 = vmatpush.msra.mxu0 %v19352_v53  ;;  %v9331_v30 = vadd.f32 %v19212_v58, %v9222_v23  ;;  %v19522_v44 = vpop.f32.mrf.mxu0  ;;  %v11882_v26 = vand.u32 4294901760, %v11881_v18  ;;  %v22433_v55 = vand.u32 4294901760, %v19465_v35  ;;  %v11904_v32 = vand.u32 4294901760, %v19499_v17  ;;  %v22434_v23 = vld [vmem:[#allocation30_spill] sm:$0xff]  ;;  %v22436_v18 = vld [vmem:[#allocation45_spill] sm:$0xff] }
 0xfa3   : > { %11865 = vmatpush.msra.mxu1 %v11864_v37  ;;  %11761 = vmatpush.msra.mxu3 %v19059_v46  ;;  %v19526_v37 = vand.u32 4294901760, %v8324_v33  ;;  %v19535_v58 = vand.u32 4294901760, %v8156_v41  ;;  %v9181_v46 = vadd.f32 %v22434_v23, %v9140_v43  ;;  %v19538_v48 = vpop.f32.mrf.mxu1  ;;  %v22435_v63 = vand.u32 4294901760, %v19033_v27 }
 0xfa4   : > { %11688 = vmatpush.msra.mxu2 %v22431_v2  ;;  %11800 = vmatpush.msra.mxu0 %v19379_v13  ;;  %v11893_v16 = vsub.f32 %v19465_v35, %v22433_v55  ;;  %v19533_v2 = vsub.f32 %v8325_v21, %v19501_v9  ;;  %v11888_v21 = vand.u32 4294901760, %v11887_v14  ;;  %v22437_v55 = vand.u32 4294901760, %v19484_v19 }
 0xfa5   : > { %11871 = vmatpush.msra.mxu1 %v11870_v50  ;;  %11460 = vmatmul.f32.gmra.mxu2 %v11459_v5  ;;  %v19543_v50 = vand.u32 4294901760, %v8323_v25  ;;  %v19546_v5 = vadd.f32 %v22436_v18, %v6820_v39  ;;  %v11910_v23 = vand.u32 4294901760, %v19518_v49  ;;  %v9230_v27 = vadd.f32 %v19277_v7, %v9181_v46  ;;  %v22441_v18 = vld [vmem:[#allocation33_spill] sm:$0xff] }
 0xfa6   : > { %11692 = vmatpush.msra.mxu2 %v22435_v63  ;;  %11763 = vmatpush.msra.mxu3 %v19085_v31  ;;  %v11899_v43 = vsub.f32 %v19484_v19, %v22437_v55  ;;  %v9389_v63 = vadd.f32 %v19228_v6, %v9331_v30  ;;  %v22438_v31 = vand.u32 4294901760, %v19057_v4  ;;  %v19559_v39 = vsub.f32 %v8324_v33, %v19526_v37  ;;  %v22439_v4 = vld [vmem:[#allocation104_spill] sm:$0xff] }
 0xfa7   : > { %11802 = vmatpush.msra.mxu0 %v19396_v34  ;;  %11877 = vmatpush.msra.mxu1 %v11876_v8  ;;  %v11894_v8 = vand.u32 4294901760, %v11893_v16  ;;  %v11905_v14 = vsub.f32 %v19499_v17, %v11904_v32  ;;  %v11916_v7 = vand.u32 4294901760, %v19533_v2  ;;  %v19567_v6 = vsub.f32 %v8156_v41, %v19535_v58 }
 0xfa8   : > { %11696 = vmatpush.msra.mxu2 %v22438_v31  ;;  %11765 = vmatpush.msra.mxu3 %v19101_v54  ;;  %v22440_v30 = vand.u32 4294901760, %v22439_v4  ;;  %v19573_v54 = vsub.f32 %v8323_v25, %v19543_v50  ;;  %v19575_v33 = vpop.f32.mrf.mxu2  ;;  %v11911_v16 = vsub.f32 %v19518_v49, %v11910_v23  ;;  %v8172_v41 = vmax.f32 %v19546_v5, 0.0  ;;  %v22442_v25 = vld [vmem:[#allocation111_spill] sm:$0xff] }
 0xfa9   : > { %11804 = vmatpush.msra.mxu0 %v19411_v3  ;;  %11883 = vmatpush.msra.mxu1 %v11882_v26  ;;  %v11900_v26 = vand.u32 4294901760, %v11899_v43  ;;  %v9335_v46 = vadd.f32 %v19282_v56, %v9230_v27  ;;  %v9433_v55 = vadd.f32 %v22441_v18, %v9389_v63  ;;  %v22443_v31 = vand.u32 4294901760, %v22442_v25  ;;  %v22444_v63 = vld [vmem:[#allocation26_spill] sm:$0xff] }
 0xfaa   : > { %11700 = vmatpush.msra.mxu2 %v22440_v30  ;;  %11767 = vmatpush.msra.mxu3 %v19119_v12  ;;  %v19584_v12 = vpop.f32.mrf.mxu3  ;;  %v11906_v43 = vand.u32 4294901760, %v11905_v14  ;;  %v11917_v5 = vsub.f32 %v19533_v2, %v11916_v7  ;;  %v19595_v27 = vpop.f32.mrf.mxu0  ;;  %v22445_v4 = vand.u32 4294901760, %v22444_v63  ;;  %v11928_v30 = vand.u32 4294901760, %v19573_v54 }
 0xfab   : > { %11806 = vmatpush.msra.mxu0 %v19430_v24  ;;  %11889 = vmatpush.msra.mxu1 %v11888_v21  ;;  %v11922_v21 = vand.u32 4294901760, %v19559_v39  ;;  %v9508_v56 = vadd.f32 %v19338_v36, %v9433_v55  ;;  %v19603_v14 = vand.u32 4294901760, %v8172_v41  ;;  %v9394_v18 = vadd.f32 %v19301_v1, %v9335_v46  ;;  %v19606_v36 = vpop.f32.mrf.mxu1  ;;  %v22446_v55 = vld [vmem:[#allocation113_spill] sm:$0xff] }
 0xfac   : > { %11704 = vmatpush.msra.mxu2 %v22443_v31  ;;  %11769 = vmatpush.msra.mxu3 %v19132_v10  ;;  %v11821_v10 = vand.u32 4294901760, %v19567_v6  ;;  %v22447_v25 = vand.u32 4294901760, %v22446_v55  ;;  %v22448_v31 = vld [vmem:[#allocation114_spill] sm:$0xff] }
 0xfad   : > { %11808 = vmatpush.msra.mxu0 %v19447_v52  ;;  %11895 = vmatpush.msra.mxu1 %v11894_v8  ;;  %v11912_v8 = vand.u32 4294901760, %v11911_v16  ;;  %v9549_v16 = vadd.f32 %v19343_v40, %v9508_v56  ;;  %v22449_v63 = vand.u32 4294901760, %v22448_v31  ;;  %v9439_v40 = vadd.f32 %v19317_v15, %v9394_v18  ;;  %v22453_v15 = vld [vmem:[#allocation34_spill] sm:$0xff]  ;;  %v22454_v18 = vld [vmem:[#allocation116_spill] sm:$0xff] }
 0xfae   : > { %11708 = vmatpush.msra.mxu2 %v22445_v4  ;;  %11771 = vmatpush.msra.mxu3 %v19152_v45  ;;  %v11923_v45 = vsub.f32 %v19559_v39, %v11922_v21  ;;  %v11822_v1 = vsub.f32 %v19567_v6, %v11821_v10  ;;  %v19635_v4 = vsub.f32 %v8172_v41, %v19603_v14 }
 0xfaf   : > { %11810 = vmatpush.msra.mxu0 %v19467_v22  ;;  %11901 = vmatpush.msra.mxu1 %v11900_v26  ;;  %v11918_v26 = vand.u32 4294901760, %v11917_v5  ;;  %v22450_v5 = vld [vmem:[#allocation115_spill] sm:$0xff]  ;;  %v9512_v55 = vadd.f32 %v19422_v11, %v9439_v40  ;;  %v22458_v40 = vld [vmem:[#allocation22_spill] sm:$0xff] }
 0xfb0   : > { %11712 = vmatpush.msra.mxu2 %v22447_v25  ;;  %11773 = vmatpush.msra.mxu3 %v19171_v59  ;;  %v11929_v59 = vsub.f32 %v19573_v54, %v11928_v30  ;;  %v19625_v46 = vpop.f32.mrf.mxu2  ;;  %v22451_v56 = vand.u32 4294901760, %v22450_v5  ;;  %v22452_v25 = vld [vmem:[#allocation118_spill] sm:$0xff]  ;;  %v11823_v5 = vand.u32 4294901760, %v11822_v1  ;;  %v11829_v11 = vand.u32 4294901760, %v19635_v4 }
 0xfb1   : > { %11812 = vmatpush.msra.mxu0 %v19486_v28  ;;  %11907 = vmatpush.msra.mxu1 %v11906_v43 }
 0xfb2   : > { %11716 = vmatpush.msra.mxu2 %v22449_v63  ;;  %11775 = vmatpush.msra.mxu3 %v19189_v0  ;;  %v19629_v43 = vpop.f32.mrf.mxu3  ;;  %v11924_v0 = vand.u32 4294901760, %v11923_v45  ;;  %v19640_v31 = vpop.f32.mrf.mxu0  ;;  %v22455_v63 = vand.u32 4294901760, %v22454_v18  ;;  %v22456_v45 = vld [vmem:[#allocation27_spill] sm:$0xff] }
 0xfb3   : > { %11814 = vmatpush.msra.mxu0 %v19501_v9  ;;  %11913 = vmatpush.msra.mxu1 %v11912_v8  ;;  %v9594_v8 = vadd.f32 %v22452_v25, %v9549_v16  ;;  %v19647_v41 = vpop.f32.mrf.mxu1  ;;  %v9553_v16 = vadd.f32 %v19434_v51, %v9512_v55  ;;  %v22461_v25 = vld [vmem:[#allocation37_spill] sm:$0xff]  ;;  %v22462_v18 = vld [vmem:[#allocation39_spill] sm:$0xff]  ;;  %v11830_v51 = vsub.f32 %v19635_v4, %v11829_v11 }
 0xfb4   : > { %11720 = vmatpush.msra.mxu2 %v22451_v56  ;;  %11777 = vmatpush.msra.mxu3 %v19203_v20  ;;  %v11930_v20 = vand.u32 4294901760, %v11929_v59  ;;  %v22459_v59 = vld [vmem:[#allocation32_spill] sm:$0xff] }
 0xfb5   : > { %11816 = vmatpush.msra.mxu0 %v19526_v37  ;;  %11919 = vmatpush.msra.mxu1 %v11918_v26  ;;  %v22457_v26 = vand.u32 4294901760, %v22456_v45  ;;  %v9703_v1 = vadd.f32 %v22458_v40, %v9594_v8  ;;  %v22460_v56 = vand.u32 4294901760, %v22459_v59  ;;  %v22464_v8 = vld [vmem:[#allocation24_spill] sm:$0xff] }
 0xfb6   : > { %11779 = vmatmul.f32.vlgmr.msra.gmra.mxu3 %v22453_v15  ;;  %11724 = vmatpush.msra.mxu2 %v22455_v63  ;;  %v22463_v63 = vand.u32 4294901760, %v22462_v18 }
 0xfb7   : > { %12001 = vmatpush.msrb.mxu3 %v19261_v60  ;;  %11818 = vmatpush.msra.mxu0 %v19543_v50 }
 0xfb8   : > { %11925 = vmatpush.msra.mxu1 %v11924_v0  ;;  %11824 = vmatmul.f32.vlgmr.msra.gmra.mxu0 %v11823_v5  ;;  %v9761_v0 = vadd.f32 %v19490_v61, %v9703_v1  ;;  %v19666_v55 = vpop.f32.mrf.mxu2  ;;  %v22465_v5 = vand.u32 4294901760, %v22464_v8  ;;  %v22467_v61 = vld [vmem:[#allocation38_spill] sm:$0xff] }
 0xfb9   : > { %12003 = vmatpush.msrb.mxu3 %v19272_v42  ;;  %12048 = vmatpush.msrb.mxu0 %v22457_v26  ;;  %v22468_v1 = vand.u32 4294901760, %v22467_v61 }
 0xfba   : > { %11728 = vmatpush.msra.mxu2 %v22460_v56  ;;  %11931 = vmatpush.msra.mxu1 %v11930_v20  ;;  %v22466_v20 = vld [vmem:[#allocation46_spill] sm:$0xff]  ;;  %v19672_v40 = vpop.f32.mrf.mxu3  ;;  %v22471_v56 = vld [vmem:[#allocation117_spill] sm:$0xff]  ;;  %v19681_v8 = vpop.f32.mrf.mxu0 }
 0xfbb   : > { %11933 = vmatmul.f32.vlgmr.msra.gmra.mxu1 %v19535_v58  ;;  %12005 = vmatpush.msrb.mxu3 %v22461_v25  ;;  %v9602_v26 = vadd.f32 %v22466_v20, %v9553_v16  ;;  %v11831_v16 = vand.u32 4294901760, %v11830_v51 }
 0xfbc   : > { %12052 = vmatpush.msrb.mxu0 %v22463_v63  ;;  %12119 = vmatpush.msrb.mxu1 %v19261_v60  ;;  %v22469_v60 = vld [vmem:[#allocation36_spill] sm:$0xff]  ;;  %v9805_v63 = vadd.f32 %v19507_v62, %v9761_v0 }
 0xfbd   : > { %11732 = vmatpush.msra.mxu2 %v22465_v5  ;;  %12007 = vmatpush.msrb.mxu3 %v19321_v29  ;;  %v22470_v59 = vand.u32 4294901760, %v22469_v60  ;;  %v22472_v5 = vld [vmem:[#allocation42_spill] sm:$0xff] }
 0xfbe   : > { %12056 = vmatpush.msrb.mxu0 %v22468_v1  ;;  %12121 = vmatpush.msrb.mxu1 %v19272_v42  ;;  %v22473_v20 = vand.u32 4294901760, %v22472_v5  ;;  %v9707_v42 = vadd.f32 %v19471_v47, %v9602_v26  ;;  %v19689_v1 = vpop.f32.mrf.mxu1  ;;  %v8354_v47 = vld [vmem:[%s14937_s16 + $0x578] sm:$0xff] }
 0xfbf   : > { %11736 = vmatpush.msra.mxu2 %v22470_v59  ;;  %11783 = vmatmul.f32.gmra.mxu3 %v22471_v56  ;;  %v22478_v59 = vld [vmem:[#allocation25_spill] sm:$0xff] }
 0xfc0   : > { %11738 = vmatmul.f32.vlgmr.msra.gmra.mxu2 %v22453_v15  ;;  %12009 = vmatpush.msrb.mxu3 %v19333_v57  ;;  %v9766_v62 = vadd.f32 %v19575_v33, %v9707_v42  ;;  %v9880_v15 = vadd.f32 %v19522_v44, %v9805_v63  ;;  %v19700_v51 = vpop.f32.mrf.mxu2  ;;  %v22476_v33 = vld [vmem:[#allocation28_spill] sm:$0xff]  ;;  %v8353_v44 = vld [vmem:[%s14937_s16 + $0x570] sm:$0xff]  ;;  %v22479_v63 = vand.u32 4294901760, %v22478_v59 }
 0xfc1   : > { %11943 = vmatpush.msrb.mxu2 %v22456_v45  ;;  %12060 = vmatpush.msrb.mxu0 %v22473_v20  ;;  %v22474_v45 = vld [vmem:[#allocation119_spill] sm:$0xff]  ;;  %v22480_v20 = vld [vmem:[#allocation40_spill] sm:$0xff] }
 0xfc2   : > { %12123 = vmatpush.msrb.mxu1 %v22461_v25  ;;  %11832 = vmatmul.f32.gmra.mxu0 %v11831_v16  ;;  %v22475_v0 = vand.u32 4294901760, %v22474_v45  ;;  %v19704_v25 = vpop.f32.mrf.mxu3  ;;  %v9811_v26 = vadd.f32 %v19584_v12, %v9766_v62  ;;  %v9921_v60 = vadd.f32 %v19538_v48, %v9880_v15  ;;  %v8352_v16 = vld [vmem:[%s14937_s16 + $0x568] sm:$0xff]  ;;  %v8351_v48 = vld [vmem:[%s14937_s16 + $0x560] sm:$0xff]  ;;  %v22481_v42 = vand.u32 4294901760, %v22480_v20 }
 0xfc3   : > { %11946 = vmatpush.msrb.mxu2 %v22462_v18  ;;  %12011 = vmatpush.msrb.mxu3 %v19352_v53  ;;  %v22477_v18 = vand.u32 4294901760, %v22476_v33  ;;  %v22482_v62 = vand.u32 4294901760, %v19445_v38 }
 0xfc4   : > { %12064 = vmatpush.msrb.mxu0 %v22475_v0  ;;  %12125 = vmatpush.msrb.mxu1 %v19321_v29  ;;  %v19712_v29 = vand.u32 4294901760, %v8354_v47 }
 0xfc5   : > { %11937 = vmatmul.f32.gmra.mxu1 %v19603_v14  ;;  %11949 = vmatpush.msrb.mxu2 %v22467_v61  ;;  %v19716_v61 = vpop.f32.mrf.mxu0 }
 0xfc6   : > { %12013 = vmatpush.msrb.mxu3 %v19379_v13  ;;  %12068 = vmatpush.msrb.mxu0 %v22477_v18  ;;  %v19727_v12 = vpop.f32.mrf.mxu1 }
 0xfc7   : > { %12127 = vmatpush.msrb.mxu1 %v19333_v57  ;;  %11952 = vmatpush.msrb.mxu2 %v22472_v5  ;;  %v19724_v57 = vand.u32 4294901760, %v8353_v44  ;;  %v9966_v5 = vadd.f32 %v19625_v46, %v9921_v60  ;;  %v9884_v46 = vadd.f32 %v19595_v27, %v9811_v26  ;;  %v8349_v26 = vld [vmem:[%s14937_s16 + $0x550] sm:$0xff]  ;;  %v22484_v60 = vand.u32 4294901760, %v19484_v19 }
 0xfc8   : > { %12015 = vmatpush.msrb.mxu3 %v19396_v34  ;;  %12072 = vmatpush.msrb.mxu0 %v22479_v63  ;;  %v19755_v27 = vpop.f32.mrf.mxu2 }
 0xfc9   : > { %12129 = vmatpush.msrb.mxu1 %v19352_v53  ;;  %11742 = vmatmul.f32.gmra.mxu2 %v22471_v56  ;;  %v19736_v53 = vsub.f32 %v8354_v47, %v19712_v29  ;;  %v19738_v56 = vand.u32 4294901760, %v8352_v16  ;;  %v19747_v15 = vsub.f32 %v8353_v44, %v19724_v57  ;;  %v10075_v0 = vadd.f32 %v19629_v43, %v9966_v5  ;;  %v8348_v5 = vld [vmem:[%s14937_s16 + $0x548] sm:$0xff] }
 0xfca   : > { %11955 = vmatpush.msrb.mxu2 %v22474_v45  ;;  %12017 = vmatpush.msrb.mxu3 %v19411_v3  ;;  %v8350_v45 = vld [vmem:[%s14937_s16 + $0x558] sm:$0xff]  ;;  %v22483_v47 = vand.u32 4294901760, %v19465_v35  ;;  %v9925_v18 = vadd.f32 %v19606_v36, %v9884_v46  ;;  %v19765_v43 = vpop.f32.mrf.mxu3 }
 0xfcb   : > { %12076 = vmatpush.msrb.mxu0 %v22481_v42  ;;  %12131 = vmatpush.msrb.mxu1 %v19379_v13  ;;  %v19749_v13 = vand.u32 4294901760, %v8351_v48  ;;  %v19769_v44 = vand.u32 4294901760, %v8350_v45 }
 0xfcc   : > { %11958 = vmatpush.msrb.mxu2 %v22476_v33  ;;  %12019 = vmatpush.msrb.mxu3 %v19430_v24  ;;  %v19762_v33 = vsub.f32 %v8352_v16, %v19738_v56  ;;  %v9974_v36 = vadd.f32 %v19666_v55, %v9925_v18  ;;  %v10133_v16 = vadd.f32 %v19640_v31, %v10075_v0 }
 0xfcd   : > { %12080 = vmatpush.msrb.mxu0 %v22482_v62  ;;  %12133 = vmatpush.msrb.mxu1 %v19396_v34  ;;  %v21906_v34 = vand.u32 4294901760, %v19736_v53  ;;  %v19780_v63 = vpop.f32.mrf.mxu0  ;;  %v19814_v62 = vand.u32 4294901760, %v8348_v5 }
 0xfce   : > { %11961 = vmatpush.msrb.mxu2 %v22478_v59  ;;  %12021 = vmatpush.msrb.mxu3 %v19447_v52  ;;  %v19777_v59 = vsub.f32 %v8351_v48, %v19749_v13  ;;  %v21897_v55 = vand.u32 4294901760, %v19762_v33  ;;  %v19793_v48 = vand.u32 4294901760, %v8349_v26  ;;  %v19799_v31 = vpop.f32.mrf.mxu1 }
 0xfcf   : > { %12084 = vmatpush.msrb.mxu0 %v22483_v47  ;;  %12135 = vmatpush.msrb.mxu1 %v19411_v3  ;;  %v21905_v3 = vand.u32 4294901760, %v19747_v15  ;;  %v22485_v47 = vld [vmem:[#allocation52_spill] sm:$0xff] }
 0xfd0   : > { %11964 = vmatpush.msrb.mxu2 %v22480_v20  ;;  %12023 = vmatpush.msrb.mxu3 %v19467_v22  ;;  %v19796_v20 = vld [vmem:[%s14931_s19 + $0x8] sm:$0xff]  ;;  %v21892_v46 = vand.u32 4294901760, %v19777_v59  ;;  %v12223_v0 = vsub.f32 %v19762_v33, %v21897_v55 }
 0xfd1   : > { %12088 = vmatpush.msrb.mxu0 %v22484_v60  ;;  %12137 = vmatpush.msrb.mxu1 %v19430_v24  ;;  %v12211_v24 = vsub.f32 %v19736_v53, %v21906_v34  ;;  %v12217_v42 = vsub.f32 %v19747_v15, %v21905_v3 }
 0xfd2   : > { %11967 = vmatpush.msrb.mxu2 %v19445_v38  ;;  %12025 = vmatpush.msrb.mxu3 %v19486_v28  ;;  %v4663_v38 = vperm.slane %v19796_v20, 2  ;;  %v19837_v60 = vpop.f32.mrf.mxu3 }
 0xfd3   : > { %12092 = vmatpush.msrb.mxu0 %v11904_v32  ;;  %12139 = vmatpush.msrb.mxu1 %v19447_v52  ;;  %v19804_v52 = vsub.f32 %v8350_v45, %v19769_v44  ;;  %v8347_v32 = vld [vmem:[%s14937_s16 + $0x540] sm:$0xff]  ;;  %v10177_v45 = vadd.f32 %v19647_v41, %v10133_v16  ;;  %v19850_v16 = vsub.f32 %v8348_v5, %v19814_v62 }
 0xfd4   : > { %11970 = vmatpush.msrb.mxu2 %v19465_v35  ;;  %12027 = vmatpush.msrb.mxu3 %v19501_v9  ;;  %v10079_v35 = vadd.f32 %v19672_v40, %v9974_v36  ;;  %v19829_v40 = vsub.f32 %v8349_v26, %v19793_v48  ;;  %v19831_v41 = vand.u32 4294901760, %v8347_v32  ;;  %v6878_v18 = vadd.f32 %v22485_v47, %v4663_v38  ;;  %v22486_v47 = vld [vmem:[#allocation11_spill] sm:$0xff] }
 0xfd5   : > { %12096 = vmatpush.msrb.mxu0 %v11910_v23  ;;  %12141 = vmatpush.msrb.mxu1 %v19467_v22  ;;  %v19820_v23 = vpop.f32.mrf.mxu2  ;;  %v12212_v22 = vand.u32 4294901760, %v12211_v24  ;;  %v12218_v26 = vand.u32 4294901760, %v12217_v42  ;;  %v12229_v36 = vsub.f32 %v19777_v59, %v21892_v46  ;;  %v19853_v24 = vpop.f32.mrf.mxu0 }
 0xfd6   : > { %11973 = vmatpush.msrb.mxu2 %v19484_v19  ;;  %12029 = vmatpush.msrb.mxu3 %v19526_v37  ;;  %v8346_v19 = vld [vmem:[%s14937_s16 + $0x538] sm:$0xff]  ;;  %v21894_v5 = vand.u32 4294901760, %v19829_v40  ;;  %v19865_v42 = vsub.f32 %v8347_v32, %v19831_v41  ;;  %v19869_v46 = vpop.f32.mrf.mxu1 }
 0xfd7   : > { %12100 = vmatpush.msrb.mxu0 %v11916_v7  ;;  %12143 = vmatpush.msrb.mxu1 %v19486_v28  ;;  %v21896_v28 = vand.u32 4294901760, %v19804_v52  ;;  %v10252_v7 = vadd.f32 %v19700_v51, %v10177_v45  ;;  %v12224_v51 = vand.u32 4294901760, %v12223_v0  ;;  %v8344_v45 = vld [vmem:[%s14937_s16 + $0x528] sm:$0xff]  ;;  %v12230_v32 = vand.u32 4294901760, %v12229_v36 }
 0xfd8   : > { %11976 = vmatpush.msrb.mxu2 %v19499_v17  ;;  %12031 = vmatpush.msrb.mxu3 %v19543_v50  ;;  %v8345_v17 = vld [vmem:[%s14937_s16 + $0x530] sm:$0xff]  ;;  %v19887_v0 = vand.u32 4294901760, %v8344_v45 }
 0xfd9   : > { %12104 = vmatpush.msrb.mxu0 %v11922_v21  ;;  %12145 = vmatpush.msrb.mxu1 %v19501_v9  ;;  %v19858_v21 = vand.u32 4294901760, %v8346_v19  ;;  %v10138_v9 = vadd.f32 %v19681_v8, %v10079_v35  ;;  %v10293_v8 = vadd.f32 %v19704_v25, %v10252_v7  ;;  %v21893_v35 = vand.u32 4294901760, %v19850_v16 }
 0xfda   : > { %12035 = vmatmul.f32.vlgmr.msrb.gmra.mxu3 %v11821_v10  ;;  %11979 = vmatpush.msrb.mxu2 %v19518_v49  ;;  %v6927_v10 = vadd.f32 %v22486_v47, %v6878_v18  ;;  %v12235_v49 = vsub.f32 %v19804_v52, %v21896_v28  ;;  %v12241_v25 = vsub.f32 %v19829_v40, %v21894_v5  ;;  %v21895_v7 = vand.u32 4294901760, %v19865_v42 }
 0xfdb   : > { %12213 = vmatpush.msra.mxu3 %v12212_v22  ;;  %12108 = vmatpush.msrb.mxu0 %v11928_v30  ;;  %v19876_v30 = vand.u32 4294901760, %v8345_v17  ;;  %v8343_v22 = vld [vmem:[%s14937_s16 + $0x520] sm:$0xff]  ;;  %v10183_v18 = vadd.f32 %v19689_v1, %v10138_v9  ;;  %v10338_v9 = vadd.f32 %v19716_v61, %v10293_v8  ;;  %v12247_v47 = vsub.f32 %v19850_v16, %v21893_v35 }
 0xfdc   : > { %12147 = vmatpush.msrb.mxu1 %v19526_v37  ;;  %12110 = vmatmul.f32.vlgmr.msrb.gmra.mxu0 %v19535_v58  ;;  %v19885_v37 = vsub.f32 %v8346_v19, %v19858_v21  ;;  %v12236_v19 = vand.u32 4294901760, %v12235_v49  ;;  %v19913_v49 = vpop.f32.mrf.mxu3  ;;  %v19919_v61 = vsub.f32 %v8344_v45, %v19887_v0 }
 0xfdd   : > { %12219 = vmatpush.msra.mxu3 %v12218_v26  ;;  %12315 = vmatpush.msra.mxu0 %v19736_v53  ;;  %v22488_v26 = vld [vmem:[#allocation49_spill] sm:$0xff]  ;;  %v19900_v1 = vsub.f32 %v8345_v17, %v19876_v30  ;;  %v10256_v36 = vadd.f32 %v19755_v27, %v10183_v18  ;;  %v12253_v18 = vsub.f32 %v19865_v42, %v21895_v7  ;;  %v19933_v45 = vpop.f32.mrf.mxu0  ;;  %v12248_v7 = vand.u32 4294901760, %v12247_v47  ;;  %v22496_v47 = vld [vmem:[#allocation58_spill] sm:$0xff] }
 0xfde   : > { %11982 = vmatpush.msrb.mxu2 %v19533_v2  ;;  %12149 = vmatpush.msrb.mxu1 %v19543_v50  ;;  %22487 = vst [vmem:[#allocation31_spill] sm:$0xff] %v19885_v37  ;;  %v8342_v2 = vld [vmem:[%s14937_s16 + $0x518] sm:$0xff]  ;;  %v6961_v50 = vadd.f32 %v22488_v26, %v6927_v10  ;;  %v8341_v10 = vld [vmem:[%s14937_s16 + $0x510] sm:$0xff]  ;;  %v21898_v27 = vand.u32 4294901760, %v19885_v37  ;;  %v8340_v26 = vld [vmem:[%s14937_s16 + $0x508] sm:$0xff]  ;;  %v10447_v5 = vadd.f32 %v19727_v12, %v10338_v9 }
 0xfdf   : > { %12151 = vmatmul.f32.vlgmr.msrb.gmra.mxu1 %v19535_v58  ;;  %12225 = vmatpush.msra.mxu3 %v12224_v51  ;;  %22489 = vst [vmem:[#allocation41_spill] sm:$0xff] %v19900_v1  ;;  %v19902_v58 = vand.u32 4294901760, %v8343_v22  ;;  %v19906_v51 = vpop.f32.mrf.mxu2  ;;  %v19921_v17 = vand.u32 4294901760, %v8342_v2  ;;  %v21899_v35 = vand.u32 4294901760, %v19900_v1  ;;  %v12254_v55 = vand.u32 4294901760, %v12253_v18 }
 0xfe0   : > { %12318 = vmatpush.msra.mxu0 %v19747_v15  ;;  %12373 = vmatpush.msra.mxu1 %v19712_v29  ;;  %22490 = vst [vmem:[#allocation43_spill] sm:$0xff] %v19919_v61  ;;  %v10505_v28 = vadd.f32 %v19820_v23, %v10447_v5 }
 0xfe1   : > { %11985 = vmatpush.msrb.mxu2 %v19559_v39  ;;  %12231 = vmatpush.msra.mxu3 %v12230_v32  ;;  %v22491_v39 = vld [vmem:[#allocation12_spill] sm:$0xff]  ;;  %v12242_v32 = vand.u32 4294901760, %v12241_v25  ;;  %v10297_v25 = vadd.f32 %v19765_v43, %v10256_v36  ;;  %v21900_v43 = vand.u32 4294901760, %v19919_v61  ;;  %v19957_v12 = vsub.f32 %v8342_v2, %v19921_v17  ;;  %v22495_v36 = vld [vmem:[#allocation53_spill] sm:$0xff] }
 0xfe2   : > { %12321 = vmatpush.msra.mxu0 %v19762_v33  ;;  %12375 = vmatpush.msra.mxu1 %v19724_v57  ;;  %v6886_v8 = vadd.f32 %v22491_v39, %v4663_v38  ;;  %v19938_v38 = vsub.f32 %v8343_v22, %v19902_v58  ;;  %v12259_v22 = vsub.f32 %v19885_v37, %v21898_v27 }
 0xfe3   : > { %11988 = vmatpush.msrb.mxu2 %v19573_v54  ;;  %12041 = vmatmul.f32.gmra.mxu3 %v11829_v11  ;;  %v19940_v54 = vand.u32 4294901760, %v8341_v10  ;;  %v22493_v11 = vld [vmem:[#allocation51_spill] sm:$0xff]  ;;  %22494 = vst [vmem:[#allocation29_spill] sm:$0xff] %v19957_v12  ;;  %v12265_v2 = vsub.f32 %v19900_v1, %v21899_v35  ;;  %v10346_v23 = vadd.f32 %v19780_v63, %v10297_v25  ;;  %v22499_v25 = vld [vmem:[#allocation13_spill] sm:$0xff] }
 0xfe4   : > { %11991 = vmatmul.f32.vlgmr.msrb.gmra.mxu2 %v19567_v6  ;;  %12237 = vmatpush.msra.mxu3 %v12236_v19  ;;  %22492 = vst [vmem:[#allocation91_spill] sm:$0xff] %v19938_v38  ;;  %v6993_v39 = vadd.f32 %v22493_v11, %v6961_v50  ;;  %v8339_v6 = vld [vmem:[%s14937_s16 + $0x500] sm:$0xff]  ;;  %v19948_v19 = vpop.f32.mrf.mxu1  ;;  %v19959_v50 = vand.u32 4294901760, %v8340_v26  ;;  %v6931_v9 = vadd.f32 %v22495_v36, %v6886_v8  ;;  %v21901_v27 = vand.u32 4294901760, %v19938_v38 }
 0xfe5   : > { %12160 = vmatpush.msra.mxu2 %v19712_v29  ;;  %12324 = vmatpush.msra.mxu0 %v19777_v59  ;;  %v19972_v8 = vsub.f32 %v8341_v10, %v19940_v54  ;;  %v12260_v18 = vand.u32 4294901760, %v12259_v22  ;;  %v12271_v10 = vsub.f32 %v19919_v61, %v21900_v43  ;;  %v21902_v36 = vand.u32 4294901760, %v19957_v12  ;;  %v19998_v22 = vpop.f32.mrf.mxu0 }
 0xfe6   : > { %12377 = vmatpush.msra.mxu1 %v19738_v56  ;;  %12114 = vmatmul.f32.gmra.mxu0 %v19603_v14  ;;  %v7032_v11 = vadd.f32 %v22496_v47, %v6993_v39  ;;  %v19974_v39 = vand.u32 4294901760, %v8339_v6  ;;  %v19989_v63 = vsub.f32 %v8340_v26, %v19959_v50  ;;  %v22500_v47 = vld [vmem:[#allocation54_spill] sm:$0xff]  ;;  %v12266_v43 = vand.u32 4294901760, %v12265_v2 }
 0xfe7   : > { %12162 = vmatpush.msra.mxu2 %v19724_v57  ;;  %12243 = vmatpush.msra.mxu3 %v12242_v32  ;;  %22497 = vst [vmem:[#allocation112_spill] sm:$0xff] %v19972_v8  ;;  %v19977_v5 = vpop.f32.mrf.mxu2  ;;  %v19981_v32 = vpop.f32.mrf.mxu3  ;;  %v6966_v35 = vadd.f32 %v22500_v47, %v6931_v9  ;;  %v12277_v26 = vsub.f32 %v19938_v38, %v21901_v27  ;;  %v12272_v2 = vand.u32 4294901760, %v12271_v10 }
 0xfe8   : > { %12327 = vmatpush.msra.mxu0 %v19804_v52  ;;  %12379 = vmatpush.msra.mxu1 %v19749_v13  ;;  %22498 = vst [vmem:[#allocation99_spill] sm:$0xff] %v19989_v63  ;;  %v20006_v9 = vsub.f32 %v8339_v6, %v19974_v39  ;;  %v21904_v6 = vand.u32 4294901760, %v19989_v63 }
 0xfe9   : > { %12155 = vmatmul.f32.gmra.mxu1 %v19603_v14  ;;  %12164 = vmatpush.msra.mxu2 %v19738_v56  ;;  %v19992_v14 = vadd.f32 %v22499_v25, %v7032_v11  ;;  %v21903_v11 = vand.u32 4294901760, %v19972_v8  ;;  %v12283_v25 = vsub.f32 %v19957_v12, %v21902_v36  ;;  %v12278_v10 = vand.u32 4294901760, %v12277_v26 }
 0xfea   : > { %12249 = vmatpush.msra.mxu3 %v12248_v7  ;;  %12330 = vmatpush.msra.mxu0 %v19829_v40  ;;  %v10549_v7 = vadd.f32 %v19837_v60, %v10505_v28  ;;  %22501 = vst [vmem:[#allocation98_spill] sm:$0xff] %v20006_v9  ;;  %v10451_v60 = vadd.f32 %v19799_v31, %v10346_v23  ;;  %v22502_v23 = vld [vmem:[#allocation55_spill] sm:$0xff] }
 0xfeb   : > { %12381 = vmatpush.msra.mxu1 %v19769_v44  ;;  %12166 = vmatpush.msra.mxu2 %v19749_v13  ;;  %v8157_v31 = vmax.f32 %v19992_v14, 0.0  ;;  %v6999_v47 = vadd.f32 %v22502_v23, %v6966_v35  ;;  %v12289_v36 = vsub.f32 %v19972_v8, %v21903_v11  ;;  %v21907_v14 = vand.u32 4294901760, %v20006_v9 }
 0xfec   : > { %12255 = vmatpush.msra.mxu3 %v12254_v55  ;;  %12333 = vmatpush.msra.mxu0 %v19850_v16  ;;  %v8370_v55 = vld [vmem:[%s14937_s16 + $0x5f8] sm:$0xff]  ;;  %v20012_v28 = vpop.f32.mrf.mxu1  ;;  %v10510_v27 = vadd.f32 %v19906_v51, %v10451_v60  ;;  %v22503_v51 = vld [vmem:[#allocation48_spill] sm:$0xff] }
 0xfed   : > { %12383 = vmatpush.msra.mxu1 %v19793_v48  ;;  %11996 = vmatmul.f32.gmra.mxu2 %v19635_v4  ;;  %v10624_v4 = vadd.f32 %v19853_v24, %v10549_v7  ;;  %v20031_v35 = vand.u32 4294901760, %v8370_v55  ;;  %v7036_v24 = vadd.f32 %v22503_v51, %v6999_v47  ;;  %v12295_v7 = vsub.f32 %v19989_v63, %v21904_v6 }
 0xfee   : > { %12168 = vmatpush.msra.mxu2 %v19769_v44  ;;  %12261 = vmatpush.msra.mxu3 %v12260_v18  ;;  %v8369_v18 = vld [vmem:[%s14937_s16 + $0x5f0] sm:$0xff]  ;;  %v20043_v23 = vand.u32 4294901760, %v8157_v31  ;;  %v12290_v6 = vand.u32 4294901760, %v12289_v36  ;;  %v12301_v3 = vsub.f32 %v20006_v9, %v21907_v14  ;;  %v8366_v14 = vld [vmem:[%s14937_s16 + $0x5d8] sm:$0xff] }
 0xfef   : > { %12336 = vmatpush.msra.mxu0 %v19865_v42  ;;  %12385 = vmatpush.msra.mxu1 %v19814_v62  ;;  %v20040_v26 = vand.u32 4294901760, %v8369_v18  ;;  %v10665_v47 = vadd.f32 %v19869_v46, %v10624_v4  ;;  %v10717_v51 = vpop.f32.mrf.mxu2  ;;  %v20050_v11 = vpop.f32.mrf.mxu3  ;;  %v20057_v46 = vsub.f32 %v8370_v55, %v20031_v35  ;;  %v22506_v4 = vld [vmem:[#allocation59_spill] sm:$0xff]  ;;  %v12296_v36 = vand.u32 4294901760, %v12295_v7 }
 0xff0   : > { %12170 = vmatpush.msra.mxu2 %v19793_v48  ;;  %12267 = vmatpush.msra.mxu3 %v12266_v43  ;;  %v12284_v43 = vand.u32 4294901760, %v12283_v25  ;;  %22504 = vst [vmem:[#allocation44_spill] sm:$0xff] %v20043_v23  ;;  %v10555_v25 = vadd.f32 %v19913_v49, %v10510_v27  ;;  %v20060_v34 = vadd.f32 %v22506_v4, %v7036_v24  ;;  %v8367_v49 = vld [vmem:[%s14937_s16 + $0x5e0] sm:$0xff]  ;;  %v20066_v27 = vpop.f32.mrf.mxu0  ;;  %v22508_v24 = vperm.slane %v19796_v20, 3  ;;  %v22509_v4 = vld [vmem:[#allocation56_spill] sm:$0xff] }
 0xff1   : > { %12339 = vmatpush.msra.mxu0 %v19885_v37  ;;  %12387 = vmatpush.msra.mxu1 %v19831_v41  ;;  %22505 = vst [vmem:[#allocation35_spill] sm:$0xff] %v20057_v46  ;;  %v10710_v60 = vadd.f32 %v19977_v5, %v10665_v47  ;;  %v20072_v55 = vsub.f32 %v8369_v18, %v20040_v26  ;;  %v12302_v18 = vand.u32 4294901760, %v12301_v3 }
 0xff2   : > { %12172 = vmatpush.msra.mxu2 %v19814_v62  ;;  %12273 = vmatpush.msra.mxu3 %v12272_v2  ;;  %v8368_v2 = vld [vmem:[%s14937_s16 + $0x5e8] sm:$0xff]  ;;  %v7094_v5 = vadd.f32 %v22509_v4, %v22508_v24  ;;  %v20078_v47 = vsub.f32 %v8157_v31, %v20043_v23  ;;  %v10628_v7 = vadd.f32 %v19933_v45, %v10555_v25  ;;  %v20088_v24 = vand.u32 4294901760, %v8367_v49  ;;  %v22511_v25 = vld [vmem:[#allocation57_spill] sm:$0xff] }
 0xff3   : > { %12342 = vmatpush.msra.mxu0 %v19900_v1  ;;  %12389 = vmatpush.msra.mxu1 %v19858_v21  ;;  %22507 = vst [vmem:[#allocation100_spill] sm:$0xff] %v20072_v55  ;;  %v8173_v31 = vmax.f32 %v20060_v34, 0.0  ;;  %v10819_v4 = vadd.f32 %v19981_v32, %v10710_v60  ;;  %v22514_v1 = vld [vmem:[#allocation62_spill] sm:$0xff] }
 0xff4   : > { %12174 = vmatpush.msra.mxu2 %v19831_v41  ;;  %12279 = vmatpush.msra.mxu3 %v12278_v10  ;;  %v20069_v10 = vand.u32 4294901760, %v8368_v2  ;;  %v7143_v34 = vadd.f32 %v22511_v25, %v7094_v5  ;;  %v12193_v32 = vand.u32 4294901760, %v20078_v47  ;;  %v20114_v5 = vsub.f32 %v8367_v49, %v20088_v24 }
 0xff5   : > { %12345 = vmatpush.msra.mxu0 %v19919_v61  ;;  %12391 = vmatpush.msra.mxu1 %v19876_v30  ;;  %v10669_v61 = vadd.f32 %v19948_v19, %v10628_v7  ;;  %v10877_v7 = vadd.f32 %v19998_v22, %v10819_v4  ;;  %v22515_v49 = vand.u32 4294901760, %v20072_v55  ;;  %v8363_v4 = vld [vmem:[%s14937_s16 + $0x5c0] sm:$0xff] }
 0xff6   : > { %12176 = vmatpush.msra.mxu2 %v19858_v21  ;;  %12285 = vmatpush.msra.mxu3 %v12284_v43  ;;  %v20083_v43 = vpop.f32.mrf.mxu1  ;;  %v20098_v3 = vsub.f32 %v8368_v2, %v20069_v10  ;;  %v22512_v2 = vand.u32 4294901760, %v20057_v46  ;;  %22513 = vst [vmem:[#allocation45_spill] sm:$0xff] %v20114_v5  ;;  %v7177_v19 = vadd.f32 %v22514_v1, %v7143_v34  ;;  %v22517_v34 = vperm.slane %v19796_v20, 3 }
 0xff7   : > { %12348 = vmatpush.msra.mxu0 %v19938_v38  ;;  %12393 = vmatpush.msra.mxu1 %v19887_v0  ;;  %v8365_v38 = vld [vmem:[%s14937_s16 + $0x5d0] sm:$0xff]  ;;  %v10995_v60 = vpop.f32.mrf.mxu2  ;;  %v10921_v1 = vadd.f32 %v20012_v28, %v10877_v7 }
 0xff8   : > { %12178 = vmatpush.msra.mxu2 %v19876_v30  ;;  %12291 = vmatpush.msra.mxu3 %v12290_v6  ;;  %22510 = vst [vmem:[#allocation30_spill] sm:$0xff] %v20098_v3  ;;  %v20100_v6 = vand.u32 4294901760, %v8366_v14  ;;  %v12583_v45 = vsub.f32 %v20057_v46, %v22512_v2  ;;  %v20116_v25 = vand.u32 4294901760, %v8365_v38  ;;  %v20125_v37 = vpop.f32.mrf.mxu0  ;;  %v12589_v2 = vsub.f32 %v20072_v55, %v22515_v49  ;;  %v8361_v7 = vld [vmem:[%s14937_s16 + $0x5b0] sm:$0xff] }
 0xff9   : > { %12351 = vmatpush.msra.mxu0 %v19957_v12  ;;  %12395 = vmatpush.msra.mxu1 %v19902_v58  ;;  %v20119_v12 = vand.u32 4294901760, %v8173_v31  ;;  %v12194_v46 = vsub.f32 %v20078_v47, %v12193_v32  ;;  %v10996_v20 = vadd.f32 %v10995_v60, %v10921_v1  ;;  %v20190_v1 = vand.u32 4294901760, %v8361_v7 }
 0xffa   : > { %12180 = vmatpush.msra.mxu2 %v19887_v0  ;;  %12297 = vmatpush.msra.mxu3 %v12296_v36  ;;  %v20107_v36 = vpop.f32.mrf.mxu3  ;;  %v20134_v22 = vsub.f32 %v8366_v14, %v20100_v6  ;;  %v12584_v14 = vand.u32 4294901760, %v12583_v45  ;;  %v20151_v49 = vsub.f32 %v8365_v38, %v20116_v25  ;;  %v12590_v38 = vand.u32 4294901760, %v12589_v2 }
 0xffb   : > { %12354 = vmatpush.msra.mxu0 %v19972_v8  ;;  %12397 = vmatpush.msra.mxu1 %v19921_v17  ;;  %v8364_v8 = vld [vmem:[%s14937_s16 + $0x5c8] sm:$0xff]  ;;  %v22523_v2 = vand.u32 4294901760, %v20114_v5 }
 0xffc   : > { %12182 = vmatpush.msra.mxu2 %v19902_v58  ;;  %12303 = vmatpush.msra.mxu3 %v12302_v18  ;;  %v10718_v18 = vadd.f32 %v10717_v51, %v10669_v61  ;;  %22516 = vst [vmem:[#allocation104_spill] sm:$0xff] %v20134_v22  ;;  %v22518_v61 = vld [vmem:[#allocation47_spill] sm:$0xff] }
 0xffd   : > { %12357 = vmatpush.msra.mxu0 %v19989_v63  ;;  %12399 = vmatpush.msra.mxu1 %v19940_v54  ;;  %v7102_v51 = vadd.f32 %v22518_v61, %v22517_v34  ;;  %v20142_v63 = vand.u32 4294901760, %v8364_v8  ;;  %v22519_v34 = vld [vmem:[#allocation50_spill] sm:$0xff] }
 0xffe   : > { %12305 = vmatmul.f32.vlgmr.msra.gmra.mxu3 %v20043_v23  ;;  %12184 = vmatpush.msra.mxu2 %v19921_v17  ;;  %v20145_v23 = vpop.f32.mrf.mxu1  ;;  %v7209_v61 = vadd.f32 %v22519_v34, %v7177_v19  ;;  %v10823_v45 = vadd.f32 %v20050_v11, %v10718_v18  ;;  %v22520_v19 = vand.u32 4294901760, %v20098_v3  ;;  %v22522_v18 = vld [vmem:[#allocation10_spill] sm:$0xff] }
 0xfff   : > { %12491 = vmatpush.msrb.mxu3 %v19712_v29  ;;  %12360 = vmatpush.msra.mxu0 %v20006_v9  ;;  %v8362_v29 = vld [vmem:[%s14937_s16 + $0x5b8] sm:$0xff]  ;;  %v20159_v9 = vsub.f32 %v8173_v31, %v20119_v12  ;;  %v20173_v31 = vsub.f32 %v8364_v8, %v20142_v63  ;;  %v7147_v34 = vadd.f32 %v22522_v18, %v7102_v51  ;;  %v10999_v55 = vpop.f32.mrf.mxu2  ;;  %v8359_v18 = vld [vmem:[%s14937_s16 + $0x5a0] sm:$0xff] }
0x1000   : > { %12401 = vmatpush.msra.mxu1 %v19959_v50  ;;  %12363 = vmatmul.f32.vlgmr.msra.gmra.mxu0 %v20078_v47  ;;  %v20161_v47 = vand.u32 4294901760, %v8363_v4  ;;  %v12595_v28 = vsub.f32 %v20098_v3, %v22520_v19  ;;  %v20175_v11 = vand.u32 4294901760, %v8362_v29  ;;  %v12601_v19 = vsub.f32 %v20114_v5, %v22523_v2  ;;  %v22524_v3 = vld [vmem:[#allocation60_spill] sm:$0xff]  ;;  %v20210_v2 = vpop.f32.mrf.mxu0  ;;  %v8358_v5 = vld [vmem:[%s14937_s16 + $0x598] sm:$0xff] }
0x1001   : > { %12493 = vmatpush.msrb.mxu3 %v19724_v57  ;;  %12532 = vmatpush.msrb.mxu0 %v20031_v35  ;;  %22521 = vst [vmem:[#allocation33_spill] sm:$0xff] %v20173_v31  ;;  %v7248_v8 = vadd.f32 %v22524_v3, %v7209_v61  ;;  %v12201_v3 = vand.u32 4294901760, %v20159_v9  ;;  %v22525_v61 = vand.u32 4294901760, %v20134_v22  ;;  %v11037_v57 = vadd.f32 %v20107_v36, %v10996_v20 }
0x1002   : > { %12186 = vmatpush.msra.mxu2 %v19940_v54  ;;  %12403 = vmatpush.msra.mxu1 %v19974_v39  ;;  %v20188_v60 = vsub.f32 %v8363_v4, %v20161_v47  ;;  %v20192_v51 = vpop.f32.mrf.mxu3  ;;  %v20225_v36 = vand.u32 4294901760, %v8359_v18 }
0x1003   : > { %12407 = vmatmul.f32.vlgmr.msra.gmra.mxu1 %v12193_v32  ;;  %12495 = vmatpush.msrb.mxu3 %v19738_v56  ;;  %v8360_v32 = vld [vmem:[%s14937_s16 + $0x5a8] sm:$0xff]  ;;  %v12195_v56 = vand.u32 4294901760, %v12194_v46  ;;  %v12596_v46 = vand.u32 4294901760, %v12595_v28 }
0x1004   : > { %12534 = vmatpush.msrb.mxu0 %v20040_v26  ;;  %12585 = vmatpush.msrb.mxu1 %v12584_v14  ;;  %v10882_v14 = vadd.f32 %v20066_v27, %v10823_v45  ;;  %v20205_v27 = vsub.f32 %v8362_v29, %v20175_v11  ;;  %v20207_v45 = vand.u32 4294901760, %v8360_v32  ;;  %v22528_v29 = vand.u32 4294901760, %v19736_v53 }
0x1005   : > { %12188 = vmatpush.msra.mxu2 %v19959_v50  ;;  %12497 = vmatpush.msrb.mxu3 %v19749_v13  ;;  %v12607_v13 = vsub.f32 %v20134_v22, %v22525_v61  ;;  %v12602_v61 = vand.u32 4294901760, %v12601_v19  ;;  %v22527_v22 = vand.u32 4294901760, %v20151_v49 }
0x1006   : > { %12536 = vmatpush.msrb.mxu0 %v20069_v10  ;;  %12591 = vmatpush.msrb.mxu1 %v12590_v38  ;;  %v22526_v38 = vld [vmem:[#allocation66_spill] sm:$0xff]  ;;  %v20230_v19 = vpop.f32.mrf.mxu1 }
0x1007   : > { %12190 = vmatpush.msra.mxu2 %v19974_v39  ;;  %12309 = vmatmul.f32.gmra.mxu3 %v20119_v12  ;;  %v7182_v28 = vadd.f32 %v22526_v38, %v7147_v34  ;;  %v12613_v4 = vsub.f32 %v20151_v49, %v22527_v22  ;;  %v20223_v38 = vsub.f32 %v8361_v7, %v20190_v1  ;;  %v12608_v53 = vand.u32 4294901760, %v12607_v13 }
0x1008   : > { %12196 = vmatmul.f32.vlgmr.msra.gmra.mxu2 %v12195_v56  ;;  %12499 = vmatpush.msrb.mxu3 %v19769_v44  ;;  %v22529_v44 = vld [vmem:[#allocation61_spill] sm:$0xff]  ;;  %v10927_v22 = vadd.f32 %v20083_v43, %v10882_v14  ;;  %v12202_v56 = vsub.f32 %v20159_v9, %v12201_v3  ;;  %v22530_v34 = vand.u32 4294901760, %v19747_v15  ;;  %v22531_v7 = vand.u32 4294901760, %v20173_v31 }
0x1009   : > { %12420 = vmatpush.msrb.mxu2 %v22528_v29  ;;  %12538 = vmatpush.msrb.mxu0 %v20088_v24  ;;  %v20228_v20 = vadd.f32 %v22529_v44, %v7248_v8  ;;  %v8357_v29 = vld [vmem:[%s14937_s16 + $0x590] sm:$0xff]  ;;  %v20244_v43 = vsub.f32 %v8360_v32, %v20207_v45  ;;  %v20246_v14 = vand.u32 4294901760, %v8358_v5  ;;  %v12614_v15 = vand.u32 4294901760, %v12613_v4  ;;  %v8356_v4 = vld [vmem:[%s14937_s16 + $0x588] sm:$0xff] }
0x100a   : > { %12597 = vmatpush.msrb.mxu1 %v12596_v46  ;;  %12368 = vmatmul.f32.gmra.mxu0 %v20159_v9  ;;  %v12619_v8 = vsub.f32 %v20173_v31, %v22531_v7  ;;  %v22532_v46 = vld [vmem:[#allocation63_spill] sm:$0xff]  ;;  %v11000_v13 = vadd.f32 %v10999_v55, %v10927_v22  ;;  %v11248_v7 = vpop.f32.mrf.mxu2  ;;  %v22534_v44 = vand.u32 4294901760, %v20188_v60  ;;  %v20258_v55 = vsub.f32 %v8359_v18, %v20225_v36 }
0x100b   : > { %12424 = vmatpush.msrb.mxu2 %v22530_v34  ;;  %12501 = vmatpush.msrb.mxu3 %v19793_v48  ;;  %v7215_v9 = vadd.f32 %v22532_v46, %v7182_v28  ;;  %v11082_v48 = vadd.f32 %v20125_v37, %v11037_v57  ;;  %v22533_v34 = vand.u32 4294901760, %v19762_v33  ;;  %v20260_v28 = vand.u32 4294901760, %v8357_v29  ;;  %v11292_v57 = vpop.f32.mrf.mxu3 }
0x100c   : > { %12540 = vmatpush.msrb.mxu0 %v20100_v6  ;;  %12603 = vmatpush.msrb.mxu1 %v12602_v61  ;;  %v12625_v32 = vsub.f32 %v20188_v60, %v22534_v44  ;;  %v8158_v37 = vmax.f32 %v20228_v20, 0.0  ;;  %v12203_v33 = vand.u32 4294901760, %v12202_v56  ;;  %v12620_v61 = vand.u32 4294901760, %v12619_v8  ;;  %v8355_v20 = vld [vmem:[%s14937_s16 + $0x580] sm:$0xff]  ;;  %v11367_v56 = vpop.f32.mrf.mxu0 }
0x100d   : > { %12413 = vmatmul.f32.gmra.mxu1 %v12201_v3  ;;  %12428 = vmatpush.msrb.mxu2 %v22533_v34  ;;  %v22535_v3 = vand.u32 4294901760, %v19777_v59  ;;  %v22536_v22 = vand.u32 4294901760, %v20205_v27  ;;  %v12642_v44 = vand.u32 4294901760, %v20244_v43  ;;  %v20273_v46 = vsub.f32 %v8358_v5, %v20246_v14  ;;  %v22537_v34 = vld [vmem:[#allocation64_spill] sm:$0xff] }
0x100e   : > { %12503 = vmatpush.msrb.mxu3 %v19814_v62  ;;  %12542 = vmatpush.msrb.mxu0 %v20116_v25  ;;  %v7252_v62 = vadd.f32 %v22537_v34, %v7215_v9  ;;  %v11041_v31 = vadd.f32 %v20192_v51, %v11000_v13  ;;  %v11191_v59 = vadd.f32 %v20145_v23, %v11082_v48  ;;  %v12626_v8 = vand.u32 4294901760, %v12625_v32 }
0x100f   : > { %12609 = vmatpush.msrb.mxu1 %v12608_v53  ;;  %12432 = vmatpush.msrb.mxu2 %v22535_v3  ;;  %v12631_v18 = vsub.f32 %v20205_v27, %v22536_v22  ;;  %v20281_v53 = vand.u32 4294901760, %v8356_v4  ;;  %v22538_v5 = vand.u32 4294901760, %v20223_v38  ;;  %v12648_v9 = vand.u32 4294901760, %v20258_v55 }
0x1010   : > { %12505 = vmatpush.msrb.mxu3 %v19831_v41  ;;  %12544 = vmatpush.msrb.mxu0 %v20142_v63  ;;  %v20288_v51 = vsub.f32 %v8357_v29, %v20260_v28  ;;  %v20290_v13 = vand.u32 4294901760, %v8158_v37  ;;  %v11408_v41 = vpop.f32.mrf.mxu1  ;;  %v11249_v22 = vadd.f32 %v11248_v7, %v11191_v59  ;;  %v22539_v23 = vand.u32 4294901760, %v19804_v52 }
0x1011   : > { %12615 = vmatpush.msrb.mxu1 %v12614_v15  ;;  %12204 = vmatmul.f32.gmra.mxu2 %v12203_v33  ;;  %v12637_v3 = vsub.f32 %v20223_v38, %v22538_v5  ;;  %v20295_v15 = vand.u32 4294901760, %v8355_v20  ;;  %v12632_v48 = vand.u32 4294901760, %v12631_v18  ;;  %v12643_v29 = vsub.f32 %v20244_v43, %v12642_v44  ;;  %v22540_v33 = vld [vmem:[#allocation65_spill] sm:$0xff] }
0x1012   : > { %12436 = vmatpush.msrb.mxu2 %v22539_v23  ;;  %12507 = vmatpush.msrb.mxu3 %v19858_v21  ;;  %v12654_v32 = vand.u32 4294901760, %v20273_v46  ;;  %v7281_v34 = vadd.f32 %v22540_v33, %v7252_v62  ;;  %v22541_v7 = vand.u32 4294901760, %v19829_v40  ;;  %v20307_v52 = vsub.f32 %v8356_v4, %v20281_v53  ;;  %v22544_v23 = vld [vmem:[#allocation31_spill] sm:$0xff] }
0x1013   : > { %12546 = vmatpush.msrb.mxu0 %v20161_v47  ;;  %12621 = vmatpush.msrb.mxu1 %v12620_v61  ;;  %v12638_v21 = vand.u32 4294901760, %v12637_v3  ;;  %v11090_v61 = vadd.f32 %v20210_v2, %v11041_v31  ;;  %v12649_v18 = vsub.f32 %v20258_v55, %v12648_v9  ;;  %v12660_v62 = vand.u32 4294901760, %v20288_v51  ;;  %v11253_v31 = vpop.f32.mrf.mxu2  ;;  %v11298_v5 = vpop.f32.mrf.mxu3 }
0x1014   : > { %12440 = vmatpush.msrb.mxu2 %v22541_v7  ;;  %12509 = vmatpush.msrb.mxu3 %v19876_v30  ;;  %v20316_v40 = vsub.f32 %v8158_v37, %v20290_v13  ;;  %v11293_v59 = vadd.f32 %v11292_v57, %v11249_v22  ;;  %v22542_v30 = vand.u32 4294901760, %v19850_v16  ;;  %v20322_v4 = vsub.f32 %v8355_v20, %v20295_v15  ;;  %v11371_v22 = vpop.f32.mrf.mxu0 }
0x1015   : > { %12548 = vmatpush.msrb.mxu0 %v20175_v11  ;;  %12627 = vmatpush.msrb.mxu1 %v12626_v8  ;;  %v12644_v2 = vand.u32 4294901760, %v12643_v29  ;;  %v12655_v8 = vsub.f32 %v20273_v46, %v12654_v32  ;;  %v8174_v37 = vmax.f32 %v7281_v34, 0.0  ;;  %v22543_v57 = vand.u32 4294901760, %v19865_v42 }
0x1016   : > { %12444 = vmatpush.msrb.mxu2 %v22542_v30  ;;  %12511 = vmatpush.msrb.mxu3 %v19887_v0  ;;  %v12666_v16 = vand.u32 4294901760, %v20307_v52  ;;  %v11195_v0 = vadd.f32 %v20230_v19, %v11090_v61  ;;  %v12650_v20 = vand.u32 4294901760, %v12649_v18  ;;  %v12661_v3 = vsub.f32 %v20288_v51, %v12660_v62  ;;  %v22548_v18 = vld [vmem:[#allocation43_spill] sm:$0xff] }
0x1017   : > { %12550 = vmatpush.msrb.mxu0 %v20190_v1  ;;  %12633 = vmatpush.msrb.mxu1 %v12632_v48  ;;  %v22545_v48 = vand.u32 4294901760, %v22544_v23  ;;  %v12565_v42 = vand.u32 4294901760, %v20316_v40  ;;  %v11368_v29 = vadd.f32 %v11367_v56, %v11293_v59  ;;  %v12656_v19 = vand.u32 4294901760, %v12655_v8 }
0x1018   : > { %12448 = vmatpush.msrb.mxu2 %v22543_v57  ;;  %12513 = vmatpush.msrb.mxu3 %v19902_v58  ;;  %v12672_v58 = vand.u32 4294901760, %v20322_v4  ;;  %v11254_v33 = vadd.f32 %v11253_v31, %v11195_v0  ;;  %v20343_v34 = vand.u32 4294901760, %v8174_v37  ;;  %v11412_v7 = vpop.f32.mrf.mxu1  ;;  %v12662_v56 = vand.u32 4294901760, %v12661_v3  ;;  %v22550_v57 = vld [vmem:[#allocation91_spill] sm:$0xff] }
0x1019   : > { %12552 = vmatpush.msrb.mxu0 %v20207_v45  ;;  %12639 = vmatpush.msrb.mxu1 %v12638_v21  ;;  %v22546_v21 = vld [vmem:[#allocation41_spill] sm:$0xff]  ;;  %v22549_v59 = vand.u32 4294901760, %v22548_v18  ;;  %v12566_v30 = vsub.f32 %v20316_v40, %v12565_v42  ;;  %v11409_v31 = vadd.f32 %v11408_v41, %v11368_v29  ;;  %v22551_v0 = vand.u32 4294901760, %v22550_v57  ;;  %v22552_v41 = vld [vmem:[#allocation44_spill] sm:$0xff] }
0x101a   : > { %12452 = vmatpush.msrb.mxu2 %v22545_v48  ;;  %12515 = vmatpush.msrb.mxu3 %v19921_v17  ;;  %v22547_v61 = vand.u32 4294901760, %v22546_v21  ;;  %v12667_v17 = vsub.f32 %v20307_v52, %v12666_v16  ;;  %v20366_v3 = vsub.f32 %v8174_v37, %v20343_v34 }
0x101b   : > { %12554 = vmatpush.msrb.mxu0 %v20225_v36  ;;  %12645 = vmatpush.msrb.mxu1 %v12644_v2  ;;  %v11299_v2 = vadd.f32 %v11298_v5, %v11254_v33  ;;  %v22553_v5 = vld [vmem:[#allocation29_spill] sm:$0xff]  ;;  %v12567_v29 = vand.u32 4294901760, %v12566_v30 }
0x101c   : > { %12456 = vmatpush.msrb.mxu2 %v22547_v61  ;;  %12517 = vmatpush.msrb.mxu3 %v19940_v54  ;;  %v12673_v54 = vsub.f32 %v20322_v4, %v12672_v58  ;;  %v22554_v48 = vand.u32 4294901760, %v22553_v5  ;;  %v11620_v33 = vpop.f32.mrf.mxu0  ;;  %v12573_v61 = vand.u32 4294901760, %v20366_v3 }
0x101d   : > { %12556 = vmatpush.msrb.mxu0 %v20246_v14  ;;  %12651 = vmatpush.msrb.mxu1 %v12650_v20  ;;  %v11562_v20 = vpop.f32.mrf.mxu3 }
0x101e   : > { %12460 = vmatpush.msrb.mxu2 %v22549_v59  ;;  %12519 = vmatpush.msrb.mxu3 %v19959_v50  ;;  %v12668_v50 = vand.u32 4294901760, %v12667_v17  ;;  %v22557_v59 = vld [vmem:[#allocation112_spill] sm:$0xff] }
0x101f   : > { %12558 = vmatpush.msrb.mxu0 %v20260_v28  ;;  %12657 = vmatpush.msrb.mxu1 %v12656_v19  ;;  %v11453_v8 = vpop.f32.mrf.mxu2  ;;  %v12674_v19 = vand.u32 4294901760, %v12673_v54  ;;  %v22558_v30 = vand.u32 4294901760, %v22557_v59  ;;  %v8385_v59 = vld [vmem:[%s14937_s16 + $0x670] sm:$0xff] }
0x1020   : > { %12464 = vmatpush.msrb.mxu2 %v22551_v0  ;;  %12521 = vmatpush.msrb.mxu3 %v19974_v39  ;;  %v11454_v23 = vadd.f32 %v11453_v8, %v11409_v31  ;;  %v11372_v39 = vadd.f32 %v11371_v22, %v11299_v2  ;;  %v11664_v37 = vpop.f32.mrf.mxu1  ;;  %v22559_v31 = vld [vmem:[#allocation100_spill] sm:$0xff]  ;;  %v12574_v8 = vsub.f32 %v20366_v3, %v12573_v61  ;;  %v22561_v0 = vld [vmem:[#allocation99_spill] sm:$0xff] }
0x1021   : > { %12560 = vmatpush.msrb.mxu0 %v20281_v53  ;;  %12663 = vmatpush.msrb.mxu1 %v12662_v56  ;;  %v22555_v56 = vld [vmem:[#allocation35_spill] sm:$0xff]  ;;  %v22560_v2 = vand.u32 4294901760, %v22559_v31 }
0x1022   : > { %12523 = vmatmul.f32.vlgmr.msrb.gmra.mxu3 %v22552_v41  ;;  %12468 = vmatpush.msrb.mxu2 %v22554_v48  ;;  %v11563_v21 = vadd.f32 %v11562_v20, %v11454_v23  ;;  %v22556_v18 = vand.u32 4294901760, %v22555_v56  ;;  %v11413_v22 = vadd.f32 %v11412_v7, %v11372_v39  ;;  %v22563_v23 = vld [vmem:[#allocation30_spill] sm:$0xff] }
0x1023   : > { %12745 = vmatpush.msra.mxu3 %v20031_v35  ;;  %12562 = vmatpush.msrb.mxu0 %v20295_v15  ;;  %v22564_v5 = vand.u32 4294901760, %v22563_v23  ;;  %v22565_v48 = vld [vmem:[#allocation98_spill] sm:$0xff] }
0x1024   : > { %12669 = vmatpush.msrb.mxu1 %v12668_v50  ;;  %12568 = vmatmul.f32.vlgmr.msrb.gmra.mxu0 %v12567_v29  ;;  %v11621_v17 = vadd.f32 %v11620_v33, %v11563_v21  ;;  %v22562_v50 = vand.u32 4294901760, %v22561_v0  ;;  %v22566_v29 = vand.u32 4294901760, %v22565_v48  ;;  %v12575_v33 = vand.u32 4294901760, %v12574_v8  ;;  %v22567_v21 = vld [vmem:[#allocation45_spill] sm:$0xff] }
0x1025   : > { %12747 = vmatpush.msra.mxu3 %v20040_v26  ;;  %12792 = vmatpush.msra.mxu0 %v22556_v18  ;;  %v11566_v7 = vpop.f32.mrf.mxu3  ;;  %v22568_v39 = vand.u32 4294901760, %v22567_v21  ;;  %v22574_v8 = vand.u32 4294901760, %v20188_v60 }
0x1026   : > { %12472 = vmatpush.msrb.mxu2 %v22558_v30  ;;  %12675 = vmatpush.msrb.mxu1 %v12674_v19  ;;  %v20380_v54 = vadd.f32 %v11664_v37, %v11621_v17  ;;  %v11625_v19 = vpop.f32.mrf.mxu0  ;;  %v22569_v17 = vld [vmem:[#allocation104_spill] sm:$0xff] }
0x1027   : > { %12677 = vmatmul.f32.vlgmr.msrb.gmra.mxu1 %v20290_v13  ;;  %12749 = vmatpush.msra.mxu3 %v20069_v10  ;;  %v22570_v18 = vand.u32 4294901760, %v22569_v17 }
0x1028   : > { %12796 = vmatpush.msra.mxu0 %v22560_v2  ;;  %12863 = vmatpush.msra.mxu1 %v20031_v35  ;;  %v11461_v57 = vpop.f32.mrf.mxu2  ;;  %v11670_v37 = vpop.f32.mrf.mxu1  ;;  %v20429_v2 = vand.u32 4294901760, %v8385_v59 }
0x1029   : > { %12476 = vmatpush.msrb.mxu2 %v22562_v50  ;;  %12751 = vmatpush.msra.mxu3 %v20088_v24  ;;  %v11462_v20 = vadd.f32 %v11461_v57, %v11413_v22 }
0x102a   : > { %12800 = vmatpush.msra.mxu0 %v22564_v5  ;;  %12865 = vmatpush.msra.mxu1 %v20040_v26  ;;  %v8381_v5 = vld [vmem:[%s14937_s16 + $0x650] sm:$0xff] }
0x102b   : > { %12480 = vmatpush.msrb.mxu2 %v22566_v29  ;;  %12527 = vmatmul.f32.gmra.mxu3 %v20119_v12  ;;  %v11567_v35 = vadd.f32 %v11566_v7, %v11462_v20  ;;  %v20484_v48 = vand.u32 4294901760, %v8381_v5  ;;  %v8379_v29 = vld [vmem:[%s14937_s16 + $0x640] sm:$0xff] }
0x102c   : > { %12482 = vmatmul.f32.vlgmr.msrb.gmra.mxu2 %v22552_v41  ;;  %12753 = vmatpush.msra.mxu3 %v20100_v6 }
0x102d   : > { %12687 = vmatpush.msra.mxu2 %v22555_v56  ;;  %12804 = vmatpush.msra.mxu0 %v22568_v39  ;;  %v11626_v26 = vadd.f32 %v11625_v19, %v11567_v35  ;;  %v8386_v56 = vld [vmem:[%s14937_s16 + $0x678] sm:$0xff]  ;;  %v20493_v35 = vld [vmem:[%s14931_s19 + $0x8] sm:$0xff]  ;;  %v20514_v19 = vsub.f32 %v8381_v5, %v20484_v48 }
0x102e   : > { %12867 = vmatpush.msra.mxu1 %v20069_v10  ;;  %12576 = vmatmul.f32.gmra.mxu0 %v12575_v33  ;;  %v22571_v10 = vand.u32 4294901760, %v20151_v49  ;;  %v20421_v30 = vand.u32 4294901760, %v8386_v56  ;;  %22577 = vst [vmem:[#allocation111_spill] sm:$0xff] %v20493_v35 }
0x102f   : > { %12690 = vmatpush.msra.mxu2 %v22559_v31  ;;  %12755 = vmatpush.msra.mxu3 %v20116_v25  ;;  %v20407_v41 = vadd.f32 %v11670_v37, %v11626_v26  ;;  %v8384_v31 = vld [vmem:[%s14937_s16 + $0x668] sm:$0xff] }
0x1030   : > { %12808 = vmatpush.msra.mxu0 %v22570_v18  ;;  %12869 = vmatpush.msra.mxu1 %v20088_v24  ;;  %v22572_v24 = vld [vmem:[#allocation33_spill] sm:$0xff]  ;;  %v20438_v57 = vsub.f32 %v8386_v56, %v20421_v30  ;;  %v20440_v0 = vand.u32 4294901760, %v8384_v31  ;;  %v22578_v37 = vld [vmem:[#allocation72_spill] sm:$0xff] }
0x1031   : > { %12681 = vmatmul.f32.gmra.mxu1 %v20343_v34  ;;  %12693 = vmatpush.msra.mxu2 %v22563_v23  ;;  %v22573_v22 = vand.u32 4294901760, %v22572_v24 }
0x1032   : > { %12757 = vmatpush.msra.mxu3 %v20142_v63  ;;  %12812 = vmatpush.msra.mxu0 %v22571_v10  ;;  %v21945_v20 = vand.u32 4294901760, %v20438_v57  ;;  %v8377_v10 = vld [vmem:[%s14937_s16 + $0x630] sm:$0xff] }
0x1033   : > { %12871 = vmatpush.msra.mxu1 %v20100_v6  ;;  %12696 = vmatpush.msra.mxu2 %v22567_v21  ;;  %v8383_v6 = vld [vmem:[%s14937_s16 + $0x660] sm:$0xff]  ;;  %v20516_v21 = vand.u32 4294901760, %v8379_v29 }
0x1034   : > { %12759 = vmatpush.msra.mxu3 %v20161_v47  ;;  %12816 = vmatpush.msra.mxu0 %v22573_v22  ;;  %v20450_v50 = vand.u32 4294901760, %v8383_v6 }
0x1035   : > { %12873 = vmatpush.msra.mxu1 %v20116_v25  ;;  %12486 = vmatmul.f32.gmra.mxu2 %v20119_v12  ;;  %v22575_v12 = vand.u32 4294901760, %v20205_v27  ;;  %v20448_v25 = vsub.f32 %v8385_v59, %v20429_v2  ;;  %v20545_v22 = vsub.f32 %v8379_v29, %v20516_v21 }
0x1036   : > { %12699 = vmatpush.msra.mxu2 %v22569_v17  ;;  %12761 = vmatpush.msra.mxu3 %v20175_v11  ;;  %v20472_v7 = vsub.f32 %v8383_v6, %v20450_v50  ;;  %v20553_v6 = vand.u32 4294901760, %v8377_v10 }
0x1037   : > { %12820 = vmatpush.msra.mxu0 %v22574_v8  ;;  %12875 = vmatpush.msra.mxu1 %v20142_v63  ;;  %v8382_v63 = vld [vmem:[%s14937_s16 + $0x658] sm:$0xff]  ;;  %v22579_v8 = vld [vmem:[#allocation15_spill] sm:$0xff] }
0x1038   : > { %12702 = vmatpush.msra.mxu2 %v20151_v49  ;;  %12763 = vmatpush.msra.mxu3 %v20190_v1  ;;  %v22576_v49 = vand.u32 4294901760, %v20223_v38  ;;  %v20464_v23 = vand.u32 4294901760, %v8382_v63 }
0x1039   : > { %12824 = vmatpush.msra.mxu0 %v22575_v12  ;;  %12877 = vmatpush.msra.mxu1 %v20161_v47  ;;  %v20460_v47 = vsub.f32 %v8384_v31, %v20440_v0  ;;  %v8376_v31 = vld [vmem:[%s14937_s16 + $0x628] sm:$0xff] }
0x103a   : > { %12705 = vmatpush.msra.mxu2 %v22572_v24  ;;  %12765 = vmatpush.msra.mxu3 %v20207_v45  ;;  %v21940_v24 = vand.u32 4294901760, %v20514_v19 }
0x103b   : > { %12828 = vmatpush.msra.mxu0 %v22576_v49  ;;  %12879 = vmatpush.msra.mxu1 %v20175_v11  ;;  %v21944_v11 = vand.u32 4294901760, %v20448_v25 }
0x103c   : > { %12708 = vmatpush.msra.mxu2 %v20188_v60  ;;  %12767 = vmatpush.msra.mxu3 %v20225_v36  ;;  %v8380_v60 = vld [vmem:[%s14937_s16 + $0x648] sm:$0xff]  ;;  %v12985_v29 = vsub.f32 %v20514_v19, %v21940_v24 }
0x103d   : > { %12832 = vmatpush.msra.mxu0 %v12642_v44  ;;  %12881 = vmatpush.msra.mxu1 %v20190_v1  ;;  %v12955_v44 = vsub.f32 %v20438_v57, %v21945_v20  ;;  %v21943_v1 = vand.u32 4294901760, %v20460_v47  ;;  %v20503_v33 = vand.u32 4294901760, %v8380_v60  ;;  %v22601_v20 = vld [vmem:[#allocation70_spill] sm:$0xff] }
0x103e   : > { %12711 = vmatpush.msra.mxu2 %v20205_v27  ;;  %12769 = vmatpush.msra.mxu3 %v20246_v14  ;;  %v20489_v27 = vsub.f32 %v8382_v63, %v20464_v23 }
0x103f   : > { %12836 = vmatpush.msra.mxu0 %v12648_v9  ;;  %12883 = vmatpush.msra.mxu1 %v20207_v45  ;;  %v4665_v45 = vperm.slane %v20493_v35, 4  ;;  %v21942_v9 = vand.u32 4294901760, %v20472_v7  ;;  %v20533_v56 = vsub.f32 %v8380_v60, %v20503_v33  ;;  %v20564_v60 = vand.u32 4294901760, %v8376_v31 }
0x1040   : > { %12714 = vmatpush.msra.mxu2 %v20223_v38  ;;  %12771 = vmatpush.msra.mxu3 %v20260_v28  ;;  %v12961_v38 = vsub.f32 %v20448_v25, %v21944_v11 }
0x1041   : > { %12840 = vmatpush.msra.mxu0 %v12654_v32  ;;  %12885 = vmatpush.msra.mxu1 %v20225_v36  ;;  %v12956_v32 = vand.u32 4294901760, %v12955_v44  ;;  %v12967_v36 = vsub.f32 %v20460_v47, %v21943_v1  ;;  %v7310_v17 = vadd.f32 %v22578_v37, %v4665_v45  ;;  %v21939_v49 = vand.u32 4294901760, %v20533_v56  ;;  %v8373_v37 = vld [vmem:[%s14937_s16 + $0x610] sm:$0xff] }
0x1042   : > { %12717 = vmatpush.msra.mxu2 %v20244_v43  ;;  %12773 = vmatpush.msra.mxu3 %v20281_v53  ;;  %v8378_v43 = vld [vmem:[%s14937_s16 + $0x638] sm:$0xff]  ;;  %v12962_v18 = vand.u32 4294901760, %v12961_v38  ;;  %v21938_v38 = vand.u32 4294901760, %v20545_v22 }
0x1043   : > { %12844 = vmatpush.msra.mxu0 %v12660_v62  ;;  %12887 = vmatpush.msra.mxu1 %v20246_v14  ;;  %v11739_v39 = vpop.f32.mrf.mxu2  ;;  %v11780_v62 = vpop.f32.mrf.mxu3  ;;  %v21941_v14 = vand.u32 4294901760, %v20489_v27  ;;  %v7359_v12 = vadd.f32 %v22579_v8, %v7310_v17 }
0x1044   : > { %12720 = vmatpush.msra.mxu2 %v20258_v55  ;;  %12775 = vmatpush.msra.mxu3 %v20295_v15  ;;  %v11740_v26 = vadd.f32 %v11739_v39, %v20380_v54  ;;  %v12973_v55 = vsub.f32 %v20472_v7, %v21942_v9  ;;  %v11825_v54 = vpop.f32.mrf.mxu0  ;;  %v22580_v39 = vld [vmem:[#allocation69_spill] sm:$0xff] }
0x1045   : > { %12848 = vmatpush.msra.mxu0 %v12666_v16  ;;  %12889 = vmatpush.msra.mxu1 %v20260_v28  ;;  %v20539_v16 = vand.u32 4294901760, %v8378_v43  ;;  %v12968_v28 = vand.u32 4294901760, %v12967_v36 }
0x1046   : > { %12779 = vmatmul.f32.vlgmr.msra.gmra.mxu3 %v12565_v42  ;;  %12723 = vmatpush.msra.mxu2 %v20273_v46  ;;  %v11781_v59 = vadd.f32 %v11780_v62, %v11740_v26  ;;  %v11934_v46 = vpop.f32.mrf.mxu1  ;;  %v12979_v42 = vsub.f32 %v20489_v27, %v21941_v14  ;;  %v12974_v63 = vand.u32 4294901760, %v12973_v55  ;;  %v12991_v62 = vsub.f32 %v20533_v56, %v21939_v49  ;;  %v22598_v49 = vld [vmem:[#allocation77_spill] sm:$0xff] }
0x1047   : > { %12957 = vmatpush.msrb.mxu3 %v12956_v32  ;;  %12852 = vmatpush.msra.mxu0 %v12672_v58  ;;  %v20562_v5 = vsub.f32 %v8378_v43, %v20539_v16  ;;  %v20577_v32 = vsub.f32 %v8377_v10, %v20553_v6  ;;  %v7393_v43 = vadd.f32 %v22580_v39, %v7359_v12  ;;  %v22581_v10 = vld [vmem:[#allocation16_spill] sm:$0xff]  ;;  %v8371_v12 = vld [vmem:[%s14937_s16 + $0x600] sm:$0xff]  ;;  %v22583_v39 = vld [vmem:[#allocation73_spill] sm:$0xff] }
0x1048   : > { %12891 = vmatpush.msra.mxu1 %v20281_v53  ;;  %12854 = vmatmul.f32.vlgmr.msra.gmra.mxu0 %v20290_v13  ;;  %v11826_v58 = vadd.f32 %v11825_v54, %v11781_v59  ;;  %v8375_v53 = vld [vmem:[%s14937_s16 + $0x620] sm:$0xff]  ;;  %v20592_v55 = vsub.f32 %v8376_v31, %v20564_v60  ;;  %v7318_v54 = vadd.f32 %v22581_v10, %v4665_v45  ;;  %v8372_v31 = vld [vmem:[%s14937_s16 + $0x608] sm:$0xff]  ;;  %v12992_v8 = vand.u32 4294901760, %v12991_v62  ;;  %v22584_v62 = vld [vmem:[#allocation78_spill] sm:$0xff] }
0x1049   : > { %12963 = vmatpush.msrb.mxu3 %v12962_v18  ;;  %13059 = vmatpush.msrb.mxu0 %v20438_v57  ;;  %v20579_v36 = vand.u32 4294901760, %v8375_v53  ;;  %v21937_v18 = vand.u32 4294901760, %v20562_v5  ;;  %v12997_v59 = vsub.f32 %v20545_v22, %v21938_v38 }
0x104a   : > { %12726 = vmatpush.msra.mxu2 %v20288_v51  ;;  %12893 = vmatpush.msra.mxu1 %v20295_v15  ;;  %v20566_v44 = vadd.f32 %v11934_v46, %v11826_v58  ;;  %v8374_v51 = vld [vmem:[%s14937_s16 + $0x618] sm:$0xff]  ;;  %v12980_v15 = vand.u32 4294901760, %v12979_v42  ;;  %v21935_v42 = vand.u32 4294901760, %v20577_v32  ;;  %v22582_v58 = vld [vmem:[#allocation71_spill] sm:$0xff] }
0x104b   : > { %12895 = vmatmul.f32.vlgmr.msra.gmra.mxu1 %v20290_v13  ;;  %12969 = vmatpush.msrb.mxu3 %v12968_v28  ;;  %v11784_v17 = vpop.f32.mrf.mxu3  ;;  %v20609_v45 = vsub.f32 %v8375_v53, %v20579_v36  ;;  %v13003_v53 = vsub.f32 %v20562_v5, %v21937_v18 }
0x104c   : > { %13062 = vmatpush.msrb.mxu0 %v20448_v25  ;;  %13117 = vmatpush.msrb.mxu1 %v20421_v30  ;;  %v11743_v13 = vpop.f32.mrf.mxu2  ;;  %v11833_v46 = vpop.f32.mrf.mxu0 }
0x104d   : > { %12729 = vmatpush.msra.mxu2 %v20307_v52  ;;  %12975 = vmatpush.msrb.mxu3 %v12974_v63  ;;  %v11744_v26 = vadd.f32 %v11743_v13, %v20407_v41  ;;  %v20594_v52 = vand.u32 4294901760, %v8374_v51  ;;  %v12986_v41 = vand.u32 4294901760, %v12985_v29  ;;  %v21934_v29 = vand.u32 4294901760, %v20592_v55 }
0x104e   : > { %13065 = vmatpush.msrb.mxu0 %v20460_v47  ;;  %13119 = vmatpush.msrb.mxu1 %v20429_v2  ;;  %v20626_v13 = vand.u32 4294901760, %v8372_v31 }
0x104f   : > { %12732 = vmatpush.msra.mxu2 %v20322_v4  ;;  %12785 = vmatmul.f32.gmra.mxu3 %v12573_v61  ;;  %v11785_v28 = vadd.f32 %v11784_v17, %v11744_v26  ;;  %v20611_v4 = vand.u32 4294901760, %v8373_v37  ;;  %v7425_v61 = vadd.f32 %v22582_v58, %v7393_v43  ;;  %v7363_v43 = vadd.f32 %v22583_v39, %v7318_v54 }
0x1050   : > { %12735 = vmatmul.f32.vlgmr.msra.gmra.mxu2 %v20316_v40  ;;  %12981 = vmatpush.msrb.mxu3 %v12980_v15  ;;  %v11938_v40 = vpop.f32.mrf.mxu1  ;;  %v20624_v15 = vsub.f32 %v8374_v51, %v20594_v52  ;;  %v12998_v17 = vand.u32 4294901760, %v12997_v59  ;;  %v13009_v51 = vsub.f32 %v20577_v32, %v21935_v42  ;;  %v13015_v59 = vsub.f32 %v20592_v55, %v21934_v29 }
0x1051   : > { %12904 = vmatpush.msrb.mxu2 %v20421_v30  ;;  %13068 = vmatpush.msrb.mxu0 %v20472_v7  ;;  %v11834_v63 = vadd.f32 %v11833_v46, %v11785_v28  ;;  %v7464_v26 = vadd.f32 %v22584_v62, %v7425_v61  ;;  %v21931_v28 = vand.u32 4294901760, %v20609_v45  ;;  %v20640_v54 = vsub.f32 %v8373_v37, %v20611_v4  ;;  %v22587_v61 = vld [vmem:[#allocation17_spill] sm:$0xff] }
0x1052   : > { %13121 = vmatpush.msrb.mxu1 %v20440_v0  ;;  %12858 = vmatmul.f32.gmra.mxu0 %v20343_v34  ;;  %v20642_v46 = vand.u32 4294901760, %v8371_v12  ;;  %v21930_v58 = vand.u32 4294901760, %v20624_v15  ;;  %v20652_v37 = vsub.f32 %v8372_v31, %v20626_v13  ;;  %v13016_v62 = vand.u32 4294901760, %v13015_v59 }
0x1053   : > { %12906 = vmatpush.msrb.mxu2 %v20429_v2  ;;  %12987 = vmatpush.msrb.mxu3 %v12986_v41  ;;  %v20631_v10 = vadd.f32 %v11938_v40, %v11834_v63  ;;  %22585 = vst [vmem:[#allocation26_spill] sm:$0xff] %v20640_v54  ;;  %v13004_v41 = vand.u32 4294901760, %v13003_v53  ;;  %v7493_v63 = vadd.f32 %v22587_v61, %v7464_v26  ;;  %v22588_v40 = vld [vmem:[#allocation74_spill] sm:$0xff]  ;;  %v21932_v31 = vand.u32 4294901760, %v20640_v54 }
0x1054   : > { %13071 = vmatpush.msrb.mxu0 %v20489_v27  ;;  %13123 = vmatpush.msrb.mxu1 %v20450_v50  ;;  %22586 = vst [vmem:[#allocation113_spill] sm:$0xff] %v20652_v37  ;;  %v13021_v53 = vsub.f32 %v20609_v45, %v21931_v28  ;;  %v20664_v39 = vsub.f32 %v8371_v12, %v20642_v46 }
0x1055   : > { %12899 = vmatmul.f32.gmra.mxu1 %v20343_v34  ;;  %12908 = vmatpush.msrb.mxu2 %v20440_v0  ;;  %v7398_v34 = vadd.f32 %v22588_v40, %v7363_v43  ;;  %v8402_v43 = vld [vmem:[%s14937_s16 + $0x6f8] sm:$0xff]  ;;  %v13027_v26 = vsub.f32 %v20624_v15, %v21930_v58  ;;  %v8159_v61 = vmax.f32 %v7493_v63, 0.0  ;;  %v22590_v40 = vld [vmem:[#allocation75_spill] sm:$0xff]  ;;  %v22591_v63 = vld [vmem:[#allocation68_spill] sm:$0xff] }
0x1056   : > { %12993 = vmatpush.msrb.mxu3 %v12992_v8  ;;  %13074 = vmatpush.msrb.mxu0 %v20514_v19  ;;  %v13010_v8 = vand.u32 4294901760, %v13009_v51  ;;  %22589 = vst [vmem:[#allocation114_spill] sm:$0xff] %v20664_v39  ;;  %v8401_v51 = vld [vmem:[%s14937_s16 + $0x6f0] sm:$0xff]  ;;  %v21936_v59 = vand.u32 4294901760, %v20664_v39  ;;  %v20683_v58 = vand.u32 4294901760, %v8402_v43 }
0x1057   : > { %13125 = vmatpush.msrb.mxu1 %v20464_v23  ;;  %12910 = vmatpush.msrb.mxu2 %v20450_v50  ;;  %v7431_v12 = vadd.f32 %v22590_v40, %v7398_v34  ;;  %v20688_v34 = vand.u32 4294901760, %v8401_v51  ;;  %v21946_v40 = vperm.slane %v20493_v35, 5 }
0x1058   : > { %12999 = vmatpush.msrb.mxu3 %v12998_v17  ;;  %13077 = vmatpush.msrb.mxu0 %v20533_v56  ;;  %v21933_v17 = vand.u32 4294901760, %v20652_v37 }
0x1059   : > { %13127 = vmatpush.msrb.mxu1 %v20484_v48  ;;  %12740 = vmatmul.f32.gmra.mxu2 %v20366_v3  ;;  %v13022_v3 = vand.u32 4294901760, %v13021_v53  ;;  %v7468_v28 = vadd.f32 %v22591_v63, %v7431_v12  ;;  %v8400_v12 = vld [vmem:[%s14937_s16 + $0x6e8] sm:$0xff]  ;;  %v20713_v42 = vsub.f32 %v8401_v51, %v20688_v34  ;;  %v8398_v51 = vld [vmem:[%s14937_s16 + $0x6d8] sm:$0xff] }
0x105a   : > { %12912 = vmatpush.msrb.mxu2 %v20464_v23  ;;  %13005 = vmatpush.msrb.mxu3 %v13004_v41  ;;  %v13033_v41 = vsub.f32 %v20640_v54, %v21932_v31  ;;  %v13039_v53 = vsub.f32 %v20652_v37, %v21933_v17  ;;  %v20695_v31 = vand.u32 4294901760, %v8159_v61  ;;  %v22593_v17 = vld [vmem:[#allocation79_spill] sm:$0xff] }
0x105b   : > { %13080 = vmatpush.msrb.mxu0 %v20545_v22  ;;  %13129 = vmatpush.msrb.mxu1 %v20503_v33  ;;  %v20708_v29 = vadd.f32 %v22593_v17, %v7468_v28  ;;  %22594 = vst [vmem:[#allocation118_spill] sm:$0xff] %v20713_v42 }
0x105c   : > { %12914 = vmatpush.msrb.mxu2 %v20484_v48  ;;  %13011 = vmatpush.msrb.mxu3 %v13010_v8  ;;  %v13028_v8 = vand.u32 4294901760, %v13027_v26  ;;  %v13034_v63 = vand.u32 4294901760, %v13033_v41  ;;  %v20705_v26 = vsub.f32 %v8402_v43, %v20683_v58  ;;  %v13040_v41 = vand.u32 4294901760, %v13039_v53  ;;  %v22596_v43 = vld [vmem:[#allocation76_spill] sm:$0xff] }
0x105d   : > { %13083 = vmatpush.msrb.mxu0 %v20562_v5  ;;  %13131 = vmatpush.msrb.mxu1 %v20516_v21  ;;  %v7526_v28 = vadd.f32 %v22596_v43, %v21946_v40  ;;  %v20723_v17 = vsub.f32 %v8159_v61, %v20695_v31  ;;  %v8175_v38 = vmax.f32 %v20708_v29, 0.0  ;;  %v21952_v61 = vand.u32 4294901760, %v20713_v42  ;;  %v8397_v43 = vld [vmem:[%s14937_s16 + $0x6d0] sm:$0xff]  ;;  %v8396_v29 = vld [vmem:[%s14937_s16 + $0x6c8] sm:$0xff] }
0x105e   : > { %12916 = vmatpush.msrb.mxu2 %v20503_v33  ;;  %13017 = vmatpush.msrb.mxu3 %v13016_v62  ;;  %v13045_v62 = vsub.f32 %v20664_v39, %v21936_v59  ;;  %22592 = vst [vmem:[#allocation115_spill] sm:$0xff] %v20705_v26  ;;  %v20717_v59 = vand.u32 4294901760, %v8400_v12  ;;  %v21947_v53 = vand.u32 4294901760, %v20705_v26 }
0x105f   : > { %13086 = vmatpush.msrb.mxu0 %v20577_v32  ;;  %13133 = vmatpush.msrb.mxu1 %v20539_v16  ;;  %v7575_v24 = vadd.f32 %v22598_v49, %v7526_v28  ;;  %v12937_v14 = vand.u32 4294901760, %v20723_v17  ;;  %v20755_v49 = vand.u32 4294901760, %v8397_v43  ;;  %v20758_v11 = vand.u32 4294901760, %v8175_v38 }
0x1060   : > { %12918 = vmatpush.msrb.mxu2 %v20516_v21  ;;  %13023 = vmatpush.msrb.mxu3 %v13022_v3  ;;  %v8399_v3 = vld [vmem:[%s14937_s16 + $0x6e0] sm:$0xff]  ;;  %22595 = vst [vmem:[#allocation34_spill] sm:$0xff] %v20717_v59 }
0x1061   : > { %13089 = vmatpush.msrb.mxu0 %v20592_v55  ;;  %13135 = vmatpush.msrb.mxu1 %v20553_v6  ;;  %v20730_v18 = vand.u32 4294901760, %v8399_v3  ;;  %22600 = vst [vmem:[#allocation22_spill] sm:$0xff] %v20758_v11  ;;  %v7609_v40 = vadd.f32 %v22601_v20, %v7575_v24  ;;  %v20772_v20 = vand.u32 4294901760, %v8396_v29 }
0x1062   : > { %12920 = vmatpush.msrb.mxu2 %v20539_v16  ;;  %13029 = vmatpush.msrb.mxu3 %v13028_v8  ;;  %v13046_v8 = vand.u32 4294901760, %v13045_v62  ;;  %v20741_v62 = vand.u32 4294901760, %v8398_v51 }
0x1063   : > { %13092 = vmatpush.msrb.mxu0 %v20609_v45  ;;  %13137 = vmatpush.msrb.mxu1 %v20564_v60  ;;  %v20753_v1 = vsub.f32 %v8399_v3, %v20730_v18  ;;  %v12111_v3 = vpop.f32.mrf.mxu0 }
0x1064   : > { %12922 = vmatpush.msrb.mxu2 %v20553_v6  ;;  %13035 = vmatpush.msrb.mxu3 %v13034_v63  ;;  %v20739_v63 = vsub.f32 %v8400_v12, %v20717_v59  ;;  %v13327_v12 = vsub.f32 %v20705_v26, %v21947_v53  ;;  %v8395_v53 = vld [vmem:[%s14937_s16 + $0x6c0] sm:$0xff] }
0x1065   : > { %13095 = vmatpush.msrb.mxu0 %v20624_v15  ;;  %13139 = vmatpush.msrb.mxu1 %v20579_v36  ;;  %22599 = vst [vmem:[#allocation27_spill] sm:$0xff] %v20753_v1 }
0x1066   : > { %12924 = vmatpush.msrb.mxu2 %v20564_v60  ;;  %13041 = vmatpush.msrb.mxu3 %v13040_v41  ;;  %22597 = vst [vmem:[#allocation116_spill] sm:$0xff] %v20739_v63  ;;  %v12036_v41 = vpop.f32.mrf.mxu3 }
0x1067   : > { %13098 = vmatpush.msrb.mxu0 %v20640_v54  ;;  %13141 = vmatpush.msrb.mxu1 %v20594_v52  ;;  %v11992_v9 = vpop.f32.mrf.mxu2  ;;  %v22604_v54 = vld [vmem:[#allocation67_spill] sm:$0xff] }
0x1068   : > { %12926 = vmatpush.msrb.mxu2 %v20579_v36  ;;  %13047 = vmatpush.msrb.mxu3 %v13046_v8  ;;  %v11993_v28 = vadd.f32 %v11992_v9, %v20566_v44  ;;  %v13333_v8 = vsub.f32 %v20713_v42, %v21952_v61  ;;  %v20770_v44 = vsub.f32 %v8398_v51, %v20741_v62  ;;  %v13328_v51 = vand.u32 4294901760, %v13327_v12  ;;  %v12152_v9 = vpop.f32.mrf.mxu1 }
0x1069   : > { %13101 = vmatpush.msrb.mxu0 %v20652_v37  ;;  %13143 = vmatpush.msrb.mxu1 %v20611_v4  ;;  %v22603_v37 = vperm.slane %v20493_v35, 5  ;;  %v12938_v61 = vsub.f32 %v20723_v17, %v12937_v14  ;;  %v8394_v35 = vld [vmem:[%s14937_s16 + $0x6b8] sm:$0xff] }
0x106a   : > { %13049 = vmatmul.f32.vlgmr.msrb.gmra.mxu3 %v20695_v31  ;;  %12928 = vmatpush.msrb.mxu2 %v20594_v52  ;;  %22602 = vst [vmem:[#allocation32_spill] sm:$0xff] %v20770_v44  ;;  %v12037_v24 = vadd.f32 %v12036_v41, %v11993_v28  ;;  %v20785_v28 = vsub.f32 %v8397_v43, %v20755_v49  ;;  %v22606_v43 = vand.u32 4294901760, %v20739_v63 }
0x106b   : > { %v7534_v26 = vadd.f32 %v22604_v54, %v22603_v37  ;;  %13235 = vmatpush.msra.mxu3 %v20421_v30  ;;  %13104 = vmatpush.msrb.mxu0 %v20664_v39  ;;  %v22605_v37 = vld [vmem:[#allocation80_spill] sm:$0xff]  ;;  %v13334_v30 = vand.u32 4294901760, %v13333_v8  ;;  %v20792_v39 = vsub.f32 %v8175_v38, %v20758_v11  ;;  %v8393_v8 = vld [vmem:[%s14937_s16 + $0x6b0] sm:$0xff]  ;;  %v20809_v38 = vand.u32 4294901760, %v8394_v35 }
0x106c   : > { %13145 = vmatpush.msrb.mxu1 %v20626_v13  ;;  %13107 = vmatmul.f32.vlgmr.msrb.gmra.mxu0 %v20723_v17  ;;  %v12112_v54 = vadd.f32 %v12111_v3, %v12037_v24  ;;  %v7641_v42 = vadd.f32 %v22605_v37, %v7609_v40  ;;  %v20794_v17 = vand.u32 4294901760, %v8395_v53  ;;  %v13339_v12 = vsub.f32 %v20739_v63, %v22606_v43  ;;  %v22607_v24 = vld [vmem:[#allocation14_spill] sm:$0xff] }
0x106d   : > { %13237 = vmatpush.msra.mxu3 %v20429_v2  ;;  %13276 = vmatpush.msra.mxu0 %v20683_v58  ;;  %v20803_v2 = vsub.f32 %v8396_v29, %v20772_v20  ;;  %v7579_v37 = vadd.f32 %v22607_v24, %v7534_v26  ;;  %v12939_v41 = vand.u32 4294901760, %v12938_v61  ;;  %v22608_v43 = vand.u32 4294901760, %v20753_v1 }
0x106e   : > { %12930 = vmatpush.msrb.mxu2 %v20611_v4  ;;  %13147 = vmatpush.msrb.mxu1 %v20642_v46  ;;  %v20806_v3 = vadd.f32 %v12152_v9, %v12112_v54  ;;  %v8392_v9 = vld [vmem:[%s14937_s16 + $0x6a8] sm:$0xff]  ;;  %v20824_v26 = vand.u32 4294901760, %v8393_v8  ;;  %v12945_v24 = vand.u32 4294901760, %v20792_v39 }
0x106f   : > { %13151 = vmatmul.f32.vlgmr.msrb.gmra.mxu1 %v12937_v14  ;;  %13239 = vmatpush.msra.mxu3 %v20440_v0  ;;  %v13345_v40 = vsub.f32 %v20753_v1, %v22608_v43  ;;  %v22609_v14 = vld [vmem:[#allocation81_spill] sm:$0xff]  ;;  %v20822_v0 = vsub.f32 %v8395_v53, %v20794_v17  ;;  %v22610_v43 = vand.u32 4294901760, %v20770_v44  ;;  %v8391_v53 = vld [vmem:[%s14937_s16 + $0x6a0] sm:$0xff] }
0x1070   : > { %13278 = vmatpush.msra.mxu0 %v20688_v34  ;;  %13329 = vmatpush.msra.mxu1 %v13328_v51  ;;  %v11997_v54 = vpop.f32.mrf.mxu2  ;;  %v7680_v63 = vadd.f32 %v22609_v14, %v7641_v42  ;;  %v13340_v51 = vand.u32 4294901760, %v13339_v12  ;;  %v12042_v14 = vpop.f32.mrf.mxu3 }
0x1071   : > { %12932 = vmatpush.msrb.mxu2 %v20626_v13  ;;  %13241 = vmatpush.msra.mxu3 %v20450_v50  ;;  %v11998_v61 = vadd.f32 %v11997_v54, %v20631_v10  ;;  %v13351_v42 = vsub.f32 %v20770_v44, %v22610_v43  ;;  %v20837_v10 = vsub.f32 %v8394_v35, %v20809_v38  ;;  %v22611_v54 = vld [vmem:[#allocation83_spill] sm:$0xff]  ;;  %v13346_v43 = vand.u32 4294901760, %v13345_v40  ;;  %v12115_v44 = vpop.f32.mrf.mxu0  ;;  %v22614_v40 = vld [vmem:[#allocation82_spill] sm:$0xff]  ;;  %v8389_v35 = vld [vmem:[%s14937_s16 + $0x690] sm:$0xff] }
0x1072   : > { %13280 = vmatpush.msra.mxu0 %v20717_v59  ;;  %13335 = vmatpush.msra.mxu1 %v13334_v30  ;;  %v20839_v30 = vand.u32 4294901760, %v8392_v9  ;;  %v7614_v29 = vadd.f32 %v22611_v54, %v7579_v37  ;;  %v22612_v50 = vand.u32 4294901760, %v20785_v28  ;;  %v8390_v59 = vld [vmem:[%s14937_s16 + $0x698] sm:$0xff]  ;;  %v20852_v37 = vsub.f32 %v8393_v8, %v20824_v26 }
0x1073   : > { %12934 = vmatpush.msrb.mxu2 %v20642_v46  ;;  %13053 = vmatmul.f32.gmra.mxu3 %v20758_v11  ;;  %v12043_v12 = vadd.f32 %v12042_v14, %v11998_v61  ;;  %v22613_v11 = vand.u32 4294901760, %v20438_v57  ;;  %v20857_v61 = vadd.f32 %v22614_v40, %v7680_v63  ;;  %v13352_v14 = vand.u32 4294901760, %v13351_v42 }
0x1074   : > { %12940 = vmatmul.f32.vlgmr.msrb.gmra.mxu2 %v12939_v41  ;;  %13243 = vmatpush.msra.mxu3 %v20464_v23  ;;  %v13357_v1 = vsub.f32 %v20785_v28, %v22612_v50  ;;  %v20854_v41 = vand.u32 4294901760, %v8391_v53  ;;  %v12156_v50 = vpop.f32.mrf.mxu1  ;;  %v12946_v57 = vsub.f32 %v20792_v39, %v12945_v24  ;;  %v22616_v8 = vand.u32 4294901760, %v20448_v25 }
0x1075   : > { %13164 = vmatpush.msra.mxu2 %v22613_v11  ;;  %13282 = vmatpush.msra.mxu0 %v20730_v18  ;;  %v12116_v23 = vadd.f32 %v12115_v44, %v12043_v12  ;;  %v22615_v11 = vand.u32 4294901760, %v20803_v2  ;;  %v13374_v63 = vand.u32 4294901760, %v20837_v10  ;;  %v20870_v44 = vsub.f32 %v8392_v9, %v20839_v30 }
0x1076   : > { %13341 = vmatpush.msra.mxu1 %v13340_v51  ;;  %13112 = vmatmul.f32.gmra.mxu0 %v20792_v39  ;;  %v20872_v51 = vand.u32 4294901760, %v8390_v59  ;;  %v22617_v39 = vld [vmem:[#allocation84_spill] sm:$0xff]  ;;  %v13358_v40 = vand.u32 4294901760, %v13357_v1  ;;  %v22618_v25 = vand.u32 4294901760, %v20460_v47  ;;  %v12947_v47 = vand.u32 4294901760, %v12946_v57 }
0x1077   : > { %v13363_v54 = vsub.f32 %v20803_v2, %v22615_v11  ;;  %13168 = vmatpush.msra.mxu2 %v22616_v8  ;;  %13245 = vmatpush.msra.mxu3 %v20484_v48  ;;  %v20874_v42 = vadd.f32 %v12156_v50, %v12116_v23  ;;  %v7647_v12 = vadd.f32 %v22617_v39, %v7614_v29  ;;  %v22619_v48 = vand.u32 4294901760, %v20822_v0  ;;  %v8388_v29 = vld [vmem:[%s14937_s16 + $0x688] sm:$0xff] }
0x1078   : > { %13284 = vmatpush.msra.mxu0 %v20741_v62  ;;  %13347 = vmatpush.msra.mxu1 %v13346_v43  ;;  %v13380_v11 = vand.u32 4294901760, %v20852_v37  ;;  %v20885_v23 = vsub.f32 %v8391_v53, %v20854_v41  ;;  %v20887_v50 = vand.u32 4294901760, %v8389_v35  ;;  %v8160_v43 = vmax.f32 %v20857_v61, 0.0  ;;  %v8387_v61 = vld [vmem:[%s14937_s16 + $0x680] sm:$0xff] }
0x1079   : > { %13157 = vmatmul.f32.gmra.mxu1 %v12945_v24  ;;  %13172 = vmatpush.msra.mxu2 %v22618_v25  ;;  %v13369_v9 = vsub.f32 %v20822_v0, %v22619_v48  ;;  %v22620_v1 = vand.u32 4294901760, %v20472_v7  ;;  %v13364_v24 = vand.u32 4294901760, %v13363_v54  ;;  %v13375_v53 = vsub.f32 %v20837_v10, %v13374_v63  ;;  %v22621_v25 = vld [vmem:[#allocation85_spill] sm:$0xff] }
0x107a   : > { %13247 = vmatpush.msra.mxu3 %v20503_v33  ;;  %13286 = vmatpush.msra.mxu0 %v20755_v49  ;;  %v13386_v8 = vand.u32 4294901760, %v20870_v44  ;;  %v20900_v39 = vsub.f32 %v8390_v59, %v20872_v51  ;;  %v7684_v33 = vadd.f32 %v22621_v25, %v7647_v12  ;;  %v13381_v57 = vsub.f32 %v20852_v37, %v13380_v11 }
0x107b   : > { %13353 = vmatpush.msra.mxu1 %v13352_v14  ;;  %13176 = vmatpush.msra.mxu2 %v22620_v1  ;;  %v20906_v14 = vand.u32 4294901760, %v8388_v29  ;;  %v13370_v7 = vand.u32 4294901760, %v13369_v9  ;;  %v13392_v54 = vand.u32 4294901760, %v20885_v23  ;;  %v20913_v59 = vsub.f32 %v8389_v35, %v20887_v50 }
0x107c   : > { %13249 = vmatpush.msra.mxu3 %v20516_v21  ;;  %13288 = vmatpush.msra.mxu0 %v20772_v20  ;;  %v20915_v48 = vand.u32 4294901760, %v8160_v43  ;;  %v22622_v21 = vand.u32 4294901760, %v20489_v27  ;;  %v20920_v12 = vand.u32 4294901760, %v8387_v61  ;;  %v13387_v9 = vsub.f32 %v20870_v44, %v13386_v8 }
0x107d   : > { %13359 = vmatpush.msra.mxu1 %v13358_v40  ;;  %12948 = vmatmul.f32.gmra.mxu2 %v12947_v47  ;;  %v13376_v40 = vand.u32 4294901760, %v13375_v53  ;;  %v13398_v35 = vand.u32 4294901760, %v20900_v39  ;;  %v22623_v47 = vld [vmem:[#allocation86_spill] sm:$0xff]  ;;  %v22624_v25 = vand.u32 4294901760, %v20514_v19  ;;  %v20932_v27 = vsub.f32 %v8388_v29, %v20906_v14 }
0x107e   : > { %13180 = vmatpush.msra.mxu2 %v22622_v21  ;;  %13251 = vmatpush.msra.mxu3 %v20539_v16  ;;  %v7713_v1 = vadd.f32 %v22623_v47, %v7684_v33  ;;  %v13382_v16 = vand.u32 4294901760, %v13381_v57  ;;  %v13404_v53 = vand.u32 4294901760, %v20913_v59  ;;  %v20940_v33 = vsub.f32 %v8160_v43, %v20915_v48 }
0x107f   : > { %13290 = vmatpush.msra.mxu0 %v20794_v17  ;;  %13365 = vmatpush.msra.mxu1 %v13364_v24  ;;  %v13393_v24 = vsub.f32 %v20885_v23, %v13392_v54  ;;  %v22625_v19 = vand.u32 4294901760, %v20533_v56  ;;  %v13388_v29 = vand.u32 4294901760, %v13387_v9  ;;  %v22626_v43 = vand.u32 4294901760, %v20545_v22 }
0x1080   : > { %13184 = vmatpush.msra.mxu2 %v22624_v25  ;;  %13253 = vmatpush.msra.mxu3 %v20553_v6  ;;  %v20946_v6 = vsub.f32 %v8387_v61, %v20920_v12  ;;  %v8176_v57 = vmax.f32 %v7713_v1, 0.0  ;;  %v13410_v56 = vand.u32 4294901760, %v20932_v27  ;;  %v13405_v61 = vsub.f32 %v20913_v59, %v13404_v53 }
0x1081   : > { %13292 = vmatpush.msra.mxu0 %v20809_v38  ;;  %13371 = vmatpush.msra.mxu1 %v13370_v7  ;;  %v13399_v7 = vsub.f32 %v20900_v39, %v13398_v35  ;;  %v22627_v21 = vand.u32 4294901760, %v20562_v5  ;;  %v13309_v22 = vand.u32 4294901760, %v20940_v33  ;;  %v22628_v47 = vand.u32 4294901760, %v20577_v32 }
0x1082   : > { %13188 = vmatpush.msra.mxu2 %v22625_v19  ;;  %13255 = vmatpush.msra.mxu3 %v20564_v60  ;;  %v13394_v60 = vand.u32 4294901760, %v13393_v24  ;;  %v20966_v9 = vand.u32 4294901760, %v8176_v57  ;;  %v13411_v5 = vsub.f32 %v20932_v27, %v13410_v56  ;;  %v22629_v1 = vand.u32 4294901760, %v20592_v55  ;;  %v12306_v24 = vpop.f32.mrf.mxu3 }
0x1083   : > { %13294 = vmatpush.msra.mxu0 %v20824_v26  ;;  %13377 = vmatpush.msra.mxu1 %v13376_v40  ;;  %v13416_v40 = vand.u32 4294901760, %v20946_v6  ;;  %v13310_v32 = vsub.f32 %v20940_v33, %v13309_v22 }
0x1084   : > { %13192 = vmatpush.msra.mxu2 %v22626_v43  ;;  %13257 = vmatpush.msra.mxu3 %v20579_v36  ;;  %v13400_v36 = vand.u32 4294901760, %v13399_v7  ;;  %v13412_v55 = vand.u32 4294901760, %v13411_v5  ;;  %v22637_v5 = vld [vmem:[#allocation34_spill] sm:$0xff] }
0x1085   : > { %13296 = vmatpush.msra.mxu0 %v20839_v30  ;;  %13383 = vmatpush.msra.mxu1 %v13382_v16  ;;  %v22630_v16 = vand.u32 4294901760, %v20609_v45  ;;  %v13311_v7 = vand.u32 4294901760, %v13310_v32  ;;  %v12364_v45 = vpop.f32.mrf.mxu0 }
0x1086   : > { %13196 = vmatpush.msra.mxu2 %v22627_v21  ;;  %13259 = vmatpush.msra.mxu3 %v20594_v52  ;;  %v13406_v52 = vand.u32 4294901760, %v13405_v61  ;;  %v22632_v61 = vld [vmem:[#allocation115_spill] sm:$0xff] }
0x1087   : > { %13298 = vmatpush.msra.mxu0 %v20854_v41  ;;  %13389 = vmatpush.msra.mxu1 %v13388_v29  ;;  %v22631_v29 = vand.u32 4294901760, %v20624_v15  ;;  %v22633_v21 = vand.u32 4294901760, %v22632_v61  ;;  %v22634_v15 = vld [vmem:[#allocation26_spill] sm:$0xff] }
0x1088   : > { %13200 = vmatpush.msra.mxu2 %v22628_v47  ;;  %13261 = vmatpush.msra.mxu3 %v20611_v4  ;;  %v13417_v4 = vsub.f32 %v20946_v6, %v13416_v40 }
0x1089   : > { %13300 = vmatpush.msra.mxu0 %v20872_v51  ;;  %13395 = vmatpush.msra.mxu1 %v13394_v60 }
0x108a   : > { %13204 = vmatpush.msra.mxu2 %v22629_v1  ;;  %13263 = vmatpush.msra.mxu3 %v20626_v13  ;;  %v20989_v13 = vsub.f32 %v8176_v57, %v20966_v9  ;;  %v13418_v43 = vand.u32 4294901760, %v13417_v4 }
0x108b   : > { %13302 = vmatpush.msra.mxu0 %v20887_v50  ;;  %13401 = vmatpush.msra.mxu1 %v13400_v36  ;;  %v12197_v25 = vpop.f32.mrf.mxu2  ;;  %v22635_v36 = vand.u32 4294901760, %v22634_v15  ;;  %v22650_v15 = vld [vmem:[#allocation32_spill] sm:$0xff] }
0x108c   : > { %13208 = vmatpush.msra.mxu2 %v22630_v16  ;;  %13265 = vmatpush.msra.mxu3 %v20642_v46  ;;  %v12198_v19 = vadd.f32 %v12197_v25, %v20806_v3  ;;  %v12408_v46 = vpop.f32.mrf.mxu1  ;;  %v13317_v3 = vand.u32 4294901760, %v20989_v13  ;;  %v22640_v25 = vld [vmem:[#allocation113_spill] sm:$0xff] }
0x108d   : > { %13304 = vmatpush.msra.mxu0 %v20906_v14  ;;  %13407 = vmatpush.msra.mxu1 %v13406_v52  ;;  %v22638_v52 = vld [vmem:[#allocation118_spill] sm:$0xff]  ;;  %v22641_v16 = vand.u32 4294901760, %v22640_v25  ;;  %v22654_v25 = vand.u32 4294901760, %v20822_v0 }
0x108e   : > { %13267 = vmatmul.f32.vlgmr.msra.gmra.mxu3 %v20695_v31  ;;  %13212 = vmatpush.msra.mxu2 %v22631_v29  ;;  %v12307_v60 = vadd.f32 %v12306_v24, %v12198_v19  ;;  %v22639_v1 = vand.u32 4294901760, %v22638_v52  ;;  %v13318_v32 = vsub.f32 %v20989_v13, %v13317_v3  ;;  %v22642_v24 = vld [vmem:[#allocation116_spill] sm:$0xff]  ;;  %v12310_v29 = vpop.f32.mrf.mxu3 }
0x108f   : > { %13489 = vmatpush.msrb.mxu3 %v20683_v58  ;;  %13306 = vmatpush.msra.mxu0 %v20920_v12  ;;  %v22643_v19 = vand.u32 4294901760, %v22642_v24 }
0x1090   : > { %13413 = vmatpush.msra.mxu1 %v13412_v55  ;;  %13312 = vmatmul.f32.vlgmr.msra.gmra.mxu0 %v13311_v7  ;;  %v12365_v57 = vadd.f32 %v12364_v45, %v12307_v60  ;;  %v22644_v7 = vld [vmem:[#allocation114_spill] sm:$0xff]  ;;  %v13319_v60 = vand.u32 4294901760, %v13318_v32  ;;  %v8416_v32 = vld [vmem:[%s14937_s16 + $0x768] sm:$0xff] }
0x1091   : > { %13491 = vmatpush.msrb.mxu3 %v20688_v34  ;;  %13536 = vmatpush.msrb.mxu0 %v22633_v21  ;;  %v22646_v45 = vld [vmem:[#allocation22_spill] sm:$0xff] }
0x1092   : > { %13216 = vmatpush.msra.mxu2 %v22635_v36  ;;  %13419 = vmatpush.msra.mxu1 %v13418_v43  ;;  %v21004_v47 = vadd.f32 %v12408_v46, %v12365_v57  ;;  %v12369_v46 = vpop.f32.mrf.mxu0  ;;  %v22651_v36 = vand.u32 4294901760, %v22650_v15 }
0x1093   : > { %13421 = vmatmul.f32.vlgmr.msra.gmra.mxu1 %v20915_v48  ;;  %13493 = vmatpush.msrb.mxu3 %v22637_v5 }
0x1094   : > { %22636 = vst [vmem:[#allocation37_spill] sm:$0xff] %v21004_v47  ;;  %13540 = vmatpush.msrb.mxu0 %v22639_v1  ;;  %13607 = vmatpush.msrb.mxu1 %v20683_v58  ;;  %v12205_v4 = vpop.f32.mrf.mxu2  ;;  %v22645_v58 = vand.u32 4294901760, %v22644_v7  ;;  %v12414_v21 = vpop.f32.mrf.mxu1  ;;  %v22678_v47 = vld [vmem:[#allocation107_spill] sm:$0xff] }
0x1095   : > { %13220 = vmatpush.msra.mxu2 %v22641_v16  ;;  %13495 = vmatpush.msrb.mxu3 %v20730_v18  ;;  %v12206_v55 = vadd.f32 %v12205_v4, %v20874_v42  ;;  %v22647_v42 = vld [vmem:[#allocation27_spill] sm:$0xff] }
0x1096   : > { %13544 = vmatpush.msrb.mxu0 %v22643_v19  ;;  %13609 = vmatpush.msrb.mxu1 %v20688_v34  ;;  %v22648_v57 = vand.u32 4294901760, %v22647_v42 }
0x1097   : > { %13224 = vmatpush.msra.mxu2 %v22645_v58  ;;  %13271 = vmatmul.f32.gmra.mxu3 %v22646_v45  ;;  %v12311_v43 = vadd.f32 %v12310_v29, %v12206_v55  ;;  %v21065_v55 = vand.u32 4294901760, %v8416_v32  ;;  %v8411_v29 = vld [vmem:[%s14937_s16 + $0x740] sm:$0xff] }
0x1098   : > { %13226 = vmatmul.f32.vlgmr.msra.gmra.mxu2 %v20695_v31  ;;  %13497 = vmatpush.msrb.mxu3 %v20741_v62 }
0x1099   : > { %13431 = vmatpush.msrb.mxu2 %v22632_v61  ;;  %13548 = vmatpush.msrb.mxu0 %v22648_v57  ;;  %v12370_v34 = vadd.f32 %v12369_v46, %v12311_v43  ;;  %v8418_v61 = vld [vmem:[%s14937_s16 + $0x778] sm:$0xff]  ;;  %v21138_v43 = vand.u32 4294901760, %v8411_v29  ;;  %v22656_v57 = vld [vmem:[#allocation87_spill] sm:$0xff] }
0x109a   : > { %13611 = vmatpush.msrb.mxu1 %v22637_v5  ;;  %13320 = vmatmul.f32.gmra.mxu0 %v13319_v60  ;;  %v22652_v5 = vand.u32 4294901760, %v20785_v28  ;;  %v21046_v1 = vand.u32 4294901760, %v8418_v61  ;;  %v8410_v60 = vld [vmem:[%s14937_s16 + $0x738] sm:$0xff] }
0x109b   : > { %13434 = vmatpush.msrb.mxu2 %v22638_v52  ;;  %13499 = vmatpush.msrb.mxu3 %v20755_v49  ;;  %v21032_v31 = vadd.f32 %v12414_v21, %v12370_v34  ;;  %v8417_v52 = vld [vmem:[%s14937_s16 + $0x770] sm:$0xff]  ;;  %v21164_v21 = vsub.f32 %v8411_v29, %v21138_v43 }
0x109c   : > { %13552 = vmatpush.msrb.mxu0 %v22651_v36  ;;  %13613 = vmatpush.msrb.mxu1 %v20730_v18  ;;  %v22653_v18 = vand.u32 4294901760, %v20803_v2  ;;  %v21054_v4 = vand.u32 4294901760, %v8417_v52  ;;  %v21063_v16 = vsub.f32 %v8418_v61, %v21046_v1  ;;  %v8407_v61 = vld [vmem:[%s14937_s16 + $0x720] sm:$0xff] }
0x109d   : > { %22649 = vst [vmem:[#allocation39_spill] sm:$0xff] %v21032_v31  ;;  %13425 = vmatmul.f32.gmra.mxu1 %v20966_v9  ;;  %13437 = vmatpush.msrb.mxu2 %v22642_v24 }
0x109e   : > { %13501 = vmatpush.msrb.mxu3 %v20772_v20  ;;  %13556 = vmatpush.msrb.mxu0 %v22652_v5 }
0x109f   : > { %13615 = vmatpush.msrb.mxu1 %v20741_v62  ;;  %13440 = vmatpush.msrb.mxu2 %v22647_v42  ;;  %v8415_v62 = vld [vmem:[%s14937_s16 + $0x760] sm:$0xff]  ;;  %v8409_v42 = vld [vmem:[%s14937_s16 + $0x730] sm:$0xff] }
0x10a0   : > { %13503 = vmatpush.msrb.mxu3 %v20794_v17  ;;  %13560 = vmatpush.msrb.mxu0 %v22653_v18  ;;  %v21075_v24 = vand.u32 4294901760, %v8415_v62 }
0x10a1   : > { %13617 = vmatpush.msrb.mxu1 %v20755_v49  ;;  %13230 = vmatmul.f32.gmra.mxu2 %v22646_v45  ;;  %v21073_v49 = vsub.f32 %v8417_v52, %v21054_v4  ;;  %v22657_v52 = vld [vmem:[#allocation88_spill] sm:$0xff] }
0x10a2   : > { %13443 = vmatpush.msrb.mxu2 %v22650_v15  ;;  %13505 = vmatpush.msrb.mxu3 %v20809_v38  ;;  %v8408_v15 = vld [vmem:[%s14937_s16 + $0x728] sm:$0xff] }
0x10a3   : > { %13564 = vmatpush.msrb.mxu0 %v22654_v25  ;;  %13619 = vmatpush.msrb.mxu1 %v20772_v20  ;;  %v8414_v20 = vld [vmem:[%s14937_s16 + $0x758] sm:$0xff]  ;;  %v21182_v5 = vand.u32 4294901760, %v8408_v15 }
0x10a4   : > { %13446 = vmatpush.msrb.mxu2 %v20785_v28  ;;  %13507 = vmatpush.msrb.mxu3 %v20824_v26  ;;  %v21983_v28 = vand.u32 4294901760, %v21063_v16 }
0x10a5   : > { %13568 = vmatpush.msrb.mxu0 %v13374_v63  ;;  %13621 = vmatpush.msrb.mxu1 %v20794_v17  ;;  %v21085_v17 = vsub.f32 %v8416_v32, %v21065_v55  ;;  %v21089_v63 = vand.u32 4294901760, %v8414_v20 }
0x10a6   : > { %13449 = vmatpush.msrb.mxu2 %v20803_v2  ;;  %13509 = vmatpush.msrb.mxu3 %v20839_v30  ;;  %v8413_v2 = vld [vmem:[%s14937_s16 + $0x750] sm:$0xff] }
0x10a7   : > { %13572 = vmatpush.msrb.mxu0 %v13380_v11  ;;  %13623 = vmatpush.msrb.mxu1 %v20809_v38  ;;  %v21982_v38 = vand.u32 4294901760, %v21073_v49  ;;  %v21097_v11 = vsub.f32 %v8415_v62, %v21075_v24  ;;  %v21109_v19 = vand.u32 4294901760, %v8413_v2  ;;  %v21975_v62 = vand.u32 4294901760, %v21164_v21 }
0x10a8   : > { %13452 = vmatpush.msrb.mxu2 %v20822_v0  ;;  %13511 = vmatpush.msrb.mxu3 %v20854_v41  ;;  %v8412_v0 = vld [vmem:[%s14937_s16 + $0x748] sm:$0xff] }
0x10a9   : > { %13576 = vmatpush.msrb.mxu0 %v13386_v8  ;;  %13625 = vmatpush.msrb.mxu1 %v20824_v26  ;;  %v13699_v8 = vsub.f32 %v21063_v16, %v21983_v28  ;;  %v21980_v26 = vand.u32 4294901760, %v21085_v17  ;;  %v21124_v7 = vand.u32 4294901760, %v8412_v0  ;;  %v21136_v45 = vsub.f32 %v8413_v2, %v21109_v19  ;;  %v8405_v2 = vld [vmem:[%s14937_s16 + $0x710] sm:$0xff] }
0x10aa   : > { %13455 = vmatpush.msrb.mxu2 %v20837_v10  ;;  %13513 = vmatpush.msrb.mxu3 %v20872_v51  ;;  %v21114_v10 = vsub.f32 %v8414_v20, %v21089_v63  ;;  %v21196_v20 = vand.u32 4294901760, %v8407_v61 }
0x10ab   : > { %13580 = vmatpush.msrb.mxu0 %v13392_v54  ;;  %13627 = vmatpush.msrb.mxu1 %v20839_v30  ;;  %v13705_v30 = vsub.f32 %v21073_v49, %v21982_v38  ;;  %v21979_v54 = vand.u32 4294901760, %v21097_v11  ;;  %v21151_v46 = vsub.f32 %v8412_v0, %v21124_v7  ;;  %v21977_v34 = vand.u32 4294901760, %v21136_v45 }
0x10ac   : > { %13458 = vmatpush.msrb.mxu2 %v20852_v37  ;;  %13515 = vmatpush.msrb.mxu3 %v20887_v50  ;;  %v22655_v37 = vld [vmem:[#allocation111_spill] sm:$0xff] }
0x10ad   : > { %13584 = vmatpush.msrb.mxu0 %v13398_v35  ;;  %13629 = vmatpush.msrb.mxu1 %v20854_v41  ;;  %v4667_v58 = vperm.slane %v22655_v37, 6  ;;  %v13700_v41 = vand.u32 4294901760, %v13699_v8  ;;  %v13711_v35 = vsub.f32 %v21085_v17, %v21980_v26  ;;  %v21976_v36 = vand.u32 4294901760, %v21151_v46  ;;  %v22659_v37 = vld [vmem:[#allocation89_spill] sm:$0xff] }
0x10ae   : > { %13461 = vmatpush.msrb.mxu2 %v20870_v44  ;;  %13517 = vmatpush.msrb.mxu3 %v20906_v14  ;;  %v21978_v44 = vand.u32 4294901760, %v21114_v10  ;;  %v13729_v32 = vsub.f32 %v21136_v45, %v21977_v34  ;;  %v21207_v8 = vsub.f32 %v8408_v15, %v21182_v5  ;;  %v22660_v15 = vld [vmem:[#allocation93_spill] sm:$0xff] }
0x10af   : > { %13588 = vmatpush.msrb.mxu0 %v13404_v53  ;;  %13631 = vmatpush.msrb.mxu1 %v20872_v51  ;;  %v13706_v51 = vand.u32 4294901760, %v13705_v30  ;;  %v13717_v53 = vsub.f32 %v21097_v11, %v21979_v54  ;;  %v22658_v30 = vld [vmem:[#allocation92_spill] sm:$0xff]  ;;  %v22672_v34 = vld [vmem:[#allocation97_spill] sm:$0xff] }
0x10b0   : > { %13464 = vmatpush.msrb.mxu2 %v20885_v23  ;;  %13519 = vmatpush.msrb.mxu3 %v20920_v12  ;;  %v21157_v23 = vand.u32 4294901760, %v8410_v60 }
0x10b1   : > { %13592 = vmatpush.msrb.mxu0 %v13410_v56  ;;  %13633 = vmatpush.msrb.mxu1 %v20887_v50  ;;  %v7742_v56 = vadd.f32 %v22656_v57, %v4667_v58  ;;  %v13712_v50 = vand.u32 4294901760, %v13711_v35  ;;  %v13730_v35 = vand.u32 4294901760, %v13729_v32  ;;  %v21971_v57 = vand.u32 4294901760, %v21207_v8 }
0x10b2   : > { %13523 = vmatmul.f32.vlgmr.msrb.gmra.mxu3 %v13309_v22  ;;  %13467 = vmatpush.msrb.mxu2 %v20900_v39  ;;  %v13723_v39 = vsub.f32 %v21114_v10, %v21978_v44  ;;  %v21172_v22 = vand.u32 4294901760, %v8409_v42  ;;  %v8428_v44 = vld [vmem:[%s14937_s16 + $0x7c8] sm:$0xff] }
0x10b3   : > { %13701 = vmatpush.msra.mxu3 %v13700_v41  ;;  %13596 = vmatpush.msrb.mxu0 %v13416_v40  ;;  %v13718_v40 = vand.u32 4294901760, %v13717_v53  ;;  %v7791_v18 = vadd.f32 %v22657_v52, %v7742_v56 }
0x10b4   : > { %13635 = vmatpush.msrb.mxu1 %v20906_v14  ;;  %13598 = vmatmul.f32.vlgmr.msrb.gmra.mxu0 %v20915_v48  ;;  %v21180_v14 = vsub.f32 %v8410_v60, %v21157_v23  ;;  %v21194_v25 = vsub.f32 %v8409_v42, %v21172_v22  ;;  %v13741_v60 = vsub.f32 %v21164_v21, %v21975_v62  ;;  %v21225_v42 = vand.u32 4294901760, %v8405_v2 }
0x10b5   : > { %13707 = vmatpush.msra.mxu3 %v13706_v51  ;;  %13803 = vmatpush.msra.mxu0 %v21063_v16  ;;  %v7825_v41 = vadd.f32 %v22659_v37, %v7791_v18  ;;  %v8404_v51 = vld [vmem:[%s14937_s16 + $0x708] sm:$0xff]  ;;  %v13759_v37 = vsub.f32 %v21207_v8, %v21971_v57  ;;  %v22669_v57 = vld [vmem:[#allocation102_spill] sm:$0xff] }
0x10b6   : > { %13470 = vmatpush.msrb.mxu2 %v20913_v59  ;;  %13637 = vmatpush.msrb.mxu1 %v20920_v12  ;;  %v8406_v59 = vld [vmem:[%s14937_s16 + $0x718] sm:$0xff]  ;;  %v13724_v12 = vand.u32 4294901760, %v13723_v39  ;;  %v21974_v0 = vand.u32 4294901760, %v21180_v14  ;;  %v21972_v53 = vand.u32 4294901760, %v21194_v25  ;;  %v13742_v52 = vand.u32 4294901760, %v13741_v60 }
0x10b7   : > { %13639 = vmatmul.f32.vlgmr.msrb.gmra.mxu1 %v20915_v48  ;;  %13713 = vmatpush.msra.mxu3 %v13712_v50  ;;  %v13735_v48 = vsub.f32 %v21151_v46, %v21976_v36  ;;  %v21209_v29 = vand.u32 4294901760, %v8406_v59  ;;  %v21239_v50 = vand.u32 4294901760, %v8404_v51 }
0x10b8   : > { %13806 = vmatpush.msra.mxu0 %v21073_v49  ;;  %13861 = vmatpush.msra.mxu1 %v21046_v1  ;;  %v13753_v18 = vsub.f32 %v21194_v25, %v21972_v53 }
0x10b9   : > { %13473 = vmatpush.msrb.mxu2 %v20932_v27  ;;  %13719 = vmatpush.msra.mxu3 %v13718_v40  ;;  %v7750_v27 = vadd.f32 %v22658_v30, %v4667_v58  ;;  %v21223_v58 = vsub.f32 %v8407_v61, %v21196_v20  ;;  %v21237_v56 = vsub.f32 %v8406_v59, %v21209_v29  ;;  %v22661_v40 = vld [vmem:[#allocation90_spill] sm:$0xff] }
0x10ba   : > { %13809 = vmatpush.msra.mxu0 %v21085_v17  ;;  %13863 = vmatpush.msra.mxu1 %v21054_v4  ;;  %v7857_v61 = vadd.f32 %v22661_v40, %v7825_v41  ;;  %v21251_v59 = vsub.f32 %v8405_v2, %v21225_v42  ;;  %v21264_v41 = vsub.f32 %v8404_v51, %v21239_v50  ;;  %v8434_v40 = vld [vmem:[%s14937_s16 + $0x7f8] sm:$0xff] }
0x10bb   : > { %13476 = vmatpush.msrb.mxu2 %v20946_v6  ;;  %13529 = vmatmul.f32.gmra.mxu3 %v13317_v3  ;;  %v13736_v6 = vand.u32 4294901760, %v13735_v48  ;;  %v8403_v3 = vld [vmem:[%s14937_s16 + $0x700] sm:$0xff]  ;;  %v7795_v39 = vadd.f32 %v22660_v15, %v7750_v27  ;;  %v21970_v32 = vand.u32 4294901760, %v21223_v58  ;;  %v21968_v2 = vand.u32 4294901760, %v21237_v56  ;;  %v22666_v15 = vld [vmem:[#allocation96_spill] sm:$0xff] }
0x10bc   : > { %13479 = vmatmul.f32.vlgmr.msrb.gmra.mxu2 %v20940_v33  ;;  %13725 = vmatpush.msra.mxu3 %v13724_v12  ;;  %v13747_v33 = vsub.f32 %v21180_v14, %v21974_v0  ;;  %v21253_v12 = vand.u32 4294901760, %v8403_v3  ;;  %v22662_v48 = vld [vmem:[#allocation95_spill] sm:$0xff]  ;;  %22663 = vst [vmem:[#allocation24_spill] sm:$0xff] %v21264_v41 }
0x10bd   : > { %13648 = vmatpush.msra.mxu2 %v21046_v1  ;;  %13812 = vmatpush.msra.mxu0 %v21097_v11  ;;  %v7896_v30 = vadd.f32 %v22662_v48, %v7857_v61  ;;  %v13760_v61 = vand.u32 4294901760, %v13759_v37  ;;  %v22667_v48 = vld [vmem:[#allocation18_spill] sm:$0xff] }
0x10be   : > { %13865 = vmatpush.msra.mxu1 %v21065_v55  ;;  %13602 = vmatmul.f32.gmra.mxu0 %v20966_v9  ;;  %v13748_v27 = vand.u32 4294901760, %v13747_v33  ;;  %v21967_v33 = vand.u32 4294901760, %v21251_v59  ;;  %v21275_v51 = vsub.f32 %v8403_v3, %v21253_v12 }
0x10bf   : > { %13650 = vmatpush.msra.mxu2 %v21054_v4  ;;  %13731 = vmatpush.msra.mxu3 %v13730_v35  ;;  %v22664_v35 = vld [vmem:[#allocation94_spill] sm:$0xff] }
0x10c0   : > { %13815 = vmatpush.msra.mxu0 %v21114_v10  ;;  %13867 = vmatpush.msra.mxu1 %v21075_v24  ;;  %v7830_v60 = vadd.f32 %v22664_v35, %v7795_v39  ;;  %22665 = vst [vmem:[#allocation46_spill] sm:$0xff] %v21275_v51  ;;  %v7925_v39 = vadd.f32 %v22666_v15, %v7896_v30  ;;  %v8433_v30 = vld [vmem:[%s14937_s16 + $0x7f0] sm:$0xff]  ;;  %v21973_v37 = vand.u32 4294901760, %v21275_v51  ;;  %v21295_v35 = vand.u32 4294901760, %v8434_v40 }
0x10c1   : > { %13643 = vmatmul.f32.gmra.mxu1 %v20966_v9  ;;  %13652 = vmatpush.msra.mxu2 %v21065_v55  ;;  %v13754_v9 = vand.u32 4294901760, %v13753_v18  ;;  %v21969_v18 = vand.u32 4294901760, %v21264_v41  ;;  %v22668_v15 = vld [vmem:[#allocation101_spill] sm:$0xff] }
0x10c2   : > { %13737 = vmatpush.msra.mxu3 %v13736_v6  ;;  %13818 = vmatpush.msra.mxu0 %v21136_v45  ;;  %v13765_v6 = vsub.f32 %v21223_v58, %v21970_v32  ;;  %v7863_v3 = vadd.f32 %v22667_v48, %v7830_v60  ;;  %v8161_v60 = vmax.f32 %v7925_v39, 0.0  ;;  %v8431_v32 = vld [vmem:[%s14937_s16 + $0x7e0] sm:$0xff] }
0x10c3   : > { %13869 = vmatpush.msra.mxu1 %v21089_v63  ;;  %13654 = vmatpush.msra.mxu2 %v21075_v24 }
0x10c4   : > { %13743 = vmatpush.msra.mxu3 %v13742_v52  ;;  %13821 = vmatpush.msra.mxu0 %v21151_v46  ;;  %v13771_v52 = vsub.f32 %v21237_v56, %v21968_v2  ;;  %v7900_v48 = vadd.f32 %v22668_v15, %v7863_v3  ;;  %v21307_v2 = vld [vmem:[%s14931_s19 + $0x8] sm:$0xff]  ;;  %v21318_v15 = vsub.f32 %v8434_v40, %v21295_v35 }
0x10c5   : > { %13871 = vmatpush.msra.mxu1 %v21109_v19  ;;  %13484 = vmatmul.f32.gmra.mxu2 %v20989_v13  ;;  %v13766_v13 = vand.u32 4294901760, %v13765_v6  ;;  %v13783_v6 = vsub.f32 %v21264_v41, %v21969_v18  ;;  %v4668_v39 = vperm.slane %v21307_v2, 7  ;;  %v8432_v3 = vld [vmem:[%s14937_s16 + $0x7e8] sm:$0xff]  ;;  %v21320_v18 = vand.u32 4294901760, %v8161_v60 }
0x10c6   : > { %13656 = vmatpush.msra.mxu2 %v21089_v63  ;;  %13749 = vmatpush.msra.mxu3 %v13748_v27  ;;  %v13777_v27 = vsub.f32 %v21251_v59, %v21967_v33  ;;  %v21304_v33 = vand.u32 4294901760, %v8433_v30  ;;  %v21326_v53 = vadd.f32 %v22669_v57, %v7900_v48  ;;  %v8430_v57 = vld [vmem:[%s14937_s16 + $0x7d8] sm:$0xff] }
0x10c7   : > { %13824 = vmatpush.msra.mxu0 %v21164_v21  ;;  %13873 = vmatpush.msra.mxu1 %v21124_v7  ;;  %v21354_v36 = vand.u32 4294901760, %v8430_v57 }
0x10c8   : > { %13658 = vmatpush.msra.mxu2 %v21109_v19  ;;  %13755 = vmatpush.msra.mxu3 %v13754_v9  ;;  %v13772_v9 = vand.u32 4294901760, %v13771_v52  ;;  %v13789_v52 = vsub.f32 %v21275_v51, %v21973_v37  ;;  %v21332_v40 = vsub.f32 %v8433_v30, %v21304_v33  ;;  %v22670_v37 = vld [vmem:[#allocation19_spill] sm:$0xff]  ;;  %v13680_v30 = vsub.f32 %v8161_v60, %v21320_v18 }
0x10c9   : > { %13827 = vmatpush.msra.mxu0 %v21180_v14  ;;  %13875 = vmatpush.msra.mxu1 %v21138_v43  ;;  %v7958_v0 = vadd.f32 %v22670_v37, %v4668_v39  ;;  %v8429_v37 = vld [vmem:[%s14937_s16 + $0x7d0] sm:$0xff]  ;;  %v8177_v62 = vmax.f32 %v21326_v53, 0.0 }
0x10ca   : > { %13660 = vmatpush.msra.mxu2 %v21124_v7  ;;  %13761 = vmatpush.msra.mxu3 %v13760_v61  ;;  %v13778_v61 = vand.u32 4294901760, %v13777_v27  ;;  %v21329_v27 = vand.u32 4294901760, %v8432_v3  ;;  %v13790_v48 = vand.u32 4294901760, %v13789_v52  ;;  %v13681_v54 = vand.u32 4294901760, %v13680_v30 }
0x10cb   : > { %13830 = vmatpush.msra.mxu0 %v21194_v25  ;;  %13877 = vmatpush.msra.mxu1 %v21157_v23  ;;  %v8007_v60 = vadd.f32 %v22672_v34, %v7958_v0  ;;  %v22674_v34 = vld [vmem:[#allocation106_spill] sm:$0xff]  ;;  %v21372_v26 = vand.u32 4294901760, %v8177_v62 }
0x10cc   : > { %13662 = vmatpush.msra.mxu2 %v21138_v43  ;;  %13767 = vmatpush.msra.mxu3 %v13766_v13  ;;  %v13784_v13 = vand.u32 4294901760, %v13783_v6  ;;  %v21342_v6 = vand.u32 4294901760, %v8431_v32  ;;  %v21352_v52 = vsub.f32 %v8432_v3, %v21329_v27  ;;  %v21366_v3 = vand.u32 4294901760, %v8429_v37 }
0x10cd   : > { %13833 = vmatpush.msra.mxu0 %v21207_v8  ;;  %13879 = vmatpush.msra.mxu1 %v21172_v22  ;;  %v8041_v0 = vadd.f32 %v22674_v34, %v8007_v60  ;;  %22675 = vst [vmem:[#allocation117_spill] sm:$0xff] %v21372_v26  ;;  %v8427_v60 = vld [vmem:[%s14937_s16 + $0x7c0] sm:$0xff]  ;;  %v21386_v34 = vand.u32 4294901760, %v8428_v44 }
0x10ce   : > { %13664 = vmatpush.msra.mxu2 %v21157_v23  ;;  %13773 = vmatpush.msra.mxu3 %v13772_v9  ;;  %v21981_v9 = vand.u32 4294901760, %v21318_v15  ;;  %22671 = vst [vmem:[#allocation38_spill] sm:$0xff] %v21352_v52 }
0x10cf   : > { %13836 = vmatpush.msra.mxu0 %v21223_v58  ;;  %13881 = vmatpush.msra.mxu1 %v21182_v5 }
0x10d0   : > { %13666 = vmatpush.msra.mxu2 %v21172_v22  ;;  %13779 = vmatpush.msra.mxu3 %v13778_v61  ;;  %v21984_v61 = vand.u32 4294901760, %v21332_v40  ;;  %v14071_v53 = vsub.f32 %v21318_v15, %v21981_v9  ;;  %v21381_v9 = vsub.f32 %v8430_v57, %v21354_v36  ;;  %v22677_v57 = vld [vmem:[#allocation103_spill] sm:$0xff] }
0x10d1   : > { %13839 = vmatpush.msra.mxu0 %v21237_v56  ;;  %13883 = vmatpush.msra.mxu1 %v21196_v20  ;;  %v7966_v31 = vadd.f32 %v22677_v57, %v4668_v39  ;;  %v13688_v39 = vsub.f32 %v8177_v62, %v21372_v26  ;;  %v8424_v57 = vld [vmem:[%s14937_s16 + $0x7a8] sm:$0xff] }
0x10d2   : > { %13668 = vmatpush.msra.mxu2 %v21182_v5  ;;  %13785 = vmatpush.msra.mxu3 %v13784_v13  ;;  %v21364_v13 = vsub.f32 %v8431_v32, %v21342_v6  ;;  %v14077_v32 = vsub.f32 %v21332_v40, %v21984_v61  ;;  %22676 = vst [vmem:[#allocation42_spill] sm:$0xff] %v21381_v9  ;;  %v14072_v38 = vand.u32 4294901760, %v14071_v53  ;;  %v22679_v53 = vand.u32 4294901760, %v21352_v52 }
0x10d3   : > { %13842 = vmatpush.msra.mxu0 %v21251_v59  ;;  %13885 = vmatpush.msra.mxu1 %v21209_v29  ;;  %v21391_v61 = vsub.f32 %v8429_v37, %v21366_v3  ;;  %v13689_v62 = vand.u32 4294901760, %v13688_v39 }
0x10d4   : > { %13670 = vmatpush.msra.mxu2 %v21196_v20  ;;  %13791 = vmatpush.msra.mxu3 %v13790_v48  ;;  %22673 = vst [vmem:[#allocation36_spill] sm:$0xff] %v21364_v13  ;;  %v21989_v28 = vand.u32 4294901760, %v21364_v13  ;;  %v8426_v48 = vld [vmem:[%s14937_s16 + $0x7b8] sm:$0xff]  ;;  %v14078_v37 = vand.u32 4294901760, %v14077_v32  ;;  %v14083_v2 = vsub.f32 %v21352_v52, %v22679_v53  ;;  %v22680_v53 = vld [vmem:[#allocation105_spill] sm:$0xff] }
0x10d5   : > { %13845 = vmatpush.msra.mxu0 %v21264_v41  ;;  %13887 = vmatpush.msra.mxu1 %v21225_v42  ;;  %v21400_v41 = vand.u32 4294901760, %v8427_v60 }
0x10d6   : > { %13793 = vmatmul.f32.vlgmr.msra.gmra.mxu3 %v21320_v18  ;;  %13672 = vmatpush.msra.mxu2 %v21209_v29  ;;  %v14089_v32 = vsub.f32 %v21364_v13, %v21989_v28  ;;  %v14084_v28 = vand.u32 4294901760, %v14083_v2  ;;  %v8422_v13 = vld [vmem:[%s14937_s16 + $0x798] sm:$0xff] }
0x10d7   : > { %13979 = vmatpush.msrb.mxu3 %v21046_v1  ;;  %13848 = vmatpush.msra.mxu0 %v21275_v51  ;;  %v13682_v1 = vsub.f32 %v13680_v30, %v13681_v54  ;;  %v8073_v51 = vadd.f32 %v22678_v47, %v8041_v0  ;;  %v21414_v0 = vand.u32 4294901760, %v8426_v48 }
0x10d8   : > { %13889 = vmatpush.msra.mxu1 %v21239_v50  ;;  %13851 = vmatmul.f32.vlgmr.msra.gmra.mxu0 %v13680_v30  ;;  %v8425_v30 = vld [vmem:[%s14937_s16 + $0x7b0] sm:$0xff]  ;;  %v14090_v2 = vand.u32 4294901760, %v14089_v32 }
0x10d9   : > { %13981 = vmatpush.msrb.mxu3 %v21054_v4  ;;  %14020 = vmatpush.msrb.mxu0 %v21295_v35  ;;  %v21412_v4 = vsub.f32 %v8428_v44, %v21386_v34  ;;  %v13683_v47 = vand.u32 4294901760, %v13682_v1  ;;  %v21428_v44 = vand.u32 4294901760, %v8425_v30 }
0x10da   : > { %13674 = vmatpush.msra.mxu2 %v21225_v42  ;;  %13891 = vmatpush.msra.mxu1 %v21253_v12 }
0x10db   : > { %13895 = vmatmul.f32.vlgmr.msra.gmra.mxu1 %v13681_v54  ;;  %13983 = vmatpush.msrb.mxu3 %v21065_v55  ;;  %v8011_v54 = vadd.f32 %v22680_v53, %v7966_v31  ;;  %v21426_v55 = vsub.f32 %v8427_v60, %v21400_v41  ;;  %v22682_v31 = vand.u32 4294901760, %v21381_v9  ;;  %v8423_v53 = vld [vmem:[%s14937_s16 + $0x7a0] sm:$0xff]  ;;  %v21440_v60 = vsub.f32 %v8426_v48, %v21414_v0 }
0x10dc   : > { %14022 = vmatpush.msrb.mxu0 %v21304_v33  ;;  %14073 = vmatpush.msrb.mxu1 %v14072_v38  ;;  %v22681_v38 = vld [vmem:[#allocation20_spill] sm:$0xff] }
0x10dd   : > { %13676 = vmatpush.msra.mxu2 %v21239_v50  ;;  %13985 = vmatpush.msrb.mxu3 %v21075_v24  ;;  %v8112_v52 = vadd.f32 %v22681_v38, %v8073_v51  ;;  %v14095_v1 = vsub.f32 %v21381_v9, %v22682_v31  ;;  %v21442_v51 = vand.u32 4294901760, %v8424_v57  ;;  %v22683_v38 = vld [vmem:[#allocation21_spill] sm:$0xff]  ;;  %v22684_v31 = vand.u32 4294901760, %v21391_v61 }
0x10de   : > { %14024 = vmatpush.msrb.mxu0 %v21329_v27  ;;  %14079 = vmatpush.msrb.mxu1 %v14078_v37  ;;  %v8046_v37 = vadd.f32 %v22683_v38, %v8011_v54  ;;  %v21455_v24 = vsub.f32 %v8425_v30, %v21428_v44  ;;  %v21457_v54 = vand.u32 4294901760, %v8423_v53  ;;  %v13690_v38 = vsub.f32 %v13688_v39, %v13689_v62 }
0x10df   : > { %13678 = vmatpush.msra.mxu2 %v21253_v12  ;;  %13797 = vmatmul.f32.gmra.mxu3 %v21372_v26  ;;  %v14101_v9 = vsub.f32 %v21391_v61, %v22684_v31  ;;  %v22685_v26 = vand.u32 4294901760, %v21063_v16  ;;  %v14096_v32 = vand.u32 4294901760, %v14095_v1  ;;  %v8421_v31 = vld [vmem:[%s14937_s16 + $0x790] sm:$0xff]  ;;  %v22687_v16 = vand.u32 4294901760, %v21073_v49  ;;  %v22689_v1 = vld [vmem:[#allocation23_spill] sm:$0xff] }
0x10e0   : > { %13684 = vmatmul.f32.vlgmr.msra.gmra.mxu2 %v13683_v47  ;;  %13987 = vmatpush.msrb.mxu3 %v21089_v63  ;;  %v22686_v47 = vld [vmem:[#allocation108_spill] sm:$0xff]  ;;  %v21486_v48 = vand.u32 4294901760, %v8421_v31 }
0x10e1   : > { %13908 = vmatpush.msrb.mxu2 %v22685_v26  ;;  %14026 = vmatpush.msrb.mxu0 %v21342_v6  ;;  %v21460_v63 = vadd.f32 %v22686_v47, %v8112_v52  ;;  %v22688_v26 = vand.u32 4294901760, %v21412_v4  ;;  %v21471_v52 = vsub.f32 %v8424_v57, %v21442_v51  ;;  %v14102_v49 = vand.u32 4294901760, %v14101_v9  ;;  %v22694_v57 = vld [vmem:[#allocation109_spill] sm:$0xff] }
0x10e2   : > { %14085 = vmatpush.msrb.mxu1 %v14084_v28  ;;  %13856 = vmatmul.f32.gmra.mxu0 %v13688_v39  ;;  %v21473_v28 = vand.u32 4294901760, %v8422_v13  ;;  %v8079_v39 = vadd.f32 %v22689_v1, %v8046_v37  ;;  %v22691_v47 = vand.u32 4294901760, %v21426_v55  ;;  %v8420_v37 = vld [vmem:[%s14937_s16 + $0x788] sm:$0xff]  ;;  %v22692_v9 = vand.u32 4294901760, %v21097_v11 }
0x10e3   : > { %13912 = vmatpush.msrb.mxu2 %v22687_v16  ;;  %13989 = vmatpush.msrb.mxu3 %v21109_v19  ;;  %v14107_v30 = vsub.f32 %v21412_v4, %v22688_v26  ;;  %v22690_v19 = vand.u32 4294901760, %v21085_v17  ;;  %v21484_v26 = vsub.f32 %v8423_v53, %v21457_v54  ;;  %v13691_v17 = vand.u32 4294901760, %v13690_v38 }
0x10e4   : > { %14028 = vmatpush.msrb.mxu0 %v21354_v36  ;;  %14091 = vmatpush.msrb.mxu1 %v14090_v2  ;;  %v14113_v16 = vsub.f32 %v21426_v55, %v22691_v47  ;;  %v8162_v2 = vmax.f32 %v21460_v63, 0.0  ;;  %v22693_v1 = vand.u32 4294901760, %v21440_v60  ;;  %v21499_v47 = vsub.f32 %v8422_v13, %v21473_v28  ;;  %v8419_v63 = vld [vmem:[%s14937_s16 + $0x780] sm:$0xff] }
0x10e5   : > { %13901 = vmatmul.f32.gmra.mxu1 %v13689_v62  ;;  %13916 = vmatpush.msrb.mxu2 %v22690_v19  ;;  %v14108_v62 = vand.u32 4294901760, %v14107_v30  ;;  %v14130_v19 = vand.u32 4294901760, %v21471_v52  ;;  %v22695_v38 = vand.u32 4294901760, %v21455_v24  ;;  %v21512_v13 = vsub.f32 %v8421_v31, %v21486_v48 }
0x10e6   : > { %13991 = vmatpush.msrb.mxu3 %v21124_v7  ;;  %14030 = vmatpush.msrb.mxu0 %v21366_v3  ;;  %v14119_v53 = vsub.f32 %v21440_v60, %v22693_v1  ;;  %v8116_v7 = vadd.f32 %v22694_v57, %v8079_v39  ;;  %v14114_v11 = vand.u32 4294901760, %v14113_v16  ;;  %v21514_v1 = vand.u32 4294901760, %v8162_v2  ;;  %v22697_v57 = vld [vmem:[#allocation110_spill] sm:$0xff] }
0x10e7   : > { %14097 = vmatpush.msrb.mxu1 %v14096_v32  ;;  %13920 = vmatpush.msrb.mxu2 %v22692_v9  ;;  %v21505_v32 = vand.u32 4294901760, %v8420_v37  ;;  %v14125_v30 = vsub.f32 %v21455_v24, %v22695_v38  ;;  %v14136_v9 = vand.u32 4294901760, %v21484_v26  ;;  %v21519_v39 = vand.u32 4294901760, %v8419_v63 }
0x10e8   : > { %13993 = vmatpush.msrb.mxu3 %v21138_v43  ;;  %14032 = vmatpush.msrb.mxu0 %v21386_v34  ;;  %v22696_v43 = vand.u32 4294901760, %v21114_v10  ;;  %v14131_v16 = vsub.f32 %v21471_v52, %v14130_v19  ;;  %v14142_v31 = vand.u32 4294901760, %v21499_v47  ;;  %v22698_v38 = vand.u32 4294901760, %v21136_v45 }
0x10e9   : > { %14103 = vmatpush.msrb.mxu1 %v14102_v49  ;;  %13692 = vmatmul.f32.gmra.mxu2 %v13691_v17  ;;  %v14120_v49 = vand.u32 4294901760, %v14119_v53  ;;  %v8145_v17 = vadd.f32 %v22697_v57, %v8116_v7  ;;  %v21531_v10 = vsub.f32 %v8420_v37, %v21505_v32  ;;  %v14148_v53 = vand.u32 4294901760, %v21512_v13 }
0x10ea   : > { %13924 = vmatpush.msrb.mxu2 %v22696_v43  ;;  %13995 = vmatpush.msrb.mxu3 %v21157_v23  ;;  %v14126_v23 = vand.u32 4294901760, %v14125_v30  ;;  %v21539_v7 = vsub.f32 %v8162_v2, %v21514_v1  ;;  %v22699_v45 = vand.u32 4294901760, %v21151_v46  ;;  %v14132_v37 = vand.u32 4294901760, %v14131_v16 }
0x10eb   : > { %14034 = vmatpush.msrb.mxu0 %v21400_v41  ;;  %14109 = vmatpush.msrb.mxu1 %v14108_v62  ;;  %v14137_v62 = vsub.f32 %v21484_v26, %v14136_v9  ;;  %v8178_v30 = vmax.f32 %v8145_v17, 0.0  ;;  %v22700_v2 = vand.u32 4294901760, %v21164_v21  ;;  %v14154_v46 = vand.u32 4294901760, %v21531_v10 }
0x10ec   : > { %13928 = vmatpush.msrb.mxu2 %v22698_v38  ;;  %13997 = vmatpush.msrb.mxu3 %v21172_v22  ;;  %v21545_v22 = vsub.f32 %v8419_v63, %v21519_v39  ;;  %v14149_v63 = vsub.f32 %v21512_v13, %v14148_v53  ;;  %v22701_v43 = vand.u32 4294901760, %v21180_v14  ;;  %v14053_v21 = vand.u32 4294901760, %v21539_v7 }
0x10ed   : > { %14036 = vmatpush.msrb.mxu0 %v21414_v0  ;;  %14115 = vmatpush.msrb.mxu1 %v14114_v11  ;;  %v14143_v11 = vsub.f32 %v21499_v47, %v14142_v31  ;;  %v21565_v16 = vand.u32 4294901760, %v8178_v30  ;;  %v22702_v57 = vand.u32 4294901760, %v21194_v25  ;;  %v14155_v14 = vsub.f32 %v21531_v10, %v14154_v46 }
0x10ee   : > { %13932 = vmatpush.msrb.mxu2 %v22699_v45  ;;  %13999 = vmatpush.msrb.mxu3 %v21182_v5  ;;  %v14138_v5 = vand.u32 4294901760, %v14137_v62  ;;  %v22703_v17 = vand.u32 4294901760, %v21207_v8  ;;  %v14054_v25 = vsub.f32 %v21539_v7, %v14053_v21  ;;  %v22704_v38 = vand.u32 4294901760, %v21223_v58 }
0x10ef   : > { %14038 = vmatpush.msrb.mxu0 %v21428_v44  ;;  %14121 = vmatpush.msrb.mxu1 %v14120_v49  ;;  %v14160_v49 = vand.u32 4294901760, %v21545_v22  ;;  %v14156_v8 = vand.u32 4294901760, %v14155_v14 }
0x10f0   : > { %13936 = vmatpush.msrb.mxu2 %v22700_v2  ;;  %14001 = vmatpush.msrb.mxu3 %v21196_v20  ;;  %v14144_v20 = vand.u32 4294901760, %v14143_v11  ;;  %v14055_v62 = vand.u32 4294901760, %v14054_v25 }
0x10f1   : > { %14040 = vmatpush.msrb.mxu0 %v21442_v51  ;;  %14127 = vmatpush.msrb.mxu1 %v14126_v23  ;;  %v21588_v23 = vsub.f32 %v8178_v30, %v21565_v16  ;;  %v22709_v30 = vld [vmem:[#allocation24_spill] sm:$0xff] }
0x10f2   : > { %13940 = vmatpush.msrb.mxu2 %v22701_v43  ;;  %14003 = vmatpush.msrb.mxu3 %v21209_v29  ;;  %v14150_v29 = vand.u32 4294901760, %v14149_v63  ;;  %v22710_v2 = vand.u32 4294901760, %v22709_v30  ;;  %v22713_v63 = vld [vmem:[#allocation46_spill] sm:$0xff] }
0x10f3   : > { %14042 = vmatpush.msrb.mxu0 %v21457_v54  ;;  %14133 = vmatpush.msrb.mxu1 %v14132_v37  ;;  %v14061_v58 = vand.u32 4294901760, %v21588_v23  ;;  %v22707_v37 = vand.u32 4294901760, %v21251_v59  ;;  %v22711_v59 = vld [vmem:[#allocation38_spill] sm:$0xff]  ;;  %v22714_v43 = vand.u32 4294901760, %v22713_v63 }
0x10f4   : > { %13944 = vmatpush.msrb.mxu2 %v22702_v57  ;;  %14005 = vmatpush.msrb.mxu3 %v21225_v42  ;;  %v14161_v42 = vsub.f32 %v21545_v22, %v14160_v49  ;;  %v22716_v57 = vld [vmem:[#allocation36_spill] sm:$0xff] }
0x10f5   : > { %14044 = vmatpush.msrb.mxu0 %v21473_v28  ;;  %14139 = vmatpush.msrb.mxu1 %v14138_v5  ;;  %v14062_v11 = vsub.f32 %v21588_v23, %v14061_v58  ;;  %v22712_v5 = vand.u32 4294901760, %v22711_v59  ;;  %v22717_v14 = vand.u32 4294901760, %v22716_v57 }
0x10f6   : > { %13948 = vmatpush.msrb.mxu2 %v22703_v17  ;;  %14007 = vmatpush.msrb.mxu3 %v21239_v50  ;;  %v22705_v50 = vand.u32 4294901760, %v21237_v56  ;;  %v14162_v45 = vand.u32 4294901760, %v14161_v42  ;;  %v22708_v56 = vand.u32 4294901760, %v21332_v40 }
0x10f7   : > { %14046 = vmatpush.msrb.mxu0 %v21486_v48  ;;  %14145 = vmatpush.msrb.mxu1 %v14144_v20  ;;  %v22715_v20 = vld [vmem:[#allocation117_spill] sm:$0xff] }
0x10f8   : > { %13952 = vmatpush.msrb.mxu2 %v22704_v38  ;;  %14009 = vmatpush.msrb.mxu3 %v21253_v12  ;;  %v22706_v12 = vand.u32 4294901760, %v21318_v15 }
0x10f9   : > { %14048 = vmatpush.msrb.mxu0 %v21505_v32  ;;  %14151 = vmatpush.msrb.mxu1 %v14150_v29 }
0x10fa   : > { %14011 = vmatmul.f32.vlgmr.msrb.gmra.mxu3 %v21320_v18  ;;  %13956 = vmatpush.msrb.mxu2 %v22705_v50 }
0x10fb   : > { %14233 = vmatpush.msra.mxu3 %v21295_v35  ;;  %14050 = vmatpush.msrb.mxu0 %v21519_v39 }
0x10fc   : > { %14157 = vmatpush.msrb.mxu1 %v14156_v8  ;;  %14056 = vmatmul.f32.vlgmr.msrb.gmra.mxu0 %v14055_v62 }
0x10fd   : > { %14235 = vmatpush.msra.mxu3 %v21304_v33  ;;  %14280 = vmatpush.msra.mxu0 %v22706_v12 }
0x10fe   : > { %13960 = vmatpush.msrb.mxu2 %v22707_v37  ;;  %14163 = vmatpush.msrb.mxu1 %v14162_v45 }
0x10ff   : > { %14165 = vmatmul.f32.vlgmr.msrb.gmra.mxu1 %v21514_v1  ;;  %14237 = vmatpush.msra.mxu3 %v21329_v27 }
0x1100   : > { %14284 = vmatpush.msra.mxu0 %v22708_v56  ;;  %14351 = vmatpush.msra.mxu1 %v21295_v35  ;;  %v14063_v35 = vand.u32 4294901760, %v14062_v11 }
0x1101   : > { %13964 = vmatpush.msrb.mxu2 %v22710_v2  ;;  %14239 = vmatpush.msra.mxu3 %v21342_v6 }
0x1102   : > { %14288 = vmatpush.msra.mxu0 %v22712_v5  ;;  %14353 = vmatpush.msra.mxu1 %v21304_v33  ;;  %v22718_v33 = vld [vmem:[#allocation42_spill] sm:$0xff] }
0x1103   : > { %13968 = vmatpush.msrb.mxu2 %v22714_v43  ;;  %14015 = vmatmul.f32.gmra.mxu3 %v22715_v20  ;;  %v22719_v29 = vand.u32 4294901760, %v22718_v33 }
0x1104   : > { %13970 = vmatmul.f32.vlgmr.msrb.gmra.mxu2 %v21320_v18  ;;  %14241 = vmatpush.msra.mxu3 %v21354_v36  ;;  %v22720_v18 = vand.u32 4294901760, %v21391_v61 }
0x1105   : > { %14175 = vmatpush.msra.mxu2 %v21318_v15  ;;  %14292 = vmatpush.msra.mxu0 %v22717_v14  ;;  %v22721_v15 = vand.u32 4294901760, %v21412_v4 }
0x1106   : > { %14355 = vmatpush.msra.mxu1 %v21329_v27  ;;  %14064 = vmatmul.f32.gmra.mxu0 %v14063_v35  ;;  %v22722_v27 = vand.u32 4294901760, %v21426_v55 }
0x1107   : > { %14178 = vmatpush.msra.mxu2 %v21332_v40  ;;  %14243 = vmatpush.msra.mxu3 %v21366_v3  ;;  %v22724_v40 = vand.u32 4294901760, %v21455_v24 }
0x1108   : > { %14296 = vmatpush.msra.mxu0 %v22719_v29  ;;  %14357 = vmatpush.msra.mxu1 %v21342_v6  ;;  %v12483_v6 = vpop.f32.mrf.mxu2 }
0x1109   : > { %14169 = vmatmul.f32.gmra.mxu1 %v21565_v16  ;;  %14181 = vmatpush.msra.mxu2 %v22711_v59 }
0x110a   : > { %14245 = vmatpush.msra.mxu3 %v21386_v34  ;;  %14300 = vmatpush.msra.mxu0 %v22720_v18 }
0x110b   : > { %14359 = vmatpush.msra.mxu1 %v21354_v36  ;;  %14184 = vmatpush.msra.mxu2 %v22716_v57  ;;  %v22723_v36 = vand.u32 4294901760, %v21440_v60 }
0x110c   : > { %14247 = vmatpush.msra.mxu3 %v21400_v41  ;;  %14304 = vmatpush.msra.mxu0 %v22721_v15 }
0x110d   : > { %14361 = vmatpush.msra.mxu1 %v21366_v3  ;;  %13974 = vmatmul.f32.gmra.mxu2 %v22715_v20  ;;  %v12678_v3 = vpop.f32.mrf.mxu1 }
0x110e   : > { %14187 = vmatpush.msra.mxu2 %v22718_v33  ;;  %14249 = vmatpush.msra.mxu3 %v21414_v0 }
0x110f   : > { %14308 = vmatpush.msra.mxu0 %v22722_v27  ;;  %14363 = vmatpush.msra.mxu1 %v21386_v34 }
0x1110   : > { %14190 = vmatpush.msra.mxu2 %v21391_v61  ;;  %14251 = vmatpush.msra.mxu3 %v21428_v44  ;;  %v12569_v61 = vpop.f32.mrf.mxu0 }
0x1111   : > { %14312 = vmatpush.msra.mxu0 %v22723_v36  ;;  %14365 = vmatpush.msra.mxu1 %v21400_v41  ;;  %v12524_v41 = vpop.f32.mrf.mxu3 }
0x1112   : > { %14193 = vmatpush.msra.mxu2 %v21412_v4  ;;  %14253 = vmatpush.msra.mxu3 %v21442_v51  ;;  %v12487_v4 = vpop.f32.mrf.mxu2 }
0x1113   : > { %14316 = vmatpush.msra.mxu0 %v22724_v40  ;;  %14367 = vmatpush.msra.mxu1 %v21414_v0 }
0x1114   : > { %14196 = vmatpush.msra.mxu2 %v21426_v55  ;;  %14255 = vmatpush.msra.mxu3 %v21457_v54 }
0x1115   : > { %14320 = vmatpush.msra.mxu0 %v14130_v19  ;;  %14369 = vmatpush.msra.mxu1 %v21428_v44  ;;  %v12682_v55 = vpop.f32.mrf.mxu1 }
0x1116   : > { %14199 = vmatpush.msra.mxu2 %v21440_v60  ;;  %14257 = vmatpush.msra.mxu3 %v21473_v28 }
0x1117   : > { %14324 = vmatpush.msra.mxu0 %v14136_v9  ;;  %14371 = vmatpush.msra.mxu1 %v21442_v51 }
0x1118   : > { %14202 = vmatpush.msra.mxu2 %v21455_v24  ;;  %14259 = vmatpush.msra.mxu3 %v21486_v48  ;;  %v12577_v0 = vpop.f32.mrf.mxu0 }
0x1119   : > { %14328 = vmatpush.msra.mxu0 %v14142_v31  ;;  %14373 = vmatpush.msra.mxu1 %v21457_v54  ;;  %v12528_v34 = vpop.f32.mrf.mxu3 }
0x111a   : > { %14205 = vmatpush.msra.mxu2 %v21471_v52  ;;  %14261 = vmatpush.msra.mxu3 %v21505_v32  ;;  %v12736_v24 = vpop.f32.mrf.mxu2  ;;  %v22725_v52 = vld [vmem:[#allocation37_spill] sm:$0xff] }
0x111b   : > { %14332 = vmatpush.msra.mxu0 %v14148_v53  ;;  %14375 = vmatpush.msra.mxu1 %v21473_v28  ;;  %v12484_v28 = vadd.f32 %v12483_v6, %v22725_v52 }
0x111c   : > { %14208 = vmatpush.msra.mxu2 %v21484_v26  ;;  %14263 = vmatpush.msra.mxu3 %v21519_v39 }
0x111d   : > { %14336 = vmatpush.msra.mxu0 %v14154_v46  ;;  %14377 = vmatpush.msra.mxu1 %v21486_v48  ;;  %v12896_v51 = vpop.f32.mrf.mxu1 }
0x111e   : > { %14267 = vmatmul.f32.vlgmr.msra.gmra.mxu3 %v14053_v21  ;;  %14211 = vmatpush.msra.mxu2 %v21499_v47  ;;  %v12525_v47 = vadd.f32 %v12524_v41, %v12484_v28 }
0x111f   : > { %14340 = vmatpush.msra.mxu0 %v14160_v49  ;;  %14379 = vmatpush.msra.mxu1 %v21505_v32 }
0x1120   : > { %14342 = vmatmul.f32.vlgmr.msra.gmra.mxu0 %v21514_v1  ;;  %14214 = vmatpush.msra.mxu2 %v21512_v13  ;;  %v12855_v60 = vpop.f32.mrf.mxu0  ;;  %v22726_v13 = vld [vmem:[#allocation39_spill] sm:$0xff] }
0x1121   : > { %14381 = vmatpush.msra.mxu1 %v21519_v39  ;;  %v12780_v44 = vpop.f32.mrf.mxu3  ;;  %v12570_v39 = vadd.f32 %v12569_v61, %v12525_v47 }
0x1122   : > { %14383 = vmatmul.f32.vlgmr.msra.gmra.mxu1 %v21514_v1  ;;  %14217 = vmatpush.msra.mxu2 %v21531_v10  ;;  %v12741_v54 = vpop.f32.mrf.mxu2  ;;  %v12488_v1 = vadd.f32 %v12487_v4, %v22726_v13 }
0x1124   : > { %14220 = vmatpush.msra.mxu2 %v21545_v22  ;;  %v12529_v53 = vadd.f32 %v12528_v34, %v12488_v1 }
0x1125   : > { %14223 = vmatmul.f32.vlgmr.msra.gmra.mxu2 %v21539_v7  ;;  %v12900_v19 = vpop.f32.mrf.mxu1  ;;  %v12679_v7 = vadd.f32 %v12678_v3, %v12570_v39 }
0x1126   : > { %14273 = vmatmul.f32.gmra.mxu3 %v14061_v58  ;;  %v12578_v46 = vadd.f32 %v12577_v0, %v12529_v53 }
0x1127   : > { %v12737_v22 = vadd.f32 %v12736_v24, %v12679_v7 }
0x1128   : > { %14346 = vmatmul.f32.gmra.mxu0 %v21565_v16  ;;  %v12859_v26 = vpop.f32.mrf.mxu0  ;;  %v12683_v25 = vadd.f32 %v12682_v55, %v12578_v46 }
0x1129   : > { %v12786_v48 = vpop.f32.mrf.mxu3 }
0x112a   : > { %14387 = vmatmul.f32.gmra.mxu1 %v21565_v16  ;;  %v12941_v9 = vpop.f32.mrf.mxu2  ;;  %v12781_v16 = vadd.f32 %v12780_v44, %v12737_v22  ;;  %v12742_v38 = vadd.f32 %v12741_v54, %v12683_v25 }
0x112c   : > { %v12856_v8 = vadd.f32 %v12855_v60, %v12781_v16  ;;  %v12787_v62 = vadd.f32 %v12786_v48, %v12742_v38 }
0x112d   : > { %14228 = vmatmul.f32.gmra.mxu2 %v21588_v23  ;;  %v13152_v10 = vpop.f32.mrf.mxu1 }
0x112e   : > { %v12897_v45 = vadd.f32 %v12896_v51, %v12856_v8  ;;  %v12860_v56 = vadd.f32 %v12859_v26, %v12787_v62 }
0x1130   : > { %v13108_v31 = vpop.f32.mrf.mxu0  ;;  %v12942_v12 = vadd.f32 %v12941_v9, %v12897_v45  ;;  %v12901_v30 = vadd.f32 %v12900_v19, %v12860_v56 }
0x1131   : > { %v13050_v32 = vpop.f32.mrf.mxu3 }
0x1132   : > { %v12949_v49 = vpop.f32.mrf.mxu2  ;;  %v13051_v11 = vadd.f32 %v13050_v32, %v12942_v12 }
0x1133   : > { %v12950_v5 = vadd.f32 %v12949_v49, %v12901_v30 }
0x1134   : > { %v13109_v63 = vadd.f32 %v13108_v31, %v13051_v11 }
0x1135   : > { %v13158_v42 = vpop.f32.mrf.mxu1 }
0x1136   : > { %v13153_v57 = vadd.f32 %v13152_v10, %v13109_v63 }
0x1138   : > { %v13113_v17 = vpop.f32.mrf.mxu0 }
0x1139   : > { %v13054_v21 = vpop.f32.mrf.mxu3 }
0x113a   : > { %v13227_v50 = vpop.f32.mrf.mxu2  ;;  %v13055_v35 = vadd.f32 %v13054_v21, %v12950_v5 }
0x113b   : > { %v13228_v14 = vadd.f32 %v13227_v50, %v13153_v57 }
0x113c   : > { %v13114_v18 = vadd.f32 %v13113_v17, %v13055_v35 }
0x113d   : > { %v13422_v37 = vpop.f32.mrf.mxu1 }
0x113e   : > { %v13159_v40 = vadd.f32 %v13158_v42, %v13114_v18 }
0x1140   : > { %v13313_v58 = vpop.f32.mrf.mxu0 }
0x1141   : > { %v13268_v23 = vpop.f32.mrf.mxu3 }
0x1142   : > { %v13231_v59 = vpop.f32.mrf.mxu2  ;;  %v13269_v27 = vadd.f32 %v13268_v23, %v13228_v14 }
0x1143   : > { %v13232_v41 = vadd.f32 %v13231_v59, %v13159_v40 }
0x1144   : > { %v13314_v6 = vadd.f32 %v13313_v58, %v13269_v27 }
0x1145   : > { %v13426_v20 = vpop.f32.mrf.mxu1 }
0x1146   : > { %v13423_v4 = vadd.f32 %v13422_v37, %v13314_v6 }
0x1148   : > { %v13321_v43 = vpop.f32.mrf.mxu0 }
0x1149   : > { %v13272_v2 = vpop.f32.mrf.mxu3 }
0x114a   : > { %v13480_v29 = vpop.f32.mrf.mxu2  ;;  %v13273_v34 = vadd.f32 %v13272_v2, %v13232_v41 }
0x114b   : > { %v13481_v55 = vadd.f32 %v13480_v29, %v13423_v4  ;;  %v22728_v4 = vld [vmem:[#allocation9_spill] sm:$0xff] }
0x114c   : > { %v13322_v24 = vadd.f32 %v13321_v43, %v13273_v34 }
0x114d   : > { %v13640_v36 = vpop.f32.mrf.mxu1 }
0x114e   : > { %v13427_v54 = vadd.f32 %v13426_v20, %v13322_v24  ;;  %v22729_v24 = vld [vmem:[#allocation7_spill] sm:$0xff] }
0x1150   : > { %v13599_v15 = vpop.f32.mrf.mxu0 }
0x1151   : > { %v13524_v33 = vpop.f32.mrf.mxu3 }
0x1152   : > { %v13485_v3 = vpop.f32.mrf.mxu2  ;;  %v13525_v60 = vadd.f32 %v13524_v33, %v13481_v55 }
0x1153   : > { %v13486_v28 = vadd.f32 %v13485_v3, %v13427_v54 }
0x1154   : > { %v13600_v26 = vadd.f32 %v13599_v15, %v13525_v60  ;;  %v22727_v15 = vld [vmem:[#allocation8_spill] sm:$0xff] }
0x1155   : > { %v13644_v44 = vpop.f32.mrf.mxu1 }
0x1156   : > { %v13641_v32 = vadd.f32 %v13640_v36, %v13600_v26 }
0x1158   : > { %v13603_v0 = vpop.f32.mrf.mxu0 }
0x1159   : > { %v13530_v61 = vpop.f32.mrf.mxu3 }
0x115a   : > { %v13531_v47 = vadd.f32 %v13530_v61, %v13486_v28 }
0x115c   : > { %v13604_v39 = vadd.f32 %v13603_v0, %v13531_v47 }
0x115d   : > { %v13896_v19 = vpop.f32.mrf.mxu1 }
0x115e   : > { %v13645_v7 = vadd.f32 %v13644_v44, %v13604_v39 }
0x1160   : > { %v13852_v52 = vpop.f32.mrf.mxu0 }
0x1161   : > { %v13794_v51 = vpop.f32.mrf.mxu3 }
0x1163   : > { %v13685_v48 = vpop.f32.mrf.mxu2 }
0x1164   : > { %v13686_v9 = vadd.f32 %v13685_v48, %v13641_v32 }
0x1165   : > { %v13902_v53 = vpop.f32.mrf.mxu1 }
0x1166   : > { %v13795_v10 = vadd.f32 %v13794_v51, %v13686_v9 }
0x1168   : > { %v13857_v31 = vpop.f32.mrf.mxu0  ;;  %v13853_v46 = vadd.f32 %v13852_v52, %v13795_v10 }
0x1169   : > { %v13798_v13 = vpop.f32.mrf.mxu3 }
0x116a   : > { %v13897_v25 = vadd.f32 %v13896_v19, %v13853_v46 }
0x116c   : > { %v13693_v1 = vpop.f32.mrf.mxu2 }
0x116d   : > { %v13694_v22 = vadd.f32 %v13693_v1, %v13645_v7 }
0x116f   : > { %v13799_v17 = vadd.f32 %v13798_v13, %v13694_v22 }
0x1171   : > { %v13858_v8 = vadd.f32 %v13857_v31, %v13799_v17  ;;  %v14690_v17 = vld [vmem:[%s679_s28] ss:$0 sm:$0xff] }
0x1173   : > { %v13903_v45 = vadd.f32 %v13902_v53, %v13858_v8 }
0x1179   : > { %v14057_v16 = vpop.f32.mrf.mxu0 }
0x117c   : > { %v14166_v42 = vpop.f32.mrf.mxu1 }
0x117d   : > { %v14012_v21 = vpop.f32.mrf.mxu3 }
0x1183   : > { %v14065_v58 = vpop.f32.mrf.mxu0 }
0x1186   : > { %v14016_v50 = vpop.f32.mrf.mxu3  ;;  %v14170_v56 = vpop.f32.mrf.mxu1 }
0x1187   : > { %v13971_v49 = vpop.f32.mrf.mxu2 }
0x1188   : > { %v13972_v38 = vadd.f32 %v13971_v49, %v13897_v25 }
0x118a   : > { %v14013_v23 = vadd.f32 %v14012_v21, %v13972_v38  ;;  %v14691_v38 = vld [vmem:[%s682_s0] ss:$0 sm:$0xff] }
0x118c   : > { %v14058_v37 = vadd.f32 %v14057_v16, %v14013_v23 }
0x118e   : > { %v14167_v30 = vadd.f32 %v14166_v42, %v14058_v37 }
0x1190   : > { %v13975_v62 = vpop.f32.mrf.mxu2 }
0x1191   : > { %v13976_v12 = vadd.f32 %v13975_v62, %v13903_v45 }
0x1193   : > { %v14017_v11 = vadd.f32 %v14016_v50, %v13976_v12 }
0x1195   : > { %v14066_v20 = vadd.f32 %v14065_v58, %v14017_v11 }
0x1197   : > { %v14171_v14 = vadd.f32 %v14170_v56, %v14066_v20 }
0x119d   : > { %v14343_v63 = vpop.f32.mrf.mxu0 }
0x119f   : > { %v14384_v35 = vpop.f32.mrf.mxu1 }
0x11a1   : > { %v14268_v2 = vpop.f32.mrf.mxu3 }
0x11a5   : > { %v14347_v6 = vpop.f32.mrf.mxu0 }
0x11a7   : > { %v14388_v3 = vpop.f32.mrf.mxu1 }
0x11a8   : > { %v14224_v59 = vpop.f32.mrf.mxu2 }
0x11a9   : > { %v14225_v5 = vadd.f32 %v14224_v59, %v14167_v30  ;;  %v14274_v36 = vpop.f32.mrf.mxu3 }
0x11ab   : > { %v14269_v43 = vadd.f32 %v14268_v2, %v14225_v5 }
0x11ad   : > { %v14344_v57 = vadd.f32 %v14343_v63, %v14269_v43 }
0x11af   : > { %v14385_v33 = vadd.f32 %v14384_v35, %v14344_v57 }
0x11b0   : > { %v14229_v29 = vpop.f32.mrf.mxu2 }
0x11b1   : > { %v14230_v18 = vadd.f32 %v14229_v29, %v14171_v14  ;;  %v14391_v27 = vadd.f32 %v14385_v33, %v22727_v15 }
0x11b3   : > { %v14275_v40 = vadd.f32 %v14274_v36, %v14230_v18  ;;  %v14395_v41 = vsel %vm908_vm2, %v14391_v27, 0.0 }
0x11b4   : > { %14396 = vadd.xlane.f32.xlu2 %v14395_v41 }
0x11b5   : > { %v14348_v61 = vadd.f32 %v14347_v6, %v14275_v40 }
0x11b7   : > { %v14389_v34 = vadd.f32 %v14388_v3, %v14348_v61 }
0x11b9   : > { %v14392_v0 = vadd.f32 %v14389_v34, %v22728_v4 }
0x11bb   : > { %v14398_v55 = vsel %vm908_vm2, %v14392_v0, 0.0 }
0x11bc   : > { %14399 = vadd.xlane.f32.xlu1 %v14398_v55 }
0x1227   : > { %v14397_v44 = vpop.xlane.xlu2 %14396 }
0x1228   : > { %v14401_v60 = vmul.f32 %v14397_v44, %v22729_v24 }
0x122a   : > { %v14403_v51 = vsub.f32 %v14391_v27, %v14401_v60 }
0x122c   : > { %v14405_v48 = vmul.f32 %v14403_v51, %v14403_v51 }
0x122e   : > { %v14407_v54 = vsel %vm908_vm2, %v14405_v48, 0.0 }
0x122f   : > { %v14400_v52 = vpop.xlane.xlu1 %14399  ;;  %14408 = vadd.xlane.f32.xlu1 %v14407_v54 }
0x1230   : > { %v14402_v28 = vmul.f32 %v14400_v52, %v22729_v24 }
0x1232   : > { %v14404_v26 = vsub.f32 %v14392_v0, %v14402_v28 }
0x1234   : > { %v14406_v19 = vmul.f32 %v14404_v26, %v14404_v26 }
0x1236   : > { %v14410_v47 = vsel %vm908_vm2, %v14406_v19, 0.0 }
0x1237   : > { %14411 = vadd.xlane.f32.xlu1 %v14410_v47 }
0x12a2   : > { %v14409_v32 = vpop.xlane.xlu1 %14408 }
0x12a3   : > { %v14413_v9 = vmul.f32 %v14409_v32, %v22729_v24 }
0x12a5   : > { %v14415_v13 = vadd.f32 1e-05, %v14413_v9 }
0x12a7   : > { %14730 = vrsqrt.f32 %v14415_v13  ;;  %vm14423_vm15 = vweird.f32 %v14415_v13 }
0x12aa   : > { %v14412_v1 = vpop.xlane.xlu1 %14411 }
0x12ab   : > { %v14414_v39 = vmul.f32 %v14412_v1, %v22729_v24 }
0x12ad   : > { %v14731_v31 = vpop.eup %14730  ;;  %v14416_v10 = vadd.f32 1e-05, %v14414_v39 }
0x12ae   : > { %v14418_v53 = vmul.f32 %v14731_v31, %v14415_v13  ;;  %vm14424_vm14 = vweird.f32 %v14731_v31 }
0x12af   : > { %14732 = vrsqrt.f32 %v14416_v10  ;;  %vm14425_vm0 = vmor %vm14423_vm15, %vm14424_vm14  ;;  %vm14433_vm4 = vweird.f32 %v14416_v10 }
0x12b0   : > { %v14419_v7 = vmul.f32 %v14731_v31, %v14418_v53 }
0x12b2   : > { %v14420_v22 = vmul.f32 0.5, %v14419_v7 }
0x12b4   : > { %v14421_v46 = vsub.f32 1.5, %v14420_v22 }
0x12b5   : > { %v14733_v21 = vpop.eup %14732 }
0x12b6   : > { %v14422_v49 = vmul.f32 %v14731_v31, %v14421_v46  ;;  %v14428_v16 = vmul.f32 %v14733_v21, %v14416_v10  ;;  %vm14434_vm1 = vweird.f32 %v14733_v21 }
0x12b7   : > { %vm14435_vm5 = vmor %vm14433_vm4, %vm14434_vm1 }
0x12b8   : > { %v14426_v25 = vsel %vm14425_vm0, %v14731_v31, %v14422_v49  ;;  %v14429_v42 = vmul.f32 %v14733_v21, %v14428_v16 }
0x12b9   : > { %v14437_v8 = vmul.f32 %v14426_v25, %v14403_v51 }
0x12ba   : > { %v14430_v23 = vmul.f32 0.5, %v14429_v42 }
0x12bb   : > { %v14442_v50 = vmul.f32 %v14690_v17, %v14437_v8 }
0x12bc   : > { %v14431_v62 = vsub.f32 1.5, %v14430_v23 }
0x12bd   : > { %v14447_v45 = vadd.f32 %v14691_v38, %v14442_v50 }
0x12be   : > { %v14432_v58 = vmul.f32 %v14733_v21, %v14431_v62 }
0x12bf   : > { %14449 = vst.msk [vmem:[#allocation2] sm:$0xff] %vm908_vm2, %v14447_v45 }
0x12c0   : > { %v14436_v12 = vsel %vm14435_vm5, %v14733_v21, %v14432_v58 }
0x12c1   : > { %v14438_v37 = vmul.f32 %v14436_v12, %v14404_v26 }
0x12c3   : > { %v14443_v56 = vmul.f32 %v14690_v17, %v14438_v37  ;;  %14454 = sbr.rel (%p14634_p5) target bundleno = 4812 (0x12cc), region = 92 }
0x12c5   : > { %v14448_v11 = vadd.f32 %v14691_v38, %v14443_v56 }
0x12c7   : > { %14450 = vst.msk [vmem:[#allocation2 + $0x8] sm:$0xff] %vm908_vm2, %v14448_v11 }
0x12c8   : > { %v14455_v30 = vmax.f32 %v14447_v45, 0.0  ;;  %v14456_v2 = vmax.f32 %v14448_v11, 0.0 }
0x12ca   : > { %14457 = vst.msk [vmem:[#allocation3] sm:$0xff] %vm908_vm2, %v14455_v30 }
0x12cb   : > { %14458 = vst.msk [vmem:[#allocation3 + $0x8] sm:$0xff] %vm908_vm2, %v14456_v2 }
0x12cc PF: > { %p14659_p6 = scmp.eq.s32.totalorder %s14886_s22, 1  ;;  %s14792_s23 = smov [#allocation3]  }
0x12cd   : > { %s14464_s28 = sshll.u32 %s14792_s23, 4  ;;  %s22730_s18 = sld [smem:[#allocation126_spill]]  ;;  %s14465_s28 = int_to_ptr.vmem [resolvable:$true] %s14464_s28 }
0x12ce   : > { %s14793_s4 = smov 128   ;;  %s14794_s29 = smov 8  }
0x12d3   : > { %s14466_s6 = sshll.u32 %s22730_s18, 4  ;;  %s14467_s6 = int_to_ptr.hbm [resolvable:$true] %s14466_s6 }
0x12d4   : > { %14656 = dma.vmem_to_hbm [thread:$0]  (%p14659_p6), %s14465_s28, 256, %s14467_s6, [#allocation4], %s14793_s4, %s14793_s4, %s14794_s29  }
0x12d5   : > { %14773 = dma.done.wait (%p14659_p6), [#allocation4], 256  }
0x12d6   : > { %14775 = vsyncadd (%p14659_p6), [#allocation4], 4294967040 }
0x12d7 PF: > { %s22731_s24 = sld [smem:[#allocation6_spill]] }
0x12dd   : > { %s27_s21 = sadd.s32 1, %s22731_s24  }
0x12de   : > { %p24_p7 = scmp.ge.s32.totalorder %s27_s21, 4  }
0x12e0   :  { %26 = sbr.rel (!%p24_p7) target bundleno = 9 (0x9), region = 152 }
0x12e5   :  { %14483 = vsyncpa [#allocation4], 1 }
0x12e6   :  { %14485 = vsyncpa [#allocation4 + $0x1], 1 }

</bundles_post_ra>
